<compile_context>
chip_gen: v7x
topology: tpu7x:2x2x1
jax: 0.10.0
libtpu: 0.0.40
codegen_flags: <defaults>
</compile_context>

<pallas_src>
import functools

import numpy as np
import jax
import jax.numpy as jnp
from jax.experimental import pallas as pl
from jax.experimental.pallas import tpu as pltpu


# ----------------------------------------------------------------------------- kernel ---
def _ifc_encoder_kernel(*refs, num_heads, shifted_flags, shift_rows, n_windows,
                        win_len, has_pad_mask):
    """Fused IFC encoder for ONE batch element; activations VMEM-resident across all blocks.

    refs = (mask_shift, [mask_nonshift], x, <16 stacked params>, out)
      x / out block : (1, Tp*N, C) f32
      masks         : (nW, L, L)   f32
      params        : stacked along a leading num_blocks axis
    """
    idx = 0
    mask_s_ref = refs[idx]; idx += 1
    if has_pad_mask:
        mask_ns_ref = refs[idx]; idx += 1
    else:
        mask_ns_ref = None
    x_ref = refs[idx]; idx += 1
    (wq_ref, bq_ref, wk_ref, bk_ref, wv_ref, bv_ref, wo_ref, bo_ref,
     g1_ref, be1_ref, g2_ref, be2_ref, w1_ref, b1_ref, w2_ref, b2_ref) = refs[idx:idx + 16]
    o_ref = refs[-1]

    x = x_ref[0]                              # (Tp*N, C) f32 residual stream
    Ltot, C = x.shape
    H = num_heads
    dh = C // H
    scale = 1.0 / float(np.sqrt(dh))
    eps = 1e-5
    nW, L = n_windows, win_len

    mask_s = mask_s_ref[...]                  # (nW, L, L) f32, loaded once, reused
    mask_ns = mask_ns_ref[...] if has_pad_mask else None

    def layer_norm(v, g, b):
        mu = jnp.mean(v, axis=-1, keepdims=True)
        var = jnp.mean(jnp.square(v - mu), axis=-1, keepdims=True)
        return (v - mu) * jax.lax.rsqrt(var + eps) * g + b

    def block(xr, blk, mask):
        # per-block params (static index on the leading num_blocks axis)
        wq = wq_ref[blk]; wk = wk_ref[blk]; wv = wv_ref[blk]; wo = wo_ref[blk]   # bf16
        bq = bq_ref[blk]; bk = bk_ref[blk]; bv = bv_ref[blk]; bo = bo_ref[blk]   # (1,C) f32
        g1 = g1_ref[blk]; be1 = be1_ref[blk]; g2 = g2_ref[blk]; be2 = be2_ref[blk]
        w1 = w1_ref[blk]; b1 = b1_ref[blk]; w2 = w2_ref[blk]; b2 = b2_ref[blk]

        # --- pre-norm windowed multi-head self-attention ---
        xn = layer_norm(xr, g1, be1)                               # f32
        xnb = xn.astype(jnp.bfloat16)
        q = jnp.dot(xnb, wq, preferred_element_type=jnp.float32) + bq
        k = jnp.dot(xnb, wk, preferred_element_type=jnp.float32) + bk
        v = jnp.dot(xnb, wv, preferred_element_type=jnp.float32) + bv
        q = q * scale                                              # fold 1/sqrt(dh) into q

        # window partition: (Tp*N, C) -> (nW, L, C); free leading-dim reshape
        q3 = q.reshape(nW, L, C).astype(jnp.bfloat16)
        k3 = k.reshape(nW, L, C).astype(jnp.bfloat16)
        v3 = v.reshape(nW, L, C).astype(jnp.bfloat16)

        heads = []
        for h in range(H):                                         # static, small H
            sl = slice(h * dh, (h + 1) * dh)
            s = jnp.einsum('wqd,wkd->wqk', q3[..., sl], k3[..., sl],
                           preferred_element_type=jnp.float32)     # (nW, L, L) f32
            if mask is not None:
                s = s + mask
            s = s - jnp.max(s, axis=-1, keepdims=True)
            p = jnp.exp(s)
            p = p * pl.reciprocal(jnp.sum(p, axis=-1, keepdims=True), approx=True)
            heads.append(jnp.einsum('wqk,wkd->wqd', p.astype(jnp.bfloat16), v3[..., sl],
                                    preferred_element_type=jnp.float32))
        attn = jnp.concatenate(heads, axis=-1).reshape(Ltot, C)    # (Tp*N, C) f32
        o = jnp.dot(attn.astype(jnp.bfloat16), wo, preferred_element_type=jnp.float32) + bo
        x2 = xr + o

        # --- pre-norm FFN ---
        x2n = layer_norm(x2, g2, be2)
        h1 = jnp.maximum(jnp.dot(x2n.astype(jnp.bfloat16), w1,
                                 preferred_element_type=jnp.float32) + b1, 0.0)
        ffn = jnp.dot(h1.astype(jnp.bfloat16), w2, preferred_element_type=jnp.float32) + b2
        return x2 + ffn

    # static loop over all blocks of all layers, activations never leave VMEM
    for blk, shifted in enumerate(shifted_flags):
        if shifted:
            x = jnp.roll(x, -shift_rows, axis=0)   # cyclic shift on the frame axis (flattened)
            x = block(x, blk, mask_s)
            x = jnp.roll(x, shift_rows, axis=0)
        else:
            x = block(x, blk, mask_ns)

    o_ref[0] = x


# ---------------------------------------------------------------------------- encoder ---
def ifc_encoder_forward(output, layer_params, *, num_frames, num_queries,
                        window_size, num_heads, training=False):
    """Exact port of IFCEncoder.forward mask construction + fused windowed blocks in Pallas."""
    B, T_in, N, C = output.shape
    assert N == num_queries
    T = num_frames if training else T_in
    W = window_size
    shift = W // 2
    Tp = int(np.ceil(T / W)) * W
    nW = Tp // W
    L = W * N

    # --- attention mask: exact port of the torch code (static, host-side numpy) ---
    img_mask = np.zeros((1, Tp, N, 1), dtype=np.float32)
    w_slices = (slice(0, -W), slice(-W, -shift), slice(-shift, None))
    cnt = 0
    for w in w_slices:
        img_mask[:, w, :, :] = cnt
        cnt += 1
    mask_windows = img_mask.reshape(-1, W, N, 1).reshape(-1, L)          # window_partition
    diff = mask_windows[:, None, :] - mask_windows[:, :, None]
    attn_mask = np.where(diff != 0, -100.0, 0.0).astype(np.float32)      # (nW, L, L)

    # --- padded-frame key masking (only when Tp > T_in) ---
    has_pad = Tp > T_in
    mask_nonshift = None
    if has_pad:
        frame_of_slot = np.repeat(np.arange(Tp), N).reshape(nW, L)       # unshifted slot -> frame
        pad_ns = np.where(frame_of_slot >= T_in, -100.0, 0.0).astype(np.float32)
        pad_sh = np.where((frame_of_slot + shift) % Tp >= T_in, -100.0, 0.0).astype(np.float32)
        attn_mask = (attn_mask + pad_sh[:, None, :]).astype(np.float32)
        mask_nonshift = np.ascontiguousarray(
            np.broadcast_to(pad_ns[:, None, :], (nW, L, L))).astype(np.float32)

    # --- stack per-block params along a leading num_blocks axis; matmul weights in bf16 ---
    flat_blocks, shifted_flags = [], []
    for blocks in layer_params:
        for bi, bp in enumerate(blocks):
            flat_blocks.append(bp)
            shifted_flags.append(bi % 2 == 1)
    bf16_idx = (0, 2, 4, 6, 12, 14)          # Wq, Wk, Wv, Wo, W1, W2
    stacked = []
    for pi in range(16):
        st = jnp.stack([blk[pi] for blk in flat_blocks], axis=0)
        stacked.append(st.astype(jnp.bfloat16) if pi in bf16_idx else st.astype(jnp.float32))

    # --- activations: pad frames to Tp, flatten (T, N) -> rows ---
    x = output.astype(jnp.float32)
    if Tp != T_in:
        x = jnp.pad(x, ((0, 0), (0, Tp - T_in), (0, 0), (0, 0)))
    x = x.reshape(B, Tp * N, C)

    kernel = functools.partial(
        _ifc_encoder_kernel, num_heads=num_heads, shifted_flags=tuple(shifted_flags),
        shift_rows=shift * N, n_windows=nW, win_len=L, has_pad_mask=has_pad)

    mask_specs = [pl.BlockSpec((nW, L, L), lambda b: (0, 0, 0))]
    mask_inputs = [jnp.asarray(attn_mask)]
    if has_pad:
        mask_specs.append(pl.BlockSpec((nW, L, L), lambda b: (0, 0, 0)))
        mask_inputs.append(jnp.asarray(mask_nonshift))
    x_spec = pl.BlockSpec((1, Tp * N, C), lambda b: (b, 0, 0))
    param_specs = [pl.BlockSpec(p.shape, lambda b: (0, 0, 0)) for p in stacked]

    out = pl.pallas_call(
        kernel,
        out_shape=jax.ShapeDtypeStruct((B, Tp * N, C), jnp.float32),
        grid=(B,),
        in_specs=mask_specs + [x_spec] + param_specs,
        out_specs=pl.BlockSpec((1, Tp * N, C), lambda b: (b, 0, 0)),
        compiler_params=pltpu.CompilerParams(dimension_semantics=("parallel",)),
    )(*mask_inputs, x, *stacked)

    out = out.reshape(B, Tp, N, C)
    return out[:, :T_in]


# ----------------------------------------------------------------------------- params ---
def init_block_params(key, C, Dff):
    ks = jax.random.split(key, 6)

    def lin(k, shape):
        return jax.random.normal(k, shape, jnp.float32) / np.sqrt(shape[0])

    Wq = lin(ks[0], (C, C)); bq = jnp.zeros((1, C), jnp.float32)
    Wk = lin(ks[1], (C, C)); bk = jnp.zeros((1, C), jnp.float32)
    Wv = lin(ks[2], (C, C)); bv = jnp.zeros((1, C), jnp.float32)
    Wo = lin(ks[3], (C, C)); bo = jnp.zeros((1, C), jnp.float32)
    g1 = jnp.ones((1, C), jnp.float32); be1 = jnp.zeros((1, C), jnp.float32)
    g2 = jnp.ones((1, C), jnp.float32); be2 = jnp.zeros((1, C), jnp.float32)
    W1 = lin(ks[4], (C, Dff)); b1 = jnp.zeros((1, Dff), jnp.float32)
    W2 = lin(ks[5], (Dff, C)); b2 = jnp.zeros((1, C), jnp.float32)
    return (Wq, bq, Wk, bk, Wv, bv, Wo, bo, g1, be1, g2, be2, W1, b1, W2, b2)


# ------------------------------------------------------------------------------- main ---
if __name__ == "__main__":
    B, T, N, C = 2, 4, 8, 32       # batch, frames, queries, hidden
    window_size = 2
    num_layers = 2
    num_heads = 4
    Dff = 64

    key = jax.random.PRNGKey(0)
    key, xk = jax.random.split(key)
    x = jax.random.normal(xk, (B, T, N, C), jnp.float32)

    layer_params = []
    for _ in range(num_layers):
        blocks = []
        for _ in range(2):         # (non-shifted, shifted) block pair per layer
            key, sub = jax.random.split(key)
            blocks.append(init_block_params(sub, C, Dff))
        layer_params.append(blocks)

    out = ifc_encoder_forward(x, layer_params, num_frames=T, num_queries=N,
                              window_size=window_size, num_heads=num_heads,
                              training=False)
    out = jax.block_until_ready(out)
    assert out.shape == (B, T, N, C), out.shape
    assert bool(jnp.all(jnp.isfinite(out)))
    print("KERNEL_OK")
</pallas_src>

<mosaic_0001>
module attributes {stable_mosaic.version = 11 : i64} {
  func.func @_ifc_encoder_kernel(%arg0: i32, %arg1: memref<2x16x16xf32, #tpu.memory_space<vmem>>, %arg2: memref<1x32x32xf32, #tpu.memory_space<vmem>>, %arg3: memref<4x32x32xbf16, #tpu.memory_space<vmem>>, %arg4: memref<4x1x32xf32, #tpu.memory_space<vmem>>, %arg5: memref<4x32x32xbf16, #tpu.memory_space<vmem>>, %arg6: memref<4x1x32xf32, #tpu.memory_space<vmem>>, %arg7: memref<4x32x32xbf16, #tpu.memory_space<vmem>>, %arg8: memref<4x1x32xf32, #tpu.memory_space<vmem>>, %arg9: memref<4x32x32xbf16, #tpu.memory_space<vmem>>, %arg10: memref<4x1x32xf32, #tpu.memory_space<vmem>>, %arg11: memref<4x1x32xf32, #tpu.memory_space<vmem>>, %arg12: memref<4x1x32xf32, #tpu.memory_space<vmem>>, %arg13: memref<4x1x32xf32, #tpu.memory_space<vmem>>, %arg14: memref<4x1x32xf32, #tpu.memory_space<vmem>>, %arg15: memref<4x32x64xbf16, #tpu.memory_space<vmem>>, %arg16: memref<4x1x64xf32, #tpu.memory_space<vmem>>, %arg17: memref<4x64x32xbf16, #tpu.memory_space<vmem>>, %arg18: memref<4x1x32xf32, #tpu.memory_space<vmem>>, %arg19: memref<1x32x32xf32, #tpu.memory_space<vmem>>) attributes {dimension_semantics = [#tpu.dimension_semantics<parallel>], iteration_bounds = array<i64: 2>, scalar_prefetch = 0 : i64, scratch_operands = 0 : i64, tpu.core_type = #tpu.core_type<tc>, window_params = [{pipeline_mode = #tpu.pipeline_mode<synchronous>, transform_indices = @transform_0, window_bounds = array<i64: 2, 16, 16>}, {transform_indices = @transform_1, window_bounds = array<i64: 1, 32, 32>}, {pipeline_mode = #tpu.pipeline_mode<synchronous>, transform_indices = @transform_2, window_bounds = array<i64: 4, 32, 32>}, {pipeline_mode = #tpu.pipeline_mode<synchronous>, transform_indices = @transform_3, window_bounds = array<i64: 4, 1, 32>}, {pipeline_mode = #tpu.pipeline_mode<synchronous>, transform_indices = @transform_4, window_bounds = array<i64: 4, 32, 32>}, {pipeline_mode = #tpu.pipeline_mode<synchronous>, transform_indices = @transform_5, window_bounds = array<i64: 4, 1, 32>}, {pipeline_mode = #tpu.pipeline_mode<synchronous>, transform_indices = @transform_6, window_bounds = array<i64: 4, 32, 32>}, {pipeline_mode = #tpu.pipeline_mode<synchronous>, transform_indices = @transform_7, window_bounds = array<i64: 4, 1, 32>}, {pipeline_mode = #tpu.pipeline_mode<synchronous>, transform_indices = @transform_8, window_bounds = array<i64: 4, 32, 32>}, {pipeline_mode = #tpu.pipeline_mode<synchronous>, transform_indices = @transform_9, window_bounds = array<i64: 4, 1, 32>}, {pipeline_mode = #tpu.pipeline_mode<synchronous>, transform_indices = @transform_10, window_bounds = array<i64: 4, 1, 32>}, {pipeline_mode = #tpu.pipeline_mode<synchronous>, transform_indices = @transform_11, window_bounds = array<i64: 4, 1, 32>}, {pipeline_mode = #tpu.pipeline_mode<synchronous>, transform_indices = @transform_12, window_bounds = array<i64: 4, 1, 32>}, {pipeline_mode = #tpu.pipeline_mode<synchronous>, transform_indices = @transform_13, window_bounds = array<i64: 4, 1, 32>}, {pipeline_mode = #tpu.pipeline_mode<synchronous>, transform_indices = @transform_14, window_bounds = array<i64: 4, 32, 64>}, {pipeline_mode = #tpu.pipeline_mode<synchronous>, transform_indices = @transform_15, window_bounds = array<i64: 4, 1, 64>}, {pipeline_mode = #tpu.pipeline_mode<synchronous>, transform_indices = @transform_16, window_bounds = array<i64: 4, 64, 32>}, {pipeline_mode = #tpu.pipeline_mode<synchronous>, transform_indices = @transform_17, window_bounds = array<i64: 4, 1, 32>}, {transform_indices = @transform_18, window_bounds = array<i64: 1, 32, 32>}]} {
    %c0 = arith.constant 0 : index
    %c0_0 = arith.constant 0 : index
    %c0_1 = arith.constant 0 : index
    %0 = vector.load %arg2[%c0, %c0_0, %c0_1] : memref<1x32x32xf32, #tpu.memory_space<vmem>>, vector<1x32x32xf32>
    %1 = vector.shape_cast %0 : vector<1x32x32xf32> to vector<32x32xf32>
    %c0_2 = arith.constant 0 : index
    %c0_3 = arith.constant 0 : index
    %c0_4 = arith.constant 0 : index
    %2 = vector.load %arg1[%c0_2, %c0_3, %c0_4] : memref<2x16x16xf32, #tpu.memory_space<vmem>>, vector<2x16x16xf32>
    %c0_5 = arith.constant 0 : index
    %c0_6 = arith.constant 0 : index
    %c0_7 = arith.constant 0 : index
    %3 = vector.load %arg3[%c0_5, %c0_6, %c0_7] : memref<4x32x32xbf16, #tpu.memory_space<vmem>>, vector<1x32x32xbf16>
    %4 = vector.shape_cast %3 : vector<1x32x32xbf16> to vector<32x32xbf16>
    %c0_8 = arith.constant 0 : index
    %c0_9 = arith.constant 0 : index
    %c0_10 = arith.constant 0 : index
    %5 = vector.load %arg5[%c0_8, %c0_9, %c0_10] : memref<4x32x32xbf16, #tpu.memory_space<vmem>>, vector<1x32x32xbf16>
    %6 = vector.shape_cast %5 : vector<1x32x32xbf16> to vector<32x32xbf16>
    %c0_11 = arith.constant 0 : index
    %c0_12 = arith.constant 0 : index
    %c0_13 = arith.constant 0 : index
    %7 = vector.load %arg7[%c0_11, %c0_12, %c0_13] : memref<4x32x32xbf16, #tpu.memory_space<vmem>>, vector<1x32x32xbf16>
    %8 = vector.shape_cast %7 : vector<1x32x32xbf16> to vector<32x32xbf16>
    %c0_14 = arith.constant 0 : index
    %c0_15 = arith.constant 0 : index
    %c0_16 = arith.constant 0 : index
    %9 = vector.load %arg9[%c0_14, %c0_15, %c0_16] : memref<4x32x32xbf16, #tpu.memory_space<vmem>>, vector<1x32x32xbf16>
    %10 = vector.shape_cast %9 : vector<1x32x32xbf16> to vector<32x32xbf16>
    %c0_17 = arith.constant 0 : index
    %c0_18 = arith.constant 0 : index
    %c0_19 = arith.constant 0 : index
    %11 = vector.load %arg4[%c0_17, %c0_18, %c0_19] : memref<4x1x32xf32, #tpu.memory_space<vmem>>, vector<1x1x32xf32>
    %12 = vector.shape_cast %11 : vector<1x1x32xf32> to vector<1x32xf32>
    %c0_20 = arith.constant 0 : index
    %c0_21 = arith.constant 0 : index
    %c0_22 = arith.constant 0 : index
    %13 = vector.load %arg6[%c0_20, %c0_21, %c0_22] : memref<4x1x32xf32, #tpu.memory_space<vmem>>, vector<1x1x32xf32>
    %14 = vector.shape_cast %13 : vector<1x1x32xf32> to vector<1x32xf32>
    %c0_23 = arith.constant 0 : index
    %c0_24 = arith.constant 0 : index
    %c0_25 = arith.constant 0 : index
    %15 = vector.load %arg8[%c0_23, %c0_24, %c0_25] : memref<4x1x32xf32, #tpu.memory_space<vmem>>, vector<1x1x32xf32>
    %16 = vector.shape_cast %15 : vector<1x1x32xf32> to vector<1x32xf32>
    %c0_26 = arith.constant 0 : index
    %c0_27 = arith.constant 0 : index
    %c0_28 = arith.constant 0 : index
    %17 = vector.load %arg10[%c0_26, %c0_27, %c0_28] : memref<4x1x32xf32, #tpu.memory_space<vmem>>, vector<1x1x32xf32>
    %18 = vector.shape_cast %17 : vector<1x1x32xf32> to vector<1x32xf32>
    %c0_29 = arith.constant 0 : index
    %c0_30 = arith.constant 0 : index
    %c0_31 = arith.constant 0 : index
    %19 = vector.load %arg11[%c0_29, %c0_30, %c0_31] : memref<4x1x32xf32, #tpu.memory_space<vmem>>, vector<1x1x32xf32>
    %20 = vector.shape_cast %19 : vector<1x1x32xf32> to vector<1x32xf32>
    %c0_32 = arith.constant 0 : index
    %c0_33 = arith.constant 0 : index
    %c0_34 = arith.constant 0 : index
    %21 = vector.load %arg12[%c0_32, %c0_33, %c0_34] : memref<4x1x32xf32, #tpu.memory_space<vmem>>, vector<1x1x32xf32>
    %22 = vector.shape_cast %21 : vector<1x1x32xf32> to vector<1x32xf32>
    %c0_35 = arith.constant 0 : index
    %c0_36 = arith.constant 0 : index
    %c0_37 = arith.constant 0 : index
    %23 = vector.load %arg13[%c0_35, %c0_36, %c0_37] : memref<4x1x32xf32, #tpu.memory_space<vmem>>, vector<1x1x32xf32>
    %24 = vector.shape_cast %23 : vector<1x1x32xf32> to vector<1x32xf32>
    %c0_38 = arith.constant 0 : index
    %c0_39 = arith.constant 0 : index
    %c0_40 = arith.constant 0 : index
    %25 = vector.load %arg14[%c0_38, %c0_39, %c0_40] : memref<4x1x32xf32, #tpu.memory_space<vmem>>, vector<1x1x32xf32>
    %26 = vector.shape_cast %25 : vector<1x1x32xf32> to vector<1x32xf32>
    %c0_41 = arith.constant 0 : index
    %c0_42 = arith.constant 0 : index
    %c0_43 = arith.constant 0 : index
    %27 = vector.load %arg15[%c0_41, %c0_42, %c0_43] : memref<4x32x64xbf16, #tpu.memory_space<vmem>>, vector<1x32x64xbf16>
    %28 = vector.shape_cast %27 : vector<1x32x64xbf16> to vector<32x64xbf16>
    %c0_44 = arith.constant 0 : index
    %c0_45 = arith.constant 0 : index
    %c0_46 = arith.constant 0 : index
    %29 = vector.load %arg16[%c0_44, %c0_45, %c0_46] : memref<4x1x64xf32, #tpu.memory_space<vmem>>, vector<1x1x64xf32>
    %30 = vector.shape_cast %29 : vector<1x1x64xf32> to vector<1x64xf32>
    %c0_47 = arith.constant 0 : index
    %c0_48 = arith.constant 0 : index
    %c0_49 = arith.constant 0 : index
    %31 = vector.load %arg17[%c0_47, %c0_48, %c0_49] : memref<4x64x32xbf16, #tpu.memory_space<vmem>>, vector<1x64x32xbf16>
    %32 = vector.shape_cast %31 : vector<1x64x32xbf16> to vector<64x32xbf16>
    %c0_50 = arith.constant 0 : index
    %c0_51 = arith.constant 0 : index
    %c0_52 = arith.constant 0 : index
    %33 = vector.load %arg18[%c0_50, %c0_51, %c0_52] : memref<4x1x32xf32, #tpu.memory_space<vmem>>, vector<1x1x32xf32>
    %34 = vector.shape_cast %33 : vector<1x1x32xf32> to vector<1x32xf32>
    %cst = arith.constant dense<0.000000e+00> : vector<32xf32>
    %35 = vector.multi_reduction <add>, %1, %cst [1] : vector<32x32xf32> to vector<32xf32>
    %36 = vector.shape_cast %35 : vector<32xf32> to vector<32x1xf32>
    %cst_53 = arith.constant 3.200000e+01 : f32
    %37 = vector.broadcast %cst_53 : f32 to vector<32x1xf32>
    %38 = arith.divf %36, %37 : vector<32x1xf32>
    %39 = vector.broadcast %38 : vector<32x1xf32> to vector<32x32xf32>
    %40 = arith.subf %1, %39 : vector<32x32xf32>
    %41 = arith.mulf %40, %40 : vector<32x32xf32>
    %cst_54 = arith.constant dense<0.000000e+00> : vector<32xf32>
    %42 = vector.multi_reduction <add>, %41, %cst_54 [1] : vector<32x32xf32> to vector<32xf32>
    %43 = vector.shape_cast %42 : vector<32xf32> to vector<32x1xf32>
    %cst_55 = arith.constant 3.200000e+01 : f32
    %44 = vector.broadcast %cst_55 : f32 to vector<32x1xf32>
    %45 = arith.divf %43, %44 : vector<32x1xf32>
    %46 = vector.broadcast %38 : vector<32x1xf32> to vector<32x32xf32>
    %47 = arith.subf %1, %46 : vector<32x32xf32>
    %cst_56 = arith.constant 9.99999974E-6 : f32
    %48 = vector.broadcast %cst_56 : f32 to vector<32x1xf32>
    %49 = arith.addf %45, %48 : vector<32x1xf32>
    %50 = math.rsqrt %49 : vector<32x1xf32>
    %51 = vector.broadcast %50 : vector<32x1xf32> to vector<32x32xf32>
    %52 = arith.mulf %47, %51 : vector<32x32xf32>
    %53 = vector.broadcast %20 : vector<1x32xf32> to vector<32x32xf32>
    %54 = arith.mulf %52, %53 : vector<32x32xf32>
    %55 = vector.broadcast %22 : vector<1x32xf32> to vector<32x32xf32>
    %56 = arith.addf %54, %55 : vector<32x32xf32>
    %57 = arith.truncf %56 : vector<32x32xf32> to vector<32x32xbf16>
    %cst_57 = arith.constant dense<0.000000e+00> : vector<32x32xf32>
    %58 = tpu.matmul %57, %4, %cst_57 {dimension_numbers = #tpu.dot_dimension_numbers<[1], [0], [0], [1], [0, 0, 1, 1], [], []>} : vector<32x32xbf16>, vector<32x32xbf16>, vector<32x32xf32> -> vector<32x32xf32>
    %59 = vector.broadcast %12 : vector<1x32xf32> to vector<32x32xf32>
    %60 = arith.addf %58, %59 : vector<32x32xf32>
    %cst_58 = arith.constant dense<0.000000e+00> : vector<32x32xf32>
    %61 = tpu.matmul %57, %6, %cst_58 {dimension_numbers = #tpu.dot_dimension_numbers<[1], [0], [0], [1], [0, 0, 1, 1], [], []>} : vector<32x32xbf16>, vector<32x32xbf16>, vector<32x32xf32> -> vector<32x32xf32>
    %62 = vector.broadcast %14 : vector<1x32xf32> to vector<32x32xf32>
    %63 = arith.addf %61, %62 : vector<32x32xf32>
    %cst_59 = arith.constant dense<0.000000e+00> : vector<32x32xf32>
    %64 = tpu.matmul %57, %8, %cst_59 {dimension_numbers = #tpu.dot_dimension_numbers<[1], [0], [0], [1], [0, 0, 1, 1], [], []>} : vector<32x32xbf16>, vector<32x32xbf16>, vector<32x32xf32> -> vector<32x32xf32>
    %65 = vector.broadcast %16 : vector<1x32xf32> to vector<32x32xf32>
    %66 = arith.addf %64, %65 : vector<32x32xf32>
    %cst_60 = arith.constant 0.353553385 : f32
    %67 = vector.broadcast %cst_60 : f32 to vector<32x32xf32>
    %68 = arith.mulf %60, %67 : vector<32x32xf32>
    %69 = vector.shape_cast %68 : vector<32x32xf32> to vector<2x16x32xf32>
    %70 = arith.truncf %69 : vector<2x16x32xf32> to vector<2x16x32xbf16>
    %71 = vector.shape_cast %63 : vector<32x32xf32> to vector<2x16x32xf32>
    %72 = arith.truncf %71 : vector<2x16x32xf32> to vector<2x16x32xbf16>
    %73 = vector.shape_cast %66 : vector<32x32xf32> to vector<2x16x32xf32>
    %74 = arith.truncf %73 : vector<2x16x32xf32> to vector<2x16x32xbf16>
    %75 = vector.extract_strided_slice %70 {offsets = [0, 0, 0], sizes = [2, 16, 8], strides = [1, 1, 1]} : vector<2x16x32xbf16> to vector<2x16x8xbf16>
    %76 = vector.extract_strided_slice %72 {offsets = [0, 0, 0], sizes = [2, 16, 8], strides = [1, 1, 1]} : vector<2x16x32xbf16> to vector<2x16x8xbf16>
    "tpu.trace_start"() <{level = 10 : i32, message = "wqd,wkd->wqk"}> : () -> ()
    %cst_61 = arith.constant dense<0.000000e+00> : vector<2x16x16xf32>
    %77 = tpu.matmul %75, %76, %cst_61 {dimension_numbers = #tpu.dot_dimension_numbers<[2], [2], [1], [1], [0, 0, 0, 1, 1, 1], [0], [0]>} : vector<2x16x8xbf16>, vector<2x16x8xbf16>, vector<2x16x16xf32> -> vector<2x16x16xf32>
    "tpu.trace_stop"() : () -> ()
    %cst_62 = arith.constant dense<0xFF800000> : vector<2x16xf32>
    %78 = vector.multi_reduction <maximumf>, %77, %cst_62 [2] : vector<2x16x16xf32> to vector<2x16xf32>
    %79 = vector.shape_cast %78 : vector<2x16xf32> to vector<2x16x1xf32>
    %80 = vector.broadcast %79 : vector<2x16x1xf32> to vector<2x16x16xf32>
    %81 = arith.subf %77, %80 : vector<2x16x16xf32>
    %82 = math.exp %81 : vector<2x16x16xf32>
    %cst_63 = arith.constant dense<0.000000e+00> : vector<2x16xf32>
    %83 = vector.multi_reduction <add>, %82, %cst_63 [2] : vector<2x16x16xf32> to vector<2x16xf32>
    %84 = vector.shape_cast %83 : vector<2x16xf32> to vector<2x16x1xf32>
    %85 = tpu.reciprocal %84 {approx = true} : vector<2x16x1xf32> -> vector<2x16x1xf32>
    %86 = vector.broadcast %85 : vector<2x16x1xf32> to vector<2x16x16xf32>
    %87 = arith.mulf %82, %86 : vector<2x16x16xf32>
    %88 = arith.truncf %87 : vector<2x16x16xf32> to vector<2x16x16xbf16>
    %89 = vector.extract_strided_slice %74 {offsets = [0, 0, 0], sizes = [2, 16, 8], strides = [1, 1, 1]} : vector<2x16x32xbf16> to vector<2x16x8xbf16>
    "tpu.trace_start"() <{level = 10 : i32, message = "wqk,wkd->wqd"}> : () -> ()
    %cst_64 = arith.constant dense<0.000000e+00> : vector<2x16x8xf32>
    %90 = tpu.matmul %88, %89, %cst_64 {dimension_numbers = #tpu.dot_dimension_numbers<[2], [1], [1], [2], [0, 0, 0, 1, 1, 2], [0], [0]>} : vector<2x16x16xbf16>, vector<2x16x8xbf16>, vector<2x16x8xf32> -> vector<2x16x8xf32>
    "tpu.trace_stop"() : () -> ()
    %91 = vector.extract_strided_slice %70 {offsets = [0, 0, 8], sizes = [2, 16, 8], strides = [1, 1, 1]} : vector<2x16x32xbf16> to vector<2x16x8xbf16>
    %92 = vector.extract_strided_slice %72 {offsets = [0, 0, 8], sizes = [2, 16, 8], strides = [1, 1, 1]} : vector<2x16x32xbf16> to vector<2x16x8xbf16>
    "tpu.trace_start"() <{level = 10 : i32, message = "wqd,wkd->wqk"}> : () -> ()
    %cst_65 = arith.constant dense<0.000000e+00> : vector<2x16x16xf32>
    %93 = tpu.matmul %91, %92, %cst_65 {dimension_numbers = #tpu.dot_dimension_numbers<[2], [2], [1], [1], [0, 0, 0, 1, 1, 1], [0], [0]>} : vector<2x16x8xbf16>, vector<2x16x8xbf16>, vector<2x16x16xf32> -> vector<2x16x16xf32>
    "tpu.trace_stop"() : () -> ()
    %cst_66 = arith.constant dense<0xFF800000> : vector<2x16xf32>
    %94 = vector.multi_reduction <maximumf>, %93, %cst_66 [2] : vector<2x16x16xf32> to vector<2x16xf32>
    %95 = vector.shape_cast %94 : vector<2x16xf32> to vector<2x16x1xf32>
    %96 = vector.broadcast %95 : vector<2x16x1xf32> to vector<2x16x16xf32>
    %97 = arith.subf %93, %96 : vector<2x16x16xf32>
    %98 = math.exp %97 : vector<2x16x16xf32>
    %cst_67 = arith.constant dense<0.000000e+00> : vector<2x16xf32>
    %99 = vector.multi_reduction <add>, %98, %cst_67 [2] : vector<2x16x16xf32> to vector<2x16xf32>
    %100 = vector.shape_cast %99 : vector<2x16xf32> to vector<2x16x1xf32>
    %101 = tpu.reciprocal %100 {approx = true} : vector<2x16x1xf32> -> vector<2x16x1xf32>
    %102 = vector.broadcast %101 : vector<2x16x1xf32> to vector<2x16x16xf32>
    %103 = arith.mulf %98, %102 : vector<2x16x16xf32>
    %104 = arith.truncf %103 : vector<2x16x16xf32> to vector<2x16x16xbf16>
    %105 = vector.extract_strided_slice %74 {offsets = [0, 0, 8], sizes = [2, 16, 8], strides = [1, 1, 1]} : vector<2x16x32xbf16> to vector<2x16x8xbf16>
    "tpu.trace_start"() <{level = 10 : i32, message = "wqk,wkd->wqd"}> : () -> ()
    %cst_68 = arith.constant dense<0.000000e+00> : vector<2x16x8xf32>
    %106 = tpu.matmul %104, %105, %cst_68 {dimension_numbers = #tpu.dot_dimension_numbers<[2], [1], [1], [2], [0, 0, 0, 1, 1, 2], [0], [0]>} : vector<2x16x16xbf16>, vector<2x16x8xbf16>, vector<2x16x8xf32> -> vector<2x16x8xf32>
    "tpu.trace_stop"() : () -> ()
    %107 = vector.extract_strided_slice %70 {offsets = [0, 0, 16], sizes = [2, 16, 8], strides = [1, 1, 1]} : vector<2x16x32xbf16> to vector<2x16x8xbf16>
    %108 = vector.extract_strided_slice %72 {offsets = [0, 0, 16], sizes = [2, 16, 8], strides = [1, 1, 1]} : vector<2x16x32xbf16> to vector<2x16x8xbf16>
    "tpu.trace_start"() <{level = 10 : i32, message = "wqd,wkd->wqk"}> : () -> ()
    %cst_69 = arith.constant dense<0.000000e+00> : vector<2x16x16xf32>
    %109 = tpu.matmul %107, %108, %cst_69 {dimension_numbers = #tpu.dot_dimension_numbers<[2], [2], [1], [1], [0, 0, 0, 1, 1, 1], [0], [0]>} : vector<2x16x8xbf16>, vector<2x16x8xbf16>, vector<2x16x16xf32> -> vector<2x16x16xf32>
    "tpu.trace_stop"() : () -> ()
    %cst_70 = arith.constant dense<0xFF800000> : vector<2x16xf32>
    %110 = vector.multi_reduction <maximumf>, %109, %cst_70 [2] : vector<2x16x16xf32> to vector<2x16xf32>
    %111 = vector.shape_cast %110 : vector<2x16xf32> to vector<2x16x1xf32>
    %112 = vector.broadcast %111 : vector<2x16x1xf32> to vector<2x16x16xf32>
    %113 = arith.subf %109, %112 : vector<2x16x16xf32>
    %114 = math.exp %113 : vector<2x16x16xf32>
    %cst_71 = arith.constant dense<0.000000e+00> : vector<2x16xf32>
    %115 = vector.multi_reduction <add>, %114, %cst_71 [2] : vector<2x16x16xf32> to vector<2x16xf32>
    %116 = vector.shape_cast %115 : vector<2x16xf32> to vector<2x16x1xf32>
    %117 = tpu.reciprocal %116 {approx = true} : vector<2x16x1xf32> -> vector<2x16x1xf32>
    %118 = vector.broadcast %117 : vector<2x16x1xf32> to vector<2x16x16xf32>
    %119 = arith.mulf %114, %118 : vector<2x16x16xf32>
    %120 = arith.truncf %119 : vector<2x16x16xf32> to vector<2x16x16xbf16>
    %121 = vector.extract_strided_slice %74 {offsets = [0, 0, 16], sizes = [2, 16, 8], strides = [1, 1, 1]} : vector<2x16x32xbf16> to vector<2x16x8xbf16>
    "tpu.trace_start"() <{level = 10 : i32, message = "wqk,wkd->wqd"}> : () -> ()
    %cst_72 = arith.constant dense<0.000000e+00> : vector<2x16x8xf32>
    %122 = tpu.matmul %120, %121, %cst_72 {dimension_numbers = #tpu.dot_dimension_numbers<[2], [1], [1], [2], [0, 0, 0, 1, 1, 2], [0], [0]>} : vector<2x16x16xbf16>, vector<2x16x8xbf16>, vector<2x16x8xf32> -> vector<2x16x8xf32>
    "tpu.trace_stop"() : () -> ()
    %123 = vector.extract_strided_slice %70 {offsets = [0, 0, 24], sizes = [2, 16, 8], strides = [1, 1, 1]} : vector<2x16x32xbf16> to vector<2x16x8xbf16>
    %124 = vector.extract_strided_slice %72 {offsets = [0, 0, 24], sizes = [2, 16, 8], strides = [1, 1, 1]} : vector<2x16x32xbf16> to vector<2x16x8xbf16>
    "tpu.trace_start"() <{level = 10 : i32, message = "wqd,wkd->wqk"}> : () -> ()
    %cst_73 = arith.constant dense<0.000000e+00> : vector<2x16x16xf32>
    %125 = tpu.matmul %123, %124, %cst_73 {dimension_numbers = #tpu.dot_dimension_numbers<[2], [2], [1], [1], [0, 0, 0, 1, 1, 1], [0], [0]>} : vector<2x16x8xbf16>, vector<2x16x8xbf16>, vector<2x16x16xf32> -> vector<2x16x16xf32>
    "tpu.trace_stop"() : () -> ()
    %cst_74 = arith.constant dense<0xFF800000> : vector<2x16xf32>
    %126 = vector.multi_reduction <maximumf>, %125, %cst_74 [2] : vector<2x16x16xf32> to vector<2x16xf32>
    %127 = vector.shape_cast %126 : vector<2x16xf32> to vector<2x16x1xf32>
    %128 = vector.broadcast %127 : vector<2x16x1xf32> to vector<2x16x16xf32>
    %129 = arith.subf %125, %128 : vector<2x16x16xf32>
    %130 = math.exp %129 : vector<2x16x16xf32>
    %cst_75 = arith.constant dense<0.000000e+00> : vector<2x16xf32>
    %131 = vector.multi_reduction <add>, %130, %cst_75 [2] : vector<2x16x16xf32> to vector<2x16xf32>
    %132 = vector.shape_cast %131 : vector<2x16xf32> to vector<2x16x1xf32>
    %133 = tpu.reciprocal %132 {approx = true} : vector<2x16x1xf32> -> vector<2x16x1xf32>
    %134 = vector.broadcast %133 : vector<2x16x1xf32> to vector<2x16x16xf32>
    %135 = arith.mulf %130, %134 : vector<2x16x16xf32>
    %136 = arith.truncf %135 : vector<2x16x16xf32> to vector<2x16x16xbf16>
    %137 = vector.extract_strided_slice %74 {offsets = [0, 0, 24], sizes = [2, 16, 8], strides = [1, 1, 1]} : vector<2x16x32xbf16> to vector<2x16x8xbf16>
    "tpu.trace_start"() <{level = 10 : i32, message = "wqk,wkd->wqd"}> : () -> ()
    %cst_76 = arith.constant dense<0.000000e+00> : vector<2x16x8xf32>
    %138 = tpu.matmul %136, %137, %cst_76 {dimension_numbers = #tpu.dot_dimension_numbers<[2], [1], [1], [2], [0, 0, 0, 1, 1, 2], [0], [0]>} : vector<2x16x16xbf16>, vector<2x16x8xbf16>, vector<2x16x8xf32> -> vector<2x16x8xf32>
    "tpu.trace_stop"() : () -> ()
    %139 = tpu.concatenate %90, %106, %122, %138 in 2 : vector<2x16x8xf32>, vector<2x16x8xf32>, vector<2x16x8xf32>, vector<2x16x8xf32> -> vector<2x16x32xf32>
    %140 = vector.shape_cast %139 : vector<2x16x32xf32> to vector<32x32xf32>
    %141 = arith.truncf %140 : vector<32x32xf32> to vector<32x32xbf16>
    %cst_77 = arith.constant dense<0.000000e+00> : vector<32x32xf32>
    %142 = tpu.matmul %141, %10, %cst_77 {dimension_numbers = #tpu.dot_dimension_numbers<[1], [0], [0], [1], [0, 0, 1, 1], [], []>} : vector<32x32xbf16>, vector<32x32xbf16>, vector<32x32xf32> -> vector<32x32xf32>
    %143 = vector.broadcast %18 : vector<1x32xf32> to vector<32x32xf32>
    %144 = arith.addf %142, %143 : vector<32x32xf32>
    %145 = arith.addf %1, %144 : vector<32x32xf32>
    %cst_78 = arith.constant dense<0.000000e+00> : vector<32xf32>
    %146 = vector.multi_reduction <add>, %145, %cst_78 [1] : vector<32x32xf32> to vector<32xf32>
    %147 = vector.shape_cast %146 : vector<32xf32> to vector<32x1xf32>
    %cst_79 = arith.constant 3.200000e+01 : f32
    %148 = vector.broadcast %cst_79 : f32 to vector<32x1xf32>
    %149 = arith.divf %147, %148 : vector<32x1xf32>
    %150 = vector.broadcast %149 : vector<32x1xf32> to vector<32x32xf32>
    %151 = arith.subf %145, %150 : vector<32x32xf32>
    %152 = arith.mulf %151, %151 : vector<32x32xf32>
    %cst_80 = arith.constant dense<0.000000e+00> : vector<32xf32>
    %153 = vector.multi_reduction <add>, %152, %cst_80 [1] : vector<32x32xf32> to vector<32xf32>
    %154 = vector.shape_cast %153 : vector<32xf32> to vector<32x1xf32>
    %cst_81 = arith.constant 3.200000e+01 : f32
    %155 = vector.broadcast %cst_81 : f32 to vector<32x1xf32>
    %156 = arith.divf %154, %155 : vector<32x1xf32>
    %157 = vector.broadcast %149 : vector<32x1xf32> to vector<32x32xf32>
    %158 = arith.subf %145, %157 : vector<32x32xf32>
    %cst_82 = arith.constant 9.99999974E-6 : f32
    %159 = vector.broadcast %cst_82 : f32 to vector<32x1xf32>
    %160 = arith.addf %156, %159 : vector<32x1xf32>
    %161 = math.rsqrt %160 : vector<32x1xf32>
    %162 = vector.broadcast %161 : vector<32x1xf32> to vector<32x32xf32>
    %163 = arith.mulf %158, %162 : vector<32x32xf32>
    %164 = vector.broadcast %24 : vector<1x32xf32> to vector<32x32xf32>
    %165 = arith.mulf %163, %164 : vector<32x32xf32>
    %166 = vector.broadcast %26 : vector<1x32xf32> to vector<32x32xf32>
    %167 = arith.addf %165, %166 : vector<32x32xf32>
    %168 = arith.truncf %167 : vector<32x32xf32> to vector<32x32xbf16>
    %cst_83 = arith.constant dense<0.000000e+00> : vector<32x64xf32>
    %169 = tpu.matmul %168, %28, %cst_83 {dimension_numbers = #tpu.dot_dimension_numbers<[1], [0], [0], [1], [0, 0, 1, 1], [], []>} : vector<32x32xbf16>, vector<32x64xbf16>, vector<32x64xf32> -> vector<32x64xf32>
    %170 = vector.broadcast %30 : vector<1x64xf32> to vector<32x64xf32>
    %171 = arith.addf %169, %170 : vector<32x64xf32>
    %cst_84 = arith.constant 0.000000e+00 : f32
    %172 = vector.broadcast %cst_84 : f32 to vector<32x64xf32>
    %173 = arith.maximumf %171, %172 : vector<32x64xf32>
    %174 = arith.truncf %173 : vector<32x64xf32> to vector<32x64xbf16>
    %cst_85 = arith.constant dense<0.000000e+00> : vector<32x32xf32>
    %175 = tpu.matmul %174, %32, %cst_85 {dimension_numbers = #tpu.dot_dimension_numbers<[1], [0], [0], [1], [0, 0, 1, 1], [], []>} : vector<32x64xbf16>, vector<64x32xbf16>, vector<32x32xf32> -> vector<32x32xf32>
    %176 = vector.broadcast %34 : vector<1x32xf32> to vector<32x32xf32>
    %177 = arith.addf %175, %176 : vector<32x32xf32>
    %178 = arith.addf %145, %177 : vector<32x32xf32>
    %179 = vector.extract_strided_slice %178 {offsets = [8, 0], sizes = [24, 32], strides = [1, 1]} : vector<32x32xf32> to vector<24x32xf32>
    %180 = vector.extract_strided_slice %178 {offsets = [0, 0], sizes = [8, 32], strides = [1, 1]} : vector<32x32xf32> to vector<8x32xf32>
    %181 = tpu.concatenate %179, %180 in 0 : vector<24x32xf32>, vector<8x32xf32> -> vector<32x32xf32>
    %c1 = arith.constant 1 : index
    %c0_86 = arith.constant 0 : index
    %c0_87 = arith.constant 0 : index
    %182 = vector.load %arg3[%c1, %c0_86, %c0_87] : memref<4x32x32xbf16, #tpu.memory_space<vmem>>, vector<1x32x32xbf16>
    %183 = vector.shape_cast %182 : vector<1x32x32xbf16> to vector<32x32xbf16>
    %c1_88 = arith.constant 1 : index
    %c0_89 = arith.constant 0 : index
    %c0_90 = arith.constant 0 : index
    %184 = vector.load %arg5[%c1_88, %c0_89, %c0_90] : memref<4x32x32xbf16, #tpu.memory_space<vmem>>, vector<1x32x32xbf16>
    %185 = vector.shape_cast %184 : vector<1x32x32xbf16> to vector<32x32xbf16>
    %c1_91 = arith.constant 1 : index
    %c0_92 = arith.constant 0 : index
    %c0_93 = arith.constant 0 : index
    %186 = vector.load %arg7[%c1_91, %c0_92, %c0_93] : memref<4x32x32xbf16, #tpu.memory_space<vmem>>, vector<1x32x32xbf16>
    %187 = vector.shape_cast %186 : vector<1x32x32xbf16> to vector<32x32xbf16>
    %c1_94 = arith.constant 1 : index
    %c0_95 = arith.constant 0 : index
    %c0_96 = arith.constant 0 : index
    %188 = vector.load %arg9[%c1_94, %c0_95, %c0_96] : memref<4x32x32xbf16, #tpu.memory_space<vmem>>, vector<1x32x32xbf16>
    %189 = vector.shape_cast %188 : vector<1x32x32xbf16> to vector<32x32xbf16>
    %c1_97 = arith.constant 1 : index
    %c0_98 = arith.constant 0 : index
    %c0_99 = arith.constant 0 : index
    %190 = vector.load %arg4[%c1_97, %c0_98, %c0_99] : memref<4x1x32xf32, #tpu.memory_space<vmem>>, vector<1x1x32xf32>
    %191 = vector.shape_cast %190 : vector<1x1x32xf32> to vector<1x32xf32>
    %c1_100 = arith.constant 1 : index
    %c0_101 = arith.constant 0 : index
    %c0_102 = arith.constant 0 : index
    %192 = vector.load %arg6[%c1_100, %c0_101, %c0_102] : memref<4x1x32xf32, #tpu.memory_space<vmem>>, vector<1x1x32xf32>
    %193 = vector.shape_cast %192 : vector<1x1x32xf32> to vector<1x32xf32>
    %c1_103 = arith.constant 1 : index
    %c0_104 = arith.constant 0 : index
    %c0_105 = arith.constant 0 : index
    %194 = vector.load %arg8[%c1_103, %c0_104, %c0_105] : memref<4x1x32xf32, #tpu.memory_space<vmem>>, vector<1x1x32xf32>
    %195 = vector.shape_cast %194 : vector<1x1x32xf32> to vector<1x32xf32>
    %c1_106 = arith.constant 1 : index
    %c0_107 = arith.constant 0 : index
    %c0_108 = arith.constant 0 : index
    %196 = vector.load %arg10[%c1_106, %c0_107, %c0_108] : memref<4x1x32xf32, #tpu.memory_space<vmem>>, vector<1x1x32xf32>
    %197 = vector.shape_cast %196 : vector<1x1x32xf32> to vector<1x32xf32>
    %c1_109 = arith.constant 1 : index
    %c0_110 = arith.constant 0 : index
    %c0_111 = arith.constant 0 : index
    %198 = vector.load %arg11[%c1_109, %c0_110, %c0_111] : memref<4x1x32xf32, #tpu.memory_space<vmem>>, vector<1x1x32xf32>
    %199 = vector.shape_cast %198 : vector<1x1x32xf32> to vector<1x32xf32>
    %c1_112 = arith.constant 1 : index
    %c0_113 = arith.constant 0 : index
    %c0_114 = arith.constant 0 : index
    %200 = vector.load %arg12[%c1_112, %c0_113, %c0_114] : memref<4x1x32xf32, #tpu.memory_space<vmem>>, vector<1x1x32xf32>
    %201 = vector.shape_cast %200 : vector<1x1x32xf32> to vector<1x32xf32>
    %c1_115 = arith.constant 1 : index
    %c0_116 = arith.constant 0 : index
    %c0_117 = arith.constant 0 : index
    %202 = vector.load %arg13[%c1_115, %c0_116, %c0_117] : memref<4x1x32xf32, #tpu.memory_space<vmem>>, vector<1x1x32xf32>
    %203 = vector.shape_cast %202 : vector<1x1x32xf32> to vector<1x32xf32>
    %c1_118 = arith.constant 1 : index
    %c0_119 = arith.constant 0 : index
    %c0_120 = arith.constant 0 : index
    %204 = vector.load %arg14[%c1_118, %c0_119, %c0_120] : memref<4x1x32xf32, #tpu.memory_space<vmem>>, vector<1x1x32xf32>
    %205 = vector.shape_cast %204 : vector<1x1x32xf32> to vector<1x32xf32>
    %c1_121 = arith.constant 1 : index
    %c0_122 = arith.constant 0 : index
    %c0_123 = arith.constant 0 : index
    %206 = vector.load %arg15[%c1_121, %c0_122, %c0_123] : memref<4x32x64xbf16, #tpu.memory_space<vmem>>, vector<1x32x64xbf16>
    %207 = vector.shape_cast %206 : vector<1x32x64xbf16> to vector<32x64xbf16>
    %c1_124 = arith.constant 1 : index
    %c0_125 = arith.constant 0 : index
    %c0_126 = arith.constant 0 : index
    %208 = vector.load %arg16[%c1_124, %c0_125, %c0_126] : memref<4x1x64xf32, #tpu.memory_space<vmem>>, vector<1x1x64xf32>
    %209 = vector.shape_cast %208 : vector<1x1x64xf32> to vector<1x64xf32>
    %c1_127 = arith.constant 1 : index
    %c0_128 = arith.constant 0 : index
    %c0_129 = arith.constant 0 : index
    %210 = vector.load %arg17[%c1_127, %c0_128, %c0_129] : memref<4x64x32xbf16, #tpu.memory_space<vmem>>, vector<1x64x32xbf16>
    %211 = vector.shape_cast %210 : vector<1x64x32xbf16> to vector<64x32xbf16>
    %c1_130 = arith.constant 1 : index
    %c0_131 = arith.constant 0 : index
    %c0_132 = arith.constant 0 : index
    %212 = vector.load %arg18[%c1_130, %c0_131, %c0_132] : memref<4x1x32xf32, #tpu.memory_space<vmem>>, vector<1x1x32xf32>
    %213 = vector.shape_cast %212 : vector<1x1x32xf32> to vector<1x32xf32>
    %cst_133 = arith.constant dense<0.000000e+00> : vector<32xf32>
    %214 = vector.multi_reduction <add>, %181, %cst_133 [1] : vector<32x32xf32> to vector<32xf32>
    %215 = vector.shape_cast %214 : vector<32xf32> to vector<32x1xf32>
    %cst_134 = arith.constant 3.200000e+01 : f32
    %216 = vector.broadcast %cst_134 : f32 to vector<32x1xf32>
    %217 = arith.divf %215, %216 : vector<32x1xf32>
    %218 = vector.broadcast %217 : vector<32x1xf32> to vector<32x32xf32>
    %219 = arith.subf %181, %218 : vector<32x32xf32>
    %220 = arith.mulf %219, %219 : vector<32x32xf32>
    %cst_135 = arith.constant dense<0.000000e+00> : vector<32xf32>
    %221 = vector.multi_reduction <add>, %220, %cst_135 [1] : vector<32x32xf32> to vector<32xf32>
    %222 = vector.shape_cast %221 : vector<32xf32> to vector<32x1xf32>
    %cst_136 = arith.constant 3.200000e+01 : f32
    %223 = vector.broadcast %cst_136 : f32 to vector<32x1xf32>
    %224 = arith.divf %222, %223 : vector<32x1xf32>
    %225 = vector.broadcast %217 : vector<32x1xf32> to vector<32x32xf32>
    %226 = arith.subf %181, %225 : vector<32x32xf32>
    %cst_137 = arith.constant 9.99999974E-6 : f32
    %227 = vector.broadcast %cst_137 : f32 to vector<32x1xf32>
    %228 = arith.addf %224, %227 : vector<32x1xf32>
    %229 = math.rsqrt %228 : vector<32x1xf32>
    %230 = vector.broadcast %229 : vector<32x1xf32> to vector<32x32xf32>
    %231 = arith.mulf %226, %230 : vector<32x32xf32>
    %232 = vector.broadcast %199 : vector<1x32xf32> to vector<32x32xf32>
    %233 = arith.mulf %231, %232 : vector<32x32xf32>
    %234 = vector.broadcast %201 : vector<1x32xf32> to vector<32x32xf32>
    %235 = arith.addf %233, %234 : vector<32x32xf32>
    %236 = arith.truncf %235 : vector<32x32xf32> to vector<32x32xbf16>
    %cst_138 = arith.constant dense<0.000000e+00> : vector<32x32xf32>
    %237 = tpu.matmul %236, %183, %cst_138 {dimension_numbers = #tpu.dot_dimension_numbers<[1], [0], [0], [1], [0, 0, 1, 1], [], []>} : vector<32x32xbf16>, vector<32x32xbf16>, vector<32x32xf32> -> vector<32x32xf32>
    %238 = vector.broadcast %191 : vector<1x32xf32> to vector<32x32xf32>
    %239 = arith.addf %237, %238 : vector<32x32xf32>
    %cst_139 = arith.constant dense<0.000000e+00> : vector<32x32xf32>
    %240 = tpu.matmul %236, %185, %cst_139 {dimension_numbers = #tpu.dot_dimension_numbers<[1], [0], [0], [1], [0, 0, 1, 1], [], []>} : vector<32x32xbf16>, vector<32x32xbf16>, vector<32x32xf32> -> vector<32x32xf32>
    %241 = vector.broadcast %193 : vector<1x32xf32> to vector<32x32xf32>
    %242 = arith.addf %240, %241 : vector<32x32xf32>
    %cst_140 = arith.constant dense<0.000000e+00> : vector<32x32xf32>
    %243 = tpu.matmul %236, %187, %cst_140 {dimension_numbers = #tpu.dot_dimension_numbers<[1], [0], [0], [1], [0, 0, 1, 1], [], []>} : vector<32x32xbf16>, vector<32x32xbf16>, vector<32x32xf32> -> vector<32x32xf32>
    %244 = vector.broadcast %195 : vector<1x32xf32> to vector<32x32xf32>
    %245 = arith.addf %243, %244 : vector<32x32xf32>
    %cst_141 = arith.constant 0.353553385 : f32
    %246 = vector.broadcast %cst_141 : f32 to vector<32x32xf32>
    %247 = arith.mulf %239, %246 : vector<32x32xf32>
    %248 = vector.shape_cast %247 : vector<32x32xf32> to vector<2x16x32xf32>
    %249 = arith.truncf %248 : vector<2x16x32xf32> to vector<2x16x32xbf16>
    %250 = vector.shape_cast %242 : vector<32x32xf32> to vector<2x16x32xf32>
    %251 = arith.truncf %250 : vector<2x16x32xf32> to vector<2x16x32xbf16>
    %252 = vector.shape_cast %245 : vector<32x32xf32> to vector<2x16x32xf32>
    %253 = arith.truncf %252 : vector<2x16x32xf32> to vector<2x16x32xbf16>
    %254 = vector.extract_strided_slice %249 {offsets = [0, 0, 0], sizes = [2, 16, 8], strides = [1, 1, 1]} : vector<2x16x32xbf16> to vector<2x16x8xbf16>
    %255 = vector.extract_strided_slice %251 {offsets = [0, 0, 0], sizes = [2, 16, 8], strides = [1, 1, 1]} : vector<2x16x32xbf16> to vector<2x16x8xbf16>
    "tpu.trace_start"() <{level = 10 : i32, message = "wqd,wkd->wqk"}> : () -> ()
    %cst_142 = arith.constant dense<0.000000e+00> : vector<2x16x16xf32>
    %256 = tpu.matmul %254, %255, %cst_142 {dimension_numbers = #tpu.dot_dimension_numbers<[2], [2], [1], [1], [0, 0, 0, 1, 1, 1], [0], [0]>} : vector<2x16x8xbf16>, vector<2x16x8xbf16>, vector<2x16x16xf32> -> vector<2x16x16xf32>
    "tpu.trace_stop"() : () -> ()
    %257 = arith.addf %256, %2 : vector<2x16x16xf32>
    %cst_143 = arith.constant dense<0xFF800000> : vector<2x16xf32>
    %258 = vector.multi_reduction <maximumf>, %257, %cst_143 [2] : vector<2x16x16xf32> to vector<2x16xf32>
    %259 = vector.shape_cast %258 : vector<2x16xf32> to vector<2x16x1xf32>
    %260 = vector.broadcast %259 : vector<2x16x1xf32> to vector<2x16x16xf32>
    %261 = arith.subf %257, %260 : vector<2x16x16xf32>
    %262 = math.exp %261 : vector<2x16x16xf32>
    %cst_144 = arith.constant dense<0.000000e+00> : vector<2x16xf32>
    %263 = vector.multi_reduction <add>, %262, %cst_144 [2] : vector<2x16x16xf32> to vector<2x16xf32>
    %264 = vector.shape_cast %263 : vector<2x16xf32> to vector<2x16x1xf32>
    %265 = tpu.reciprocal %264 {approx = true} : vector<2x16x1xf32> -> vector<2x16x1xf32>
    %266 = vector.broadcast %265 : vector<2x16x1xf32> to vector<2x16x16xf32>
    %267 = arith.mulf %262, %266 : vector<2x16x16xf32>
    %268 = arith.truncf %267 : vector<2x16x16xf32> to vector<2x16x16xbf16>
    %269 = vector.extract_strided_slice %253 {offsets = [0, 0, 0], sizes = [2, 16, 8], strides = [1, 1, 1]} : vector<2x16x32xbf16> to vector<2x16x8xbf16>
    "tpu.trace_start"() <{level = 10 : i32, message = "wqk,wkd->wqd"}> : () -> ()
    %cst_145 = arith.constant dense<0.000000e+00> : vector<2x16x8xf32>
    %270 = tpu.matmul %268, %269, %cst_145 {dimension_numbers = #tpu.dot_dimension_numbers<[2], [1], [1], [2], [0, 0, 0, 1, 1, 2], [0], [0]>} : vector<2x16x16xbf16>, vector<2x16x8xbf16>, vector<2x16x8xf32> -> vector<2x16x8xf32>
    "tpu.trace_stop"() : () -> ()
    %271 = vector.extract_strided_slice %249 {offsets = [0, 0, 8], sizes = [2, 16, 8], strides = [1, 1, 1]} : vector<2x16x32xbf16> to vector<2x16x8xbf16>
    %272 = vector.extract_strided_slice %251 {offsets = [0, 0, 8], sizes = [2, 16, 8], strides = [1, 1, 1]} : vector<2x16x32xbf16> to vector<2x16x8xbf16>
    "tpu.trace_start"() <{level = 10 : i32, message = "wqd,wkd->wqk"}> : () -> ()
    %cst_146 = arith.constant dense<0.000000e+00> : vector<2x16x16xf32>
    %273 = tpu.matmul %271, %272, %cst_146 {dimension_numbers = #tpu.dot_dimension_numbers<[2], [2], [1], [1], [0, 0, 0, 1, 1, 1], [0], [0]>} : vector<2x16x8xbf16>, vector<2x16x8xbf16>, vector<2x16x16xf32> -> vector<2x16x16xf32>
    "tpu.trace_stop"() : () -> ()
    %274 = arith.addf %273, %2 : vector<2x16x16xf32>
    %cst_147 = arith.constant dense<0xFF800000> : vector<2x16xf32>
    %275 = vector.multi_reduction <maximumf>, %274, %cst_147 [2] : vector<2x16x16xf32> to vector<2x16xf32>
    %276 = vector.shape_cast %275 : vector<2x16xf32> to vector<2x16x1xf32>
    %277 = vector.broadcast %276 : vector<2x16x1xf32> to vector<2x16x16xf32>
    %278 = arith.subf %274, %277 : vector<2x16x16xf32>
    %279 = math.exp %278 : vector<2x16x16xf32>
    %cst_148 = arith.constant dense<0.000000e+00> : vector<2x16xf32>
    %280 = vector.multi_reduction <add>, %279, %cst_148 [2] : vector<2x16x16xf32> to vector<2x16xf32>
    %281 = vector.shape_cast %280 : vector<2x16xf32> to vector<2x16x1xf32>
    %282 = tpu.reciprocal %281 {approx = true} : vector<2x16x1xf32> -> vector<2x16x1xf32>
    %283 = vector.broadcast %282 : vector<2x16x1xf32> to vector<2x16x16xf32>
    %284 = arith.mulf %279, %283 : vector<2x16x16xf32>
    %285 = arith.truncf %284 : vector<2x16x16xf32> to vector<2x16x16xbf16>
    %286 = vector.extract_strided_slice %253 {offsets = [0, 0, 8], sizes = [2, 16, 8], strides = [1, 1, 1]} : vector<2x16x32xbf16> to vector<2x16x8xbf16>
    "tpu.trace_start"() <{level = 10 : i32, message = "wqk,wkd->wqd"}> : () -> ()
    %cst_149 = arith.constant dense<0.000000e+00> : vector<2x16x8xf32>
    %287 = tpu.matmul %285, %286, %cst_149 {dimension_numbers = #tpu.dot_dimension_numbers<[2], [1], [1], [2], [0, 0, 0, 1, 1, 2], [0], [0]>} : vector<2x16x16xbf16>, vector<2x16x8xbf16>, vector<2x16x8xf32> -> vector<2x16x8xf32>
    "tpu.trace_stop"() : () -> ()
    %288 = vector.extract_strided_slice %249 {offsets = [0, 0, 16], sizes = [2, 16, 8], strides = [1, 1, 1]} : vector<2x16x32xbf16> to vector<2x16x8xbf16>
    %289 = vector.extract_strided_slice %251 {offsets = [0, 0, 16], sizes = [2, 16, 8], strides = [1, 1, 1]} : vector<2x16x32xbf16> to vector<2x16x8xbf16>
    "tpu.trace_start"() <{level = 10 : i32, message = "wqd,wkd->wqk"}> : () -> ()
    %cst_150 = arith.constant dense<0.000000e+00> : vector<2x16x16xf32>
    %290 = tpu.matmul %288, %289, %cst_150 {dimension_numbers = #tpu.dot_dimension_numbers<[2], [2], [1], [1], [0, 0, 0, 1, 1, 1], [0], [0]>} : vector<2x16x8xbf16>, vector<2x16x8xbf16>, vector<2x16x16xf32> -> vector<2x16x16xf32>
    "tpu.trace_stop"() : () -> ()
    %291 = arith.addf %290, %2 : vector<2x16x16xf32>
    %cst_151 = arith.constant dense<0xFF800000> : vector<2x16xf32>
    %292 = vector.multi_reduction <maximumf>, %291, %cst_151 [2] : vector<2x16x16xf32> to vector<2x16xf32>
    %293 = vector.shape_cast %292 : vector<2x16xf32> to vector<2x16x1xf32>
    %294 = vector.broadcast %293 : vector<2x16x1xf32> to vector<2x16x16xf32>
    %295 = arith.subf %291, %294 : vector<2x16x16xf32>
    %296 = math.exp %295 : vector<2x16x16xf32>
    %cst_152 = arith.constant dense<0.000000e+00> : vector<2x16xf32>
    %297 = vector.multi_reduction <add>, %296, %cst_152 [2] : vector<2x16x16xf32> to vector<2x16xf32>
    %298 = vector.shape_cast %297 : vector<2x16xf32> to vector<2x16x1xf32>
    %299 = tpu.reciprocal %298 {approx = true} : vector<2x16x1xf32> -> vector<2x16x1xf32>
    %300 = vector.broadcast %299 : vector<2x16x1xf32> to vector<2x16x16xf32>
    %301 = arith.mulf %296, %300 : vector<2x16x16xf32>
    %302 = arith.truncf %301 : vector<2x16x16xf32> to vector<2x16x16xbf16>
    %303 = vector.extract_strided_slice %253 {offsets = [0, 0, 16], sizes = [2, 16, 8], strides = [1, 1, 1]} : vector<2x16x32xbf16> to vector<2x16x8xbf16>
    "tpu.trace_start"() <{level = 10 : i32, message = "wqk,wkd->wqd"}> : () -> ()
    %cst_153 = arith.constant dense<0.000000e+00> : vector<2x16x8xf32>
    %304 = tpu.matmul %302, %303, %cst_153 {dimension_numbers = #tpu.dot_dimension_numbers<[2], [1], [1], [2], [0, 0, 0, 1, 1, 2], [0], [0]>} : vector<2x16x16xbf16>, vector<2x16x8xbf16>, vector<2x16x8xf32> -> vector<2x16x8xf32>
    "tpu.trace_stop"() : () -> ()
    %305 = vector.extract_strided_slice %249 {offsets = [0, 0, 24], sizes = [2, 16, 8], strides = [1, 1, 1]} : vector<2x16x32xbf16> to vector<2x16x8xbf16>
    %306 = vector.extract_strided_slice %251 {offsets = [0, 0, 24], sizes = [2, 16, 8], strides = [1, 1, 1]} : vector<2x16x32xbf16> to vector<2x16x8xbf16>
    "tpu.trace_start"() <{level = 10 : i32, message = "wqd,wkd->wqk"}> : () -> ()
    %cst_154 = arith.constant dense<0.000000e+00> : vector<2x16x16xf32>
    %307 = tpu.matmul %305, %306, %cst_154 {dimension_numbers = #tpu.dot_dimension_numbers<[2], [2], [1], [1], [0, 0, 0, 1, 1, 1], [0], [0]>} : vector<2x16x8xbf16>, vector<2x16x8xbf16>, vector<2x16x16xf32> -> vector<2x16x16xf32>
    "tpu.trace_stop"() : () -> ()
    %308 = arith.addf %307, %2 : vector<2x16x16xf32>
    %cst_155 = arith.constant dense<0xFF800000> : vector<2x16xf32>
    %309 = vector.multi_reduction <maximumf>, %308, %cst_155 [2] : vector<2x16x16xf32> to vector<2x16xf32>
    %310 = vector.shape_cast %309 : vector<2x16xf32> to vector<2x16x1xf32>
    %311 = vector.broadcast %310 : vector<2x16x1xf32> to vector<2x16x16xf32>
    %312 = arith.subf %308, %311 : vector<2x16x16xf32>
    %313 = math.exp %312 : vector<2x16x16xf32>
    %cst_156 = arith.constant dense<0.000000e+00> : vector<2x16xf32>
    %314 = vector.multi_reduction <add>, %313, %cst_156 [2] : vector<2x16x16xf32> to vector<2x16xf32>
    %315 = vector.shape_cast %314 : vector<2x16xf32> to vector<2x16x1xf32>
    %316 = tpu.reciprocal %315 {approx = true} : vector<2x16x1xf32> -> vector<2x16x1xf32>
    %317 = vector.broadcast %316 : vector<2x16x1xf32> to vector<2x16x16xf32>
    %318 = arith.mulf %313, %317 : vector<2x16x16xf32>
    %319 = arith.truncf %318 : vector<2x16x16xf32> to vector<2x16x16xbf16>
    %320 = vector.extract_strided_slice %253 {offsets = [0, 0, 24], sizes = [2, 16, 8], strides = [1, 1, 1]} : vector<2x16x32xbf16> to vector<2x16x8xbf16>
    "tpu.trace_start"() <{level = 10 : i32, message = "wqk,wkd->wqd"}> : () -> ()
    %cst_157 = arith.constant dense<0.000000e+00> : vector<2x16x8xf32>
    %321 = tpu.matmul %319, %320, %cst_157 {dimension_numbers = #tpu.dot_dimension_numbers<[2], [1], [1], [2], [0, 0, 0, 1, 1, 2], [0], [0]>} : vector<2x16x16xbf16>, vector<2x16x8xbf16>, vector<2x16x8xf32> -> vector<2x16x8xf32>
    "tpu.trace_stop"() : () -> ()
    %322 = tpu.concatenate %270, %287, %304, %321 in 2 : vector<2x16x8xf32>, vector<2x16x8xf32>, vector<2x16x8xf32>, vector<2x16x8xf32> -> vector<2x16x32xf32>
    %323 = vector.shape_cast %322 : vector<2x16x32xf32> to vector<32x32xf32>
    %324 = arith.truncf %323 : vector<32x32xf32> to vector<32x32xbf16>
    %cst_158 = arith.constant dense<0.000000e+00> : vector<32x32xf32>
    %325 = tpu.matmul %324, %189, %cst_158 {dimension_numbers = #tpu.dot_dimension_numbers<[1], [0], [0], [1], [0, 0, 1, 1], [], []>} : vector<32x32xbf16>, vector<32x32xbf16>, vector<32x32xf32> -> vector<32x32xf32>
    %326 = vector.broadcast %197 : vector<1x32xf32> to vector<32x32xf32>
    %327 = arith.addf %325, %326 : vector<32x32xf32>
    %328 = arith.addf %181, %327 : vector<32x32xf32>
    %cst_159 = arith.constant dense<0.000000e+00> : vector<32xf32>
    %329 = vector.multi_reduction <add>, %328, %cst_159 [1] : vector<32x32xf32> to vector<32xf32>
    %330 = vector.shape_cast %329 : vector<32xf32> to vector<32x1xf32>
    %cst_160 = arith.constant 3.200000e+01 : f32
    %331 = vector.broadcast %cst_160 : f32 to vector<32x1xf32>
    %332 = arith.divf %330, %331 : vector<32x1xf32>
    %333 = vector.broadcast %332 : vector<32x1xf32> to vector<32x32xf32>
    %334 = arith.subf %328, %333 : vector<32x32xf32>
    %335 = arith.mulf %334, %334 : vector<32x32xf32>
    %cst_161 = arith.constant dense<0.000000e+00> : vector<32xf32>
    %336 = vector.multi_reduction <add>, %335, %cst_161 [1] : vector<32x32xf32> to vector<32xf32>
    %337 = vector.shape_cast %336 : vector<32xf32> to vector<32x1xf32>
    %cst_162 = arith.constant 3.200000e+01 : f32
    %338 = vector.broadcast %cst_162 : f32 to vector<32x1xf32>
    %339 = arith.divf %337, %338 : vector<32x1xf32>
    %340 = vector.broadcast %332 : vector<32x1xf32> to vector<32x32xf32>
    %341 = arith.subf %328, %340 : vector<32x32xf32>
    %cst_163 = arith.constant 9.99999974E-6 : f32
    %342 = vector.broadcast %cst_163 : f32 to vector<32x1xf32>
    %343 = arith.addf %339, %342 : vector<32x1xf32>
    %344 = math.rsqrt %343 : vector<32x1xf32>
    %345 = vector.broadcast %344 : vector<32x1xf32> to vector<32x32xf32>
    %346 = arith.mulf %341, %345 : vector<32x32xf32>
    %347 = vector.broadcast %203 : vector<1x32xf32> to vector<32x32xf32>
    %348 = arith.mulf %346, %347 : vector<32x32xf32>
    %349 = vector.broadcast %205 : vector<1x32xf32> to vector<32x32xf32>
    %350 = arith.addf %348, %349 : vector<32x32xf32>
    %351 = arith.truncf %350 : vector<32x32xf32> to vector<32x32xbf16>
    %cst_164 = arith.constant dense<0.000000e+00> : vector<32x64xf32>
    %352 = tpu.matmul %351, %207, %cst_164 {dimension_numbers = #tpu.dot_dimension_numbers<[1], [0], [0], [1], [0, 0, 1, 1], [], []>} : vector<32x32xbf16>, vector<32x64xbf16>, vector<32x64xf32> -> vector<32x64xf32>
    %353 = vector.broadcast %209 : vector<1x64xf32> to vector<32x64xf32>
    %354 = arith.addf %352, %353 : vector<32x64xf32>
    %cst_165 = arith.constant 0.000000e+00 : f32
    %355 = vector.broadcast %cst_165 : f32 to vector<32x64xf32>
    %356 = arith.maximumf %354, %355 : vector<32x64xf32>
    %357 = arith.truncf %356 : vector<32x64xf32> to vector<32x64xbf16>
    %cst_166 = arith.constant dense<0.000000e+00> : vector<32x32xf32>
    %358 = tpu.matmul %357, %211, %cst_166 {dimension_numbers = #tpu.dot_dimension_numbers<[1], [0], [0], [1], [0, 0, 1, 1], [], []>} : vector<32x64xbf16>, vector<64x32xbf16>, vector<32x32xf32> -> vector<32x32xf32>
    %359 = vector.broadcast %213 : vector<1x32xf32> to vector<32x32xf32>
    %360 = arith.addf %358, %359 : vector<32x32xf32>
    %361 = arith.addf %328, %360 : vector<32x32xf32>
    %362 = vector.extract_strided_slice %361 {offsets = [24, 0], sizes = [8, 32], strides = [1, 1]} : vector<32x32xf32> to vector<8x32xf32>
    %363 = vector.extract_strided_slice %361 {offsets = [0, 0], sizes = [24, 32], strides = [1, 1]} : vector<32x32xf32> to vector<24x32xf32>
    %364 = tpu.concatenate %362, %363 in 0 : vector<8x32xf32>, vector<24x32xf32> -> vector<32x32xf32>
    %c2 = arith.constant 2 : index
    %c0_167 = arith.constant 0 : index
    %c0_168 = arith.constant 0 : index
    %365 = vector.load %arg3[%c2, %c0_167, %c0_168] : memref<4x32x32xbf16, #tpu.memory_space<vmem>>, vector<1x32x32xbf16>
    %366 = vector.shape_cast %365 : vector<1x32x32xbf16> to vector<32x32xbf16>
    %c2_169 = arith.constant 2 : index
    %c0_170 = arith.constant 0 : index
    %c0_171 = arith.constant 0 : index
    %367 = vector.load %arg5[%c2_169, %c0_170, %c0_171] : memref<4x32x32xbf16, #tpu.memory_space<vmem>>, vector<1x32x32xbf16>
    %368 = vector.shape_cast %367 : vector<1x32x32xbf16> to vector<32x32xbf16>
    %c2_172 = arith.constant 2 : index
    %c0_173 = arith.constant 0 : index
    %c0_174 = arith.constant 0 : index
    %369 = vector.load %arg7[%c2_172, %c0_173, %c0_174] : memref<4x32x32xbf16, #tpu.memory_space<vmem>>, vector<1x32x32xbf16>
    %370 = vector.shape_cast %369 : vector<1x32x32xbf16> to vector<32x32xbf16>
    %c2_175 = arith.constant 2 : index
    %c0_176 = arith.constant 0 : index
    %c0_177 = arith.constant 0 : index
    %371 = vector.load %arg9[%c2_175, %c0_176, %c0_177] : memref<4x32x32xbf16, #tpu.memory_space<vmem>>, vector<1x32x32xbf16>
    %372 = vector.shape_cast %371 : vector<1x32x32xbf16> to vector<32x32xbf16>
    %c2_178 = arith.constant 2 : index
    %c0_179 = arith.constant 0 : index
    %c0_180 = arith.constant 0 : index
    %373 = vector.load %arg4[%c2_178, %c0_179, %c0_180] : memref<4x1x32xf32, #tpu.memory_space<vmem>>, vector<1x1x32xf32>
    %374 = vector.shape_cast %373 : vector<1x1x32xf32> to vector<1x32xf32>
    %c2_181 = arith.constant 2 : index
    %c0_182 = arith.constant 0 : index
    %c0_183 = arith.constant 0 : index
    %375 = vector.load %arg6[%c2_181, %c0_182, %c0_183] : memref<4x1x32xf32, #tpu.memory_space<vmem>>, vector<1x1x32xf32>
    %376 = vector.shape_cast %375 : vector<1x1x32xf32> to vector<1x32xf32>
    %c2_184 = arith.constant 2 : index
    %c0_185 = arith.constant 0 : index
    %c0_186 = arith.constant 0 : index
    %377 = vector.load %arg8[%c2_184, %c0_185, %c0_186] : memref<4x1x32xf32, #tpu.memory_space<vmem>>, vector<1x1x32xf32>
    %378 = vector.shape_cast %377 : vector<1x1x32xf32> to vector<1x32xf32>
    %c2_187 = arith.constant 2 : index
    %c0_188 = arith.constant 0 : index
    %c0_189 = arith.constant 0 : index
    %379 = vector.load %arg10[%c2_187, %c0_188, %c0_189] : memref<4x1x32xf32, #tpu.memory_space<vmem>>, vector<1x1x32xf32>
    %380 = vector.shape_cast %379 : vector<1x1x32xf32> to vector<1x32xf32>
    %c2_190 = arith.constant 2 : index
    %c0_191 = arith.constant 0 : index
    %c0_192 = arith.constant 0 : index
    %381 = vector.load %arg11[%c2_190, %c0_191, %c0_192] : memref<4x1x32xf32, #tpu.memory_space<vmem>>, vector<1x1x32xf32>
    %382 = vector.shape_cast %381 : vector<1x1x32xf32> to vector<1x32xf32>
    %c2_193 = arith.constant 2 : index
    %c0_194 = arith.constant 0 : index
    %c0_195 = arith.constant 0 : index
    %383 = vector.load %arg12[%c2_193, %c0_194, %c0_195] : memref<4x1x32xf32, #tpu.memory_space<vmem>>, vector<1x1x32xf32>
    %384 = vector.shape_cast %383 : vector<1x1x32xf32> to vector<1x32xf32>
    %c2_196 = arith.constant 2 : index
    %c0_197 = arith.constant 0 : index
    %c0_198 = arith.constant 0 : index
    %385 = vector.load %arg13[%c2_196, %c0_197, %c0_198] : memref<4x1x32xf32, #tpu.memory_space<vmem>>, vector<1x1x32xf32>
    %386 = vector.shape_cast %385 : vector<1x1x32xf32> to vector<1x32xf32>
    %c2_199 = arith.constant 2 : index
    %c0_200 = arith.constant 0 : index
    %c0_201 = arith.constant 0 : index
    %387 = vector.load %arg14[%c2_199, %c0_200, %c0_201] : memref<4x1x32xf32, #tpu.memory_space<vmem>>, vector<1x1x32xf32>
    %388 = vector.shape_cast %387 : vector<1x1x32xf32> to vector<1x32xf32>
    %c2_202 = arith.constant 2 : index
    %c0_203 = arith.constant 0 : index
    %c0_204 = arith.constant 0 : index
    %389 = vector.load %arg15[%c2_202, %c0_203, %c0_204] : memref<4x32x64xbf16, #tpu.memory_space<vmem>>, vector<1x32x64xbf16>
    %390 = vector.shape_cast %389 : vector<1x32x64xbf16> to vector<32x64xbf16>
    %c2_205 = arith.constant 2 : index
    %c0_206 = arith.constant 0 : index
    %c0_207 = arith.constant 0 : index
    %391 = vector.load %arg16[%c2_205, %c0_206, %c0_207] : memref<4x1x64xf32, #tpu.memory_space<vmem>>, vector<1x1x64xf32>
    %392 = vector.shape_cast %391 : vector<1x1x64xf32> to vector<1x64xf32>
    %c2_208 = arith.constant 2 : index
    %c0_209 = arith.constant 0 : index
    %c0_210 = arith.constant 0 : index
    %393 = vector.load %arg17[%c2_208, %c0_209, %c0_210] : memref<4x64x32xbf16, #tpu.memory_space<vmem>>, vector<1x64x32xbf16>
    %394 = vector.shape_cast %393 : vector<1x64x32xbf16> to vector<64x32xbf16>
    %c2_211 = arith.constant 2 : index
    %c0_212 = arith.constant 0 : index
    %c0_213 = arith.constant 0 : index
    %395 = vector.load %arg18[%c2_211, %c0_212, %c0_213] : memref<4x1x32xf32, #tpu.memory_space<vmem>>, vector<1x1x32xf32>
    %396 = vector.shape_cast %395 : vector<1x1x32xf32> to vector<1x32xf32>
    %cst_214 = arith.constant dense<0.000000e+00> : vector<32xf32>
    %397 = vector.multi_reduction <add>, %364, %cst_214 [1] : vector<32x32xf32> to vector<32xf32>
    %398 = vector.shape_cast %397 : vector<32xf32> to vector<32x1xf32>
    %cst_215 = arith.constant 3.200000e+01 : f32
    %399 = vector.broadcast %cst_215 : f32 to vector<32x1xf32>
    %400 = arith.divf %398, %399 : vector<32x1xf32>
    %401 = vector.broadcast %400 : vector<32x1xf32> to vector<32x32xf32>
    %402 = arith.subf %364, %401 : vector<32x32xf32>
    %403 = arith.mulf %402, %402 : vector<32x32xf32>
    %cst_216 = arith.constant dense<0.000000e+00> : vector<32xf32>
    %404 = vector.multi_reduction <add>, %403, %cst_216 [1] : vector<32x32xf32> to vector<32xf32>
    %405 = vector.shape_cast %404 : vector<32xf32> to vector<32x1xf32>
    %cst_217 = arith.constant 3.200000e+01 : f32
    %406 = vector.broadcast %cst_217 : f32 to vector<32x1xf32>
    %407 = arith.divf %405, %406 : vector<32x1xf32>
    %408 = vector.broadcast %400 : vector<32x1xf32> to vector<32x32xf32>
    %409 = arith.subf %364, %408 : vector<32x32xf32>
    %cst_218 = arith.constant 9.99999974E-6 : f32
    %410 = vector.broadcast %cst_218 : f32 to vector<32x1xf32>
    %411 = arith.addf %407, %410 : vector<32x1xf32>
    %412 = math.rsqrt %411 : vector<32x1xf32>
    %413 = vector.broadcast %412 : vector<32x1xf32> to vector<32x32xf32>
    %414 = arith.mulf %409, %413 : vector<32x32xf32>
    %415 = vector.broadcast %382 : vector<1x32xf32> to vector<32x32xf32>
    %416 = arith.mulf %414, %415 : vector<32x32xf32>
    %417 = vector.broadcast %384 : vector<1x32xf32> to vector<32x32xf32>
    %418 = arith.addf %416, %417 : vector<32x32xf32>
    %419 = arith.truncf %418 : vector<32x32xf32> to vector<32x32xbf16>
    %cst_219 = arith.constant dense<0.000000e+00> : vector<32x32xf32>
    %420 = tpu.matmul %419, %366, %cst_219 {dimension_numbers = #tpu.dot_dimension_numbers<[1], [0], [0], [1], [0, 0, 1, 1], [], []>} : vector<32x32xbf16>, vector<32x32xbf16>, vector<32x32xf32> -> vector<32x32xf32>
    %421 = vector.broadcast %374 : vector<1x32xf32> to vector<32x32xf32>
    %422 = arith.addf %420, %421 : vector<32x32xf32>
    %cst_220 = arith.constant dense<0.000000e+00> : vector<32x32xf32>
    %423 = tpu.matmul %419, %368, %cst_220 {dimension_numbers = #tpu.dot_dimension_numbers<[1], [0], [0], [1], [0, 0, 1, 1], [], []>} : vector<32x32xbf16>, vector<32x32xbf16>, vector<32x32xf32> -> vector<32x32xf32>
    %424 = vector.broadcast %376 : vector<1x32xf32> to vector<32x32xf32>
    %425 = arith.addf %423, %424 : vector<32x32xf32>
    %cst_221 = arith.constant dense<0.000000e+00> : vector<32x32xf32>
    %426 = tpu.matmul %419, %370, %cst_221 {dimension_numbers = #tpu.dot_dimension_numbers<[1], [0], [0], [1], [0, 0, 1, 1], [], []>} : vector<32x32xbf16>, vector<32x32xbf16>, vector<32x32xf32> -> vector<32x32xf32>
    %427 = vector.broadcast %378 : vector<1x32xf32> to vector<32x32xf32>
    %428 = arith.addf %426, %427 : vector<32x32xf32>
    %cst_222 = arith.constant 0.353553385 : f32
    %429 = vector.broadcast %cst_222 : f32 to vector<32x32xf32>
    %430 = arith.mulf %422, %429 : vector<32x32xf32>
    %431 = vector.shape_cast %430 : vector<32x32xf32> to vector<2x16x32xf32>
    %432 = arith.truncf %431 : vector<2x16x32xf32> to vector<2x16x32xbf16>
    %433 = vector.shape_cast %425 : vector<32x32xf32> to vector<2x16x32xf32>
    %434 = arith.truncf %433 : vector<2x16x32xf32> to vector<2x16x32xbf16>
    %435 = vector.shape_cast %428 : vector<32x32xf32> to vector<2x16x32xf32>
    %436 = arith.truncf %435 : vector<2x16x32xf32> to vector<2x16x32xbf16>
    %437 = vector.extract_strided_slice %432 {offsets = [0, 0, 0], sizes = [2, 16, 8], strides = [1, 1, 1]} : vector<2x16x32xbf16> to vector<2x16x8xbf16>
    %438 = vector.extract_strided_slice %434 {offsets = [0, 0, 0], sizes = [2, 16, 8], strides = [1, 1, 1]} : vector<2x16x32xbf16> to vector<2x16x8xbf16>
    "tpu.trace_start"() <{level = 10 : i32, message = "wqd,wkd->wqk"}> : () -> ()
    %cst_223 = arith.constant dense<0.000000e+00> : vector<2x16x16xf32>
    %439 = tpu.matmul %437, %438, %cst_223 {dimension_numbers = #tpu.dot_dimension_numbers<[2], [2], [1], [1], [0, 0, 0, 1, 1, 1], [0], [0]>} : vector<2x16x8xbf16>, vector<2x16x8xbf16>, vector<2x16x16xf32> -> vector<2x16x16xf32>
    "tpu.trace_stop"() : () -> ()
    %cst_224 = arith.constant dense<0xFF800000> : vector<2x16xf32>
    %440 = vector.multi_reduction <maximumf>, %439, %cst_224 [2] : vector<2x16x16xf32> to vector<2x16xf32>
    %441 = vector.shape_cast %440 : vector<2x16xf32> to vector<2x16x1xf32>
    %442 = vector.broadcast %441 : vector<2x16x1xf32> to vector<2x16x16xf32>
    %443 = arith.subf %439, %442 : vector<2x16x16xf32>
    %444 = math.exp %443 : vector<2x16x16xf32>
    %cst_225 = arith.constant dense<0.000000e+00> : vector<2x16xf32>
    %445 = vector.multi_reduction <add>, %444, %cst_225 [2] : vector<2x16x16xf32> to vector<2x16xf32>
    %446 = vector.shape_cast %445 : vector<2x16xf32> to vector<2x16x1xf32>
    %447 = tpu.reciprocal %446 {approx = true} : vector<2x16x1xf32> -> vector<2x16x1xf32>
    %448 = vector.broadcast %447 : vector<2x16x1xf32> to vector<2x16x16xf32>
    %449 = arith.mulf %444, %448 : vector<2x16x16xf32>
    %450 = arith.truncf %449 : vector<2x16x16xf32> to vector<2x16x16xbf16>
    %451 = vector.extract_strided_slice %436 {offsets = [0, 0, 0], sizes = [2, 16, 8], strides = [1, 1, 1]} : vector<2x16x32xbf16> to vector<2x16x8xbf16>
    "tpu.trace_start"() <{level = 10 : i32, message = "wqk,wkd->wqd"}> : () -> ()
    %cst_226 = arith.constant dense<0.000000e+00> : vector<2x16x8xf32>
    %452 = tpu.matmul %450, %451, %cst_226 {dimension_numbers = #tpu.dot_dimension_numbers<[2], [1], [1], [2], [0, 0, 0, 1, 1, 2], [0], [0]>} : vector<2x16x16xbf16>, vector<2x16x8xbf16>, vector<2x16x8xf32> -> vector<2x16x8xf32>
    "tpu.trace_stop"() : () -> ()
    %453 = vector.extract_strided_slice %432 {offsets = [0, 0, 8], sizes = [2, 16, 8], strides = [1, 1, 1]} : vector<2x16x32xbf16> to vector<2x16x8xbf16>
    %454 = vector.extract_strided_slice %434 {offsets = [0, 0, 8], sizes = [2, 16, 8], strides = [1, 1, 1]} : vector<2x16x32xbf16> to vector<2x16x8xbf16>
    "tpu.trace_start"() <{level = 10 : i32, message = "wqd,wkd->wqk"}> : () -> ()
    %cst_227 = arith.constant dense<0.000000e+00> : vector<2x16x16xf32>
    %455 = tpu.matmul %453, %454, %cst_227 {dimension_numbers = #tpu.dot_dimension_numbers<[2], [2], [1], [1], [0, 0, 0, 1, 1, 1], [0], [0]>} : vector<2x16x8xbf16>, vector<2x16x8xbf16>, vector<2x16x16xf32> -> vector<2x16x16xf32>
    "tpu.trace_stop"() : () -> ()
    %cst_228 = arith.constant dense<0xFF800000> : vector<2x16xf32>
    %456 = vector.multi_reduction <maximumf>, %455, %cst_228 [2] : vector<2x16x16xf32> to vector<2x16xf32>
    %457 = vector.shape_cast %456 : vector<2x16xf32> to vector<2x16x1xf32>
    %458 = vector.broadcast %457 : vector<2x16x1xf32> to vector<2x16x16xf32>
    %459 = arith.subf %455, %458 : vector<2x16x16xf32>
    %460 = math.exp %459 : vector<2x16x16xf32>
    %cst_229 = arith.constant dense<0.000000e+00> : vector<2x16xf32>
    %461 = vector.multi_reduction <add>, %460, %cst_229 [2] : vector<2x16x16xf32> to vector<2x16xf32>
    %462 = vector.shape_cast %461 : vector<2x16xf32> to vector<2x16x1xf32>
    %463 = tpu.reciprocal %462 {approx = true} : vector<2x16x1xf32> -> vector<2x16x1xf32>
    %464 = vector.broadcast %463 : vector<2x16x1xf32> to vector<2x16x16xf32>
    %465 = arith.mulf %460, %464 : vector<2x16x16xf32>
    %466 = arith.truncf %465 : vector<2x16x16xf32> to vector<2x16x16xbf16>
    %467 = vector.extract_strided_slice %436 {offsets = [0, 0, 8], sizes = [2, 16, 8], strides = [1, 1, 1]} : vector<2x16x32xbf16> to vector<2x16x8xbf16>
    "tpu.trace_start"() <{level = 10 : i32, message = "wqk,wkd->wqd"}> : () -> ()
    %cst_230 = arith.constant dense<0.000000e+00> : vector<2x16x8xf32>
    %468 = tpu.matmul %466, %467, %cst_230 {dimension_numbers = #tpu.dot_dimension_numbers<[2], [1], [1], [2], [0, 0, 0, 1, 1, 2], [0], [0]>} : vector<2x16x16xbf16>, vector<2x16x8xbf16>, vector<2x16x8xf32> -> vector<2x16x8xf32>
    "tpu.trace_stop"() : () -> ()
    %469 = vector.extract_strided_slice %432 {offsets = [0, 0, 16], sizes = [2, 16, 8], strides = [1, 1, 1]} : vector<2x16x32xbf16> to vector<2x16x8xbf16>
    %470 = vector.extract_strided_slice %434 {offsets = [0, 0, 16], sizes = [2, 16, 8], strides = [1, 1, 1]} : vector<2x16x32xbf16> to vector<2x16x8xbf16>
    "tpu.trace_start"() <{level = 10 : i32, message = "wqd,wkd->wqk"}> : () -> ()
    %cst_231 = arith.constant dense<0.000000e+00> : vector<2x16x16xf32>
    %471 = tpu.matmul %469, %470, %cst_231 {dimension_numbers = #tpu.dot_dimension_numbers<[2], [2], [1], [1], [0, 0, 0, 1, 1, 1], [0], [0]>} : vector<2x16x8xbf16>, vector<2x16x8xbf16>, vector<2x16x16xf32> -> vector<2x16x16xf32>
    "tpu.trace_stop"() : () -> ()
    %cst_232 = arith.constant dense<0xFF800000> : vector<2x16xf32>
    %472 = vector.multi_reduction <maximumf>, %471, %cst_232 [2] : vector<2x16x16xf32> to vector<2x16xf32>
    %473 = vector.shape_cast %472 : vector<2x16xf32> to vector<2x16x1xf32>
    %474 = vector.broadcast %473 : vector<2x16x1xf32> to vector<2x16x16xf32>
    %475 = arith.subf %471, %474 : vector<2x16x16xf32>
    %476 = math.exp %475 : vector<2x16x16xf32>
    %cst_233 = arith.constant dense<0.000000e+00> : vector<2x16xf32>
    %477 = vector.multi_reduction <add>, %476, %cst_233 [2] : vector<2x16x16xf32> to vector<2x16xf32>
    %478 = vector.shape_cast %477 : vector<2x16xf32> to vector<2x16x1xf32>
    %479 = tpu.reciprocal %478 {approx = true} : vector<2x16x1xf32> -> vector<2x16x1xf32>
    %480 = vector.broadcast %479 : vector<2x16x1xf32> to vector<2x16x16xf32>
    %481 = arith.mulf %476, %480 : vector<2x16x16xf32>
    %482 = arith.truncf %481 : vector<2x16x16xf32> to vector<2x16x16xbf16>
    %483 = vector.extract_strided_slice %436 {offsets = [0, 0, 16], sizes = [2, 16, 8], strides = [1, 1, 1]} : vector<2x16x32xbf16> to vector<2x16x8xbf16>
    "tpu.trace_start"() <{level = 10 : i32, message = "wqk,wkd->wqd"}> : () -> ()
    %cst_234 = arith.constant dense<0.000000e+00> : vector<2x16x8xf32>
    %484 = tpu.matmul %482, %483, %cst_234 {dimension_numbers = #tpu.dot_dimension_numbers<[2], [1], [1], [2], [0, 0, 0, 1, 1, 2], [0], [0]>} : vector<2x16x16xbf16>, vector<2x16x8xbf16>, vector<2x16x8xf32> -> vector<2x16x8xf32>
    "tpu.trace_stop"() : () -> ()
    %485 = vector.extract_strided_slice %432 {offsets = [0, 0, 24], sizes = [2, 16, 8], strides = [1, 1, 1]} : vector<2x16x32xbf16> to vector<2x16x8xbf16>
    %486 = vector.extract_strided_slice %434 {offsets = [0, 0, 24], sizes = [2, 16, 8], strides = [1, 1, 1]} : vector<2x16x32xbf16> to vector<2x16x8xbf16>
    "tpu.trace_start"() <{level = 10 : i32, message = "wqd,wkd->wqk"}> : () -> ()
    %cst_235 = arith.constant dense<0.000000e+00> : vector<2x16x16xf32>
    %487 = tpu.matmul %485, %486, %cst_235 {dimension_numbers = #tpu.dot_dimension_numbers<[2], [2], [1], [1], [0, 0, 0, 1, 1, 1], [0], [0]>} : vector<2x16x8xbf16>, vector<2x16x8xbf16>, vector<2x16x16xf32> -> vector<2x16x16xf32>
    "tpu.trace_stop"() : () -> ()
    %cst_236 = arith.constant dense<0xFF800000> : vector<2x16xf32>
    %488 = vector.multi_reduction <maximumf>, %487, %cst_236 [2] : vector<2x16x16xf32> to vector<2x16xf32>
    %489 = vector.shape_cast %488 : vector<2x16xf32> to vector<2x16x1xf32>
    %490 = vector.broadcast %489 : vector<2x16x1xf32> to vector<2x16x16xf32>
    %491 = arith.subf %487, %490 : vector<2x16x16xf32>
    %492 = math.exp %491 : vector<2x16x16xf32>
    %cst_237 = arith.constant dense<0.000000e+00> : vector<2x16xf32>
    %493 = vector.multi_reduction <add>, %492, %cst_237 [2] : vector<2x16x16xf32> to vector<2x16xf32>
    %494 = vector.shape_cast %493 : vector<2x16xf32> to vector<2x16x1xf32>
    %495 = tpu.reciprocal %494 {approx = true} : vector<2x16x1xf32> -> vector<2x16x1xf32>
    %496 = vector.broadcast %495 : vector<2x16x1xf32> to vector<2x16x16xf32>
    %497 = arith.mulf %492, %496 : vector<2x16x16xf32>
    %498 = arith.truncf %497 : vector<2x16x16xf32> to vector<2x16x16xbf16>
    %499 = vector.extract_strided_slice %436 {offsets = [0, 0, 24], sizes = [2, 16, 8], strides = [1, 1, 1]} : vector<2x16x32xbf16> to vector<2x16x8xbf16>
    "tpu.trace_start"() <{level = 10 : i32, message = "wqk,wkd->wqd"}> : () -> ()
    %cst_238 = arith.constant dense<0.000000e+00> : vector<2x16x8xf32>
    %500 = tpu.matmul %498, %499, %cst_238 {dimension_numbers = #tpu.dot_dimension_numbers<[2], [1], [1], [2], [0, 0, 0, 1, 1, 2], [0], [0]>} : vector<2x16x16xbf16>, vector<2x16x8xbf16>, vector<2x16x8xf32> -> vector<2x16x8xf32>
    "tpu.trace_stop"() : () -> ()
    %501 = tpu.concatenate %452, %468, %484, %500 in 2 : vector<2x16x8xf32>, vector<2x16x8xf32>, vector<2x16x8xf32>, vector<2x16x8xf32> -> vector<2x16x32xf32>
    %502 = vector.shape_cast %501 : vector<2x16x32xf32> to vector<32x32xf32>
    %503 = arith.truncf %502 : vector<32x32xf32> to vector<32x32xbf16>
    %cst_239 = arith.constant dense<0.000000e+00> : vector<32x32xf32>
    %504 = tpu.matmul %503, %372, %cst_239 {dimension_numbers = #tpu.dot_dimension_numbers<[1], [0], [0], [1], [0, 0, 1, 1], [], []>} : vector<32x32xbf16>, vector<32x32xbf16>, vector<32x32xf32> -> vector<32x32xf32>
    %505 = vector.broadcast %380 : vector<1x32xf32> to vector<32x32xf32>
    %506 = arith.addf %504, %505 : vector<32x32xf32>
    %507 = arith.addf %364, %506 : vector<32x32xf32>
    %cst_240 = arith.constant dense<0.000000e+00> : vector<32xf32>
    %508 = vector.multi_reduction <add>, %507, %cst_240 [1] : vector<32x32xf32> to vector<32xf32>
    %509 = vector.shape_cast %508 : vector<32xf32> to vector<32x1xf32>
    %cst_241 = arith.constant 3.200000e+01 : f32
    %510 = vector.broadcast %cst_241 : f32 to vector<32x1xf32>
    %511 = arith.divf %509, %510 : vector<32x1xf32>
    %512 = vector.broadcast %511 : vector<32x1xf32> to vector<32x32xf32>
    %513 = arith.subf %507, %512 : vector<32x32xf32>
    %514 = arith.mulf %513, %513 : vector<32x32xf32>
    %cst_242 = arith.constant dense<0.000000e+00> : vector<32xf32>
    %515 = vector.multi_reduction <add>, %514, %cst_242 [1] : vector<32x32xf32> to vector<32xf32>
    %516 = vector.shape_cast %515 : vector<32xf32> to vector<32x1xf32>
    %cst_243 = arith.constant 3.200000e+01 : f32
    %517 = vector.broadcast %cst_243 : f32 to vector<32x1xf32>
    %518 = arith.divf %516, %517 : vector<32x1xf32>
    %519 = vector.broadcast %511 : vector<32x1xf32> to vector<32x32xf32>
    %520 = arith.subf %507, %519 : vector<32x32xf32>
    %cst_244 = arith.constant 9.99999974E-6 : f32
    %521 = vector.broadcast %cst_244 : f32 to vector<32x1xf32>
    %522 = arith.addf %518, %521 : vector<32x1xf32>
    %523 = math.rsqrt %522 : vector<32x1xf32>
    %524 = vector.broadcast %523 : vector<32x1xf32> to vector<32x32xf32>
    %525 = arith.mulf %520, %524 : vector<32x32xf32>
    %526 = vector.broadcast %386 : vector<1x32xf32> to vector<32x32xf32>
    %527 = arith.mulf %525, %526 : vector<32x32xf32>
    %528 = vector.broadcast %388 : vector<1x32xf32> to vector<32x32xf32>
    %529 = arith.addf %527, %528 : vector<32x32xf32>
    %530 = arith.truncf %529 : vector<32x32xf32> to vector<32x32xbf16>
    %cst_245 = arith.constant dense<0.000000e+00> : vector<32x64xf32>
    %531 = tpu.matmul %530, %390, %cst_245 {dimension_numbers = #tpu.dot_dimension_numbers<[1], [0], [0], [1], [0, 0, 1, 1], [], []>} : vector<32x32xbf16>, vector<32x64xbf16>, vector<32x64xf32> -> vector<32x64xf32>
    %532 = vector.broadcast %392 : vector<1x64xf32> to vector<32x64xf32>
    %533 = arith.addf %531, %532 : vector<32x64xf32>
    %cst_246 = arith.constant 0.000000e+00 : f32
    %534 = vector.broadcast %cst_246 : f32 to vector<32x64xf32>
    %535 = arith.maximumf %533, %534 : vector<32x64xf32>
    %536 = arith.truncf %535 : vector<32x64xf32> to vector<32x64xbf16>
    %cst_247 = arith.constant dense<0.000000e+00> : vector<32x32xf32>
    %537 = tpu.matmul %536, %394, %cst_247 {dimension_numbers = #tpu.dot_dimension_numbers<[1], [0], [0], [1], [0, 0, 1, 1], [], []>} : vector<32x64xbf16>, vector<64x32xbf16>, vector<32x32xf32> -> vector<32x32xf32>
    %538 = vector.broadcast %396 : vector<1x32xf32> to vector<32x32xf32>
    %539 = arith.addf %537, %538 : vector<32x32xf32>
    %540 = arith.addf %507, %539 : vector<32x32xf32>
    %541 = vector.extract_strided_slice %540 {offsets = [8, 0], sizes = [24, 32], strides = [1, 1]} : vector<32x32xf32> to vector<24x32xf32>
    %542 = vector.extract_strided_slice %540 {offsets = [0, 0], sizes = [8, 32], strides = [1, 1]} : vector<32x32xf32> to vector<8x32xf32>
    %543 = tpu.concatenate %541, %542 in 0 : vector<24x32xf32>, vector<8x32xf32> -> vector<32x32xf32>
    %c3 = arith.constant 3 : index
    %c0_248 = arith.constant 0 : index
    %c0_249 = arith.constant 0 : index
    %544 = vector.load %arg3[%c3, %c0_248, %c0_249] : memref<4x32x32xbf16, #tpu.memory_space<vmem>>, vector<1x32x32xbf16>
    %545 = vector.shape_cast %544 : vector<1x32x32xbf16> to vector<32x32xbf16>
    %c3_250 = arith.constant 3 : index
    %c0_251 = arith.constant 0 : index
    %c0_252 = arith.constant 0 : index
    %546 = vector.load %arg5[%c3_250, %c0_251, %c0_252] : memref<4x32x32xbf16, #tpu.memory_space<vmem>>, vector<1x32x32xbf16>
    %547 = vector.shape_cast %546 : vector<1x32x32xbf16> to vector<32x32xbf16>
    %c3_253 = arith.constant 3 : index
    %c0_254 = arith.constant 0 : index
    %c0_255 = arith.constant 0 : index
    %548 = vector.load %arg7[%c3_253, %c0_254, %c0_255] : memref<4x32x32xbf16, #tpu.memory_space<vmem>>, vector<1x32x32xbf16>
    %549 = vector.shape_cast %548 : vector<1x32x32xbf16> to vector<32x32xbf16>
    %c3_256 = arith.constant 3 : index
    %c0_257 = arith.constant 0 : index
    %c0_258 = arith.constant 0 : index
    %550 = vector.load %arg9[%c3_256, %c0_257, %c0_258] : memref<4x32x32xbf16, #tpu.memory_space<vmem>>, vector<1x32x32xbf16>
    %551 = vector.shape_cast %550 : vector<1x32x32xbf16> to vector<32x32xbf16>
    %c3_259 = arith.constant 3 : index
    %c0_260 = arith.constant 0 : index
    %c0_261 = arith.constant 0 : index
    %552 = vector.load %arg4[%c3_259, %c0_260, %c0_261] : memref<4x1x32xf32, #tpu.memory_space<vmem>>, vector<1x1x32xf32>
    %553 = vector.shape_cast %552 : vector<1x1x32xf32> to vector<1x32xf32>
    %c3_262 = arith.constant 3 : index
    %c0_263 = arith.constant 0 : index
    %c0_264 = arith.constant 0 : index
    %554 = vector.load %arg6[%c3_262, %c0_263, %c0_264] : memref<4x1x32xf32, #tpu.memory_space<vmem>>, vector<1x1x32xf32>
    %555 = vector.shape_cast %554 : vector<1x1x32xf32> to vector<1x32xf32>
    %c3_265 = arith.constant 3 : index
    %c0_266 = arith.constant 0 : index
    %c0_267 = arith.constant 0 : index
    %556 = vector.load %arg8[%c3_265, %c0_266, %c0_267] : memref<4x1x32xf32, #tpu.memory_space<vmem>>, vector<1x1x32xf32>
    %557 = vector.shape_cast %556 : vector<1x1x32xf32> to vector<1x32xf32>
    %c3_268 = arith.constant 3 : index
    %c0_269 = arith.constant 0 : index
    %c0_270 = arith.constant 0 : index
    %558 = vector.load %arg10[%c3_268, %c0_269, %c0_270] : memref<4x1x32xf32, #tpu.memory_space<vmem>>, vector<1x1x32xf32>
    %559 = vector.shape_cast %558 : vector<1x1x32xf32> to vector<1x32xf32>
    %c3_271 = arith.constant 3 : index
    %c0_272 = arith.constant 0 : index
    %c0_273 = arith.constant 0 : index
    %560 = vector.load %arg11[%c3_271, %c0_272, %c0_273] : memref<4x1x32xf32, #tpu.memory_space<vmem>>, vector<1x1x32xf32>
    %561 = vector.shape_cast %560 : vector<1x1x32xf32> to vector<1x32xf32>
    %c3_274 = arith.constant 3 : index
    %c0_275 = arith.constant 0 : index
    %c0_276 = arith.constant 0 : index
    %562 = vector.load %arg12[%c3_274, %c0_275, %c0_276] : memref<4x1x32xf32, #tpu.memory_space<vmem>>, vector<1x1x32xf32>
    %563 = vector.shape_cast %562 : vector<1x1x32xf32> to vector<1x32xf32>
    %c3_277 = arith.constant 3 : index
    %c0_278 = arith.constant 0 : index
    %c0_279 = arith.constant 0 : index
    %564 = vector.load %arg13[%c3_277, %c0_278, %c0_279] : memref<4x1x32xf32, #tpu.memory_space<vmem>>, vector<1x1x32xf32>
    %565 = vector.shape_cast %564 : vector<1x1x32xf32> to vector<1x32xf32>
    %c3_280 = arith.constant 3 : index
    %c0_281 = arith.constant 0 : index
    %c0_282 = arith.constant 0 : index
    %566 = vector.load %arg14[%c3_280, %c0_281, %c0_282] : memref<4x1x32xf32, #tpu.memory_space<vmem>>, vector<1x1x32xf32>
    %567 = vector.shape_cast %566 : vector<1x1x32xf32> to vector<1x32xf32>
    %c3_283 = arith.constant 3 : index
    %c0_284 = arith.constant 0 : index
    %c0_285 = arith.constant 0 : index
    %568 = vector.load %arg15[%c3_283, %c0_284, %c0_285] : memref<4x32x64xbf16, #tpu.memory_space<vmem>>, vector<1x32x64xbf16>
    %569 = vector.shape_cast %568 : vector<1x32x64xbf16> to vector<32x64xbf16>
    %c3_286 = arith.constant 3 : index
    %c0_287 = arith.constant 0 : index
    %c0_288 = arith.constant 0 : index
    %570 = vector.load %arg16[%c3_286, %c0_287, %c0_288] : memref<4x1x64xf32, #tpu.memory_space<vmem>>, vector<1x1x64xf32>
    %571 = vector.shape_cast %570 : vector<1x1x64xf32> to vector<1x64xf32>
    %c3_289 = arith.constant 3 : index
    %c0_290 = arith.constant 0 : index
    %c0_291 = arith.constant 0 : index
    %572 = vector.load %arg17[%c3_289, %c0_290, %c0_291] : memref<4x64x32xbf16, #tpu.memory_space<vmem>>, vector<1x64x32xbf16>
    %573 = vector.shape_cast %572 : vector<1x64x32xbf16> to vector<64x32xbf16>
    %c3_292 = arith.constant 3 : index
    %c0_293 = arith.constant 0 : index
    %c0_294 = arith.constant 0 : index
    %574 = vector.load %arg18[%c3_292, %c0_293, %c0_294] : memref<4x1x32xf32, #tpu.memory_space<vmem>>, vector<1x1x32xf32>
    %575 = vector.shape_cast %574 : vector<1x1x32xf32> to vector<1x32xf32>
    %cst_295 = arith.constant dense<0.000000e+00> : vector<32xf32>
    %576 = vector.multi_reduction <add>, %543, %cst_295 [1] : vector<32x32xf32> to vector<32xf32>
    %577 = vector.shape_cast %576 : vector<32xf32> to vector<32x1xf32>
    %cst_296 = arith.constant 3.200000e+01 : f32
    %578 = vector.broadcast %cst_296 : f32 to vector<32x1xf32>
    %579 = arith.divf %577, %578 : vector<32x1xf32>
    %580 = vector.broadcast %579 : vector<32x1xf32> to vector<32x32xf32>
    %581 = arith.subf %543, %580 : vector<32x32xf32>
    %582 = arith.mulf %581, %581 : vector<32x32xf32>
    %cst_297 = arith.constant dense<0.000000e+00> : vector<32xf32>
    %583 = vector.multi_reduction <add>, %582, %cst_297 [1] : vector<32x32xf32> to vector<32xf32>
    %584 = vector.shape_cast %583 : vector<32xf32> to vector<32x1xf32>
    %cst_298 = arith.constant 3.200000e+01 : f32
    %585 = vector.broadcast %cst_298 : f32 to vector<32x1xf32>
    %586 = arith.divf %584, %585 : vector<32x1xf32>
    %587 = vector.broadcast %579 : vector<32x1xf32> to vector<32x32xf32>
    %588 = arith.subf %543, %587 : vector<32x32xf32>
    %cst_299 = arith.constant 9.99999974E-6 : f32
    %589 = vector.broadcast %cst_299 : f32 to vector<32x1xf32>
    %590 = arith.addf %586, %589 : vector<32x1xf32>
    %591 = math.rsqrt %590 : vector<32x1xf32>
    %592 = vector.broadcast %591 : vector<32x1xf32> to vector<32x32xf32>
    %593 = arith.mulf %588, %592 : vector<32x32xf32>
    %594 = vector.broadcast %561 : vector<1x32xf32> to vector<32x32xf32>
    %595 = arith.mulf %593, %594 : vector<32x32xf32>
    %596 = vector.broadcast %563 : vector<1x32xf32> to vector<32x32xf32>
    %597 = arith.addf %595, %596 : vector<32x32xf32>
    %598 = arith.truncf %597 : vector<32x32xf32> to vector<32x32xbf16>
    %cst_300 = arith.constant dense<0.000000e+00> : vector<32x32xf32>
    %599 = tpu.matmul %598, %545, %cst_300 {dimension_numbers = #tpu.dot_dimension_numbers<[1], [0], [0], [1], [0, 0, 1, 1], [], []>} : vector<32x32xbf16>, vector<32x32xbf16>, vector<32x32xf32> -> vector<32x32xf32>
    %600 = vector.broadcast %553 : vector<1x32xf32> to vector<32x32xf32>
    %601 = arith.addf %599, %600 : vector<32x32xf32>
    %cst_301 = arith.constant dense<0.000000e+00> : vector<32x32xf32>
    %602 = tpu.matmul %598, %547, %cst_301 {dimension_numbers = #tpu.dot_dimension_numbers<[1], [0], [0], [1], [0, 0, 1, 1], [], []>} : vector<32x32xbf16>, vector<32x32xbf16>, vector<32x32xf32> -> vector<32x32xf32>
    %603 = vector.broadcast %555 : vector<1x32xf32> to vector<32x32xf32>
    %604 = arith.addf %602, %603 : vector<32x32xf32>
    %cst_302 = arith.constant dense<0.000000e+00> : vector<32x32xf32>
    %605 = tpu.matmul %598, %549, %cst_302 {dimension_numbers = #tpu.dot_dimension_numbers<[1], [0], [0], [1], [0, 0, 1, 1], [], []>} : vector<32x32xbf16>, vector<32x32xbf16>, vector<32x32xf32> -> vector<32x32xf32>
    %606 = vector.broadcast %557 : vector<1x32xf32> to vector<32x32xf32>
    %607 = arith.addf %605, %606 : vector<32x32xf32>
    %cst_303 = arith.constant 0.353553385 : f32
    %608 = vector.broadcast %cst_303 : f32 to vector<32x32xf32>
    %609 = arith.mulf %601, %608 : vector<32x32xf32>
    %610 = vector.shape_cast %609 : vector<32x32xf32> to vector<2x16x32xf32>
    %611 = arith.truncf %610 : vector<2x16x32xf32> to vector<2x16x32xbf16>
    %612 = vector.shape_cast %604 : vector<32x32xf32> to vector<2x16x32xf32>
    %613 = arith.truncf %612 : vector<2x16x32xf32> to vector<2x16x32xbf16>
    %614 = vector.shape_cast %607 : vector<32x32xf32> to vector<2x16x32xf32>
    %615 = arith.truncf %614 : vector<2x16x32xf32> to vector<2x16x32xbf16>
    %616 = vector.extract_strided_slice %611 {offsets = [0, 0, 0], sizes = [2, 16, 8], strides = [1, 1, 1]} : vector<2x16x32xbf16> to vector<2x16x8xbf16>
    %617 = vector.extract_strided_slice %613 {offsets = [0, 0, 0], sizes = [2, 16, 8], strides = [1, 1, 1]} : vector<2x16x32xbf16> to vector<2x16x8xbf16>
    "tpu.trace_start"() <{level = 10 : i32, message = "wqd,wkd->wqk"}> : () -> ()
    %cst_304 = arith.constant dense<0.000000e+00> : vector<2x16x16xf32>
    %618 = tpu.matmul %616, %617, %cst_304 {dimension_numbers = #tpu.dot_dimension_numbers<[2], [2], [1], [1], [0, 0, 0, 1, 1, 1], [0], [0]>} : vector<2x16x8xbf16>, vector<2x16x8xbf16>, vector<2x16x16xf32> -> vector<2x16x16xf32>
    "tpu.trace_stop"() : () -> ()
    %619 = arith.addf %618, %2 : vector<2x16x16xf32>
    %cst_305 = arith.constant dense<0xFF800000> : vector<2x16xf32>
    %620 = vector.multi_reduction <maximumf>, %619, %cst_305 [2] : vector<2x16x16xf32> to vector<2x16xf32>
    %621 = vector.shape_cast %620 : vector<2x16xf32> to vector<2x16x1xf32>
    %622 = vector.broadcast %621 : vector<2x16x1xf32> to vector<2x16x16xf32>
    %623 = arith.subf %619, %622 : vector<2x16x16xf32>
    %624 = math.exp %623 : vector<2x16x16xf32>
    %cst_306 = arith.constant dense<0.000000e+00> : vector<2x16xf32>
    %625 = vector.multi_reduction <add>, %624, %cst_306 [2] : vector<2x16x16xf32> to vector<2x16xf32>
    %626 = vector.shape_cast %625 : vector<2x16xf32> to vector<2x16x1xf32>
    %627 = tpu.reciprocal %626 {approx = true} : vector<2x16x1xf32> -> vector<2x16x1xf32>
    %628 = vector.broadcast %627 : vector<2x16x1xf32> to vector<2x16x16xf32>
    %629 = arith.mulf %624, %628 : vector<2x16x16xf32>
    %630 = arith.truncf %629 : vector<2x16x16xf32> to vector<2x16x16xbf16>
    %631 = vector.extract_strided_slice %615 {offsets = [0, 0, 0], sizes = [2, 16, 8], strides = [1, 1, 1]} : vector<2x16x32xbf16> to vector<2x16x8xbf16>
    "tpu.trace_start"() <{level = 10 : i32, message = "wqk,wkd->wqd"}> : () -> ()
    %cst_307 = arith.constant dense<0.000000e+00> : vector<2x16x8xf32>
    %632 = tpu.matmul %630, %631, %cst_307 {dimension_numbers = #tpu.dot_dimension_numbers<[2], [1], [1], [2], [0, 0, 0, 1, 1, 2], [0], [0]>} : vector<2x16x16xbf16>, vector<2x16x8xbf16>, vector<2x16x8xf32> -> vector<2x16x8xf32>
    "tpu.trace_stop"() : () -> ()
    %633 = vector.extract_strided_slice %611 {offsets = [0, 0, 8], sizes = [2, 16, 8], strides = [1, 1, 1]} : vector<2x16x32xbf16> to vector<2x16x8xbf16>
    %634 = vector.extract_strided_slice %613 {offsets = [0, 0, 8], sizes = [2, 16, 8], strides = [1, 1, 1]} : vector<2x16x32xbf16> to vector<2x16x8xbf16>
    "tpu.trace_start"() <{level = 10 : i32, message = "wqd,wkd->wqk"}> : () -> ()
    %cst_308 = arith.constant dense<0.000000e+00> : vector<2x16x16xf32>
    %635 = tpu.matmul %633, %634, %cst_308 {dimension_numbers = #tpu.dot_dimension_numbers<[2], [2], [1], [1], [0, 0, 0, 1, 1, 1], [0], [0]>} : vector<2x16x8xbf16>, vector<2x16x8xbf16>, vector<2x16x16xf32> -> vector<2x16x16xf32>
    "tpu.trace_stop"() : () -> ()
    %636 = arith.addf %635, %2 : vector<2x16x16xf32>
    %cst_309 = arith.constant dense<0xFF800000> : vector<2x16xf32>
    %637 = vector.multi_reduction <maximumf>, %636, %cst_309 [2] : vector<2x16x16xf32> to vector<2x16xf32>
    %638 = vector.shape_cast %637 : vector<2x16xf32> to vector<2x16x1xf32>
    %639 = vector.broadcast %638 : vector<2x16x1xf32> to vector<2x16x16xf32>
    %640 = arith.subf %636, %639 : vector<2x16x16xf32>
    %641 = math.exp %640 : vector<2x16x16xf32>
    %cst_310 = arith.constant dense<0.000000e+00> : vector<2x16xf32>
    %642 = vector.multi_reduction <add>, %641, %cst_310 [2] : vector<2x16x16xf32> to vector<2x16xf32>
    %643 = vector.shape_cast %642 : vector<2x16xf32> to vector<2x16x1xf32>
    %644 = tpu.reciprocal %643 {approx = true} : vector<2x16x1xf32> -> vector<2x16x1xf32>
    %645 = vector.broadcast %644 : vector<2x16x1xf32> to vector<2x16x16xf32>
    %646 = arith.mulf %641, %645 : vector<2x16x16xf32>
    %647 = arith.truncf %646 : vector<2x16x16xf32> to vector<2x16x16xbf16>
    %648 = vector.extract_strided_slice %615 {offsets = [0, 0, 8], sizes = [2, 16, 8], strides = [1, 1, 1]} : vector<2x16x32xbf16> to vector<2x16x8xbf16>
    "tpu.trace_start"() <{level = 10 : i32, message = "wqk,wkd->wqd"}> : () -> ()
    %cst_311 = arith.constant dense<0.000000e+00> : vector<2x16x8xf32>
    %649 = tpu.matmul %647, %648, %cst_311 {dimension_numbers = #tpu.dot_dimension_numbers<[2], [1], [1], [2], [0, 0, 0, 1, 1, 2], [0], [0]>} : vector<2x16x16xbf16>, vector<2x16x8xbf16>, vector<2x16x8xf32> -> vector<2x16x8xf32>
    "tpu.trace_stop"() : () -> ()
    %650 = vector.extract_strided_slice %611 {offsets = [0, 0, 16], sizes = [2, 16, 8], strides = [1, 1, 1]} : vector<2x16x32xbf16> to vector<2x16x8xbf16>
    %651 = vector.extract_strided_slice %613 {offsets = [0, 0, 16], sizes = [2, 16, 8], strides = [1, 1, 1]} : vector<2x16x32xbf16> to vector<2x16x8xbf16>
    "tpu.trace_start"() <{level = 10 : i32, message = "wqd,wkd->wqk"}> : () -> ()
    %cst_312 = arith.constant dense<0.000000e+00> : vector<2x16x16xf32>
    %652 = tpu.matmul %650, %651, %cst_312 {dimension_numbers = #tpu.dot_dimension_numbers<[2], [2], [1], [1], [0, 0, 0, 1, 1, 1], [0], [0]>} : vector<2x16x8xbf16>, vector<2x16x8xbf16>, vector<2x16x16xf32> -> vector<2x16x16xf32>
    "tpu.trace_stop"() : () -> ()
    %653 = arith.addf %652, %2 : vector<2x16x16xf32>
    %cst_313 = arith.constant dense<0xFF800000> : vector<2x16xf32>
    %654 = vector.multi_reduction <maximumf>, %653, %cst_313 [2] : vector<2x16x16xf32> to vector<2x16xf32>
    %655 = vector.shape_cast %654 : vector<2x16xf32> to vector<2x16x1xf32>
    %656 = vector.broadcast %655 : vector<2x16x1xf32> to vector<2x16x16xf32>
    %657 = arith.subf %653, %656 : vector<2x16x16xf32>
    %658 = math.exp %657 : vector<2x16x16xf32>
    %cst_314 = arith.constant dense<0.000000e+00> : vector<2x16xf32>
    %659 = vector.multi_reduction <add>, %658, %cst_314 [2] : vector<2x16x16xf32> to vector<2x16xf32>
    %660 = vector.shape_cast %659 : vector<2x16xf32> to vector<2x16x1xf32>
    %661 = tpu.reciprocal %660 {approx = true} : vector<2x16x1xf32> -> vector<2x16x1xf32>
    %662 = vector.broadcast %661 : vector<2x16x1xf32> to vector<2x16x16xf32>
    %663 = arith.mulf %658, %662 : vector<2x16x16xf32>
    %664 = arith.truncf %663 : vector<2x16x16xf32> to vector<2x16x16xbf16>
    %665 = vector.extract_strided_slice %615 {offsets = [0, 0, 16], sizes = [2, 16, 8], strides = [1, 1, 1]} : vector<2x16x32xbf16> to vector<2x16x8xbf16>
    "tpu.trace_start"() <{level = 10 : i32, message = "wqk,wkd->wqd"}> : () -> ()
    %cst_315 = arith.constant dense<0.000000e+00> : vector<2x16x8xf32>
    %666 = tpu.matmul %664, %665, %cst_315 {dimension_numbers = #tpu.dot_dimension_numbers<[2], [1], [1], [2], [0, 0, 0, 1, 1, 2], [0], [0]>} : vector<2x16x16xbf16>, vector<2x16x8xbf16>, vector<2x16x8xf32> -> vector<2x16x8xf32>
    "tpu.trace_stop"() : () -> ()
    %667 = vector.extract_strided_slice %611 {offsets = [0, 0, 24], sizes = [2, 16, 8], strides = [1, 1, 1]} : vector<2x16x32xbf16> to vector<2x16x8xbf16>
    %668 = vector.extract_strided_slice %613 {offsets = [0, 0, 24], sizes = [2, 16, 8], strides = [1, 1, 1]} : vector<2x16x32xbf16> to vector<2x16x8xbf16>
    "tpu.trace_start"() <{level = 10 : i32, message = "wqd,wkd->wqk"}> : () -> ()
    %cst_316 = arith.constant dense<0.000000e+00> : vector<2x16x16xf32>
    %669 = tpu.matmul %667, %668, %cst_316 {dimension_numbers = #tpu.dot_dimension_numbers<[2], [2], [1], [1], [0, 0, 0, 1, 1, 1], [0], [0]>} : vector<2x16x8xbf16>, vector<2x16x8xbf16>, vector<2x16x16xf32> -> vector<2x16x16xf32>
    "tpu.trace_stop"() : () -> ()
    %670 = arith.addf %669, %2 : vector<2x16x16xf32>
    %cst_317 = arith.constant dense<0xFF800000> : vector<2x16xf32>
    %671 = vector.multi_reduction <maximumf>, %670, %cst_317 [2] : vector<2x16x16xf32> to vector<2x16xf32>
    %672 = vector.shape_cast %671 : vector<2x16xf32> to vector<2x16x1xf32>
    %673 = vector.broadcast %672 : vector<2x16x1xf32> to vector<2x16x16xf32>
    %674 = arith.subf %670, %673 : vector<2x16x16xf32>
    %675 = math.exp %674 : vector<2x16x16xf32>
    %cst_318 = arith.constant dense<0.000000e+00> : vector<2x16xf32>
    %676 = vector.multi_reduction <add>, %675, %cst_318 [2] : vector<2x16x16xf32> to vector<2x16xf32>
    %677 = vector.shape_cast %676 : vector<2x16xf32> to vector<2x16x1xf32>
    %678 = tpu.reciprocal %677 {approx = true} : vector<2x16x1xf32> -> vector<2x16x1xf32>
    %679 = vector.broadcast %678 : vector<2x16x1xf32> to vector<2x16x16xf32>
    %680 = arith.mulf %675, %679 : vector<2x16x16xf32>
    %681 = arith.truncf %680 : vector<2x16x16xf32> to vector<2x16x16xbf16>
    %682 = vector.extract_strided_slice %615 {offsets = [0, 0, 24], sizes = [2, 16, 8], strides = [1, 1, 1]} : vector<2x16x32xbf16> to vector<2x16x8xbf16>
    "tpu.trace_start"() <{level = 10 : i32, message = "wqk,wkd->wqd"}> : () -> ()
    %cst_319 = arith.constant dense<0.000000e+00> : vector<2x16x8xf32>
    %683 = tpu.matmul %681, %682, %cst_319 {dimension_numbers = #tpu.dot_dimension_numbers<[2], [1], [1], [2], [0, 0, 0, 1, 1, 2], [0], [0]>} : vector<2x16x16xbf16>, vector<2x16x8xbf16>, vector<2x16x8xf32> -> vector<2x16x8xf32>
    "tpu.trace_stop"() : () -> ()
    %684 = tpu.concatenate %632, %649, %666, %683 in 2 : vector<2x16x8xf32>, vector<2x16x8xf32>, vector<2x16x8xf32>, vector<2x16x8xf32> -> vector<2x16x32xf32>
    %685 = vector.shape_cast %684 : vector<2x16x32xf32> to vector<32x32xf32>
    %686 = arith.truncf %685 : vector<32x32xf32> to vector<32x32xbf16>
    %cst_320 = arith.constant dense<0.000000e+00> : vector<32x32xf32>
    %687 = tpu.matmul %686, %551, %cst_320 {dimension_numbers = #tpu.dot_dimension_numbers<[1], [0], [0], [1], [0, 0, 1, 1], [], []>} : vector<32x32xbf16>, vector<32x32xbf16>, vector<32x32xf32> -> vector<32x32xf32>
    %688 = vector.broadcast %559 : vector<1x32xf32> to vector<32x32xf32>
    %689 = arith.addf %687, %688 : vector<32x32xf32>
    %690 = arith.addf %543, %689 : vector<32x32xf32>
    %cst_321 = arith.constant dense<0.000000e+00> : vector<32xf32>
    %691 = vector.multi_reduction <add>, %690, %cst_321 [1] : vector<32x32xf32> to vector<32xf32>
    %692 = vector.shape_cast %691 : vector<32xf32> to vector<32x1xf32>
    %cst_322 = arith.constant 3.200000e+01 : f32
    %693 = vector.broadcast %cst_322 : f32 to vector<32x1xf32>
    %694 = arith.divf %692, %693 : vector<32x1xf32>
    %695 = vector.broadcast %694 : vector<32x1xf32> to vector<32x32xf32>
    %696 = arith.subf %690, %695 : vector<32x32xf32>
    %697 = arith.mulf %696, %696 : vector<32x32xf32>
    %cst_323 = arith.constant dense<0.000000e+00> : vector<32xf32>
    %698 = vector.multi_reduction <add>, %697, %cst_323 [1] : vector<32x32xf32> to vector<32xf32>
    %699 = vector.shape_cast %698 : vector<32xf32> to vector<32x1xf32>
    %cst_324 = arith.constant 3.200000e+01 : f32
    %700 = vector.broadcast %cst_324 : f32 to vector<32x1xf32>
    %701 = arith.divf %699, %700 : vector<32x1xf32>
    %702 = vector.broadcast %694 : vector<32x1xf32> to vector<32x32xf32>
    %703 = arith.subf %690, %702 : vector<32x32xf32>
    %cst_325 = arith.constant 9.99999974E-6 : f32
    %704 = vector.broadcast %cst_325 : f32 to vector<32x1xf32>
    %705 = arith.addf %701, %704 : vector<32x1xf32>
    %706 = math.rsqrt %705 : vector<32x1xf32>
    %707 = vector.broadcast %706 : vector<32x1xf32> to vector<32x32xf32>
    %708 = arith.mulf %703, %707 : vector<32x32xf32>
    %709 = vector.broadcast %565 : vector<1x32xf32> to vector<32x32xf32>
    %710 = arith.mulf %708, %709 : vector<32x32xf32>
    %711 = vector.broadcast %567 : vector<1x32xf32> to vector<32x32xf32>
    %712 = arith.addf %710, %711 : vector<32x32xf32>
    %713 = arith.truncf %712 : vector<32x32xf32> to vector<32x32xbf16>
    %cst_326 = arith.constant dense<0.000000e+00> : vector<32x64xf32>
    %714 = tpu.matmul %713, %569, %cst_326 {dimension_numbers = #tpu.dot_dimension_numbers<[1], [0], [0], [1], [0, 0, 1, 1], [], []>} : vector<32x32xbf16>, vector<32x64xbf16>, vector<32x64xf32> -> vector<32x64xf32>
    %715 = vector.broadcast %571 : vector<1x64xf32> to vector<32x64xf32>
    %716 = arith.addf %714, %715 : vector<32x64xf32>
    %cst_327 = arith.constant 0.000000e+00 : f32
    %717 = vector.broadcast %cst_327 : f32 to vector<32x64xf32>
    %718 = arith.maximumf %716, %717 : vector<32x64xf32>
    %719 = arith.truncf %718 : vector<32x64xf32> to vector<32x64xbf16>
    %cst_328 = arith.constant dense<0.000000e+00> : vector<32x32xf32>
    %720 = tpu.matmul %719, %573, %cst_328 {dimension_numbers = #tpu.dot_dimension_numbers<[1], [0], [0], [1], [0, 0, 1, 1], [], []>} : vector<32x64xbf16>, vector<64x32xbf16>, vector<32x32xf32> -> vector<32x32xf32>
    %721 = vector.broadcast %575 : vector<1x32xf32> to vector<32x32xf32>
    %722 = arith.addf %720, %721 : vector<32x32xf32>
    %723 = arith.addf %690, %722 : vector<32x32xf32>
    %724 = vector.extract_strided_slice %723 {offsets = [24, 0], sizes = [8, 32], strides = [1, 1]} : vector<32x32xf32> to vector<8x32xf32>
    %725 = vector.extract_strided_slice %723 {offsets = [0, 0], sizes = [24, 32], strides = [1, 1]} : vector<32x32xf32> to vector<24x32xf32>
    %726 = tpu.concatenate %724, %725 in 0 : vector<8x32xf32>, vector<24x32xf32> -> vector<32x32xf32>
    %c0_329 = arith.constant 0 : index
    %c0_330 = arith.constant 0 : index
    %c0_331 = arith.constant 0 : index
    %727 = vector.load %arg19[%c0_329, %c0_330, %c0_331] : memref<1x32x32xf32, #tpu.memory_space<vmem>>, vector<1x32x32xf32>
    %728 = vector.shape_cast %727 : vector<1x32x32xf32> to vector<32x32xf32>
    %729 = vector.shape_cast %726 : vector<32x32xf32> to vector<1x32x32xf32>
    tpu.vector_store %arg19[%c0_329, %c0_330, %c0_331], %729 {strides = array<i32>} : memref<1x32x32xf32, #tpu.memory_space<vmem>>, vector<1x32x32xf32>,
    return
  }
  func.func @transform_0(%arg0: i32) -> (i32, i32, i32) {
    %c0_i32 = arith.constant 0 : i32
    %c0_i32_0 = arith.constant 0 : i32
    %c0_i32_1 = arith.constant 0 : i32
    %c0_i32_2 = arith.constant 0 : i32
    return %c0_i32, %c0_i32_0, %c0_i32_1 : i32, i32, i32
  }
  func.func @transform_1(%arg0: i32) -> (i32, i32, i32) {
    %c0_i32 = arith.constant 0 : i32
    %c0_i32_0 = arith.constant 0 : i32
    %c0_i32_1 = arith.constant 0 : i32
    return %arg0, %c0_i32, %c0_i32_0 : i32, i32, i32
  }
  func.func @transform_2(%arg0: i32) -> (i32, i32, i32) {
    %c0_i32 = arith.constant 0 : i32
    %c0_i32_0 = arith.constant 0 : i32
    %c0_i32_1 = arith.constant 0 : i32
    %c0_i32_2 = arith.constant 0 : i32
    return %c0_i32, %c0_i32_0, %c0_i32_1 : i32, i32, i32
  }
  func.func @transform_3(%arg0: i32) -> (i32, i32, i32) {
    %c0_i32 = arith.constant 0 : i32
    %c0_i32_0 = arith.constant 0 : i32
    %c0_i32_1 = arith.constant 0 : i32
    %c0_i32_2 = arith.constant 0 : i32
    return %c0_i32, %c0_i32_0, %c0_i32_1 : i32, i32, i32
  }
  func.func @transform_4(%arg0: i32) -> (i32, i32, i32) {
    %c0_i32 = arith.constant 0 : i32
    %c0_i32_0 = arith.constant 0 : i32
    %c0_i32_1 = arith.constant 0 : i32
    %c0_i32_2 = arith.constant 0 : i32
    return %c0_i32, %c0_i32_0, %c0_i32_1 : i32, i32, i32
  }
  func.func @transform_5(%arg0: i32) -> (i32, i32, i32) {
    %c0_i32 = arith.constant 0 : i32
    %c0_i32_0 = arith.constant 0 : i32
    %c0_i32_1 = arith.constant 0 : i32
    %c0_i32_2 = arith.constant 0 : i32
    return %c0_i32, %c0_i32_0, %c0_i32_1 : i32, i32, i32
  }
  func.func @transform_6(%arg0: i32) -> (i32, i32, i32) {
    %c0_i32 = arith.constant 0 : i32
    %c0_i32_0 = arith.constant 0 : i32
    %c0_i32_1 = arith.constant 0 : i32
    %c0_i32_2 = arith.constant 0 : i32
    return %c0_i32, %c0_i32_0, %c0_i32_1 : i32, i32, i32
  }
  func.func @transform_7(%arg0: i32) -> (i32, i32, i32) {
    %c0_i32 = arith.constant 0 : i32
    %c0_i32_0 = arith.constant 0 : i32
    %c0_i32_1 = arith.constant 0 : i32
    %c0_i32_2 = arith.constant 0 : i32
    return %c0_i32, %c0_i32_0, %c0_i32_1 : i32, i32, i32
  }
  func.func @transform_8(%arg0: i32) -> (i32, i32, i32) {
    %c0_i32 = arith.constant 0 : i32
    %c0_i32_0 = arith.constant 0 : i32
    %c0_i32_1 = arith.constant 0 : i32
    %c0_i32_2 = arith.constant 0 : i32
    return %c0_i32, %c0_i32_0, %c0_i32_1 : i32, i32, i32
  }
  func.func @transform_9(%arg0: i32) -> (i32, i32, i32) {
    %c0_i32 = arith.constant 0 : i32
    %c0_i32_0 = arith.constant 0 : i32
    %c0_i32_1 = arith.constant 0 : i32
    %c0_i32_2 = arith.constant 0 : i32
    return %c0_i32, %c0_i32_0, %c0_i32_1 : i32, i32, i32
  }
  func.func @transform_10(%arg0: i32) -> (i32, i32, i32) {
    %c0_i32 = arith.constant 0 : i32
    %c0_i32_0 = arith.constant 0 : i32
    %c0_i32_1 = arith.constant 0 : i32
    %c0_i32_2 = arith.constant 0 : i32
    return %c0_i32, %c0_i32_0, %c0_i32_1 : i32, i32, i32
  }
  func.func @transform_11(%arg0: i32) -> (i32, i32, i32) {
    %c0_i32 = arith.constant 0 : i32
    %c0_i32_0 = arith.constant 0 : i32
    %c0_i32_1 = arith.constant 0 : i32
    %c0_i32_2 = arith.constant 0 : i32
    return %c0_i32, %c0_i32_0, %c0_i32_1 : i32, i32, i32
  }
  func.func @transform_12(%arg0: i32) -> (i32, i32, i32) {
    %c0_i32 = arith.constant 0 : i32
    %c0_i32_0 = arith.constant 0 : i32
    %c0_i32_1 = arith.constant 0 : i32
    %c0_i32_2 = arith.constant 0 : i32
    return %c0_i32, %c0_i32_0, %c0_i32_1 : i32, i32, i32
  }
  func.func @transform_13(%arg0: i32) -> (i32, i32, i32) {
    %c0_i32 = arith.constant 0 : i32
    %c0_i32_0 = arith.constant 0 : i32
    %c0_i32_1 = arith.constant 0 : i32
    %c0_i32_2 = arith.constant 0 : i32
    return %c0_i32, %c0_i32_0, %c0_i32_1 : i32, i32, i32
  }
  func.func @transform_14(%arg0: i32) -> (i32, i32, i32) {
    %c0_i32 = arith.constant 0 : i32
    %c0_i32_0 = arith.constant 0 : i32
    %c0_i32_1 = arith.constant 0 : i32
    %c0_i32_2 = arith.constant 0 : i32
    return %c0_i32, %c0_i32_0, %c0_i32_1 : i32, i32, i32
  }
  func.func @transform_15(%arg0: i32) -> (i32, i32, i32) {
    %c0_i32 = arith.constant 0 : i32
    %c0_i32_0 = arith.constant 0 : i32
    %c0_i32_1 = arith.constant 0 : i32
    %c0_i32_2 = arith.constant 0 : i32
    return %c0_i32, %c0_i32_0, %c0_i32_1 : i32, i32, i32
  }
  func.func @transform_16(%arg0: i32) -> (i32, i32, i32) {
    %c0_i32 = arith.constant 0 : i32
    %c0_i32_0 = arith.constant 0 : i32
    %c0_i32_1 = arith.constant 0 : i32
    %c0_i32_2 = arith.constant 0 : i32
    return %c0_i32, %c0_i32_0, %c0_i32_1 : i32, i32, i32
  }
  func.func @transform_17(%arg0: i32) -> (i32, i32, i32) {
    %c0_i32 = arith.constant 0 : i32
    %c0_i32_0 = arith.constant 0 : i32
    %c0_i32_1 = arith.constant 0 : i32
    %c0_i32_2 = arith.constant 0 : i32
    return %c0_i32, %c0_i32_0, %c0_i32_1 : i32, i32, i32
  }
  func.func @transform_18(%arg0: i32) -> (i32, i32, i32) {
    %c0_i32 = arith.constant 0 : i32
    %c0_i32_0 = arith.constant 0 : i32
    %c0_i32_1 = arith.constant 0 : i32
    return %arg0, %c0_i32, %c0_i32_0 : i32, i32, i32
  }
}

</mosaic_0001>

<bundles_post_ra>
// kernel: tpu_custom_call.1
= control target key start
LH: loop header
LB: loop body
LE: loop exit
PB: predicated region body
PF: predicated region fallthrough
CT: control target
= control target key end

     0   :  { %s11119_s0 = inlined_call_operand.hbm [shape: f32[2,16,16], index: 0, kind: input, shape index: {}]   ;;  %s11120_s1 = inlined_call_operand.vmem [shape: f32[2,32,32], index: 1, kind: input, shape index: {}]   ;;  %s11121_s2 = inlined_call_operand.vmem [shape: bf16[4,32,32], index: 2, kind: input, shape index: {}]   ;;  %s11122_s3 = inlined_call_operand.vmem [shape: f32[4,1,32], index: 3, kind: input, shape index: {}]   ;;  %s11123_s4 = inlined_call_operand.vmem [shape: bf16[4,32,32], index: 4, kind: input, shape index: {}]   ;;  %s11124_s5 = inlined_call_operand.vmem [shape: f32[4,1,32], index: 5, kind: input, shape index: {}]   ;;  %s11125_s6 = inlined_call_operand.hbm [shape: bf16[4,32,32], index: 6, kind: input, shape index: {}]   ;;  %s11126_s7 = inlined_call_operand.vmem [shape: f32[4,1,32], index: 7, kind: input, shape index: {}]   ;;  %s11127_s8 = inlined_call_operand.hbm [shape: bf16[4,32,32], index: 8, kind: input, shape index: {}]   ;;  %s11128_s9 = inlined_call_operand.vmem [shape: f32[4,1,32], index: 9, kind: input, shape index: {}]   ;;  %s11129_s10 = inlined_call_operand.vmem [shape: f32[4,1,32], index: 10, kind: input, shape index: {}]   ;;  %s11130_s11 = inlined_call_operand.vmem [shape: f32[4,1,32], index: 11, kind: input, shape index: {}]   ;;  %s11131_s12 = inlined_call_operand.vmem [shape: f32[4,1,32], index: 12, kind: input, shape index: {}]   ;;  %s11132_s13 = inlined_call_operand.vmem [shape: f32[4,1,32], index: 13, kind: input, shape index: {}]   ;;  %s11133_s14 = inlined_call_operand.hbm [shape: bf16[4,32,64], index: 14, kind: input, shape index: {}]   ;;  %s11134_s15 = inlined_call_operand.vmem [shape: f32[4,1,64], index: 15, kind: input, shape index: {}]   ;;  %s11135_s16 = inlined_call_operand.vmem [shape: bf16[4,64,32], index: 16, kind: input, shape index: {}]   ;;  %s11136_s17 = inlined_call_operand.vmem [shape: f32[4,1,32], index: 17, kind: input, shape index: {}]   ;;  %s11137_s18 = inlined_call_operand.hbm [shape: f32[2,32,32], index: 18, kind: output, shape index: {}]  }
   0x1   :  { %11159 = sst [smem:[#allocation23_spill]] %s11119_s0 }
   0x2   :  { %11160 = sst [smem:[#allocation24_spill]] %s11120_s1 }
   0x3   :  { %11161 = sst [smem:[#allocation25_spill]] %s11121_s2 }
   0x4   :  { %11162 = sst [smem:[#allocation26_spill]] %s11125_s6 }
   0x5   :  { %11163 = sst [smem:[#allocation27_spill]] %s11134_s15 }
   0x6   :  { %11164 = sst [smem:[#allocation28_spill]] %s11136_s17 }
   0x7   :  { %11165 = sst [smem:[#allocation29_spill]] %s11137_s18 }
   0x8   :  { %23 = vsyncpa [#allocation3], 0 }
   0x9   :  { %24 = vsyncpa [#allocation6], 0 }
   0xa   :  { %25 = vsyncpa [#allocation9], 0 }
   0xb   :  { %26 = vsyncpa [#allocation4], 0 }
   0xc   :  { %28 = vsyncpa [#allocation4 + $0x1], 0  ;;  %s9527_s27 = smov 0   ;;  %s9529_s28 = smov 0  }
   0xd   :  { %s9531_s29 = smov 0   ;;  %s9533_s30 = smov 0  }
   0xe LB: > { %11166 = sst [smem:[#allocation15_spill]] %s9400_s27  ;;  %s9548_s0 = sadd.s32 4294967295, %s9412_s30   ;;  %s9412_s30 = sphi %s9533_s30, %s11204_s30   ;;  %s9408_s29 = sphi %s9531_s29, %s11207_s29   ;;  %s9404_s28 = sphi %s9529_s28, %s11206_s28   ;;  %s9400_s27 = sphi %s9527_s27, %s11205_s27  }
   0xf   : > { %11167 = sst [smem:[#allocation16_spill]] %s9404_s28  ;;  %s7497_s19 = sadd.s32 4294967294, %s9412_s30  }
  0x10   : > { %11168 = sst [smem:[#allocation17_spill]] %s9408_s29  ;;  %s9552_s1 = sadd.s32 1, %s9412_s30  }
  0x11   : > { %11169 = sst [smem:[#allocation18_spill]] %s9412_s30  ;;  %s424_s20 = sadd.s32 1, %s9408_s29 }
  0x12   : > { %11170 = sst [smem:[#allocation19_spill]] %s9552_s1  ;;  %s421_s21 = ssub.s32 %s9412_s30, %s9552_s1 }
  0x13   : > { %p434_p0 = scmp.ne.s32.totalorder %s9408_s29, %s9404_s28  ;;  %p422_p1 = scmp.eq.s32.totalorder %s421_s21, 0 }
  0x14   : > { %p435_p2 = scmp.eq.s32.totalorder %s9548_s0, 1  ;;  %p440_p3 = scmp.ne.s32.totalorder %s9404_s28, %s9400_s27 }
  0x15   : > { %p441_p4 = scmp.eq.s32.totalorder %s7497_s19, 1  ;;  %p7498_p7 = scmp.ge.s32.totalorder %s9412_s30, 1 }
  0x16   : > { %s9563_s22 = scalar_select %p422_p1, %s9408_s29, %s424_s20  }
  0x17   : > { %p9565_p5 = por %p435_p2, %p434_p0  ;;  %p9569_p6 = por %p441_p4, %p440_p3 }
  0x18   : > { %11171 = sst [smem:[#allocation20_spill]] %s9563_s22  ;;  %p448_p8 = scmp.lt.s32.totalorder %s9412_s30, 3 }
  0x19   : > { %s11172_s2 = scalar_select %p9565_p5, 1, 0 }
  0x1a   : > { %s11174_s23 = scalar_select %p9569_p6, 1, 0 }
  0x1b   : > { %11173 = sst [smem:[#allocation21_spill]] %s11172_s2  ;;  %p11146_p9 = scmp.eq.s32.totalorder %s9548_s0, 0 }
  0x1c   : > { %11175 = sst [smem:[#allocation22_spill]] %s11174_s23  ;;  %p9576_p10 = pnand %p7498_p7, %p448_p8 }
  0x1d   : > { %s9414_s25 = smov [#allocation5]   ;;  %s9415_s20 = smov [#allocation2]  }
  0x1e   : > { %s11176_s24 = scalar_select %p9576_p10, 1, 0 }
  0x1f   : > { %s485_s26 = sshll.u32 %s9414_s25, 4  ;;  %p8647_p11 = pneg %p9576_p10  ;;  %s486_s26 = int_to_ptr.vmem [resolvable:$true] %s485_s26 }
  0x20   : > { %s460_s21 = sshll.u32 %s9415_s20, 4  ;;  %s11178_s6 = sld [smem:[#allocation26_spill]]  ;;  %s9588_s21 = int_to_ptr.vmem [resolvable:$true] %s460_s21 }
  0x21   : > { %p9584_p12 = pnand %p11146_p9, %p8647_p11 }
  0x23   : > { %p9598_p0 = pneg %p9584_p12 }
  0x26   : > { %s9226_s1 = scalar_lea.hbm %s11178_s6, 1024 }
  0x27   : > { %p9227_p13 = scmp.ne.s32.totalorder %s11178_s6, %s9226_s1  ;;  %p9233_p3 = scmp.lt.u32.totalorder %s9226_s1, %s11178_s6 }
  0x29   : > { %p9229_p1 = pnand %p9598_p0, %p9227_p13 }
  0x2b   : > { %p9230_p2 = pneg %p9229_p1 }
  0x2d   : > { %p9235_p4 = pnand %p9233_p3, %p9230_p2 }
  0x2f   : > { %9238 = shalt.err (!%p9235_p4)
}
  0x30   : > { %s9239_s29 = scalar_lea.vmem %s486_s26, 1024  ;;  %p9247_p9 = scmp.lt.s32.totalorder %s486_s26, %s486_s26 }
  0x31   : > { %p9240_p7 = scmp.ne.s32.totalorder %s486_s26, %s9239_s29  ;;  %p9248_p6 = scmp.lt.s32.totalorder %s9239_s29, %s9239_s29 }
  0x33   : > { %p9242_p8 = pnand %p9240_p7, %p9598_p0  ;;  %p9249_p5 = por %p9248_p6, %p9247_p9 }
  0x35   : > { %p9243_p11 = pneg %p9242_p8 }
  0x37   : > { %p9250_p10 = pnand %p9249_p5, %p9243_p11 }
  0x39   : > { %9253 = shalt.err (!%p9250_p10)
}
  0x3a   : > { %s11155_s27 = smov 64   ;;  %s11157_s22 = smov 4  }
  0x3b   : > { %8653 = dma.hbm_to_vmem [thread:$0]  (!%p9584_p12), %s11178_s6, 1024, %s486_s26, [#allocation6], %s11155_s27, %s11155_s27, %s11157_s22  }
  0x3c   : > { %s11180_s18 = sld [smem:[#allocation23_spill]] }
  0x42   : > { %s9254_s2 = scalar_lea.hbm %s11180_s18, 512 }
  0x43   : > { %p9255_p5 = scmp.ne.s32.totalorder %s11180_s18, %s9254_s2  ;;  %p9261_p10 = scmp.lt.u32.totalorder %s9254_s2, %s11180_s18 }
  0x45   : > { %p9257_p6 = pnand %p9255_p5, %p9598_p0 }
  0x47   : > { %p9258_p9 = pneg %p9257_p6 }
  0x49   : > { %p9263_p13 = pnand %p9261_p10, %p9258_p9 }
  0x4b   : > { %9266 = shalt.err (!%p9263_p13)
}
  0x4c   : > { %s9267_s26 = scalar_lea.vmem %s9588_s21, 512  ;;  %p9275_p4 = scmp.lt.s32.totalorder %s9588_s21, %s9588_s21 }
  0x4d   : > { %p9268_p1 = scmp.ne.s32.totalorder %s9588_s21, %s9267_s26  ;;  %p9276_p7 = scmp.lt.s32.totalorder %s9267_s26, %s9267_s26 }
  0x4f   : > { %p9270_p2 = pnand %p9268_p1, %p9598_p0  ;;  %p9277_p8 = por %p9276_p7, %p9275_p4 }
  0x51   : > { %p9271_p3 = pneg %p9270_p2 }
  0x53   : > { %p9278_p11 = pnand %p9277_p8, %p9271_p3 }
  0x55   : > { %9281 = shalt.err (!%p9278_p11)
}
  0x56   : > { %s9418_s28 = smov 128   ;;  %s9419_s15 = smov 8  }
  0x57   : > { %8650 = dma.hbm_to_vmem [thread:$0]  (!%p9584_p12), %s11180_s18, 512, %s9588_s21, [#allocation3], %s9418_s28, %s9418_s28, %s9419_s15  }
  0x58   : > { %s9420_s30 = smov [#allocation7]   ;;  %s9421_s23 = smov [#allocation8]  }
  0x59   : > { %s501_s1 = sshll.u32 %s9420_s30, 4  ;;  %s529_s20 = sshll.u32 %s9421_s23, 4  ;;  %s502_s1 = int_to_ptr.vmem [resolvable:$true] %s501_s1  ;;  %s9640_s20 = int_to_ptr.vmem [resolvable:$true] %s529_s20 }
  0x5a   : > { %s9282_s27 = scalar_lea.hbm %s11127_s8, 1024 }
  0x5b   : > { %p9283_p5 = scmp.ne.s32.totalorder %s11127_s8, %s9282_s27  ;;  %p9289_p10 = scmp.lt.u32.totalorder %s9282_s27, %s11127_s8 }
  0x5d   : > { %p9285_p6 = pnand %p9283_p5, %p9598_p0 }
  0x5f   : > { %p9286_p9 = pneg %p9285_p6 }
  0x61   : > { %p9291_p13 = pnand %p9289_p10, %p9286_p9 }
  0x63   : > { %9294 = shalt.err (!%p9291_p13)
}
  0x64   : > { %s9295_s28 = scalar_lea.vmem %s502_s1, 1024  ;;  %p9303_p4 = scmp.lt.s32.totalorder %s502_s1, %s502_s1 }
  0x65   : > { %p9296_p1 = scmp.ne.s32.totalorder %s502_s1, %s9295_s28  ;;  %p9304_p7 = scmp.lt.s32.totalorder %s9295_s28, %s9295_s28 }
  0x67   : > { %p9298_p2 = pnand %p9296_p1, %p9598_p0  ;;  %p9305_p8 = por %p9304_p7, %p9303_p4 }
  0x69   : > { %p9299_p3 = pneg %p9298_p2 }
  0x6b   : > { %p9306_p11 = pnand %p9305_p8, %p9299_p3 }
  0x6d   : > { %9309 = shalt.err (!%p9306_p11)
}
  0x6e   : > { %s11181_s6 = smov 4   ;;  %s11182_s22 = smov 64  }
  0x6f   : > { %8656 = dma.hbm_to_vmem [thread:$0]  (!%p9584_p12), %s11127_s8, 1024, %s502_s1, [#allocation6], %s11182_s22, %s11182_s22, %s11181_s6  }
  0x70   : > { %s9310_s23 = scalar_lea.hbm %s11133_s14, 1024 }
  0x71   : > { %p9311_p5 = scmp.ne.s32.totalorder %s11133_s14, %s9310_s23  ;;  %p9317_p10 = scmp.lt.u32.totalorder %s9310_s23, %s11133_s14 }
  0x73   : > { %p9313_p6 = pnand %p9311_p5, %p9598_p0 }
  0x75   : > { %p9314_p9 = pneg %p9313_p6 }
  0x77   : > { %p9319_p13 = pnand %p9317_p10, %p9314_p9 }
  0x79   : > { %9322 = shalt.err (!%p9319_p13)
}
  0x7a   : > { %s9323_s1 = scalar_lea.vmem %s9640_s20, 1024  ;;  %p9331_p4 = scmp.lt.s32.totalorder %s9640_s20, %s9640_s20 }
  0x7b   : > { %p9324_p1 = scmp.ne.s32.totalorder %s9640_s20, %s9323_s1  ;;  %p9332_p7 = scmp.lt.s32.totalorder %s9323_s1, %s9323_s1 }
  0x7d   : > { %p9326_p2 = pnand %p9324_p1, %p9598_p0  ;;  %p9333_p8 = por %p9332_p7, %p9331_p4 }
  0x7f   : > { %p9327_p3 = pneg %p9326_p2 }
  0x81   : > { %p9334_p11 = pnand %p9333_p8, %p9327_p3 }
  0x83   : > { %9337 = shalt.err (!%p9334_p11)
}
  0x84   : > { %8659 = dma.hbm_to_vmem [thread:$0]  (!%p9584_p12), %s11133_s14, 1024, %s9640_s20, [#allocation9], %s11182_s22, %s11182_s22, %s11181_s6  }
  0x85   : > { %p11183_p5 = scmp.ne.s32.totalorder %s11176_s24, 0 }
  0x86   : > { %p11184_p0 = scmp.eq.s32.totalorder (!%p11183_p5), %s9548_s0, 0 }
  0x87   : > { %562 = sbr.rel (%p11183_p5) target bundleno = 16407 (0x4017), region = 92 }
  0x8e   : > { %9383 = dma.done.wait (%p11184_p0), [#allocation3], 512   ;;  %p11185_p6 = pmov %p11184_p0 }
  0x8f   : > { %p11186_p9 = pmov %p11184_p0 }
  0x90   : > { %9385 = vsyncadd (%p11185_p6), [#allocation3], 4294966784 }
  0x91   : > { %9387 = dma.done.wait (%p11186_p9), [#allocation6], 2048   ;;  %p11187_p10 = pmov %p11184_p0 }
  0x92   : > { %p11188_p13 = pmov %p11184_p0 }
  0x93   : > { %9389 = vsyncadd (%p11187_p10), [#allocation6], 4294965248 }
  0x94   : > { %9391 = dma.done.wait (%p11188_p13), [#allocation9], 1024   ;;  %p11189_p12 = pmov %p11184_p0 }
  0x95   : > { %p628_p1 = scmp.lt.s32.totalorder %s9548_s0, 1  ;;  %s11190_s6 = sld [smem:[#allocation24_spill]]  ;;  %vm680_vm0 = vcmask 261120   ;;  %v8843_v29 = vld [vmem:[#allocation5] sm:$0xff]   ;;  %v8845_v31 = vld [vmem:[#allocation5 + $0x8] sm:$0xff]   ;;  %vm9423_vm1 = vmmov 0  }
  0x96   : > { %9393 = vsyncadd (%p11189_p12), [#allocation9], 4294966272  ;;  %s11191_s30 = sld [smem:[#allocation25_spill]]  ;;  %8053 = vmatprep.subr.bf16.mxu0 %v8843_v29  ;;  %v8846_v32 = vld [vmem:[%s11123_s4] sm:$0xff]   ;;  %vm973_vm2 = vcmask 64512   ;;  %vm1068_vm3 = vcmask 130048  }
  0x97   : > { %s629_s24 = scalar_select %p628_p1, %s9548_s0, 1  ;;  %8054 = vmatpush3.bf16.msra.mxu0 %v8843_v29  ;;  %v7512_v47 = vld [vmem:[%s11129_s10] ss:$0 sm:$0xff]  ;;  %vm1991_vm4 = vcmask 195584   ;;  %vm2258_vm5 = vcmask 523264  }
  0x98   : > { %8055 = vmatprep.subr.bf16.mxu0 %v8845_v31  ;;  %v7513_v52 = vld [vmem:[%s11130_s11] ss:$0 sm:$0xff]  ;;  %s9424_s26 = smov 120   ;;  %s9425_s17 = smov 112  }
  0x99   : > { %s7803_s19 = sshll.u32 %s629_s24, 5  ;;  %s9426_s21 = smov 104  }
  0x9a   : > { %s9427_s1 = smov 8   ;;  %s9428_s28 = smov 16  }
  0x9b   : > { %s9708_s22 = scalar_lea.vmem %s11190_s6, %s7803_s19  ;;  %8056 = vmatpush3.bf16.msra.mxu0 %v8845_v31  ;;  %s9429_s15 = smov 24  }
  0x9c   : > { %v634_v0 = vld [vmem:[%s9708_s22] sm:$0xff]  ;;  %v636_v1 = vld [vmem:[%s9708_s22 + $0x10] sm:$0xff]  ;;  %v635_v2 = vld [vmem:[%s9708_s22 + $0x8] sm:$0xff]  ;;  %s11192_s23 = smov %s11191_s30  ;;  %s11193_s27 = sld [smem:[#allocation27_spill]] }
  0x9d   : > { %v681_v3 = vsel %vm680_vm0, %v634_v0, 0.0  ;;  %v687_v4 = vsel %vm680_vm0, %v636_v1, 0.0  ;;  %v637_v5 = vld [vmem:[%s9708_s22 + $0x18] sm:$0xff]  ;;  %v684_v6 = vsel %vm680_vm0, %v635_v2, 0.0  ;;  %v8842_v28 = vld [vmem:[%s11191_s30] sm:$0xff]   ;;  %v8844_v30 = vld [vmem:[%s11192_s23 + $0x8] sm:$0xff]  }
  0x9e   : > { %682 = vadd.xlane.f32.xlu0 %v681_v3  ;;  %688 = vadd.xlane.f32.xlu1 %v687_v4  ;;  %v690_v7 = vsel %vm680_vm0, %v637_v5, 0.0  ;;  %v7514_v3 = vld [vmem:[%s11122_s3] ss:$0 sm:$0xff]  ;;  %s11195_s24 = sld [smem:[#allocation28_spill]]  ;;  %s7804_s19 = sshll.u32 %s9548_s0, 9 }
  0x9f   : > { %8037 = vmatprep.subr.bf16.mxu1 %v8842_v28  ;;  %s11197_s29 = sld [smem:[#allocation21_spill]] }
  0xa0   : > { %8038 = vmatpush3.bf16.msra.mxu1 %v8842_v28 }
  0xa1   : > { %8039 = vmatprep.subr.bf16.mxu1 %v8844_v30 }
  0xa2   : > { %685 = vadd.xlane.f32.xlu0 %v684_v6  ;;  %691 = vadd.xlane.f32.xlu1 %v690_v7  ;;  %v7524_v6 = vld [vmem:[%s11126_s7] ss:$0 sm:$0xff]  ;;  %s11194_s2 = smov %s11193_s27 }
  0xa4   : > { %8040 = vmatpush3.bf16.msra.mxu1 %v8844_v30  ;;  %v7519_v30 = vld [vmem:[%s11124_s5] ss:$0 sm:$0xff] }
  0xa5   : > { %8045 = vmatprep.subr.bf16.mxu1 %v8846_v32  ;;  %p11199_p3 = scmp.ne.s32.totalorder %s11197_s29, 0 }
 0x12b   : > { %v683_v8 = vpop.xlane.xlu0 %682  ;;  %v689_v9 = vpop.xlane.xlu1 %688 }
 0x12c   : > { %v694_v10 = vmul.f32 0.03125, %v683_v8  ;;  %v696_v11 = vmul.f32 0.03125, %v689_v9 }
 0x12e   : > { %v698_v12 = vsub.f32 %v634_v0, %v694_v10  ;;  %v700_v13 = vsub.f32 %v636_v1, %v696_v11  ;;  %v8847_v1 = vld [vmem:[%s11123_s4 + $0x8] sm:$0xff]  }
 0x12f   : > { %v686_v14 = vpop.xlane.xlu0 %685  ;;  %v692_v15 = vpop.xlane.xlu1 %691 }
 0x130   : > { %v695_v16 = vmul.f32 0.03125, %v686_v14  ;;  %v697_v17 = vmul.f32 0.03125, %v692_v15  ;;  %v702_v18 = vmul.f32 %v698_v12, %v698_v12  ;;  %v704_v19 = vmul.f32 %v700_v13, %v700_v13 }
 0x132   : > { %v699_v20 = vsub.f32 %v635_v2, %v695_v16  ;;  %v701_v21 = vsub.f32 %v637_v5, %v697_v17  ;;  %v706_v22 = vsel %vm680_vm0, %v702_v18, 0.0  ;;  %v712_v23 = vsel %vm680_vm0, %v704_v19, 0.0 }
 0x133   : > { %707 = vadd.xlane.f32.xlu0 %v706_v22  ;;  %v9422_v2 = vmov 0.0  }
 0x134   : > { %v703_v24 = vmul.f32 %v699_v20, %v699_v20  ;;  %v705_v25 = vmul.f32 %v701_v21, %v701_v21  ;;  %8067 = vmatprep.subr.bf16.mxu0 %v9422_v2 }
 0x136   : > { %v709_v26 = vsel %vm680_vm0, %v703_v24, 0.0  ;;  %v715_v27 = vsel %vm680_vm0, %v705_v25, 0.0 }
 0x137   : > { %713 = vadd.xlane.f32.xlu0 %v712_v23  ;;  %710 = vadd.xlane.f32.xlu1 %v709_v26 }
 0x13b   : > { %716 = vadd.xlane.f32.xlu1 %v715_v27 }
 0x1c0   : > { %v708_v33 = vpop.xlane.xlu0 %707 }
 0x1c1   : > { %v718_v34 = vmul.f32 0.03125, %v708_v33 }
 0x1c3   : > { %v722_v35 = vadd.f32 1e-05, %v718_v34 }
 0x1c4   : > { %v711_v36 = vpop.xlane.xlu1 %710  ;;  %v714_v37 = vpop.xlane.xlu0 %713 }
 0x1c5   : > { %8898 = vrsqrt.f32 %v722_v35  ;;  %v719_v38 = vmul.f32 0.03125, %v711_v36  ;;  %v720_v39 = vmul.f32 0.03125, %v714_v37 }
 0x1c7   : > { %v723_v40 = vadd.f32 1e-05, %v719_v38  ;;  %v724_v41 = vadd.f32 1e-05, %v720_v39 }
 0x1c8   : > { %v717_v42 = vpop.xlane.xlu1 %716 }
 0x1c9   : > { %8900 = vrsqrt.f32 %v723_v40  ;;  %v721_v43 = vmul.f32 0.03125, %v717_v42 }
 0x1ca   : > { %8902 = vrsqrt.f32 %v724_v41 }
 0x1cb   : > { %v725_v44 = vadd.f32 1e-05, %v721_v43 }
 0x1cd   : > { %8904 = vrsqrt.f32 %v725_v44 }
 0x1cf   : > { %v8899_v45 = vpop.eup %8898 }
 0x1d0   : > { %v730_v46 = vmul.f32 %v8899_v45, %v698_v12 }
 0x1d2   : > { %v740_v51 = vmul.f32 %v7512_v47, %v730_v46 }
 0x1d3   : > { %v8901_v48 = vpop.eup %8900 }
 0x1d4   : > { %v8903_v49 = vpop.eup %8902  ;;  %v731_v50 = vmul.f32 %v8901_v48, %v699_v20  ;;  %v750_v56 = vadd.f32 %v7513_v52, %v740_v51 }
 0x1d5   : > { %v732_v53 = vmul.f32 %v8903_v49, %v700_v13 }
 0x1d6   : > { %v741_v54 = vmul.f32 %v7512_v47, %v731_v50 }
 0x1d7   : > { %v8905_v55 = vpop.eup %8904  ;;  %v742_v59 = vmul.f32 %v7512_v47, %v732_v53 }
 0x1d8   : > { %v751_v57 = vadd.f32 %v7513_v52, %v741_v54  ;;  %v733_v58 = vmul.f32 %v8905_v55, %v701_v21 }
 0x1d9   : > { %v752_v62 = vadd.f32 %v7513_v52, %v742_v59 }
 0x1da   : > { %v754_v60 = vpack.c.bf16 %v751_v57, %v750_v56  ;;  %v743_v61 = vmul.f32 %v7512_v47, %v733_v58 }
 0x1dc   : > { %8041 = vmatprep.mubr.msk.bf16.mxu1 %vm680_vm0, %v754_v60  ;;  %8057 = vmatprep.mubr.msk.bf16.mxu0 %vm680_vm0, %v754_v60  ;;  %v753_v63 = vadd.f32 %v7513_v52, %v743_v61 }
 0x1de   : > { %v755_v0 = vpack.c.bf16 %v753_v63, %v752_v62 }
 0x1e0   : > { %8042 = vmatmul.mubr.msk.bf16.vlgmr.msra.gmra.mrb[0].mxu1 %vm680_vm0, %v755_v0  ;;  %8058 = vmatmul.mubr.msk.bf16.vlgmr.msra.gmra.mrb[0].mxu0 %vm680_vm0, %v755_v0 }
 0x1e1   : > { %8046 = vmatpush3.bf16.msra.mxu1 %v8846_v32  ;;  %8049 = vmatprep.mubr.msk.bf16.mxu1 %vm680_vm0, %v754_v60 }
 0x1e2   : > { %8047 = vmatprep.subr.bf16.mxu1 %v8847_v1  ;;  %8069 = vmatprep.mubr.msk.bf16.mxu0 %vm9423_vm1, %v9422_v2 }
 0x1e5   : > { %8048 = vmatpush3.bf16.msra.mxu1 %v8847_v1 }
 0x1e6   : > { %8061 = vmatprep.subr.bf16.mxu1 %v9422_v2 }
 0x1e8   : > { %8050 = vmatmul.mubr.msk.bf16.vlgmr.msra.gmra.mrb[4].mxu1 %vm680_vm0, %v755_v0 }
 0x1e9   : > { %8063 = vmatprep.mubr.msk.bf16.mxu1 %vm9423_vm1, %v9422_v2 }
 0x2b3   : > { %v8043_v4 = vpop.f32.mrb[0].mxu1  ;;  %v8059_v5 = vpop.f32.mrb[0].mxu0 }
 0x2b4   : > { %v823_v7 = vadd.f32 %v8043_v4, %v7514_v3  ;;  %v814_v8 = vpop.f32.mrb[1].mxu1  ;;  %v948_v9 = vpop.f32.mrb[1].mxu0  ;;  %v957_v13 = vadd.f32 %v8059_v5, %v7524_v6 }
 0x2b5   : > { %v815_v10 = vadd.f32 %v7514_v3, %v814_v8  ;;  %v8044_v11 = vpop.f32.mrb[2].mxu1  ;;  %v8060_v12 = vpop.f32.mrb[2].mxu0  ;;  %v949_v18 = vadd.f32 %v7524_v6, %v948_v9 }
 0x2b6   : > { %v826_v14 = vadd.f32 %v8044_v11, %v7514_v3  ;;  %v960_v15 = vadd.f32 %v8060_v12, %v7524_v6  ;;  %v817_v16 = vpop.f32.mrb[3].mxu1  ;;  %v951_v17 = vpop.f32.mrb[3].mxu0  ;;  %v965_v21 = vmul.f32 0.35355338, %v823_v7 }
 0x2b7   : > { %v818_v19 = vadd.f32 %v7514_v3, %v817_v16  ;;  %v952_v20 = vadd.f32 %v7524_v6, %v951_v17  ;;  %v963_v24 = vmul.f32 0.35355338, %v815_v10 }
 0x2b8   : > { %v966_v22 = vmul.f32 0.35355338, %v826_v14  ;;  %v9758_v23 = vpack.c.bf16 %v960_v15, %v957_v13 }
 0x2b9   : > { %v964_v25 = vmul.f32 0.35355338, %v818_v19  ;;  %v9760_v26 = vpack.c.bf16 %v952_v20, %v949_v18 }
 0x2ba   : > { %v9762_v27 = vpack.c.bf16 %v966_v22, %v965_v21 }
 0x2bb   : > { %v9764_v28 = vpack.c.bf16 %v964_v25, %v963_v24  ;;  %v8051_v29 = vpop.f32.mrb[4].mxu1 }
 0x2bc   : > { %v881_v31 = vpop.f32.mrb[5].mxu1  ;;  %v890_v33 = vadd.f32 %v8051_v29, %v7519_v30 }
 0x2bd   : > { %v8052_v32 = vpop.f32.mrb[6].mxu1  ;;  %v882_v36 = vadd.f32 %v7519_v30, %v881_v31 }
 0x2be   : > { %v893_v34 = vadd.f32 %v8052_v32, %v7519_v30  ;;  %v884_v35 = vpop.f32.mrb[7].mxu1 }
 0x2bf   : > { %v885_v37 = vadd.f32 %v7519_v30, %v884_v35 }
 0x2c0   : > { %v9769_v38 = vpack.c.bf16 %v893_v34, %v890_v33 }
 0x2c1   : > { %v9771_v39 = vpack.c.bf16 %v885_v37, %v882_v36 }
 0x2c2   : > { %v1025_v40 = vsel %vm973_vm2, %v9769_v38, 0 }
 0x2c3   : > { %8068 = vmatpush3.bf16.xpose.msra.mxu0 %v1025_v40  ;;  %v978_v41 = vsel %vm973_vm2, %v9771_v39, 0 }
 0x2c4   : > { %8062 = vmatpush3.bf16.xpose.msra.mxu1 %v978_v41  ;;  %8079 = vmatprep.subr.bf16.mxu0 %v9422_v2 }
 0x2c5   : > { %8073 = vmatprep.subr.bf16.mxu1 %v9422_v2 }
 0x2ca   : > { %8070 = vmatmul.mubr.msk.bf16.vlgmr.msra.gmra.mrb[4].mxu0 %vm973_vm2, %v9762_v27 }
 0x2cb   : > { %8064 = vmatmul.mubr.msk.bf16.vlgmr.msra.gmra.mrb[8].mxu1 %vm973_vm2, %v9764_v28  ;;  %8080 = vmatpush3.bf16.msra.mxu0 %v9758_v23 }
 0x2cc   : > { %8074 = vmatpush3.bf16.msra.mxu1 %v9760_v26  ;;  %8081 = vmatprep.mubr.msk.bf16.mxu0 %vm9423_vm1, %v9422_v2 }
 0x2cd   : > { %8091 = vmatprep.subr.bf16.mxu0 %v9422_v2  ;;  %8075 = vmatprep.mubr.msk.bf16.mxu1 %vm9423_vm1, %v9422_v2 }
 0x2ce   : > { %8085 = vmatprep.subr.bf16.mxu1 %v9422_v2 }
 0x39d   : > { %v1061_v42 = vpop.f32.mrb[4].mxu0 }
 0x39e   : > { %v1014_v43 = vpop.f32.mrb[8].mxu1  ;;  %v8071_v44 = vpop.f32.mrb[5].mxu0  ;;  %v1075_v52 = vsel %vm1068_vm3, %v1061_v42, -inf }
 0x39f   : > { %v8065_v45 = vpop.f32.mrb[9].mxu1  ;;  %v1064_v46 = vpop.f32.mrb[6].mxu0  ;;  %v1069_v47 = vsel %vm1068_vm3, %v1014_v43, -inf }
 0x3a0   : > { %v8072_v48 = vpop.f32.mrb[7].mxu0  ;;  %1070 = vmax.xlane.f32.xlu0 %v1069_v47  ;;  %v1017_v49 = vpop.f32.mrb[10].mxu1  ;;  %v1078_v53 = vsel %vm1068_vm3, %v1064_v46, -inf }
 0x3a1   : > { %v8066_v50 = vpop.f32.mrb[11].mxu1  ;;  %v1072_v51 = vsel %vm1068_vm3, %v1017_v49, -inf }
 0x3a2   : > { %1073 = vmax.xlane.f32.xlu1 %v1072_v51 }
 0x3a4   : > { %1076 = vmax.xlane.f32.xlu0 %v1075_v52 }
 0x3a6   : > { %1079 = vmax.xlane.f32.xlu1 %v1078_v53 }
 0x3b7   : > { %1260 = vrot.lane.b32.xlu1 %v9769_v38, %s9424_s26 }
 0x42d   : > { %v1071_v54 = vpop.xlane.xlu0 %1070 }
 0x42e   : > { %v1081_v55 = vsub.f32 %v1014_v43, %v1071_v54 }
 0x42f   : > { %v1074_v56 = vpop.xlane.xlu1 %1073 }
 0x430   : > { %v1082_v58 = vsub.f32 %v1017_v49, %v1074_v56  ;;  %v1085_v60 = vmul.f32 1.442695, %v1081_v55 }
 0x431   : > { %v1077_v57 = vpop.xlane.xlu0 %1076 }
 0x432   : > { %v1083_v59 = vsub.f32 %v1061_v42, %v1077_v57  ;;  %v1087_v0 = vmul.f32 1.442695, %v1082_v58 }
 0x433   : > { %v1080_v61 = vpop.xlane.xlu1 %1079 }
 0x434   : > { %v1089_v62 = vmul.f32 1.442695, %v1083_v59  ;;  %v1084_v63 = vsub.f32 %v1064_v46, %v1080_v61 }
 0x436   : > { %8906 = vpow2.f32 %v1089_v62  ;;  %v1091_v1 = vmul.f32 1.442695, %v1084_v63 }
 0x437   : > { %8908 = vpow2.f32 %v1085_v60  ;;  %v1261_v11 = vpop.permute.xlu1 %1260 }
 0x438   : > { %8910 = vpow2.f32 %v1091_v1  ;;  %v1266_v24 = vsel %vm973_vm2, %v1261_v11, 0 }
 0x439   : > { %8912 = vpow2.f32 %v1087_v0 }
 0x440   : > { %v8907_v3 = vpop.eup %8906 }
 0x441   : > { %v8909_v4 = vpop.eup %8908  ;;  %v1099_v5 = vsel %vm1068_vm3, %v8907_v3, 0.0 }
 0x442   : > { %v8911_v6 = vpop.eup %8910  ;;  %1100 = vadd.xlane.f32.xlu0 %v1099_v5  ;;  %v1093_v9 = vsel %vm1068_vm3, %v8909_v4, 0.0 }
 0x443   : > { %v1102_v7 = vsel %vm1068_vm3, %v8911_v6, 0.0  ;;  %v8913_v8 = vpop.eup %8912 }
 0x444   : > { %1103 = vadd.xlane.f32.xlu1 %v1102_v7  ;;  %v1096_v10 = vsel %vm1068_vm3, %v8913_v8, 0.0 }
 0x446   : > { %1094 = vadd.xlane.f32.xlu0 %v1093_v9 }
 0x448   : > { %1097 = vadd.xlane.f32.xlu1 %v1096_v10 }
 0x459   : > { %1204 = vrot.lane.b32.xlu1 %v9764_v28, %s9424_s26 }
 0x45c   : > { %1207 = vrot.lane.b32.xlu0 %v9771_v39, %s9424_s26 }
 0x45d   : > { %1257 = vrot.lane.b32.xlu1 %v9762_v27, %s9424_s26 }
 0x4cf   : > { %v1101_v12 = vpop.xlane.xlu0 %1100 }
 0x4d0   : > { %8914 = vrcp.f32 %v1101_v12 }
 0x4d1   : > { %v1104_v13 = vpop.xlane.xlu1 %1103 }
 0x4d2   : > { %8916 = vrcp.f32 %v1104_v13 }
 0x4d3   : > { %v1095_v14 = vpop.xlane.xlu0 %1094 }
 0x4d4   : > { %8918 = vrcp.f32 %v1095_v14 }
 0x4d5   : > { %v1098_v15 = vpop.xlane.xlu1 %1097 }
 0x4d6   : > { %8920 = vrcp.f32 %v1098_v15 }
 0x4d7   : > { %v1208_v30 = vpop.permute.xlu0 %1207 }
 0x4d8   : > { %v1213_v33 = vsel %vm973_vm2, %v1208_v30, 0 }
 0x4d9   : > { %v1205_v31 = vpop.permute.xlu1 %1204 }
 0x4da   : > { %v8915_v16 = vpop.eup %8914 }
 0x4db   : > { %v1111_v18 = vmul.f32 %v8915_v16, %v8907_v3 }
 0x4dc   : > { %v8917_v17 = vpop.eup %8916 }
 0x4dd   : > { %v1112_v19 = vmul.f32 %v8917_v17, %v8911_v6  ;;  %v1258_v34 = vpop.permute.xlu1 %1257 }
 0x4de   : > { %v8919_v20 = vpop.eup %8918 }
 0x4df   : > { %v1114_v21 = vpack.c.bf16 %v1112_v19, %v1111_v18  ;;  %v1109_v25 = vmul.f32 %v8919_v20, %v8909_v4 }
 0x4e0   : > { %v8921_v22 = vpop.eup %8920 }
 0x4e1   : > { %v1110_v29 = vmul.f32 %v8921_v22, %v8913_v8  ;;  %8082 = vmatmul.mubr.msk.bf16.vlgmr.msra.gmra.mrb[8].mxu0 %vm1068_vm3, %v1114_v21 }
 0x4e2   : > { %8092 = vmatpush3.bf16.xpose.msra.mxu0 %v1266_v24  ;;  %8093 = vmatprep.mubr.msk.bf16.mxu0 %vm9423_vm1, %v9422_v2 }
 0x4e3   : > { %v1113_v32 = vpack.c.bf16 %v1110_v29, %v1109_v25  ;;  %8103 = vmatprep.subr.bf16.mxu0 %v9422_v2 }
 0x4e5   : > { %8076 = vmatmul.mubr.msk.bf16.vlgmr.msra.gmra.mrb[12].mxu1 %vm1068_vm3, %v1113_v32 }
 0x4e6   : > { %8086 = vmatpush3.bf16.xpose.msra.mxu1 %v1213_v33  ;;  %8087 = vmatprep.mubr.msk.bf16.mxu1 %vm9423_vm1, %v9422_v2 }
 0x4e7   : > { %8097 = vmatprep.subr.bf16.mxu1 %v9422_v2 }
 0x4e9   : > { %8094 = vmatmul.mubr.msk.bf16.vlgmr.msra.gmra.mrb[12].mxu0 %vm973_vm2, %v1258_v34 }
 0x4ea   : > { %8105 = vmatprep.mubr.msk.bf16.mxu0 %vm9423_vm1, %v9422_v2 }
 0x4ed   : > { %8088 = vmatmul.mubr.msk.bf16.vlgmr.msra.gmra.mrb[16].mxu1 %vm973_vm2, %v1205_v31 }
 0x4ee   : > { %8099 = vmatprep.mubr.msk.bf16.mxu1 %vm9423_vm1, %v9422_v2 }
 0x5b4   : > { %v9823_v35 = vpop.f32.mrb[8].mxu0 }
 0x5b5   : > { %v8083_v36 = vpop.f32.mrb[9].mxu0 }
 0x5b6   : > { %v9825_v37 = vpop.f32.mrb[10].mxu0 }
 0x5b7   : > { %v8084_v40 = vpop.f32.mrb[11].mxu0 }
 0x5b8   : > { %v9827_v41 = vpop.f32.mrb[12].mxu1 }
 0x5b9   : > { %v8077_v42 = vpop.f32.mrb[13].mxu1 }
 0x5ba   : > { %v9829_v43 = vpop.f32.mrb[14].mxu1 }
 0x5bb   : > { %v8078_v44 = vpop.f32.mrb[15].mxu1 }
 0x5bc   : > { %v1302_v45 = vpop.f32.mrb[12].mxu0 }
 0x5bd   : > { %v8095_v46 = vpop.f32.mrb[13].mxu0  ;;  %v1315_v55 = vsel %vm1068_vm3, %v1302_v45, -inf }
 0x5be   : > { %v1305_v47 = vpop.f32.mrb[14].mxu0 }
 0x5bf   : > { %v8096_v48 = vpop.f32.mrb[15].mxu0  ;;  %v1318_v56 = vsel %vm1068_vm3, %v1305_v47, -inf }
 0x5c0   : > { %v1249_v49 = vpop.f32.mrb[16].mxu1 }
 0x5c1   : > { %v8089_v50 = vpop.f32.mrb[17].mxu1  ;;  %v1309_v51 = vsel %vm1068_vm3, %v1249_v49, -inf }
 0x5c2   : > { %1310 = vmax.xlane.f32.xlu0 %v1309_v51  ;;  %v1252_v52 = vpop.f32.mrb[18].mxu1 }
 0x5c3   : > { %v8090_v53 = vpop.f32.mrb[19].mxu1  ;;  %v1312_v54 = vsel %vm1068_vm3, %v1252_v52, -inf }
 0x5c4   : > { %1313 = vmax.xlane.f32.xlu1 %v1312_v54 }
 0x5c6   : > { %1316 = vmax.xlane.f32.xlu0 %v1315_v55 }
 0x5ca   : > { %1319 = vmax.xlane.f32.xlu0 %v1318_v56 }
 0x5d5   : > { %1404 = vrot.lane.b32.xlu1 %v9758_v23, %s9424_s26 }
 0x5d9   : > { %1453 = vrot.lane.b32.xlu1 %v9771_v39, %s9425_s17 }
 0x64f   : > { %v1311_v57 = vpop.xlane.xlu0 %1310 }
 0x650   : > { %v1321_v59 = vsub.f32 %v1249_v49, %v1311_v57 }
 0x651   : > { %v1314_v58 = vpop.xlane.xlu1 %1313 }
 0x652   : > { %v1325_v63 = vmul.f32 1.442695, %v1321_v59  ;;  %v1322_v0 = vsub.f32 %v1252_v52, %v1314_v58 }
 0x653   : > { %v1317_v60 = vpop.xlane.xlu0 %1316 }
 0x654   : > { %v1323_v61 = vsub.f32 %v1302_v45, %v1317_v60  ;;  %v1327_v5 = vmul.f32 1.442695, %v1322_v0 }
 0x655   : > { %v1405_v62 = vpop.permute.xlu1 %1404 }
 0x656   : > { %v1329_v1 = vmul.f32 1.442695, %v1323_v61  ;;  %8104 = vmatpush3.bf16.msra.mxu0 %v1405_v62 }
 0x657   : > { %v1320_v3 = vpop.xlane.xlu0 %1319  ;;  %8115 = vmatprep.subr.bf16.mxu0 %v9422_v2 }
 0x658   : > { %8922 = vpow2.f32 %v1329_v1  ;;  %v1324_v4 = vsub.f32 %v1305_v47, %v1320_v3 }
 0x659   : > { %8924 = vpow2.f32 %v1325_v63  ;;  %v1454_v15 = vpop.permute.xlu1 %1453 }
 0x65a   : > { %v1331_v6 = vmul.f32 1.442695, %v1324_v4  ;;  %v1459_v42 = vsel %vm973_vm2, %v1454_v15, 0 }
 0x65c   : > { %8926 = vpow2.f32 %v1331_v6 }
 0x65d   : > { %8928 = vpow2.f32 %v1327_v5 }
 0x662   : > { %v8923_v7 = vpop.eup %8922 }
 0x663   : > { %v1339_v8 = vsel %vm1068_vm3, %v8923_v7, 0.0  ;;  %v8925_v9 = vpop.eup %8924 }
 0x664   : > { %1340 = vadd.xlane.f32.xlu0 %v1339_v8  ;;  %v1333_v11 = vsel %vm1068_vm3, %v8925_v9, 0.0 }
 0x666   : > { %v8927_v10 = vpop.eup %8926 }
 0x667   : > { %v1342_v12 = vsel %vm1068_vm3, %v8927_v10, 0.0  ;;  %v8929_v13 = vpop.eup %8928 }
 0x668   : > { %1334 = vadd.xlane.f32.xlu0 %v1333_v11  ;;  %1343 = vadd.xlane.f32.xlu1 %v1342_v12  ;;  %v1336_v14 = vsel %vm1068_vm3, %v8929_v13, 0.0 }
 0x66c   : > { %1337 = vadd.xlane.f32.xlu1 %v1336_v14 }
 0x67d   : > { %1504 = vrot.lane.b32.xlu1 %v9769_v38, %s9425_s17 }
 0x67e   : > { %1356 = vrot.lane.b32.xlu0 %v9760_v26, %s9424_s26 }
 0x681   : > { %1502 = vrot.lane.b32.xlu1 %v9762_v27, %s9425_s17 }
 0x682   : > { %1451 = vrot.lane.b32.xlu0 %v9764_v28, %s9425_s17 }
 0x6f1   : > { %v1341_v16 = vpop.xlane.xlu0 %1340 }
 0x6f2   : > { %8930 = vrcp.f32 %v1341_v16 }
 0x6f5   : > { %v1335_v17 = vpop.xlane.xlu0 %1334  ;;  %v1344_v18 = vpop.xlane.xlu1 %1343 }
 0x6f6   : > { %8932 = vrcp.f32 %v1344_v18 }
 0x6f7   : > { %8934 = vrcp.f32 %v1335_v17 }
 0x6f9   : > { %v1357_v19 = vpop.permute.xlu0 %1356  ;;  %v1338_v20 = vpop.xlane.xlu1 %1337 }
 0x6fa   : > { %8936 = vrcp.f32 %v1338_v20  ;;  %8098 = vmatpush3.bf16.msra.mxu1 %v1357_v19 }
 0x6fb   : > { %8109 = vmatprep.subr.bf16.mxu1 %v9422_v2 }
 0x6fc   : > { %v8931_v21 = vpop.eup %8930 }
 0x6fd   : > { %v1351_v25 = vmul.f32 %v8931_v21, %v8923_v7  ;;  %v1505_v30 = vpop.permute.xlu1 %1504  ;;  %v1452_v45 = vpop.permute.xlu0 %1451 }
 0x6fe   : > { %v1510_v36 = vsel %vm973_vm2, %v1505_v30, 0 }
 0x700   : > { %v8933_v22 = vpop.eup %8932 }
 0x701   : > { %v8935_v24 = vpop.eup %8934  ;;  %v1352_v29 = vmul.f32 %v8933_v22, %v8927_v10  ;;  %v1503_v44 = vpop.permute.xlu1 %1502 }
 0x702   : > { %v1349_v33 = vmul.f32 %v8935_v24, %v8925_v9 }
 0x703   : > { %v1354_v32 = vpack.c.bf16 %v1352_v29, %v1351_v25 }
 0x704   : > { %v8937_v31 = vpop.eup %8936 }
 0x705   : > { %v1350_v34 = vmul.f32 %v8937_v31, %v8929_v13  ;;  %8106 = vmatmul.mubr.msk.bf16.vlgmr.msra.gmra.mrb[16].mxu0 %vm1068_vm3, %v1354_v32 }
 0x706   : > { %8116 = vmatpush3.bf16.xpose.msra.mxu0 %v1510_v36  ;;  %8117 = vmatprep.mubr.msk.bf16.mxu0 %vm9423_vm1, %v9422_v2 }
 0x707   : > { %v1353_v40 = vpack.c.bf16 %v1350_v34, %v1349_v33  ;;  %8127 = vmatprep.subr.bf16.mxu0 %v9422_v2 }
 0x709   : > { %8100 = vmatmul.mubr.msk.bf16.vlgmr.msra.gmra.mrb[20].mxu1 %vm1068_vm3, %v1353_v40 }
 0x70a   : > { %8110 = vmatpush3.bf16.xpose.msra.mxu1 %v1459_v42  ;;  %8111 = vmatprep.mubr.msk.bf16.mxu1 %vm9423_vm1, %v9422_v2 }
 0x70b   : > { %8121 = vmatprep.subr.bf16.mxu1 %v9422_v2 }
 0x70d   : > { %8118 = vmatmul.mubr.msk.bf16.vlgmr.msra.gmra.mrb[20].mxu0 %vm973_vm2, %v1503_v44 }
 0x70e   : > { %8129 = vmatprep.mubr.msk.bf16.mxu0 %vm9423_vm1, %v9422_v2 }
 0x711   : > { %8112 = vmatmul.mubr.msk.bf16.vlgmr.msra.gmra.mrb[24].mxu1 %vm973_vm2, %v1452_v45 }
 0x712   : > { %8123 = vmatprep.mubr.msk.bf16.mxu1 %vm9423_vm1, %v9422_v2 }
 0x7d8   : > { %v9869_v46 = vpop.f32.mrb[16].mxu0 }
 0x7d9   : > { %v8107_v47 = vpop.f32.mrb[17].mxu0 }
 0x7da   : > { %v9871_v48 = vpop.f32.mrb[18].mxu0 }
 0x7db   : > { %v8727_v49 = vpack.i.bf16 %v9871_v48, %v9869_v46  ;;  %v8108_v50 = vpop.f32.mrb[19].mxu0 }
 0x7dc   : > { %v9875_v51 = vpop.f32.mrb[20].mxu1 }
 0x7dd   : > { %v8101_v52 = vpop.f32.mrb[21].mxu1 }
 0x7de   : > { %v9877_v53 = vpop.f32.mrb[22].mxu1 }
 0x7df   : > { %v8722_v54 = vpack.i.bf16 %v9877_v53, %v9875_v51  ;;  %v8102_v55 = vpop.f32.mrb[23].mxu1 }
 0x7e0   : > { %v1546_v56 = vpop.f32.mrb[20].mxu0 }
 0x7e1   : > { %v8119_v57 = vpop.f32.mrb[21].mxu0  ;;  %v1559_v3 = vsel %vm1068_vm3, %v1546_v56, -inf }
 0x7e2   : > { %v1549_v58 = vpop.f32.mrb[22].mxu0 }
 0x7e3   : > { %v8120_v59 = vpop.f32.mrb[23].mxu0  ;;  %v1562_v4 = vsel %vm1068_vm3, %v1549_v58, -inf }
 0x7e4   : > { %v1495_v60 = vpop.f32.mrb[24].mxu1 }
 0x7e5   : > { %v8113_v61 = vpop.f32.mrb[25].mxu1  ;;  %v1553_v62 = vsel %vm1068_vm3, %v1495_v60, -inf }
 0x7e6   : > { %1554 = vmax.xlane.f32.xlu0 %v1553_v62  ;;  %v1498_v63 = vpop.f32.mrb[26].mxu1 }
 0x7e7   : > { %v8114_v0 = vpop.f32.mrb[27].mxu1  ;;  %v1556_v1 = vsel %vm1068_vm3, %v1498_v63, -inf }
 0x7e8   : > { %1557 = vmax.xlane.f32.xlu1 %v1556_v1 }
 0x7ea   : > { %1560 = vmax.xlane.f32.xlu0 %v1559_v3 }
 0x7ee   : > { %1563 = vmax.xlane.f32.xlu0 %v1562_v4 }
 0x7f9   : > { %1646 = vrot.lane.b32.xlu1 %v9758_v23, %s9425_s17 }
 0x7fd   : > { %1695 = vrot.lane.b32.xlu1 %v9771_v39, %s9426_s21 }
 0x873   : > { %v1555_v5 = vpop.xlane.xlu0 %1554 }
 0x874   : > { %v1565_v7 = vsub.f32 %v1495_v60, %v1555_v5 }
 0x875   : > { %v1558_v6 = vpop.xlane.xlu1 %1557 }
 0x876   : > { %v1569_v11 = vmul.f32 1.442695, %v1565_v7  ;;  %v1566_v12 = vsub.f32 %v1498_v63, %v1558_v6 }
 0x877   : > { %v1561_v8 = vpop.xlane.xlu0 %1560 }
 0x878   : > { %v1567_v9 = vsub.f32 %v1546_v56, %v1561_v8  ;;  %v1571_v16 = vmul.f32 1.442695, %v1566_v12 }
 0x879   : > { %v1647_v10 = vpop.permute.xlu1 %1646 }
 0x87a   : > { %v1573_v13 = vmul.f32 1.442695, %v1567_v9  ;;  %8128 = vmatpush3.bf16.msra.mxu0 %v1647_v10 }
 0x87b   : > { %v1564_v14 = vpop.xlane.xlu0 %1563  ;;  %8139 = vmatprep.subr.bf16.mxu0 %v9422_v2 }
 0x87c   : > { %8938 = vpow2.f32 %v1573_v13  ;;  %v1568_v15 = vsub.f32 %v1549_v58, %v1564_v14 }
 0x87d   : > { %8940 = vpow2.f32 %v1569_v11  ;;  %v1696_v29 = vpop.permute.xlu1 %1695 }
 0x87e   : > { %v1575_v17 = vmul.f32 1.442695, %v1568_v15  ;;  %v1701_v56 = vsel %vm973_vm2, %v1696_v29, 0 }
 0x880   : > { %8942 = vpow2.f32 %v1575_v17 }
 0x881   : > { %8944 = vpow2.f32 %v1571_v16 }
 0x886   : > { %v8939_v39 = vpop.eup %8938 }
 0x887   : > { %v1583_v18 = vsel %vm1068_vm3, %v8939_v39, 0.0  ;;  %v8941_v19 = vpop.eup %8940 }
 0x888   : > { %1584 = vadd.xlane.f32.xlu0 %v1583_v18  ;;  %v1577_v21 = vsel %vm1068_vm3, %v8941_v19, 0.0 }
 0x88a   : > { %v8943_v20 = vpop.eup %8942 }
 0x88b   : > { %v1586_v22 = vsel %vm1068_vm3, %v8943_v20, 0.0  ;;  %v8945_v24 = vpop.eup %8944 }
 0x88c   : > { %1578 = vadd.xlane.f32.xlu0 %v1577_v21  ;;  %1587 = vadd.xlane.f32.xlu1 %v1586_v22  ;;  %v1580_v25 = vsel %vm1068_vm3, %v8945_v24, 0.0 }
 0x890   : > { %1581 = vadd.xlane.f32.xlu1 %v1580_v25 }
 0x8a1   : > { %1746 = vrot.lane.b32.xlu1 %v9769_v38, %s9426_s21 }
 0x8a2   : > { %1599 = vrot.lane.b32.xlu0 %v9760_v26, %s9425_s17 }
 0x8a5   : > { %1744 = vrot.lane.b32.xlu1 %v9762_v27, %s9426_s21 }
 0x8a6   : > { %1693 = vrot.lane.b32.xlu0 %v9764_v28, %s9426_s21 }
 0x915   : > { %v1585_v30 = vpop.xlane.xlu0 %1584 }
 0x916   : > { %8946 = vrcp.f32 %v1585_v30 }
 0x919   : > { %v1579_v31 = vpop.xlane.xlu0 %1578  ;;  %v1588_v32 = vpop.xlane.xlu1 %1587 }
 0x91a   : > { %8948 = vrcp.f32 %v1588_v32 }
 0x91b   : > { %8950 = vrcp.f32 %v1579_v31 }
 0x91d   : > { %v1600_v33 = vpop.permute.xlu0 %1599  ;;  %v1582_v34 = vpop.xlane.xlu1 %1581 }
 0x91e   : > { %8952 = vrcp.f32 %v1582_v34  ;;  %8122 = vmatpush3.bf16.msra.mxu1 %v1600_v33 }
 0x91f   : > { %8133 = vmatprep.subr.bf16.mxu1 %v9422_v2 }
 0x920   : > { %v8947_v38 = vpop.eup %8946 }
 0x921   : > { %v1595_v27 = vmul.f32 %v8947_v38, %v8939_v39  ;;  %v1747_v44 = vpop.permute.xlu1 %1746  ;;  %v1694_v58 = vpop.permute.xlu0 %1693 }
 0x922   : > { %v1752_v52 = vsel %vm973_vm2, %v1747_v44, 0 }
 0x924   : > { %v8949_v36 = vpop.eup %8948 }
 0x925   : > { %v8951_v40 = vpop.eup %8950  ;;  %v1596_v42 = vmul.f32 %v8949_v36, %v8943_v20  ;;  %v1745_v57 = vpop.permute.xlu1 %1744 }
 0x926   : > { %v1593_v47 = vmul.f32 %v8951_v40, %v8941_v19 }
 0x927   : > { %v1598_v45 = vpack.c.bf16 %v1596_v42, %v1595_v27 }
 0x928   : > { %v8953_v28 = vpop.eup %8952 }
 0x929   : > { %v1594_v50 = vmul.f32 %v8953_v28, %v8945_v24  ;;  %8130 = vmatmul.mubr.msk.bf16.vlgmr.msra.gmra.mrb[24].mxu0 %vm1068_vm3, %v1598_v45 }
 0x92a   : > { %8140 = vmatpush3.bf16.xpose.msra.mxu0 %v1752_v52  ;;  %8141 = vmatprep.mubr.msk.bf16.mxu0 %vm9423_vm1, %v9422_v2 }
 0x92b   : > { %v1597_v55 = vpack.c.bf16 %v1594_v50, %v1593_v47  ;;  %8151 = vmatprep.subr.bf16.mxu0 %v9422_v2 }
 0x92d   : > { %8124 = vmatmul.mubr.msk.bf16.vlgmr.msra.gmra.mrb[28].mxu1 %vm1068_vm3, %v1597_v55 }
 0x92e   : > { %8134 = vmatpush3.bf16.xpose.msra.mxu1 %v1701_v56  ;;  %8135 = vmatprep.mubr.msk.bf16.mxu1 %vm9423_vm1, %v9422_v2 }
 0x92f   : > { %8145 = vmatprep.subr.bf16.mxu1 %v9422_v2 }
 0x931   : > { %8142 = vmatmul.mubr.msk.bf16.vlgmr.msra.gmra.mrb[28].mxu0 %vm973_vm2, %v1745_v57 }
 0x932   : > { %8153 = vmatprep.mubr.msk.bf16.mxu0 %vm9423_vm1, %v9422_v2 }
 0x935   : > { %8136 = vmatmul.mubr.msk.bf16.vlgmr.msra.gmra.mrb[32].mxu1 %vm973_vm2, %v1694_v58  ;;  %v8848_v58 = vld [vmem:[#allocation7] sm:$0xff]  }
 0x936   : > { %8147 = vmatprep.mubr.msk.bf16.mxu1 %vm9423_vm1, %v9422_v2 }
 0x9fc   : > { %v1686_v59 = vpop.f32.mrb[24].mxu0 }
 0x9fd   : > { %v8131_v60 = vpop.f32.mrb[25].mxu0 }
 0x9fe   : > { %v1689_v61 = vpop.f32.mrb[26].mxu0 }
 0x9ff   : > { %v8737_v62 = vpack.i.bf16 %v1689_v61, %v1686_v59  ;;  %v8132_v63 = vpop.f32.mrb[27].mxu0  ;;  %v8849_v59 = vld [vmem:[#allocation7 + $0x8] sm:$0xff]  }
 0xa00   : > { %v1639_v0 = vpop.f32.mrb[28].mxu1 }
 0xa01   : > { %v8125_v1 = vpop.f32.mrb[29].mxu1 }
 0xa02   : > { %v1642_v3 = vpop.f32.mrb[30].mxu1 }
 0xa03   : > { %v8732_v4 = vpack.i.bf16 %v1642_v3, %v1639_v0  ;;  %v8126_v5 = vpop.f32.mrb[31].mxu1 }
 0xa04   : > { %v1788_v6 = vpop.f32.mrb[28].mxu0 }
 0xa05   : > { %v8143_v7 = vpop.f32.mrb[29].mxu0  ;;  %v1801_v16 = vsel %vm1068_vm3, %v1788_v6, -inf }
 0xa06   : > { %v1791_v8 = vpop.f32.mrb[30].mxu0 }
 0xa07   : > { %v8144_v9 = vpop.f32.mrb[31].mxu0  ;;  %v1804_v17 = vsel %vm1068_vm3, %v1791_v8, -inf }
 0xa08   : > { %v1737_v10 = vpop.f32.mrb[32].mxu1 }
 0xa09   : > { %v8137_v11 = vpop.f32.mrb[33].mxu1  ;;  %v1795_v12 = vsel %vm1068_vm3, %v1737_v10, -inf }
 0xa0a   : > { %1796 = vmax.xlane.f32.xlu0 %v1795_v12  ;;  %v1740_v13 = vpop.f32.mrb[34].mxu1 }
 0xa0b   : > { %v8138_v14 = vpop.f32.mrb[35].mxu1  ;;  %v1798_v15 = vsel %vm1068_vm3, %v1740_v13, -inf }
 0xa0c   : > { %1799 = vmax.xlane.f32.xlu1 %v1798_v15 }
 0xa0e   : > { %1802 = vmax.xlane.f32.xlu0 %v1801_v16 }
 0xa12   : > { %1805 = vmax.xlane.f32.xlu0 %v1804_v17 }
 0xa97   : > { %v1797_v39 = vpop.xlane.xlu0 %1796 }
 0xa98   : > { %v1807_v18 = vsub.f32 %v1737_v10, %v1797_v39 }
 0xa99   : > { %v1800_v19 = vpop.xlane.xlu1 %1799 }
 0xa9a   : > { %v1811_v22 = vmul.f32 1.442695, %v1807_v18  ;;  %v1808_v24 = vsub.f32 %v1740_v13, %v1800_v19 }
 0xa9b   : > { %v1803_v20 = vpop.xlane.xlu0 %1802 }
 0xa9c   : > { %v1809_v21 = vsub.f32 %v1788_v6, %v1803_v20  ;;  %v1813_v31 = vmul.f32 1.442695, %v1808_v24 }
 0xa9e   : > { %v1815_v25 = vmul.f32 1.442695, %v1809_v21 }
 0xa9f   : > { %v1806_v29 = vpop.xlane.xlu0 %1805 }
 0xaa0   : > { %8954 = vpow2.f32 %v1815_v25  ;;  %v1810_v30 = vsub.f32 %v1791_v8, %v1806_v29 }
 0xaa1   : > { %8956 = vpow2.f32 %v1811_v22 }
 0xaa2   : > { %v1817_v32 = vmul.f32 1.442695, %v1810_v30 }
 0xaa4   : > { %8958 = vpow2.f32 %v1817_v32 }
 0xaa5   : > { %8960 = vpow2.f32 %v1813_v31 }
 0xaaa   : > { %v8955_v33 = vpop.eup %8954 }
 0xaab   : > { %v1825_v34 = vsel %vm1068_vm3, %v8955_v33, 0.0  ;;  %v8957_v38 = vpop.eup %8956 }
 0xaac   : > { %1826 = vadd.xlane.f32.xlu0 %v1825_v34  ;;  %v1819_v40 = vsel %vm1068_vm3, %v8957_v38, 0.0 }
 0xaae   : > { %v8959_v36 = vpop.eup %8958 }
 0xaaf   : > { %v1828_v27 = vsel %vm1068_vm3, %v8959_v36, 0.0  ;;  %v8961_v42 = vpop.eup %8960 }
 0xab0   : > { %1820 = vadd.xlane.f32.xlu0 %v1819_v40  ;;  %1829 = vadd.xlane.f32.xlu1 %v1828_v27  ;;  %v1822_v44 = vsel %vm1068_vm3, %v8961_v42, 0.0  ;;  %v7545_v27 = vld [vmem:[%s11128_s9] ss:$0 sm:$0xff] }
 0xab4   : > { %1823 = vadd.xlane.f32.xlu1 %v1822_v44 }
 0xac5   : > { %1888 = vrot.lane.b32.xlu1 %v9758_v23, %s9426_s21 }
 0xac6   : > { %1841 = vrot.lane.b32.xlu0 %v9760_v26, %s9426_s21 }
 0xac9   : > { %8723 = vrot.lane.b32.xlu1 %v8722_v54, %s9427_s1 }
 0xaca   : > { %8733 = vrot.lane.b32.xlu0 %v8732_v4, %s9428_s28 }
 0xacd   : > { %8728 = vrot.lane.b32.xlu1 %v8727_v49, %s9427_s1 }
 0xad1   : > { %8738 = vrot.lane.b32.xlu1 %v8737_v62, %s9428_s28 }
 0xb39   : > { %v1827_v23 = vpop.xlane.xlu0 %1826 }
 0xb3a   : > { %8962 = vrcp.f32 %v1827_v23 }
 0xb3d   : > { %v1821_v28 = vpop.xlane.xlu0 %1820  ;;  %v1830_v26 = vpop.xlane.xlu1 %1829 }
 0xb3e   : > { %8964 = vrcp.f32 %v1830_v26 }
 0xb3f   : > { %8966 = vrcp.f32 %v1821_v28 }
 0xb41   : > { %v1842_v45 = vpop.permute.xlu0 %1841  ;;  %v1824_v47 = vpop.xlane.xlu1 %1823 }
 0xb42   : > { %8968 = vrcp.f32 %v1824_v47  ;;  %8146 = vmatpush3.bf16.msra.mxu1 %v1842_v45  ;;  %v9218_v47 = vld [vmem:[%s9708_s22] sm:$0xff] }
 0xb43   : > { %8157 = vmatprep.subr.bf16.mxu1 %v8848_v58 }
 0xb44   : > { %v8963_v53 = vpop.eup %8962 }
 0xb45   : > { %v1889_v51 = vpop.permute.xlu1 %1888  ;;  %v1837_v52 = vmul.f32 %v8963_v53, %v8955_v33  ;;  %v8734_v16 = vpop.permute.xlu0 %8733 }
 0xb46   : > { %8152 = vmatpush3.bf16.msra.mxu0 %v1889_v51  ;;  %v8736_v29 = vunpack.i.h.bf16 %v8734_v16  ;;  %v8735_v30 = vunpack.i.l.bf16 %v8734_v16 }
 0xb48   : > { %v8965_v54 = vpop.eup %8964 }
 0xb49   : > { %v8967_v50 = vpop.eup %8966  ;;  %v1838_v46 = vmul.f32 %v8965_v54, %v8959_v36  ;;  %v8724_v7 = vpop.permute.xlu1 %8723  ;;  %v9219_v54 = vld [vmem:[%s9708_s22 + $0x10] sm:$0xff] }
 0xb4a   : > { %v1835_v55 = vmul.f32 %v8967_v50, %v8957_v38  ;;  %v8726_v12 = vunpack.i.h.bf16 %v8724_v7  ;;  %v8725_v13 = vunpack.i.l.bf16 %v8724_v7 }
 0xb4b   : > { %v1840_v49 = vpack.c.bf16 %v1838_v46, %v1837_v52  ;;  %v9220_v46 = vld [vmem:[%s9708_s22 + $0x8] sm:$0xff] }
 0xb4c   : > { %v8969_v48 = vpop.eup %8968  ;;  %v1984_v21 = vsel %vm973_vm2, %v9829_v43, %v8726_v12  ;;  %v1983_v22 = vsel %vm973_vm2, %v9827_v41, %v8725_v13 }
 0xb4d   : > { %v1836_v56 = vmul.f32 %v8969_v48, %v8961_v42  ;;  %8154 = vmatmul.mubr.msk.bf16.vlgmr.msra.gmra.mrb[32].mxu0 %vm1068_vm3, %v1840_v49  ;;  %v8729_v8 = vpop.permute.xlu1 %8728  ;;  %v1987_v43 = vsel %vm1068_vm3, %v1983_v22, %v8735_v30  ;;  %v1988_v38 = vsel %vm1068_vm3, %v1984_v21, %v8736_v29 }
 0xb4e   : > { %v8731_v10 = vunpack.i.h.bf16 %v8729_v8  ;;  %v8730_v11 = vunpack.i.l.bf16 %v8729_v8 }
 0xb4f   : > { %v1839_v57 = vpack.c.bf16 %v1836_v56, %v1835_v55  ;;  %v9221_v56 = vld [vmem:[%s9708_s22 + $0x18] sm:$0xff] }
 0xb50   : > { %v1986_v39 = vsel %vm973_vm2, %v9825_v37, %v8731_v10  ;;  %v1985_v18 = vsel %vm973_vm2, %v9823_v35, %v8730_v11 }
 0xb51   : > { %8148 = vmatmul.mubr.msk.bf16.vlgmr.msra.gmra.mrb[36].mxu1 %vm1068_vm3, %v1839_v57  ;;  %v8739_v9 = vpop.permute.xlu1 %8738 }
 0xb52   : > { %8158 = vmatpush3.bf16.msra.mxu1 %v8848_v58  ;;  %v8741_v14 = vunpack.i.h.bf16 %v8739_v9  ;;  %v8740_v15 = vunpack.i.l.bf16 %v8739_v9 }
 0xb53   : > { %8159 = vmatprep.subr.bf16.mxu1 %v8849_v59 }
 0xb54   : > { %v1989_v24 = vsel %vm1068_vm3, %v1985_v18, %v8740_v15  ;;  %v1990_v25 = vsel %vm1068_vm3, %v1986_v39, %v8741_v14  ;;  %v8851_v39 = vld [vmem:[#allocation8 + $0x8] sm:$0xff]   ;;  %v8852_v18 = vld [vmem:[%s11135_s16] sm:$0xff]  }
 0xb56   : > { %8160 = vmatpush3.bf16.msra.mxu1 %v8849_v59 }
 0xb57   : > { %8173 = vmatprep.subr.bf16.mxu1 %v8852_v18 }
 0xc20   : > { %v1928_v60 = vpop.f32.mrb[32].mxu0 }
 0xc21   : > { %v8155_v61 = vpop.f32.mrb[33].mxu0 }
 0xc22   : > { %v1931_v62 = vpop.f32.mrb[34].mxu0 }
 0xc23   : > { %v8747_v63 = vpack.i.bf16 %v1931_v62, %v1928_v60  ;;  %v8156_v0 = vpop.f32.mrb[35].mxu0 }
 0xc24   : > { %v1881_v1 = vpop.f32.mrb[36].mxu1 }
 0xc25   : > { %v8149_v3 = vpop.f32.mrb[37].mxu1  ;;  %8748 = vrot.lane.b32.xlu1 %v8747_v63, %s9429_s15 }
 0xc26   : > { %v1884_v4 = vpop.f32.mrb[38].mxu1 }
 0xc27   : > { %v8742_v5 = vpack.i.bf16 %v1884_v4, %v1881_v1  ;;  %v8150_v6 = vpop.f32.mrb[39].mxu1 }
 0xc29   : > { %8743 = vrot.lane.b32.xlu0 %v8742_v5, %s9429_s15 }
 0xc97   : > { %v8749_v17 = vpop.permute.xlu1 %8748 }
 0xc98   : > { %v8751_v19 = vunpack.i.h.bf16 %v8749_v17  ;;  %v8750_v20 = vunpack.i.l.bf16 %v8749_v17  ;;  %v8850_v17 = vld [vmem:[#allocation8] sm:$0xff]  }
 0xc99   : > { %8165 = vmatprep.subr.bf16.mxu0 %v8850_v17 }
 0xc9a   : > { %v1994_v31 = vsel %vm1991_vm4, %v1989_v24, %v8750_v20  ;;  %v1995_v37 = vsel %vm1991_vm4, %v1990_v25, %v8751_v19  ;;  %8166 = vmatpush3.bf16.msra.mxu0 %v8850_v17  ;;  %v8853_v19 = vld [vmem:[%s11135_s16 + $0x8] sm:$0xff]  }
 0xc9b   : > { %v8744_v32 = vpop.permute.xlu0 %8743  ;;  %v1997_v35 = vpack.c.bf16 %v1995_v37, %v1994_v31  ;;  %8167 = vmatprep.subr.bf16.mxu0 %v8851_v39 }
 0xc9c   : > { %v8746_v33 = vunpack.i.h.bf16 %v8744_v32  ;;  %v8745_v34 = vunpack.i.l.bf16 %v8744_v32 }
 0xc9e   : > { %v1993_v41 = vsel %vm1991_vm4, %v1988_v38, %v8746_v33  ;;  %v1992_v36 = vsel %vm1991_vm4, %v1987_v43, %v8745_v34  ;;  %8168 = vmatpush3.bf16.msra.mxu0 %v8851_v39  ;;  %v7550_v43 = vld [vmem:[%s11131_s12] ss:$0 sm:$0xff] }
 0xc9f   : > { %v1996_v40 = vpack.c.bf16 %v1993_v41, %v1992_v36 }
 0xca1   : > { %8161 = vmatprep.mubr.msk.bf16.mxu1 %vm680_vm0, %v1996_v40 }
 0xca2   : > { %8162 = vmatmul.mubr.msk.bf16.vlgmr.msra.gmra.mrb[40].mxu1 %vm680_vm0, %v1997_v35 }
 0xca3   : > { %8174 = vmatpush3.bf16.msra.mxu1 %v8852_v18 }
 0xca4   : > { %8175 = vmatprep.subr.bf16.mxu1 %v8853_v19 }
 0xca7   : > { %8176 = vmatpush3.bf16.msra.mxu1 %v8853_v19 }
 0xd75   : > { %v8163_v42 = vpop.f32.mrb[40].mxu1 }
 0xd76   : > { %v2056_v44 = vpop.f32.mrb[41].mxu1  ;;  %v2065_v23 = vadd.f32 %v8163_v42, %v7545_v27  ;;  %v7551_v42 = vld [vmem:[%s11132_s13] ss:$0 sm:$0xff] }
 0xd77   : > { %v2057_v28 = vadd.f32 %v7545_v27, %v2056_v44  ;;  %v8164_v26 = vpop.f32.mrb[42].mxu1 }
 0xd78   : > { %v2059_v45 = vpop.f32.mrb[43].mxu1  ;;  %v9970_v50 = vadd.f32 %v9219_v54, %v2065_v23  ;;  %v2068_v52 = vadd.f32 %v8164_v26, %v7545_v27 }
 0xd79   : > { %v9967_v51 = vadd.f32 %v9218_v47, %v2057_v28  ;;  %v2060_v53 = vadd.f32 %v7545_v27, %v2059_v45 }
 0xd7a   : > { %v9980_v57 = vadd.f32 %v9221_v56, %v2068_v52  ;;  %v2081_v58 = vsel %vm680_vm0, %v9970_v50, 0.0  ;;  %v8854_v56 = vld [vmem:[%s11135_s16 + $0x10] sm:$0xff]  }
 0xd7b   : > { %v9973_v48 = vadd.f32 %v9220_v46, %v2060_v53  ;;  %v2075_v49 = vsel %vm680_vm0, %v9967_v51, 0.0  ;;  %8177 = vmatprep.subr.bf16.mxu1 %v8854_v56 }
 0xd7c   : > { %2076 = vadd.xlane.f32.xlu0 %v2075_v49  ;;  %v2084_v59 = vsel %vm680_vm0, %v9980_v57, 0.0  ;;  %8178 = vmatpush3.bf16.msra.mxu1 %v8854_v56 }
 0xd7d   : > { %v2078_v55 = vsel %vm680_vm0, %v9973_v48, 0.0 }
 0xd7e   : > { %2079 = vadd.xlane.f32.xlu1 %v2078_v55 }
 0xd80   : > { %2082 = vadd.xlane.f32.xlu0 %v2081_v58  ;;  %v8855_v58 = vld [vmem:[%s11135_s16 + $0x18] sm:$0xff]  }
 0xd81   : > { %8179 = vmatprep.subr.bf16.mxu1 %v8855_v58 }
 0xd82   : > { %8180 = vmatpush3.bf16.msra.mxu1 %v8855_v58 }
 0xd84   : > { %2085 = vadd.xlane.f32.xlu0 %v2084_v59  ;;  %v7552_v59 = vld [vmem:[%s11193_s27] ss:$0 sm:$0xff] }
 0xe09   : > { %v2077_v60 = vpop.xlane.xlu0 %2076 }
 0xe0a   : > { %v2087_v61 = vmul.f32 0.03125, %v2077_v60 }
 0xe0b   : > { %v2080_v62 = vpop.xlane.xlu1 %2079 }
 0xe0c   : > { %v2091_v63 = vsub.f32 %v9967_v51, %v2087_v61  ;;  %v2088_v0 = vmul.f32 0.03125, %v2080_v62 }
 0xe0d   : > { %v2083_v1 = vpop.xlane.xlu0 %2082 }
 0xe0e   : > { %v2092_v3 = vsub.f32 %v9973_v48, %v2088_v0  ;;  %v2089_v4 = vmul.f32 0.03125, %v2083_v1  ;;  %v2095_v5 = vmul.f32 %v2091_v63, %v2091_v63 }
 0xe10   : > { %v2093_v6 = vsub.f32 %v9970_v50, %v2089_v4  ;;  %v2099_v7 = vsel %vm680_vm0, %v2095_v5, 0.0  ;;  %v2096_v8 = vmul.f32 %v2092_v3, %v2092_v3 }
 0xe11   : > { %2100 = vadd.xlane.f32.xlu0 %v2099_v7  ;;  %v2086_v9 = vpop.xlane.xlu0 %2085 }
 0xe12   : > { %v2090_v10 = vmul.f32 0.03125, %v2086_v9  ;;  %v2102_v11 = vsel %vm680_vm0, %v2096_v8, 0.0  ;;  %v2097_v12 = vmul.f32 %v2093_v6, %v2093_v6 }
 0xe13   : > { %2103 = vadd.xlane.f32.xlu1 %v2102_v11  ;;  %v7557_v11 = vld [vmem:[%s11195_s24] ss:$0 sm:$0xff] }
 0xe14   : > { %v2094_v13 = vsub.f32 %v9980_v57, %v2090_v10  ;;  %v2105_v14 = vsel %vm680_vm0, %v2097_v12, 0.0 }
 0xe15   : > { %2106 = vadd.xlane.f32.xlu0 %v2105_v14 }
 0xe16   : > { %v2098_v15 = vmul.f32 %v2094_v13, %v2094_v13 }
 0xe18   : > { %v2108_v16 = vsel %vm680_vm0, %v2098_v15, 0.0 }
 0xe19   : > { %2109 = vadd.xlane.f32.xlu1 %v2108_v16 }
 0xe9e   : > { %v2101_v20 = vpop.xlane.xlu0 %2100 }
 0xe9f   : > { %v2111_v21 = vmul.f32 0.03125, %v2101_v20 }
 0xea0   : > { %v2104_v22 = vpop.xlane.xlu1 %2103 }
 0xea1   : > { %v2115_v24 = vadd.f32 1e-05, %v2111_v21  ;;  %v2112_v25 = vmul.f32 0.03125, %v2104_v22 }
 0xea2   : > { %v2107_v29 = vpop.xlane.xlu0 %2106 }
 0xea3   : > { %8970 = vrsqrt.f32 %v2115_v24  ;;  %v2116_v30 = vadd.f32 1e-05, %v2112_v25  ;;  %v2113_v31 = vmul.f32 0.03125, %v2107_v29 }
 0xea5   : > { %8972 = vrsqrt.f32 %v2116_v30  ;;  %v2117_v37 = vadd.f32 1e-05, %v2113_v31 }
 0xea6   : > { %v2110_v32 = vpop.xlane.xlu1 %2109 }
 0xea7   : > { %8974 = vrsqrt.f32 %v2117_v37  ;;  %v2114_v35 = vmul.f32 0.03125, %v2110_v32 }
 0xea9   : > { %v2118_v33 = vadd.f32 1e-05, %v2114_v35 }
 0xeab   : > { %8976 = vrsqrt.f32 %v2118_v33 }
 0xead   : > { %v8971_v34 = vpop.eup %8970 }
 0xeae   : > { %v2123_v38 = vmul.f32 %v8971_v34, %v2091_v63 }
 0xeaf   : > { %v8973_v41 = vpop.eup %8972 }
 0xeb0   : > { %v2124_v36 = vmul.f32 %v8973_v41, %v2092_v3  ;;  %v2133_v40 = vmul.f32 %v7550_v43, %v2123_v38 }
 0xeb1   : > { %v8975_v27 = vpop.eup %8974 }
 0xeb2   : > { %v2125_v44 = vmul.f32 %v8975_v27, %v2093_v6  ;;  %v2134_v23 = vmul.f32 %v7550_v43, %v2124_v36  ;;  %v2143_v28 = vadd.f32 %v7551_v42, %v2133_v40 }
 0xeb4   : > { %v2144_v26 = vadd.f32 %v7551_v42, %v2134_v23  ;;  %v2135_v54 = vmul.f32 %v7550_v43, %v2125_v44 }
 0xeb5   : > { %v8977_v45 = vpop.eup %8976 }
 0xeb6   : > { %v2126_v47 = vmul.f32 %v8977_v45, %v2094_v13  ;;  %v2147_v53 = vpack.c.bf16 %v2144_v26, %v2143_v28  ;;  %v2145_v46 = vadd.f32 %v7551_v42, %v2135_v54  ;;  %v8856_v26 = vld [vmem:[%s11192_s23 + $0x10] sm:$0xff]  }
 0xeb7   : > { %v8857_v45 = vld [vmem:[#allocation5 + $0x10] sm:$0xff]   ;;  %8185 = vmatprep.subr.bf16.mxu0 %v8856_v26 }
 0xeb8   : > { %8169 = vmatprep.mubr.msk.bf16.mxu0 %vm680_vm0, %v2147_v53  ;;  %v2136_v52 = vmul.f32 %v7550_v43, %v2126_v47  ;;  %v8858_v47 = vld [vmem:[%s11192_s23 + $0x18] sm:$0xff]   ;;  %8201 = vmatprep.subr.bf16.mxu1 %v8857_v45  ;;  %v8860_v54 = vld [vmem:[%s11123_s4 + $0x10] sm:$0xff]  }
 0xeb9   : > { %v8859_v53 = vld [vmem:[#allocation5 + $0x18] sm:$0xff]  }
 0xeba   : > { %v2146_v49 = vadd.f32 %v7551_v42, %v2136_v52 }
 0xebc   : > { %v2148_v55 = vpack.c.bf16 %v2146_v49, %v2145_v46 }
 0xebe   : > { %8170 = vmatmul.mubr.msk.bf16.vlgmr.msra.gmra.mrb[36].mxu0 %vm680_vm0, %v2148_v55 }
 0xebf   : > { %8186 = vmatpush3.bf16.msra.mxu0 %v8856_v26 }
 0xec0   : > { %8187 = vmatprep.subr.bf16.mxu0 %v8858_v47 }
 0xec3   : > { %8188 = vmatpush3.bf16.msra.mxu0 %v8858_v47 }
 0xec4   : > { %8193 = vmatprep.subr.bf16.mxu0 %v8860_v54 }
 0xf91   : > { %v8171_v60 = vpop.f32.mrb[36].mxu0 }
 0xf92   : > { %v2216_v61 = vadd.f32 %v8171_v60, %v7552_v59  ;;  %v2207_v62 = vpop.f32.mrb[37].mxu0 }
 0xf93   : > { %v2208_v63 = vadd.f32 %v7552_v59, %v2207_v62  ;;  %v8172_v0 = vpop.f32.mrb[38].mxu0 }
 0xf94   : > { %v2219_v1 = vadd.f32 %v8172_v0, %v7552_v59  ;;  %v2210_v3 = vpop.f32.mrb[39].mxu0  ;;  %v2224_v5 = vmax.f32 %v2216_v61, 0.0 }
 0xf95   : > { %v2211_v4 = vadd.f32 %v7552_v59, %v2210_v3  ;;  %v2222_v7 = vmax.f32 %v2208_v63, 0.0  ;;  %v7590_v3 = vld [vmem:[%s11129_s10 + $0x1] ss:$0 sm:$0xff] }
 0xf96   : > { %v2225_v6 = vmax.f32 %v2219_v1, 0.0 }
 0xf97   : > { %v2223_v8 = vmax.f32 %v2211_v4, 0.0 }
 0xf98   : > { %v2227_v9 = vpack.c.bf16 %v2225_v6, %v2224_v5 }
 0xf99   : > { %v2226_v10 = vpack.c.bf16 %v2223_v8, %v2222_v7 }
 0xf9b   : > { %8181 = vmatprep.mubr.msk.bf16.mxu1 %vm2258_vm5, %v2226_v10  ;;  %v7591_v10 = vld [vmem:[%s11130_s11 + $0x1] ss:$0 sm:$0xff] }
 0xf9c   : > { %8182 = vmatmul.mubr.msk.bf16.vlgmr.msra.gmra.mrb[44].mxu1 %vm2258_vm5, %v2227_v9 }
 0xf9d   : > { %8202 = vmatpush3.bf16.msra.mxu1 %v8857_v45 }
 0xf9e   : > { %8203 = vmatprep.subr.bf16.mxu1 %v8859_v53 }
 0xfa1   : > { %8204 = vmatpush3.bf16.msra.mxu1 %v8859_v53 }
 0xfa2   : > { %8215 = vmatprep.subr.bf16.mxu1 %v9422_v2 }
0x106f   : > { %v8183_v12 = vpop.f32.mrb[44].mxu1 }
0x1070   : > { %v2308_v13 = vadd.f32 %v8183_v12, %v7557_v11  ;;  %v2299_v14 = vpop.f32.mrb[45].mxu1 }
0x1071   : > { %v2300_v15 = vadd.f32 %v7557_v11, %v2299_v14  ;;  %v8184_v16 = vpop.f32.mrb[46].mxu1 }
0x1072   : > { %v10023_v17 = vadd.f32 %v2308_v13, %v9970_v50  ;;  %v2302_v39 = vpop.f32.mrb[47].mxu1  ;;  %v2311_v18 = vadd.f32 %v8184_v16, %v7557_v11 }
0x1073   : > { %v2303_v19 = vadd.f32 %v7557_v11, %v2302_v39  ;;  %v10026_v20 = vadd.f32 %v2300_v15, %v9967_v51 }
0x1074   : > { %v2375_v21 = vsel %vm680_vm0, %v10023_v17, 0.0  ;;  %v10034_v24 = vadd.f32 %v2311_v18, %v9980_v57 }
0x1075   : > { %v10031_v22 = vadd.f32 %v2303_v19, %v9973_v48  ;;  %2376 = vadd.xlane.f32.xlu1 %v2375_v21  ;;  %v2381_v25 = vsel %vm680_vm0, %v10026_v20, 0.0 }
0x1076   : > { %v2378_v51 = vsel %vm680_vm0, %v10034_v24, 0.0 }
0x1077   : > { %v2372_v50 = vsel %vm680_vm0, %v10031_v22, 0.0 }
0x1078   : > { %2373 = vadd.xlane.f32.xlu0 %v2372_v50 }
0x1079   : > { %2382 = vadd.xlane.f32.xlu1 %v2381_v25  ;;  %v8861_v25 = vld [vmem:[%s11123_s4 + $0x18] sm:$0xff]  }
0x107c   : > { %2379 = vadd.xlane.f32.xlu0 %v2378_v51  ;;  %v7592_v51 = vld [vmem:[%s11122_s3 + $0x1] ss:$0 sm:$0xff] }
0x1102   : > { %v2377_v29 = vpop.xlane.xlu1 %2376 }
0x1103   : > { %v2385_v30 = vmul.f32 0.03125, %v2377_v29 }
0x1105   : > { %v2389_v48 = vsub.f32 %v10023_v17, %v2385_v30  ;;  %v2374_v31 = vpop.xlane.xlu0 %2373 }
0x1106   : > { %v2384_v37 = vmul.f32 0.03125, %v2374_v31  ;;  %v2383_v57 = vpop.xlane.xlu1 %2382 }
0x1107   : > { %v2387_v32 = vmul.f32 0.03125, %v2383_v57  ;;  %v2393_v35 = vmul.f32 %v2389_v48, %v2389_v48 }
0x1108   : > { %v2388_v33 = vsub.f32 %v10031_v22, %v2384_v37 }
0x1109   : > { %v2391_v34 = vsub.f32 %v10026_v20, %v2387_v32  ;;  %v2380_v43 = vpop.xlane.xlu0 %2379  ;;  %v2399_v38 = vsel %vm680_vm0, %v2393_v35, 0.0 }
0x110a   : > { %v2386_v41 = vmul.f32 0.03125, %v2380_v43  ;;  %2400 = vadd.xlane.f32.xlu1 %v2399_v38  ;;  %v2392_v36 = vmul.f32 %v2388_v33, %v2388_v33 }
0x110b   : > { %v2395_v40 = vmul.f32 %v2391_v34, %v2391_v34 }
0x110c   : > { %v2390_v27 = vsub.f32 %v10034_v24, %v2386_v41  ;;  %v2396_v42 = vsel %vm680_vm0, %v2392_v36, 0.0 }
0x110d   : > { %2397 = vadd.xlane.f32.xlu0 %v2396_v42  ;;  %v2405_v44 = vsel %vm680_vm0, %v2395_v40, 0.0 }
0x110e   : > { %2406 = vadd.xlane.f32.xlu1 %v2405_v44  ;;  %v2394_v23 = vmul.f32 %v2390_v27, %v2390_v27 }
0x1110   : > { %v2402_v28 = vsel %vm680_vm0, %v2394_v23, 0.0 }
0x1111   : > { %2403 = vadd.xlane.f32.xlu0 %v2402_v28 }
0x1197   : > { %v2401_v52 = vpop.xlane.xlu1 %2400 }
0x1198   : > { %v2409_v46 = vmul.f32 0.03125, %v2401_v52 }
0x119a   : > { %v2413_v49 = vadd.f32 1e-05, %v2409_v46  ;;  %v2398_v55 = vpop.xlane.xlu0 %2397  ;;  %v7597_v46 = vld [vmem:[%s11124_s5 + $0x1] ss:$0 sm:$0xff] }
0x119b   : > { %v2408_v56 = vmul.f32 0.03125, %v2398_v55  ;;  %v2407_v58 = vpop.xlane.xlu1 %2406 }
0x119c   : > { %8978 = vrsqrt.f32 %v2413_v49  ;;  %v2411_v59 = vmul.f32 0.03125, %v2407_v58 }
0x119d   : > { %v2412_v60 = vadd.f32 1e-05, %v2408_v56 }
0x119e   : > { %v2415_v61 = vadd.f32 1e-05, %v2411_v59  ;;  %v2404_v62 = vpop.xlane.xlu0 %2403 }
0x119f   : > { %8980 = vrsqrt.f32 %v2412_v60  ;;  %v2410_v63 = vmul.f32 0.03125, %v2404_v62 }
0x11a0   : > { %8982 = vrsqrt.f32 %v2415_v61 }
0x11a1   : > { %v2414_v0 = vadd.f32 1e-05, %v2410_v63 }
0x11a3   : > { %8984 = vrsqrt.f32 %v2414_v0 }
0x11a6   : > { %v8979_v1 = vpop.eup %8978 }
0x11a7   : > { %v2421_v4 = vmul.f32 %v8979_v1, %v2389_v48  ;;  %v7602_v48 = vld [vmem:[%s11126_s7 + $0x1] ss:$0 sm:$0xff] }
0x11a9   : > { %v8981_v5 = vpop.eup %8980  ;;  %v2431_v8 = vmul.f32 %v7590_v3, %v2421_v4 }
0x11aa   : > { %v8983_v6 = vpop.eup %8982  ;;  %v2420_v7 = vmul.f32 %v8981_v5, %v2388_v33  ;;  %v10121_v5 = vld [vmem:[#allocation2 + $0x10] sm:$0xff] }
0x11ab   : > { %v2423_v9 = vmul.f32 %v8983_v6, %v2391_v34  ;;  %v2441_v15 = vadd.f32 %v7591_v10, %v2431_v8  ;;  %v10123_v8 = vld [vmem:[#allocation2 + $0x8] sm:$0xff] }
0x11ac   : > { %v2430_v11 = vmul.f32 %v7590_v3, %v2420_v7 }
0x11ad   : > { %v8985_v12 = vpop.eup %8984  ;;  %v2433_v16 = vmul.f32 %v7590_v3, %v2423_v9 }
0x11ae   : > { %v2422_v13 = vmul.f32 %v8985_v12, %v2390_v27  ;;  %v2440_v14 = vadd.f32 %v7591_v10, %v2430_v11  ;;  %v10126_v12 = vld [vmem:[#allocation2 + $0x18] sm:$0xff] }
0x11af   : > { %v2443_v21 = vadd.f32 %v7591_v10, %v2433_v16 }
0x11b0   : > { %v2444_v39 = vpack.c.bf16 %v2441_v15, %v2440_v14  ;;  %v2432_v18 = vmul.f32 %v7590_v3, %v2422_v13  ;;  %v10119_v3 = vld [vmem:[#allocation2] sm:$0xff] }
0x11b2   : > { %8189 = vmatprep.mubr.msk.bf16.mxu0 %vm680_vm0, %v2444_v39  ;;  %8205 = vmatprep.mubr.msk.bf16.mxu1 %vm680_vm0, %v2444_v39  ;;  %v2442_v19 = vadd.f32 %v7591_v10, %v2432_v18 }
0x11b4   : > { %v2445_v50 = vpack.c.bf16 %v2443_v21, %v2442_v19 }
0x11b6   : > { %8190 = vmatmul.mubr.msk.bf16.vlgmr.msra.gmra.mrb[40].mxu0 %vm680_vm0, %v2445_v50  ;;  %8206 = vmatmul.mubr.msk.bf16.vlgmr.msra.gmra.mrb[48].mxu1 %vm680_vm0, %v2445_v50 }
0x11b7   : > { %8194 = vmatpush3.bf16.msra.mxu0 %v8860_v54  ;;  %8197 = vmatprep.mubr.msk.bf16.mxu0 %vm680_vm0, %v2444_v39 }
0x11b8   : > { %8195 = vmatprep.subr.bf16.mxu0 %v8861_v25  ;;  %8217 = vmatprep.mubr.msk.bf16.mxu1 %vm9423_vm1, %v9422_v2 }
0x11bb   : > { %8196 = vmatpush3.bf16.msra.mxu0 %v8861_v25 }
0x11bc   : > { %8209 = vmatprep.subr.bf16.mxu0 %v9422_v2 }
0x11be   : > { %8198 = vmatmul.mubr.msk.bf16.vlgmr.msra.gmra.mrb[44].mxu0 %vm680_vm0, %v2445_v50 }
0x11bf   : > { %8211 = vmatprep.mubr.msk.bf16.mxu0 %vm9423_vm1, %v9422_v2 }
0x1289   : > { %v8191_v29 = vpop.f32.mrb[40].mxu0  ;;  %v8207_v30 = vpop.f32.mrb[48].mxu1 }
0x128a   : > { %v2513_v31 = vadd.f32 %v8191_v29, %v7592_v51  ;;  %v2504_v37 = vpop.f32.mrb[41].mxu0  ;;  %v2638_v57 = vpop.f32.mrb[49].mxu1  ;;  %v2647_v34 = vadd.f32 %v8207_v30, %v7602_v48 }
0x128b   : > { %v2505_v32 = vadd.f32 %v7592_v51, %v2504_v37  ;;  %v8192_v35 = vpop.f32.mrb[42].mxu0  ;;  %v8208_v33 = vpop.f32.mrb[50].mxu1  ;;  %v2639_v40 = vadd.f32 %v7602_v48, %v2638_v57 }
0x128c   : > { %v2516_v43 = vadd.f32 %v8192_v35, %v7592_v51  ;;  %v2650_v38 = vadd.f32 %v8208_v33, %v7602_v48  ;;  %v2507_v41 = vpop.f32.mrb[43].mxu0  ;;  %v2641_v36 = vpop.f32.mrb[51].mxu1  ;;  %v2655_v44 = vmul.f32 0.35355338, %v2513_v31 }
0x128d   : > { %v2508_v27 = vadd.f32 %v7592_v51, %v2507_v41  ;;  %v2642_v42 = vadd.f32 %v7602_v48, %v2641_v36  ;;  %v2653_v26 = vmul.f32 0.35355338, %v2505_v32 }
0x128e   : > { %v2656_v23 = vmul.f32 0.35355338, %v2516_v43  ;;  %v10086_v28 = vpack.c.bf16 %v2650_v38, %v2647_v34 }
0x128f   : > { %v2654_v45 = vmul.f32 0.35355338, %v2508_v27  ;;  %v10088_v47 = vpack.c.bf16 %v2642_v42, %v2639_v40 }
0x1290   : > { %v10090_v53 = vpack.c.bf16 %v2656_v23, %v2655_v44 }
0x1291   : > { %v10092_v54 = vpack.c.bf16 %v2654_v45, %v2653_v26  ;;  %v8199_v52 = vpop.f32.mrb[44].mxu0 }
0x1292   : > { %v2571_v49 = vpop.f32.mrb[45].mxu0  ;;  %v2580_v56 = vadd.f32 %v8199_v52, %v7597_v46 }
0x1293   : > { %v8200_v55 = vpop.f32.mrb[46].mxu0  ;;  %v2572_v60 = vadd.f32 %v7597_v46, %v2571_v49 }
0x1294   : > { %v2583_v58 = vadd.f32 %v8200_v55, %v7597_v46  ;;  %v2574_v59 = vpop.f32.mrb[47].mxu0 }
0x1295   : > { %v2575_v61 = vadd.f32 %v7597_v46, %v2574_v59 }
0x1296   : > { %v10097_v62 = vpack.c.bf16 %v2583_v58, %v2580_v56 }
0x1297   : > { %v10099_v63 = vpack.c.bf16 %v2575_v61, %v2572_v60 }
0x1298   : > { %v2714_v0 = vsel %vm973_vm2, %v10097_v62, 0 }
0x1299   : > { %8216 = vmatpush3.bf16.xpose.msra.mxu1 %v2714_v0  ;;  %v2667_v1 = vsel %vm973_vm2, %v10099_v63, 0 }
0x129a   : > { %8210 = vmatpush3.bf16.xpose.msra.mxu0 %v2667_v1  ;;  %8227 = vmatprep.subr.bf16.mxu1 %v9422_v2 }
0x129b   : > { %8221 = vmatprep.subr.bf16.mxu0 %v9422_v2 }
0x12a0   : > { %8218 = vmatmul.mubr.msk.bf16.vlgmr.msra.gmra.mrb[52].mxu1 %vm973_vm2, %v10090_v53 }
0x12a1   : > { %8212 = vmatmul.mubr.msk.bf16.vlgmr.msra.gmra.mrb[48].mxu0 %vm973_vm2, %v10092_v54  ;;  %8228 = vmatpush3.bf16.msra.mxu1 %v10086_v28 }
0x12a2   : > { %8222 = vmatpush3.bf16.msra.mxu0 %v10088_v47  ;;  %8229 = vmatprep.mubr.msk.bf16.mxu1 %vm9423_vm1, %v9422_v2 }
0x12a3   : > { %8239 = vmatprep.subr.bf16.mxu1 %v9422_v2  ;;  %8223 = vmatprep.mubr.msk.bf16.mxu0 %vm9423_vm1, %v9422_v2 }
0x12a4   : > { %8233 = vmatprep.subr.bf16.mxu0 %v9422_v2 }
0x1373   : > { %v2750_v4 = vpop.f32.mrb[52].mxu1 }
0x1374   : > { %v2703_v6 = vpop.f32.mrb[48].mxu0  ;;  %v8219_v7 = vpop.f32.mrb[53].mxu1  ;;  %v2751_v15 = vadd.f32 %v2750_v4, %v10121_v5 }
0x1375   : > { %v2704_v9 = vadd.f32 %v2703_v6, %v10119_v3  ;;  %v8213_v10 = vpop.f32.mrb[49].mxu0  ;;  %v2753_v11 = vpop.f32.mrb[54].mxu1 }
0x1376   : > { %v2706_v13 = vpop.f32.mrb[50].mxu0  ;;  %v8220_v14 = vpop.f32.mrb[55].mxu1  ;;  %v2754_v19 = vadd.f32 %v2753_v11, %v10126_v12  ;;  %v2763_v50 = vsel %vm1068_vm3, %v2751_v15, -inf }
0x1377   : > { %v2707_v16 = vadd.f32 %v2706_v13, %v10123_v8  ;;  %v8214_v39 = vpop.f32.mrb[51].mxu0  ;;  %v2757_v18 = vsel %vm1068_vm3, %v2704_v9, -inf }
0x1378   : > { %2758 = vmax.xlane.f32.xlu0 %v2757_v18  ;;  %v2766_v25 = vsel %vm1068_vm3, %v2754_v19, -inf }
0x1379   : > { %v2760_v21 = vsel %vm1068_vm3, %v2707_v16, -inf }
0x137a   : > { %2761 = vmax.xlane.f32.xlu1 %v2760_v21 }
0x137c   : > { %2764 = vmax.xlane.f32.xlu0 %v2763_v50 }
0x137e   : > { %2767 = vmax.xlane.f32.xlu1 %v2766_v25 }
0x138f   : > { %2948 = vrot.lane.b32.xlu1 %v10097_v62, %s9424_s26 }
0x1405   : > { %v2759_v51 = vpop.xlane.xlu0 %2758 }
0x1406   : > { %v2769_v29 = vsub.f32 %v2704_v9, %v2759_v51 }
0x1407   : > { %v2762_v30 = vpop.xlane.xlu1 %2761 }
0x1408   : > { %v2770_v31 = vsub.f32 %v2707_v16, %v2762_v30  ;;  %v2773_v57 = vmul.f32 1.442695, %v2769_v29 }
0x1409   : > { %v2765_v48 = vpop.xlane.xlu0 %2764 }
0x140a   : > { %v2771_v37 = vsub.f32 %v2751_v15, %v2765_v48  ;;  %v2775_v34 = vmul.f32 1.442695, %v2770_v31 }
0x140b   : > { %v2768_v32 = vpop.xlane.xlu1 %2767 }
0x140c   : > { %v2777_v35 = vmul.f32 1.442695, %v2771_v37  ;;  %v2772_v33 = vsub.f32 %v2754_v19, %v2768_v32 }
0x140e   : > { %8986 = vpow2.f32 %v2777_v35  ;;  %v2779_v43 = vmul.f32 1.442695, %v2772_v33 }
0x140f   : > { %8988 = vpow2.f32 %v2773_v57  ;;  %v2949_v26 = vpop.permute.xlu1 %2948 }
0x1410   : > { %8990 = vpow2.f32 %v2779_v43  ;;  %v2954_v1 = vsel %vm973_vm2, %v2949_v26, 0 }
0x1411   : > { %8992 = vpow2.f32 %v2775_v34 }
0x1418   : > { %v8987_v38 = vpop.eup %8986 }
0x1419   : > { %v8989_v41 = vpop.eup %8988  ;;  %v2787_v36 = vsel %vm1068_vm3, %v8987_v38, 0.0 }
0x141a   : > { %v8991_v40 = vpop.eup %8990  ;;  %2788 = vadd.xlane.f32.xlu0 %v2787_v36  ;;  %v2781_v44 = vsel %vm1068_vm3, %v8989_v41, 0.0 }
0x141b   : > { %v2790_v27 = vsel %vm1068_vm3, %v8991_v40, 0.0  ;;  %v8993_v42 = vpop.eup %8992 }
0x141c   : > { %2791 = vadd.xlane.f32.xlu1 %v2790_v27  ;;  %v2784_v23 = vsel %vm1068_vm3, %v8993_v42, 0.0 }
0x141e   : > { %2782 = vadd.xlane.f32.xlu0 %v2781_v44 }
0x1420   : > { %2785 = vadd.xlane.f32.xlu1 %v2784_v23 }
0x1431   : > { %2892 = vrot.lane.b32.xlu1 %v10092_v54, %s9424_s26 }
0x1434   : > { %2895 = vrot.lane.b32.xlu0 %v10099_v63, %s9424_s26 }
0x1435   : > { %2945 = vrot.lane.b32.xlu1 %v10090_v53, %s9424_s26 }
0x14a7   : > { %v2789_v45 = vpop.xlane.xlu0 %2788 }
0x14a8   : > { %8994 = vrcp.f32 %v2789_v45 }
0x14a9   : > { %v2792_v52 = vpop.xlane.xlu1 %2791 }
0x14aa   : > { %8996 = vrcp.f32 %v2792_v52 }
0x14ab   : > { %v2783_v46 = vpop.xlane.xlu0 %2782 }
0x14ac   : > { %8998 = vrcp.f32 %v2783_v46 }
0x14ad   : > { %v2786_v49 = vpop.xlane.xlu1 %2785 }
0x14ae   : > { %9000 = vrcp.f32 %v2786_v49 }
0x14af   : > { %v2896_v7 = vpop.permute.xlu0 %2895 }
0x14b0   : > { %v2901_v11 = vsel %vm973_vm2, %v2896_v7, 0 }
0x14b1   : > { %v2893_v9 = vpop.permute.xlu1 %2892 }
0x14b2   : > { %v8995_v55 = vpop.eup %8994 }
0x14b3   : > { %v2799_v58 = vmul.f32 %v8995_v55, %v8987_v38 }
0x14b4   : > { %v8997_v56 = vpop.eup %8996 }
0x14b5   : > { %v2800_v59 = vmul.f32 %v8997_v56, %v8991_v40  ;;  %v2946_v13 = vpop.permute.xlu1 %2945 }
0x14b6   : > { %v8999_v60 = vpop.eup %8998 }
0x14b7   : > { %v2802_v61 = vpack.c.bf16 %v2800_v59, %v2799_v58  ;;  %v2797_v4 = vmul.f32 %v8999_v60, %v8989_v41 }
0x14b8   : > { %v9001_v0 = vpop.eup %9000 }
0x14b9   : > { %v2798_v6 = vmul.f32 %v9001_v0, %v8993_v42  ;;  %8230 = vmatmul.mubr.msk.bf16.vlgmr.msra.gmra.mrb[56].mxu1 %vm1068_vm3, %v2802_v61 }
0x14ba   : > { %8240 = vmatpush3.bf16.xpose.msra.mxu1 %v2954_v1  ;;  %8241 = vmatprep.mubr.msk.bf16.mxu1 %vm9423_vm1, %v9422_v2 }
0x14bb   : > { %v2801_v10 = vpack.c.bf16 %v2798_v6, %v2797_v4  ;;  %8251 = vmatprep.subr.bf16.mxu1 %v9422_v2 }
0x14bd   : > { %8224 = vmatmul.mubr.msk.bf16.vlgmr.msra.gmra.mrb[52].mxu0 %vm1068_vm3, %v2801_v10 }
0x14be   : > { %8234 = vmatpush3.bf16.xpose.msra.mxu0 %v2901_v11  ;;  %8235 = vmatprep.mubr.msk.bf16.mxu0 %vm9423_vm1, %v9422_v2 }
0x14bf   : > { %8245 = vmatprep.subr.bf16.mxu0 %v9422_v2 }
0x14c1   : > { %8242 = vmatmul.mubr.msk.bf16.vlgmr.msra.gmra.mrb[60].mxu1 %vm973_vm2, %v2946_v13 }
0x14c2   : > { %8253 = vmatprep.mubr.msk.bf16.mxu1 %vm9423_vm1, %v9422_v2 }
0x14c5   : > { %8236 = vmatmul.mubr.msk.bf16.vlgmr.msra.gmra.mrb[56].mxu0 %vm973_vm2, %v2893_v9 }
0x14c6   : > { %8247 = vmatprep.mubr.msk.bf16.mxu0 %vm9423_vm1, %v9422_v2 }
0x158c   : > { %v10163_v14 = vpop.f32.mrb[56].mxu1 }
0x158d   : > { %v8231_v15 = vpop.f32.mrb[57].mxu1 }
0x158e   : > { %v10165_v16 = vpop.f32.mrb[58].mxu1 }
0x158f   : > { %v8232_v39 = vpop.f32.mrb[59].mxu1 }
0x1590   : > { %v10167_v18 = vpop.f32.mrb[52].mxu0 }
0x1591   : > { %v8225_v19 = vpop.f32.mrb[53].mxu0 }
0x1592   : > { %v10169_v21 = vpop.f32.mrb[54].mxu0 }
0x1593   : > { %v8226_v50 = vpop.f32.mrb[55].mxu0 }
0x1594   : > { %v2990_v25 = vpop.f32.mrb[60].mxu1 }
0x1595   : > { %v8243_v51 = vpop.f32.mrb[61].mxu1  ;;  %v2991_v32 = vadd.f32 %v2990_v25, %v10121_v5 }
0x1596   : > { %v2993_v29 = vpop.f32.mrb[62].mxu1 }
0x1597   : > { %v8244_v30 = vpop.f32.mrb[63].mxu1  ;;  %v2994_v38 = vadd.f32 %v2993_v29, %v10126_v12  ;;  %v3003_v41 = vsel %vm1068_vm3, %v2991_v32, -inf }
0x1598   : > { %v2937_v48 = vpop.f32.mrb[56].mxu0 }
0x1599   : > { %v2938_v31 = vadd.f32 %v2937_v48, %v10119_v3  ;;  %v8237_v37 = vpop.f32.mrb[57].mxu0  ;;  %v3006_v36 = vsel %vm1068_vm3, %v2994_v38, -inf }
0x159a   : > { %v2940_v57 = vpop.f32.mrb[58].mxu0 }
0x159b   : > { %v2941_v35 = vadd.f32 %v2940_v57, %v10123_v8  ;;  %v8238_v33 = vpop.f32.mrb[59].mxu0  ;;  %v2997_v34 = vsel %vm1068_vm3, %v2938_v31, -inf }
0x159c   : > { %2998 = vmax.xlane.f32.xlu0 %v2997_v34 }
0x159d   : > { %v3000_v43 = vsel %vm1068_vm3, %v2941_v35, -inf }
0x159e   : > { %3001 = vmax.xlane.f32.xlu1 %v3000_v43 }
0x15a0   : > { %3004 = vmax.xlane.f32.xlu0 %v3003_v41 }
0x15a4   : > { %3007 = vmax.xlane.f32.xlu0 %v3006_v36 }
0x15af   : > { %3092 = vrot.lane.b32.xlu1 %v10086_v28, %s9424_s26 }
0x15b3   : > { %3141 = vrot.lane.b32.xlu1 %v10099_v63, %s9425_s17 }
0x1629   : > { %v2999_v40 = vpop.xlane.xlu0 %2998 }
0x162a   : > { %v3009_v42 = vsub.f32 %v2938_v31, %v2999_v40 }
0x162b   : > { %v3002_v27 = vpop.xlane.xlu1 %3001 }
0x162c   : > { %v3013_v45 = vmul.f32 1.442695, %v3009_v42  ;;  %v3010_v52 = vsub.f32 %v2941_v35, %v3002_v27 }
0x162d   : > { %v3005_v44 = vpop.xlane.xlu0 %3004 }
0x162e   : > { %v3011_v23 = vsub.f32 %v2991_v32, %v3005_v44  ;;  %v3015_v56 = vmul.f32 1.442695, %v3010_v52 }
0x162f   : > { %v3093_v26 = vpop.permute.xlu1 %3092 }
0x1630   : > { %v3017_v46 = vmul.f32 1.442695, %v3011_v23  ;;  %8252 = vmatpush3.bf16.msra.mxu1 %v3093_v26 }
0x1631   : > { %v3008_v49 = vpop.xlane.xlu0 %3007  ;;  %8263 = vmatprep.subr.bf16.mxu1 %v9422_v2 }
0x1632   : > { %9002 = vpow2.f32 %v3017_v46  ;;  %v3012_v55 = vsub.f32 %v2994_v38, %v3008_v49 }
0x1633   : > { %9004 = vpow2.f32 %v3013_v45  ;;  %v3142_v9 = vpop.permute.xlu1 %3141 }
0x1634   : > { %v3019_v58 = vmul.f32 1.442695, %v3012_v55  ;;  %v3147_v33 = vsel %vm973_vm2, %v3142_v9, 0 }
0x1636   : > { %9006 = vpow2.f32 %v3019_v58 }
0x1637   : > { %9008 = vpow2.f32 %v3015_v56 }
0x163c   : > { %v9003_v59 = vpop.eup %9002 }
0x163d   : > { %v3027_v60 = vsel %vm1068_vm3, %v9003_v59, 0.0  ;;  %v9005_v61 = vpop.eup %9004 }
0x163e   : > { %3028 = vadd.xlane.f32.xlu0 %v3027_v60  ;;  %v3021_v1 = vsel %vm1068_vm3, %v9005_v61, 0.0 }
0x1640   : > { %v9007_v0 = vpop.eup %9006 }
0x1641   : > { %v3030_v4 = vsel %vm1068_vm3, %v9007_v0, 0.0  ;;  %v9009_v6 = vpop.eup %9008 }
0x1642   : > { %3022 = vadd.xlane.f32.xlu0 %v3021_v1  ;;  %3031 = vadd.xlane.f32.xlu1 %v3030_v4  ;;  %v3024_v7 = vsel %vm1068_vm3, %v9009_v6, 0.0 }
0x1646   : > { %3025 = vadd.xlane.f32.xlu1 %v3024_v7 }
0x1657   : > { %3192 = vrot.lane.b32.xlu1 %v10097_v62, %s9425_s17 }
0x1658   : > { %3044 = vrot.lane.b32.xlu0 %v10088_v47, %s9424_s26 }
0x165b   : > { %3190 = vrot.lane.b32.xlu1 %v10090_v53, %s9425_s17 }
0x165c   : > { %3139 = vrot.lane.b32.xlu0 %v10092_v54, %s9425_s17 }
0x16cb   : > { %v3029_v10 = vpop.xlane.xlu0 %3028 }
0x16cc   : > { %9010 = vrcp.f32 %v3029_v10 }
0x16cf   : > { %v3023_v11 = vpop.xlane.xlu0 %3022  ;;  %v3032_v13 = vpop.xlane.xlu1 %3031 }
0x16d0   : > { %9012 = vrcp.f32 %v3032_v13 }
0x16d1   : > { %9014 = vrcp.f32 %v3023_v11 }
0x16d3   : > { %v3045_v15 = vpop.permute.xlu0 %3044  ;;  %v3026_v39 = vpop.xlane.xlu1 %3025 }
0x16d4   : > { %9016 = vrcp.f32 %v3026_v39  ;;  %8246 = vmatpush3.bf16.msra.mxu0 %v3045_v15 }
0x16d5   : > { %8257 = vmatprep.subr.bf16.mxu0 %v9422_v2 }
0x16d6   : > { %v9011_v19 = vpop.eup %9010 }
0x16d7   : > { %v3039_v51 = vmul.f32 %v9011_v19, %v9003_v59  ;;  %v3193_v30 = vpop.permute.xlu1 %3192  ;;  %v3140_v43 = vpop.permute.xlu0 %3139 }
0x16d8   : > { %v3198_v32 = vsel %vm973_vm2, %v3193_v30, 0 }
0x16da   : > { %v9013_v50 = vpop.eup %9012 }
0x16db   : > { %v9015_v25 = vpop.eup %9014  ;;  %v3040_v29 = vmul.f32 %v9013_v50, %v9007_v0  ;;  %v3191_v34 = vpop.permute.xlu1 %3190 }
0x16dc   : > { %v3037_v37 = vmul.f32 %v9015_v25, %v9005_v61 }
0x16dd   : > { %v3042_v31 = vpack.c.bf16 %v3040_v29, %v3039_v51 }
0x16de   : > { %v9017_v48 = vpop.eup %9016 }
0x16df   : > { %v3038_v57 = vmul.f32 %v9017_v48, %v9009_v6  ;;  %8254 = vmatmul.mubr.msk.bf16.vlgmr.msra.gmra.mrb[64].mxu1 %vm1068_vm3, %v3042_v31 }
0x16e0   : > { %8264 = vmatpush3.bf16.xpose.msra.mxu1 %v3198_v32  ;;  %8265 = vmatprep.mubr.msk.bf16.mxu1 %vm9423_vm1, %v9422_v2 }
0x16e1   : > { %v3041_v35 = vpack.c.bf16 %v3038_v57, %v3037_v37  ;;  %8275 = vmatprep.subr.bf16.mxu1 %v9422_v2 }
0x16e3   : > { %8248 = vmatmul.mubr.msk.bf16.vlgmr.msra.gmra.mrb[60].mxu0 %vm1068_vm3, %v3041_v35 }
0x16e4   : > { %8258 = vmatpush3.bf16.xpose.msra.mxu0 %v3147_v33  ;;  %8259 = vmatprep.mubr.msk.bf16.mxu0 %vm9423_vm1, %v9422_v2 }
0x16e5   : > { %8269 = vmatprep.subr.bf16.mxu0 %v9422_v2 }
0x16e7   : > { %8266 = vmatmul.mubr.msk.bf16.vlgmr.msra.gmra.mrb[68].mxu1 %vm973_vm2, %v3191_v34 }
0x16e8   : > { %8277 = vmatprep.mubr.msk.bf16.mxu1 %vm9423_vm1, %v9422_v2 }
0x16eb   : > { %8260 = vmatmul.mubr.msk.bf16.vlgmr.msra.gmra.mrb[64].mxu0 %vm973_vm2, %v3140_v43 }
0x16ec   : > { %8271 = vmatprep.mubr.msk.bf16.mxu0 %vm9423_vm1, %v9422_v2 }
0x17b2   : > { %v10213_v38 = vpop.f32.mrb[64].mxu1 }
0x17b3   : > { %v8255_v41 = vpop.f32.mrb[65].mxu1 }
0x17b4   : > { %v10215_v36 = vpop.f32.mrb[66].mxu1 }
0x17b5   : > { %v8757_v40 = vpack.i.bf16 %v10215_v36, %v10213_v38  ;;  %v8256_v27 = vpop.f32.mrb[67].mxu1 }
0x17b6   : > { %v10219_v42 = vpop.f32.mrb[60].mxu0 }
0x17b7   : > { %v8249_v44 = vpop.f32.mrb[61].mxu0 }
0x17b8   : > { %v10221_v23 = vpop.f32.mrb[62].mxu0 }
0x17b9   : > { %v8752_v26 = vpack.i.bf16 %v10221_v23, %v10219_v42  ;;  %v8250_v45 = vpop.f32.mrb[63].mxu0 }
0x17ba   : > { %v3234_v52 = vpop.f32.mrb[68].mxu1 }
0x17bb   : > { %v8267_v46 = vpop.f32.mrb[69].mxu1  ;;  %v3235_v61 = vadd.f32 %v3234_v52, %v10121_v5 }
0x17bc   : > { %v3237_v49 = vpop.f32.mrb[70].mxu1 }
0x17bd   : > { %v8268_v55 = vpop.f32.mrb[71].mxu1  ;;  %v3238_v7 = vadd.f32 %v3237_v49, %v10126_v12  ;;  %v3247_v9 = vsel %vm1068_vm3, %v3235_v61, -inf }
0x17be   : > { %v3183_v56 = vpop.f32.mrb[64].mxu0 }
0x17bf   : > { %v3184_v58 = vadd.f32 %v3183_v56, %v10119_v3  ;;  %v8261_v59 = vpop.f32.mrb[65].mxu0  ;;  %v3250_v10 = vsel %vm1068_vm3, %v3238_v7, -inf }
0x17c0   : > { %v3186_v60 = vpop.f32.mrb[66].mxu0 }
0x17c1   : > { %v3187_v0 = vadd.f32 %v3186_v60, %v10123_v8  ;;  %v8262_v1 = vpop.f32.mrb[67].mxu0  ;;  %v3241_v4 = vsel %vm1068_vm3, %v3184_v58, -inf }
0x17c2   : > { %3242 = vmax.xlane.f32.xlu0 %v3241_v4 }
0x17c3   : > { %v3244_v6 = vsel %vm1068_vm3, %v3187_v0, -inf }
0x17c4   : > { %3245 = vmax.xlane.f32.xlu1 %v3244_v6 }
0x17c6   : > { %3248 = vmax.xlane.f32.xlu0 %v3247_v9 }
0x17ca   : > { %3251 = vmax.xlane.f32.xlu0 %v3250_v10 }
0x17d5   : > { %3334 = vrot.lane.b32.xlu1 %v10086_v28, %s9425_s17 }
0x17d9   : > { %3383 = vrot.lane.b32.xlu1 %v10099_v63, %s9426_s21 }
0x184f   : > { %v3243_v11 = vpop.xlane.xlu0 %3242 }
0x1850   : > { %v3253_v15 = vsub.f32 %v3184_v58, %v3243_v11 }
0x1851   : > { %v3246_v13 = vpop.xlane.xlu1 %3245 }
0x1852   : > { %v3257_v25 = vmul.f32 1.442695, %v3253_v15  ;;  %v3254_v51 = vsub.f32 %v3187_v0, %v3246_v13 }
0x1853   : > { %v3249_v39 = vpop.xlane.xlu0 %3248 }
0x1854   : > { %v3255_v19 = vsub.f32 %v3235_v61, %v3249_v39  ;;  %v3259_v31 = vmul.f32 1.442695, %v3254_v51 }
0x1855   : > { %v3335_v50 = vpop.permute.xlu1 %3334 }
0x1856   : > { %v3261_v29 = vmul.f32 1.442695, %v3255_v19  ;;  %8276 = vmatpush3.bf16.msra.mxu1 %v3335_v50 }
0x1857   : > { %v3252_v30 = vpop.xlane.xlu0 %3251  ;;  %8287 = vmatprep.subr.bf16.mxu1 %v9422_v2 }
0x1858   : > { %9018 = vpow2.f32 %v3261_v29  ;;  %v3256_v48 = vsub.f32 %v3238_v7, %v3252_v30 }
0x1859   : > { %9020 = vpow2.f32 %v3257_v25  ;;  %v3384_v27 = vpop.permute.xlu1 %3383 }
0x185a   : > { %v3263_v37 = vmul.f32 1.442695, %v3256_v48  ;;  %v3389_v6 = vsel %vm973_vm2, %v3384_v27, 0 }
0x185c   : > { %9022 = vpow2.f32 %v3263_v37 }
0x185d   : > { %9024 = vpow2.f32 %v3259_v31 }
0x1862   : > { %v9019_v63 = vpop.eup %9018 }
0x1863   : > { %v3271_v57 = vsel %vm1068_vm3, %v9019_v63, 0.0  ;;  %v9021_v32 = vpop.eup %9020 }
0x1864   : > { %3272 = vadd.xlane.f32.xlu0 %v3271_v57  ;;  %v3265_v33 = vsel %vm1068_vm3, %v9021_v32, 0.0 }
0x1866   : > { %v9023_v35 = vpop.eup %9022 }
0x1867   : > { %v3274_v34 = vsel %vm1068_vm3, %v9023_v35, 0.0  ;;  %v9025_v43 = vpop.eup %9024 }
0x1868   : > { %3266 = vadd.xlane.f32.xlu0 %v3265_v33  ;;  %3275 = vadd.xlane.f32.xlu1 %v3274_v34  ;;  %v3268_v41 = vsel %vm1068_vm3, %v9025_v43, 0.0 }
0x186c   : > { %3269 = vadd.xlane.f32.xlu1 %v3268_v41 }
0x187d   : > { %3434 = vrot.lane.b32.xlu1 %v10097_v62, %s9426_s21 }
0x187e   : > { %3287 = vrot.lane.b32.xlu0 %v10088_v47, %s9425_s17 }
0x1881   : > { %3432 = vrot.lane.b32.xlu1 %v10090_v53, %s9426_s21 }
0x1882   : > { %3381 = vrot.lane.b32.xlu0 %v10092_v54, %s9426_s21 }
0x18f1   : > { %v3273_v44 = vpop.xlane.xlu0 %3272 }
0x18f2   : > { %9026 = vrcp.f32 %v3273_v44 }
0x18f5   : > { %v3267_v45 = vpop.xlane.xlu0 %3266  ;;  %v3276_v52 = vpop.xlane.xlu1 %3275 }
0x18f6   : > { %9028 = vrcp.f32 %v3276_v52 }
0x18f7   : > { %9030 = vrcp.f32 %v3267_v45 }
0x18f9   : > { %v3288_v46 = vpop.permute.xlu0 %3287  ;;  %v3270_v49 = vpop.xlane.xlu1 %3269 }
0x18fa   : > { %9032 = vrcp.f32 %v3270_v49  ;;  %8270 = vmatpush3.bf16.msra.mxu0 %v3288_v46 }
0x18fb   : > { %8281 = vmatprep.subr.bf16.mxu0 %v9422_v2 }
0x18fc   : > { %v9027_v62 = vpop.eup %9026 }
0x18fd   : > { %v3283_v53 = vmul.f32 %v9027_v62, %v9019_v63  ;;  %v3435_v59 = vpop.permute.xlu1 %3434  ;;  %v3382_v9 = vpop.permute.xlu0 %3381 }
0x18fe   : > { %v3440_v1 = vsel %vm973_vm2, %v3435_v59, 0 }
0x1900   : > { %v9029_v55 = vpop.eup %9028 }
0x1901   : > { %v9031_v56 = vpop.eup %9030  ;;  %v3284_v58 = vmul.f32 %v9029_v55, %v9023_v35  ;;  %v3433_v7 = vpop.permute.xlu1 %3432 }
0x1902   : > { %v3281_v61 = vmul.f32 %v9031_v56, %v9021_v32 }
0x1903   : > { %v3286_v60 = vpack.c.bf16 %v3284_v58, %v3283_v53 }
0x1904   : > { %v9033_v54 = vpop.eup %9032 }
0x1905   : > { %v3282_v0 = vmul.f32 %v9033_v54, %v9025_v43  ;;  %8278 = vmatmul.mubr.msk.bf16.vlgmr.msra.gmra.mrb[72].mxu1 %vm1068_vm3, %v3286_v60 }
0x1906   : > { %8288 = vmatpush3.bf16.xpose.msra.mxu1 %v3440_v1  ;;  %8289 = vmatprep.mubr.msk.bf16.mxu1 %vm9423_vm1, %v9422_v2 }
0x1907   : > { %v3285_v4 = vpack.c.bf16 %v3282_v0, %v3281_v61  ;;  %8299 = vmatprep.subr.bf16.mxu1 %v9422_v2 }
0x1909   : > { %8272 = vmatmul.mubr.msk.bf16.vlgmr.msra.gmra.mrb[68].mxu0 %vm1068_vm3, %v3285_v4 }
0x190a   : > { %8282 = vmatpush3.bf16.xpose.msra.mxu0 %v3389_v6  ;;  %8283 = vmatprep.mubr.msk.bf16.mxu0 %vm9423_vm1, %v9422_v2 }
0x190b   : > { %8293 = vmatprep.subr.bf16.mxu0 %v9422_v2 }
0x190d   : > { %8290 = vmatmul.mubr.msk.bf16.vlgmr.msra.gmra.mrb[76].mxu1 %vm973_vm2, %v3433_v7 }
0x190e   : > { %8301 = vmatprep.mubr.msk.bf16.mxu1 %vm9423_vm1, %v9422_v2 }
0x1911   : > { %8284 = vmatmul.mubr.msk.bf16.vlgmr.msra.gmra.mrb[72].mxu0 %vm973_vm2, %v3382_v9 }
0x1912   : > { %8295 = vmatprep.mubr.msk.bf16.mxu0 %vm9423_vm1, %v9422_v2 }
0x19d8   : > { %v10267_v10 = vpop.f32.mrb[72].mxu1 }
0x19d9   : > { %v8279_v11 = vpop.f32.mrb[73].mxu1 }
0x19da   : > { %v3377_v13 = vpop.f32.mrb[74].mxu1 }
0x19db   : > { %v8767_v15 = vpack.i.bf16 %v3377_v13, %v10267_v10  ;;  %v8280_v39 = vpop.f32.mrb[75].mxu1 }
0x19dc   : > { %v3327_v19 = vpop.f32.mrb[68].mxu0 }
0x19dd   : > { %v8273_v50 = vpop.f32.mrb[69].mxu0 }
0x19de   : > { %v3330_v25 = vpop.f32.mrb[70].mxu0 }
0x19df   : > { %v8762_v51 = vpack.i.bf16 %v3330_v25, %v3327_v19  ;;  %v8274_v29 = vpop.f32.mrb[71].mxu0  ;;  %v8862_v25 = vld [vmem:[#allocation7 + $0x10] sm:$0xff]  }
0x19e0   : > { %v3476_v30 = vpop.f32.mrb[76].mxu1 }
0x19e1   : > { %v8291_v48 = vpop.f32.mrb[77].mxu1  ;;  %v3477_v33 = vadd.f32 %v3476_v30, %v10121_v5 }
0x19e2   : > { %v3479_v31 = vpop.f32.mrb[78].mxu1 }
0x19e3   : > { %v8292_v37 = vpop.f32.mrb[79].mxu1  ;;  %v3480_v44 = vadd.f32 %v3479_v31, %v10126_v12  ;;  %v3489_v45 = vsel %vm1068_vm3, %v3477_v33, -inf }
0x19e4   : > { %v3425_v63 = vpop.f32.mrb[72].mxu0 }
0x19e5   : > { %v3426_v57 = vadd.f32 %v3425_v63, %v10119_v3  ;;  %v8285_v32 = vpop.f32.mrb[73].mxu0  ;;  %v3492_v3 = vsel %vm1068_vm3, %v3480_v44, -inf }
0x19e6   : > { %v3428_v35 = vpop.f32.mrb[74].mxu0 }
0x19e7   : > { %v3429_v34 = vadd.f32 %v3428_v35, %v10123_v8  ;;  %v8286_v43 = vpop.f32.mrb[75].mxu0  ;;  %v3483_v41 = vsel %vm1068_vm3, %v3426_v57, -inf }
0x19e8   : > { %3484 = vmax.xlane.f32.xlu0 %v3483_v41 }
0x19e9   : > { %v3486_v27 = vsel %vm1068_vm3, %v3429_v34, -inf }
0x19ea   : > { %3487 = vmax.xlane.f32.xlu1 %v3486_v27 }
0x19ec   : > { %3490 = vmax.xlane.f32.xlu0 %v3489_v45 }
0x19f0   : > { %3493 = vmax.xlane.f32.xlu0 %v3492_v3 }
0x1a75   : > { %v3485_v52 = vpop.xlane.xlu0 %3484 }
0x1a76   : > { %v3495_v46 = vsub.f32 %v3426_v57, %v3485_v52 }
0x1a77   : > { %v3488_v5 = vpop.xlane.xlu1 %3487 }
0x1a78   : > { %v3499_v62 = vmul.f32 1.442695, %v3495_v46  ;;  %v3496_v55 = vsub.f32 %v3429_v34, %v3488_v5 }
0x1a79   : > { %v3491_v49 = vpop.xlane.xlu0 %3490 }
0x1a7a   : > { %v3497_v8 = vsub.f32 %v3477_v33, %v3491_v49  ;;  %v3501_v59 = vmul.f32 1.442695, %v3496_v55 }
0x1a7c   : > { %v3503_v56 = vmul.f32 1.442695, %v3497_v8 }
0x1a7d   : > { %v3494_v53 = vpop.xlane.xlu0 %3493 }
0x1a7e   : > { %9034 = vpow2.f32 %v3503_v56  ;;  %v3498_v58 = vsub.f32 %v3480_v44, %v3494_v53 }
0x1a7f   : > { %9036 = vpow2.f32 %v3499_v62 }
0x1a80   : > { %v3505_v12 = vmul.f32 1.442695, %v3498_v58 }
0x1a82   : > { %9038 = vpow2.f32 %v3505_v12 }
0x1a83   : > { %9040 = vpow2.f32 %v3501_v59 }
0x1a88   : > { %v9035_v54 = vpop.eup %9034 }
0x1a89   : > { %v3513_v60 = vsel %vm1068_vm3, %v9035_v54, 0.0  ;;  %v9037_v61 = vpop.eup %9036 }
0x1a8a   : > { %3514 = vadd.xlane.f32.xlu0 %v3513_v60  ;;  %v3507_v1 = vsel %vm1068_vm3, %v9037_v61, 0.0 }
0x1a8c   : > { %v9039_v0 = vpop.eup %9038 }
0x1a8d   : > { %v3516_v4 = vsel %vm1068_vm3, %v9039_v0, 0.0  ;;  %v9041_v6 = vpop.eup %9040 }
0x1a8e   : > { %3508 = vadd.xlane.f32.xlu0 %v3507_v1  ;;  %3517 = vadd.xlane.f32.xlu1 %v3516_v4  ;;  %v3510_v7 = vsel %vm1068_vm3, %v9041_v6, 0.0 }
0x1a92   : > { %3511 = vadd.xlane.f32.xlu1 %v3510_v7 }
0x1aa3   : > { %3576 = vrot.lane.b32.xlu1 %v10086_v28, %s9426_s21 }
0x1aa4   : > { %3529 = vrot.lane.b32.xlu0 %v10088_v47, %s9426_s21 }
0x1aa7   : > { %8753 = vrot.lane.b32.xlu1 %v8752_v26, %s9427_s1 }
0x1aa8   : > { %8763 = vrot.lane.b32.xlu0 %v8762_v51, %s9428_s28  ;;  %v8863_v51 = vld [vmem:[#allocation7 + $0x18] sm:$0xff]  }
0x1aab   : > { %8758 = vrot.lane.b32.xlu1 %v8757_v40, %s9427_s1 }
0x1aaf   : > { %8768 = vrot.lane.b32.xlu1 %v8767_v15, %s9428_s28 }
0x1b17   : > { %v3515_v9 = vpop.xlane.xlu0 %3514 }
0x1b18   : > { %9042 = vrcp.f32 %v3515_v9 }
0x1b1b   : > { %v3509_v28 = vpop.xlane.xlu0 %3508  ;;  %v3518_v10 = vpop.xlane.xlu1 %3517 }
0x1b1c   : > { %9044 = vrcp.f32 %v3518_v10 }
0x1b1d   : > { %9046 = vrcp.f32 %v3509_v28  ;;  %v7623_v28 = vld [vmem:[%s11128_s9 + $0x1] ss:$0 sm:$0xff] }
0x1b1f   : > { %v3530_v47 = vpop.permute.xlu0 %3529  ;;  %v3512_v11 = vpop.xlane.xlu1 %3511 }
0x1b20   : > { %9048 = vrcp.f32 %v3512_v11  ;;  %8294 = vmatpush3.bf16.msra.mxu0 %v3530_v47 }
0x1b21   : > { %8305 = vmatprep.subr.bf16.mxu0 %v8862_v25 }
0x1b22   : > { %v9043_v23 = vpop.eup %9042 }
0x1b23   : > { %v3577_v42 = vpop.permute.xlu1 %3576  ;;  %v3525_v39 = vmul.f32 %v9043_v23, %v9035_v54  ;;  %v8764_v5 = vpop.permute.xlu0 %8763 }
0x1b24   : > { %8300 = vmatpush3.bf16.msra.mxu1 %v3577_v42  ;;  %v8766_v54 = vunpack.i.h.bf16 %v8764_v5  ;;  %v8765_v60 = vunpack.i.l.bf16 %v8764_v5  ;;  %v8867_v5 = vld [vmem:[%s11135_s16 + $0x28] sm:$0xff]  }
0x1b26   : > { %v9045_v26 = vpop.eup %9044 }
0x1b27   : > { %v9047_v13 = vpop.eup %9046  ;;  %v3526_v38 = vmul.f32 %v9045_v26, %v9039_v0  ;;  %v8754_v34 = vpop.permute.xlu1 %8753 }
0x1b28   : > { %v3523_v15 = vmul.f32 %v9047_v13, %v9037_v61  ;;  %v8756_v45 = vunpack.i.h.bf16 %v8754_v34  ;;  %v8755_v3 = vunpack.i.l.bf16 %v8754_v34 }
0x1b29   : > { %v3528_v40 = vpack.c.bf16 %v3526_v38, %v3525_v39 }
0x1b2a   : > { %v9049_v36 = vpop.eup %9048  ;;  %v3672_v53 = vsel %vm973_vm2, %v10169_v21, %v8756_v45  ;;  %v3671_v58 = vsel %vm973_vm2, %v10167_v18, %v8755_v3  ;;  %v8864_v3 = vld [vmem:[#allocation8 + $0x10] sm:$0xff]  }
0x1b2b   : > { %v3524_v19 = vmul.f32 %v9049_v36, %v9041_v6  ;;  %8302 = vmatmul.mubr.msk.bf16.vlgmr.msra.gmra.mrb[80].mxu1 %vm1068_vm3, %v3528_v40  ;;  %v8759_v43 = vpop.permute.xlu1 %8758  ;;  %v3675_v6 = vsel %vm1068_vm3, %v3671_v58, %v8765_v60  ;;  %v3676_v21 = vsel %vm1068_vm3, %v3672_v53, %v8766_v54  ;;  %8313 = vmatprep.subr.bf16.mxu1 %v8864_v3 }
0x1b2c   : > { %v8761_v27 = vunpack.i.h.bf16 %v8759_v43  ;;  %v8760_v44 = vunpack.i.l.bf16 %v8759_v43  ;;  %8314 = vmatpush3.bf16.msra.mxu1 %v8864_v3 }
0x1b2d   : > { %v3527_v50 = vpack.c.bf16 %v3524_v19, %v3523_v15 }
0x1b2e   : > { %v3674_v8 = vsel %vm973_vm2, %v10165_v16, %v8761_v27  ;;  %v3673_v62 = vsel %vm973_vm2, %v10163_v14, %v8760_v44 }
0x1b2f   : > { %8296 = vmatmul.mubr.msk.bf16.vlgmr.msra.gmra.mrb[76].mxu0 %vm1068_vm3, %v3527_v50  ;;  %v8769_v41 = vpop.permute.xlu1 %8768 }
0x1b30   : > { %8306 = vmatpush3.bf16.msra.mxu0 %v8862_v25  ;;  %v8771_v52 = vunpack.i.h.bf16 %v8769_v41  ;;  %v8770_v46 = vunpack.i.l.bf16 %v8769_v41 }
0x1b31   : > { %8307 = vmatprep.subr.bf16.mxu0 %v8863_v51 }
0x1b32   : > { %v3677_v59 = vsel %vm1068_vm3, %v3673_v62, %v8770_v46  ;;  %v3678_v12 = vsel %vm1068_vm3, %v3674_v8, %v8771_v52  ;;  %v8865_v52 = vld [vmem:[#allocation8 + $0x18] sm:$0xff]   ;;  %v8866_v46 = vld [vmem:[%s11135_s16 + $0x20] sm:$0xff]  }
0x1b33   : > { %8315 = vmatprep.subr.bf16.mxu1 %v8865_v52 }
0x1b34   : > { %8308 = vmatpush3.bf16.msra.mxu0 %v8863_v51  ;;  %8316 = vmatpush3.bf16.msra.mxu1 %v8865_v52 }
0x1b35   : > { %8321 = vmatprep.subr.bf16.mxu0 %v8866_v46 }
0x1bfe   : > { %v3616_v29 = vpop.f32.mrb[80].mxu1 }
0x1bff   : > { %v8303_v30 = vpop.f32.mrb[81].mxu1 }
0x1c00   : > { %v3619_v48 = vpop.f32.mrb[82].mxu1 }
0x1c01   : > { %v8777_v31 = vpack.i.bf16 %v3619_v48, %v3616_v29  ;;  %v8304_v37 = vpop.f32.mrb[83].mxu1 }
0x1c02   : > { %v3569_v63 = vpop.f32.mrb[76].mxu0 }
0x1c03   : > { %v8297_v57 = vpop.f32.mrb[77].mxu0  ;;  %8778 = vrot.lane.b32.xlu1 %v8777_v31, %s9429_s15 }
0x1c04   : > { %v3572_v32 = vpop.f32.mrb[78].mxu0 }
0x1c05   : > { %v8772_v35 = vpack.i.bf16 %v3572_v32, %v3569_v63  ;;  %v8298_v33 = vpop.f32.mrb[79].mxu0 }
0x1c07   : > { %8773 = vrot.lane.b32.xlu0 %v8772_v35, %s9429_s15 }
0x1c75   : > { %v8779_v49 = vpop.permute.xlu1 %8778 }
0x1c76   : > { %v8781_v55 = vunpack.i.h.bf16 %v8779_v49  ;;  %v8780_v56 = vunpack.i.l.bf16 %v8779_v49 }
0x1c78   : > { %v3681_v61 = vsel %vm1991_vm4, %v3677_v59, %v8780_v56  ;;  %v3682_v16 = vsel %vm1991_vm4, %v3678_v12, %v8781_v55 }
0x1c79   : > { %v8774_v0 = vpop.permute.xlu0 %8773  ;;  %v3684_v14 = vpack.c.bf16 %v3682_v16, %v3681_v61 }
0x1c7a   : > { %v8776_v1 = vunpack.i.h.bf16 %v8774_v0  ;;  %v8775_v4 = vunpack.i.l.bf16 %v8774_v0  ;;  %v7628_v0 = vld [vmem:[%s11131_s12 + $0x1] ss:$0 sm:$0xff] }
0x1c7c   : > { %v3680_v18 = vsel %vm1991_vm4, %v3676_v21, %v8776_v1  ;;  %v3679_v7 = vsel %vm1991_vm4, %v3675_v6, %v8775_v4 }
0x1c7d   : > { %v3683_v9 = vpack.c.bf16 %v3680_v18, %v3679_v7  ;;  %v7629_v18 = vld [vmem:[%s11132_s13 + $0x1] ss:$0 sm:$0xff] }
0x1c7f   : > { %8309 = vmatprep.mubr.msk.bf16.mxu0 %vm680_vm0, %v3683_v9 }
0x1c80   : > { %8310 = vmatmul.mubr.msk.bf16.vlgmr.msra.gmra.mrb[80].mxu0 %vm680_vm0, %v3684_v14 }
0x1c81   : > { %8322 = vmatpush3.bf16.msra.mxu0 %v8866_v46 }
0x1c82   : > { %8323 = vmatprep.subr.bf16.mxu0 %v8867_v5 }
0x1c85   : > { %8324 = vmatpush3.bf16.msra.mxu0 %v8867_v5 }
0x1d53   : > { %v8311_v10 = vpop.f32.mrb[80].mxu0 }
0x1d54   : > { %v3743_v47 = vpop.f32.mrb[81].mxu0  ;;  %v3752_v11 = vadd.f32 %v8311_v10, %v7623_v28 }
0x1d55   : > { %v3744_v42 = vadd.f32 %v7623_v28, %v3743_v47  ;;  %v8312_v23 = vpop.f32.mrb[82].mxu0 }
0x1d56   : > { %v3746_v26 = vpop.f32.mrb[83].mxu0  ;;  %v10325_v38 = vadd.f32 %v3752_v11, %v10034_v24  ;;  %v3755_v36 = vadd.f32 %v8312_v23, %v7623_v28 }
0x1d57   : > { %v10322_v13 = vadd.f32 %v3744_v42, %v10031_v22  ;;  %v3747_v39 = vadd.f32 %v7623_v28, %v3746_v26 }
0x1d58   : > { %v10335_v50 = vadd.f32 %v3755_v36, %v10026_v20  ;;  %v3768_v22 = vsel %vm680_vm0, %v10325_v38, 0.0 }
0x1d59   : > { %v10328_v40 = vadd.f32 %v3747_v39, %v10023_v17  ;;  %v3762_v15 = vsel %vm680_vm0, %v10322_v13, 0.0 }
0x1d5a   : > { %3763 = vadd.xlane.f32.xlu0 %v3762_v15  ;;  %v3771_v24 = vsel %vm680_vm0, %v10335_v50, 0.0 }
0x1d5b   : > { %v3765_v19 = vsel %vm680_vm0, %v10328_v40, 0.0 }
0x1d5c   : > { %3766 = vadd.xlane.f32.xlu1 %v3765_v19  ;;  %v8868_v19 = vld [vmem:[%s11135_s16 + $0x30] sm:$0xff]  }
0x1d5d   : > { %8325 = vmatprep.subr.bf16.mxu0 %v8868_v19 }
0x1d5e   : > { %3769 = vadd.xlane.f32.xlu0 %v3768_v22  ;;  %8326 = vmatpush3.bf16.msra.mxu0 %v8868_v19  ;;  %v8869_v22 = vld [vmem:[%s11135_s16 + $0x38] sm:$0xff]  }
0x1d5f   : > { %8327 = vmatprep.subr.bf16.mxu0 %v8869_v22 }
0x1d62   : > { %3772 = vadd.xlane.f32.xlu0 %v3771_v24  ;;  %8328 = vmatpush3.bf16.msra.mxu0 %v8869_v22  ;;  %v7630_v24 = vld [vmem:[%s11194_s2 + $0x1] ss:$0 sm:$0xff] }
0x1de7   : > { %v3764_v17 = vpop.xlane.xlu0 %3763 }
0x1de8   : > { %v3774_v25 = vmul.f32 0.03125, %v3764_v17 }
0x1de9   : > { %v3767_v51 = vpop.xlane.xlu1 %3766 }
0x1dea   : > { %v3778_v29 = vsub.f32 %v10322_v13, %v3774_v25  ;;  %v3775_v30 = vmul.f32 0.03125, %v3767_v51 }
0x1deb   : > { %v3770_v48 = vpop.xlane.xlu0 %3769 }
0x1dec   : > { %v3779_v31 = vsub.f32 %v10328_v40, %v3775_v30  ;;  %v3776_v37 = vmul.f32 0.03125, %v3770_v48  ;;  %v3782_v20 = vmul.f32 %v3778_v29, %v3778_v29 }
0x1dee   : > { %v3780_v63 = vsub.f32 %v10325_v38, %v3776_v37  ;;  %v3786_v57 = vsel %vm680_vm0, %v3782_v20, 0.0  ;;  %v3783_v32 = vmul.f32 %v3779_v31, %v3779_v31 }
0x1def   : > { %3787 = vadd.xlane.f32.xlu0 %v3786_v57  ;;  %v3773_v35 = vpop.xlane.xlu0 %3772 }
0x1df0   : > { %v3777_v33 = vmul.f32 0.03125, %v3773_v35  ;;  %v3789_v34 = vsel %vm680_vm0, %v3783_v32, 0.0  ;;  %v3784_v43 = vmul.f32 %v3780_v63, %v3780_v63 }
0x1df1   : > { %3790 = vadd.xlane.f32.xlu1 %v3789_v34  ;;  %v7635_v34 = vld [vmem:[%s11195_s24 + $0x1] ss:$0 sm:$0xff] }
0x1df2   : > { %v3781_v41 = vsub.f32 %v10335_v50, %v3777_v33  ;;  %v3792_v27 = vsel %vm680_vm0, %v3784_v43, 0.0 }
0x1df3   : > { %3793 = vadd.xlane.f32.xlu0 %v3792_v27 }
0x1df4   : > { %v3785_v44 = vmul.f32 %v3781_v41, %v3781_v41 }
0x1df6   : > { %v3795_v45 = vsel %vm680_vm0, %v3785_v44, 0.0 }
0x1df7   : > { %3796 = vadd.xlane.f32.xlu1 %v3795_v45 }
0x1e7c   : > { %v3788_v49 = vpop.xlane.xlu0 %3787 }
0x1e7d   : > { %v3798_v8 = vmul.f32 0.03125, %v3788_v49 }
0x1e7e   : > { %v3791_v62 = vpop.xlane.xlu1 %3790 }
0x1e7f   : > { %v3802_v55 = vadd.f32 1e-05, %v3798_v8  ;;  %v3799_v56 = vmul.f32 0.03125, %v3791_v62 }
0x1e80   : > { %v3794_v53 = vpop.xlane.xlu0 %3793 }
0x1e81   : > { %9050 = vrsqrt.f32 %v3802_v55  ;;  %v3803_v58 = vadd.f32 1e-05, %v3799_v56  ;;  %v3800_v59 = vmul.f32 0.03125, %v3794_v53 }
0x1e83   : > { %9052 = vrsqrt.f32 %v3803_v58  ;;  %v3804_v12 = vadd.f32 1e-05, %v3800_v59 }
0x1e84   : > { %v3797_v54 = vpop.xlane.xlu1 %3796 }
0x1e85   : > { %9054 = vrsqrt.f32 %v3804_v12  ;;  %v3801_v60 = vmul.f32 0.03125, %v3797_v54 }
0x1e87   : > { %v3805_v61 = vadd.f32 1e-05, %v3801_v60 }
0x1e89   : > { %9056 = vrsqrt.f32 %v3805_v61 }
0x1e8b   : > { %v9051_v16 = vpop.eup %9050 }
0x1e8c   : > { %v3810_v14 = vmul.f32 %v9051_v16, %v3778_v29 }
0x1e8d   : > { %v9053_v1 = vpop.eup %9052 }
0x1e8e   : > { %v3811_v4 = vmul.f32 %v9053_v1, %v3779_v31  ;;  %v3820_v6 = vmul.f32 %v7628_v0, %v3810_v14 }
0x1e8f   : > { %v9055_v21 = vpop.eup %9054 }
0x1e90   : > { %v3812_v7 = vmul.f32 %v9055_v21, %v3780_v63  ;;  %v3821_v9 = vmul.f32 %v7628_v0, %v3811_v4  ;;  %v3830_v28 = vadd.f32 %v7629_v18, %v3820_v6 }
0x1e92   : > { %v3831_v10 = vadd.f32 %v7629_v18, %v3821_v9  ;;  %v3822_v23 = vmul.f32 %v7628_v0, %v3812_v7 }
0x1e93   : > { %v9057_v47 = vpop.eup %9056 }
0x1e94   : > { %v3813_v11 = vmul.f32 %v9057_v47, %v3781_v41  ;;  %v3834_v42 = vpack.c.bf16 %v3831_v10, %v3830_v28  ;;  %v3832_v39 = vadd.f32 %v7629_v18, %v3822_v23  ;;  %v8870_v10 = vld [vmem:[%s11192_s23 + $0x20] sm:$0xff]  }
0x1e95   : > { %v8871_v47 = vld [vmem:[#allocation5 + $0x20] sm:$0xff]   ;;  %8333 = vmatprep.subr.bf16.mxu1 %v8870_v10 }
0x1e96   : > { %8317 = vmatprep.mubr.msk.bf16.mxu1 %vm680_vm0, %v3834_v42  ;;  %v3823_v26 = vmul.f32 %v7628_v0, %v3813_v11  ;;  %v8872_v11 = vld [vmem:[%s11192_s23 + $0x28] sm:$0xff]   ;;  %8349 = vmatprep.subr.bf16.mxu0 %v8871_v47  ;;  %v8874_v23 = vld [vmem:[%s11123_s4 + $0x20] sm:$0xff]  }
0x1e97   : > { %v8873_v42 = vld [vmem:[#allocation5 + $0x28] sm:$0xff]  }
0x1e98   : > { %v3833_v36 = vadd.f32 %v7629_v18, %v3823_v26 }
0x1e9a   : > { %v3835_v15 = vpack.c.bf16 %v3833_v36, %v3832_v39 }
0x1e9c   : > { %8318 = vmatmul.mubr.msk.bf16.vlgmr.msra.gmra.mrb[84].mxu1 %vm680_vm0, %v3835_v15 }
0x1e9d   : > { %8334 = vmatpush3.bf16.msra.mxu1 %v8870_v10 }
0x1e9e   : > { %8335 = vmatprep.subr.bf16.mxu1 %v8872_v11 }
0x1ea1   : > { %8336 = vmatpush3.bf16.msra.mxu1 %v8872_v11 }
0x1ea2   : > { %8341 = vmatprep.subr.bf16.mxu1 %v8874_v23 }
0x1f6f   : > { %v8319_v17 = vpop.f32.mrb[84].mxu1 }
0x1f70   : > { %v3903_v25 = vadd.f32 %v8319_v17, %v7630_v24  ;;  %v3894_v51 = vpop.f32.mrb[85].mxu1 }
0x1f71   : > { %v3895_v29 = vadd.f32 %v7630_v24, %v3894_v51  ;;  %v8320_v30 = vpop.f32.mrb[86].mxu1 }
0x1f72   : > { %v3906_v48 = vadd.f32 %v8320_v30, %v7630_v24  ;;  %v3897_v31 = vpop.f32.mrb[87].mxu1  ;;  %v3911_v20 = vmax.f32 %v3903_v25, 0.0 }
0x1f73   : > { %v3898_v37 = vadd.f32 %v7630_v24, %v3897_v31  ;;  %v3909_v57 = vmax.f32 %v3895_v29, 0.0  ;;  %v7668_v31 = vld [vmem:[%s11129_s10 + $0x2] ss:$0 sm:$0xff] }
0x1f74   : > { %v3912_v63 = vmax.f32 %v3906_v48, 0.0 }
0x1f75   : > { %v3910_v32 = vmax.f32 %v3898_v37, 0.0 }
0x1f76   : > { %v3914_v35 = vpack.c.bf16 %v3912_v63, %v3911_v20  ;;  %v7669_v63 = vld [vmem:[%s11130_s11 + $0x2] ss:$0 sm:$0xff] }
0x1f77   : > { %v3913_v33 = vpack.c.bf16 %v3910_v32, %v3909_v57 }
0x1f79   : > { %8329 = vmatprep.mubr.msk.bf16.mxu0 %vm2258_vm5, %v3913_v33 }
0x1f7a   : > { %8330 = vmatmul.mubr.msk.bf16.vlgmr.msra.gmra.mrb[84].mxu0 %vm2258_vm5, %v3914_v35 }
0x1f7b   : > { %8350 = vmatpush3.bf16.msra.mxu0 %v8871_v47 }
0x1f7c   : > { %8351 = vmatprep.subr.bf16.mxu0 %v8873_v42 }
0x1f7f   : > { %8352 = vmatpush3.bf16.msra.mxu0 %v8873_v42 }
0x1f80   : > { %8363 = vmatprep.subr.bf16.mxu0 %v9422_v2 }
0x204d   : > { %v8331_v43 = vpop.f32.mrb[84].mxu0 }
0x204e   : > { %v3985_v41 = vpop.f32.mrb[85].mxu0  ;;  %v3994_v27 = vadd.f32 %v8331_v43, %v7635_v34 }
0x204f   : > { %v3986_v44 = vadd.f32 %v7635_v34, %v3985_v41  ;;  %v8332_v45 = vpop.f32.mrb[86].mxu0 }
0x2050   : > { %v3997_v3 = vadd.f32 %v8332_v45, %v7635_v34  ;;  %v3988_v52 = vpop.f32.mrb[87].mxu0  ;;  %v10384_v8 = vadd.f32 %v3994_v27, %v10325_v38 }
0x2051   : > { %v10378_v46 = vadd.f32 %v3986_v44, %v10322_v13  ;;  %v3989_v5 = vadd.f32 %v7635_v34, %v3988_v52 }
0x2052   : > { %v10381_v49 = vadd.f32 %v3997_v3, %v10335_v50  ;;  %v4067_v13 = vsel %vm680_vm0, %v10384_v8, 0.0 }
0x2053   : > { %v4061_v62 = vsel %vm680_vm0, %v10378_v46, 0.0  ;;  %v10389_v55 = vadd.f32 %v3989_v5, %v10328_v40 }
0x2054   : > { %4062 = vadd.xlane.f32.xlu1 %v4061_v62  ;;  %v4058_v56 = vsel %vm680_vm0, %v10381_v49, 0.0 }
0x2055   : > { %4059 = vadd.xlane.f32.xlu0 %v4058_v56  ;;  %v4064_v50 = vsel %vm680_vm0, %v10389_v55, 0.0 }
0x2058   : > { %4068 = vadd.xlane.f32.xlu1 %v4067_v13  ;;  %v8875_v13 = vld [vmem:[%s11123_s4 + $0x28] sm:$0xff]  }
0x2059   : > { %4065 = vadd.xlane.f32.xlu0 %v4064_v50  ;;  %v7670_v50 = vld [vmem:[%s11122_s3 + $0x2] ss:$0 sm:$0xff] }
0x20e1   : > { %v4063_v38 = vpop.xlane.xlu1 %4062 }
0x20e2   : > { %v4071_v53 = vmul.f32 0.03125, %v4063_v38  ;;  %v4060_v58 = vpop.xlane.xlu0 %4059 }
0x20e3   : > { %v4070_v59 = vmul.f32 0.03125, %v4060_v58  ;;  %v7680_v58 = vld [vmem:[%s11126_s7 + $0x2] ss:$0 sm:$0xff] }
0x20e4   : > { %v4075_v40 = vsub.f32 %v10378_v46, %v4071_v53 }
0x20e5   : > { %v4074_v12 = vsub.f32 %v10381_v49, %v4070_v59  ;;  %v4069_v54 = vpop.xlane.xlu1 %4068 }
0x20e6   : > { %v4073_v60 = vmul.f32 0.03125, %v4069_v54  ;;  %v4066_v61 = vpop.xlane.xlu0 %4065  ;;  %v4079_v16 = vmul.f32 %v4075_v40, %v4075_v40 }
0x20e7   : > { %v4072_v0 = vmul.f32 0.03125, %v4066_v61  ;;  %v4078_v14 = vmul.f32 %v4074_v12, %v4074_v12 }
0x20e8   : > { %v4077_v1 = vsub.f32 %v10384_v8, %v4073_v60  ;;  %v4085_v4 = vsel %vm680_vm0, %v4079_v16, 0.0 }
0x20e9   : > { %v4076_v6 = vsub.f32 %v10389_v55, %v4072_v0  ;;  %4086 = vadd.xlane.f32.xlu1 %v4085_v4  ;;  %v4082_v21 = vsel %vm680_vm0, %v4078_v14, 0.0 }
0x20ea   : > { %4083 = vadd.xlane.f32.xlu0 %v4082_v21  ;;  %v4081_v18 = vmul.f32 %v4077_v1, %v4077_v1 }
0x20eb   : > { %v4080_v7 = vmul.f32 %v4076_v6, %v4076_v6 }
0x20ec   : > { %v4091_v9 = vsel %vm680_vm0, %v4081_v18, 0.0 }
0x20ed   : > { %4092 = vadd.xlane.f32.xlu1 %v4091_v9  ;;  %v4088_v28 = vsel %vm680_vm0, %v4080_v7, 0.0 }
0x20ee   : > { %4089 = vadd.xlane.f32.xlu0 %v4088_v28 }
0x2176   : > { %v4087_v26 = vpop.xlane.xlu1 %4086 }
0x2177   : > { %v4095_v39 = vmul.f32 0.03125, %v4087_v26  ;;  %v4084_v36 = vpop.xlane.xlu0 %4083 }
0x2178   : > { %v4094_v15 = vmul.f32 0.03125, %v4084_v36 }
0x2179   : > { %v4099_v19 = vadd.f32 1e-05, %v4095_v39  ;;  %v7675_v39 = vld [vmem:[%s11124_s5 + $0x2] ss:$0 sm:$0xff] }
0x217a   : > { %v4098_v22 = vadd.f32 1e-05, %v4094_v15  ;;  %v4093_v24 = vpop.xlane.xlu1 %4092 }
0x217b   : > { %9058 = vrsqrt.f32 %v4099_v19  ;;  %v4097_v17 = vmul.f32 0.03125, %v4093_v24  ;;  %v4090_v25 = vpop.xlane.xlu0 %4089 }
0x217c   : > { %9060 = vrsqrt.f32 %v4098_v22  ;;  %v4096_v51 = vmul.f32 0.03125, %v4090_v25 }
0x217d   : > { %v4101_v29 = vadd.f32 1e-05, %v4097_v17 }
0x217e   : > { %v4100_v30 = vadd.f32 1e-05, %v4096_v51 }
0x217f   : > { %9062 = vrsqrt.f32 %v4101_v29 }
0x2180   : > { %9064 = vrsqrt.f32 %v4100_v30 }
0x2185   : > { %v9059_v48 = vpop.eup %9058 }
0x2186   : > { %v9061_v37 = vpop.eup %9060  ;;  %v4107_v20 = vmul.f32 %v9059_v48, %v4075_v40 }
0x2187   : > { %v4106_v57 = vmul.f32 %v9061_v37, %v4074_v12 }
0x2188   : > { %v4117_v32 = vmul.f32 %v7668_v31, %v4107_v20 }
0x2189   : > { %v9063_v35 = vpop.eup %9062  ;;  %v4116_v33 = vmul.f32 %v7668_v31, %v4106_v57 }
0x218a   : > { %v9065_v34 = vpop.eup %9064  ;;  %v4109_v43 = vmul.f32 %v9063_v35, %v4077_v1  ;;  %v4127_v41 = vadd.f32 %v7669_v63, %v4117_v32 }
0x218b   : > { %v4108_v27 = vmul.f32 %v9065_v34, %v4076_v6  ;;  %v4126_v44 = vadd.f32 %v7669_v63, %v4116_v33 }
0x218c   : > { %v4119_v45 = vmul.f32 %v7668_v31, %v4109_v43 }
0x218d   : > { %v4130_v3 = vpack.c.bf16 %v4127_v41, %v4126_v44  ;;  %v4118_v52 = vmul.f32 %v7668_v31, %v4108_v27 }
0x218e   : > { %v4129_v5 = vadd.f32 %v7669_v63, %v4119_v45 }
0x218f   : > { %8337 = vmatprep.mubr.msk.bf16.mxu1 %vm680_vm0, %v4130_v3  ;;  %8353 = vmatprep.mubr.msk.bf16.mxu0 %vm680_vm0, %v4130_v3  ;;  %v4128_v62 = vadd.f32 %v7669_v63, %v4118_v52 }
0x2191   : > { %v4131_v56 = vpack.c.bf16 %v4129_v5, %v4128_v62 }
0x2193   : > { %8338 = vmatmul.mubr.msk.bf16.vlgmr.msra.gmra.mrb[88].mxu1 %vm680_vm0, %v4131_v56  ;;  %8354 = vmatmul.mubr.msk.bf16.vlgmr.msra.gmra.mrb[88].mxu0 %vm680_vm0, %v4131_v56 }
0x2194   : > { %8342 = vmatpush3.bf16.msra.mxu1 %v8874_v23  ;;  %8345 = vmatprep.mubr.msk.bf16.mxu1 %vm680_vm0, %v4130_v3 }
0x2195   : > { %8343 = vmatprep.subr.bf16.mxu1 %v8875_v13  ;;  %8365 = vmatprep.mubr.msk.bf16.mxu0 %vm9423_vm1, %v9422_v2 }
0x2198   : > { %8344 = vmatpush3.bf16.msra.mxu1 %v8875_v13 }
0x2199   : > { %8357 = vmatprep.subr.bf16.mxu1 %v9422_v2 }
0x219b   : > { %8346 = vmatmul.mubr.msk.bf16.vlgmr.msra.gmra.mrb[92].mxu1 %vm680_vm0, %v4131_v56 }
0x219c   : > { %8359 = vmatprep.mubr.msk.bf16.mxu1 %vm9423_vm1, %v9422_v2 }
0x2266   : > { %v8339_v38 = vpop.f32.mrb[88].mxu1  ;;  %v8355_v53 = vpop.f32.mrb[88].mxu0 }
0x2267   : > { %v4199_v59 = vadd.f32 %v8339_v38, %v7670_v50  ;;  %v4190_v40 = vpop.f32.mrb[89].mxu1  ;;  %v4324_v12 = vpop.f32.mrb[89].mxu0  ;;  %v4333_v16 = vadd.f32 %v8355_v53, %v7680_v58 }
0x2268   : > { %v4191_v54 = vadd.f32 %v7670_v50, %v4190_v40  ;;  %v8340_v60 = vpop.f32.mrb[90].mxu1  ;;  %v8356_v61 = vpop.f32.mrb[90].mxu0  ;;  %v4325_v6 = vadd.f32 %v7680_v58, %v4324_v12 }
0x2269   : > { %v4202_v0 = vadd.f32 %v8340_v60, %v7670_v50  ;;  %v4336_v14 = vadd.f32 %v8356_v61, %v7680_v58  ;;  %v4193_v1 = vpop.f32.mrb[91].mxu1  ;;  %v4327_v4 = vpop.f32.mrb[91].mxu0  ;;  %v4341_v7 = vmul.f32 0.35355338, %v4199_v59 }
0x226a   : > { %v4194_v21 = vadd.f32 %v7670_v50, %v4193_v1  ;;  %v4328_v18 = vadd.f32 %v7680_v58, %v4327_v4  ;;  %v4339_v10 = vmul.f32 0.35355338, %v4191_v54 }
0x226b   : > { %v4342_v9 = vmul.f32 0.35355338, %v4202_v0  ;;  %v10441_v28 = vpack.c.bf16 %v4336_v14, %v4333_v16 }
0x226c   : > { %v4340_v47 = vmul.f32 0.35355338, %v4194_v21  ;;  %v10443_v11 = vpack.c.bf16 %v4328_v18, %v4325_v6 }
0x226d   : > { %v10445_v42 = vpack.c.bf16 %v4342_v9, %v4341_v7 }
0x226e   : > { %v10447_v23 = vpack.c.bf16 %v4340_v47, %v4339_v10  ;;  %v8347_v26 = vpop.f32.mrb[92].mxu1 }
0x226f   : > { %v4257_v36 = vpop.f32.mrb[93].mxu1  ;;  %v4266_v19 = vadd.f32 %v8347_v26, %v7675_v39 }
0x2270   : > { %v8348_v15 = vpop.f32.mrb[94].mxu1  ;;  %v4258_v17 = vadd.f32 %v7675_v39, %v4257_v36 }
0x2271   : > { %v4269_v22 = vadd.f32 %v8348_v15, %v7675_v39  ;;  %v4260_v24 = vpop.f32.mrb[95].mxu1 }
0x2272   : > { %v4261_v25 = vadd.f32 %v7675_v39, %v4260_v24 }
0x2273   : > { %v10452_v51 = vpack.c.bf16 %v4269_v22, %v4266_v19 }
0x2274   : > { %v10454_v29 = vpack.c.bf16 %v4261_v25, %v4258_v17 }
0x2275   : > { %v4400_v30 = vsel %vm973_vm2, %v10452_v51, 0 }
0x2276   : > { %8364 = vmatpush3.bf16.xpose.msra.mxu0 %v4400_v30  ;;  %v4353_v48 = vsel %vm973_vm2, %v10454_v29, 0 }
0x2277   : > { %8358 = vmatpush3.bf16.xpose.msra.mxu1 %v4353_v48  ;;  %8375 = vmatprep.subr.bf16.mxu0 %v9422_v2 }
0x2278   : > { %8369 = vmatprep.subr.bf16.mxu1 %v9422_v2 }
0x227d   : > { %8366 = vmatmul.mubr.msk.bf16.vlgmr.msra.gmra.mrb[92].mxu0 %vm973_vm2, %v10445_v42 }
0x227e   : > { %8360 = vmatmul.mubr.msk.bf16.vlgmr.msra.gmra.mrb[96].mxu1 %vm973_vm2, %v10447_v23  ;;  %8376 = vmatpush3.bf16.msra.mxu0 %v10441_v28 }
0x227f   : > { %8370 = vmatpush3.bf16.msra.mxu1 %v10443_v11  ;;  %8377 = vmatprep.mubr.msk.bf16.mxu0 %vm9423_vm1, %v9422_v2 }
0x2280   : > { %8387 = vmatprep.subr.bf16.mxu0 %v9422_v2  ;;  %8371 = vmatprep.mubr.msk.bf16.mxu1 %vm9423_vm1, %v9422_v2 }
0x2281   : > { %8381 = vmatprep.subr.bf16.mxu1 %v9422_v2 }
0x2350   : > { %v4436_v31 = vpop.f32.mrb[92].mxu0 }
0x2351   : > { %v4389_v37 = vpop.f32.mrb[96].mxu1  ;;  %v8367_v20 = vpop.f32.mrb[93].mxu0  ;;  %v4449_v41 = vsel %vm1068_vm3, %v4436_v31, -inf }
0x2352   : > { %v8361_v63 = vpop.f32.mrb[97].mxu1  ;;  %v4439_v57 = vpop.f32.mrb[94].mxu0  ;;  %v4443_v32 = vsel %vm1068_vm3, %v4389_v37, -inf }
0x2353   : > { %v8368_v35 = vpop.f32.mrb[95].mxu0  ;;  %4444 = vmax.xlane.f32.xlu0 %v4443_v32  ;;  %v4392_v33 = vpop.f32.mrb[98].mxu1  ;;  %v4452_v27 = vsel %vm1068_vm3, %v4439_v57, -inf }
0x2354   : > { %v8362_v34 = vpop.f32.mrb[99].mxu1  ;;  %v4446_v43 = vsel %vm1068_vm3, %v4392_v33, -inf }
0x2355   : > { %4447 = vmax.xlane.f32.xlu1 %v4446_v43 }
0x2357   : > { %4450 = vmax.xlane.f32.xlu0 %v4449_v41 }
0x2359   : > { %4453 = vmax.xlane.f32.xlu1 %v4452_v27 }
0x236a   : > { %4634 = vrot.lane.b32.xlu1 %v10452_v51, %s9424_s26 }
0x23e0   : > { %v4445_v44 = vpop.xlane.xlu0 %4444 }
0x23e1   : > { %v4455_v45 = vsub.f32 %v4389_v37, %v4445_v44 }
0x23e2   : > { %v4448_v3 = vpop.xlane.xlu1 %4447 }
0x23e3   : > { %v4456_v5 = vsub.f32 %v4392_v33, %v4448_v3  ;;  %v4459_v56 = vmul.f32 1.442695, %v4455_v45 }
0x23e4   : > { %v4451_v52 = vpop.xlane.xlu0 %4450 }
0x23e5   : > { %v4457_v62 = vsub.f32 %v4436_v31, %v4451_v52  ;;  %v4461_v53 = vmul.f32 1.442695, %v4456_v5 }
0x23e6   : > { %v4454_v13 = vpop.xlane.xlu1 %4453 }
0x23e7   : > { %v4463_v50 = vmul.f32 1.442695, %v4457_v62  ;;  %v4458_v38 = vsub.f32 %v4439_v57, %v4454_v13 }
0x23e9   : > { %9066 = vpow2.f32 %v4463_v50  ;;  %v4465_v58 = vmul.f32 1.442695, %v4458_v38 }
0x23ea   : > { %9068 = vpow2.f32 %v4459_v56  ;;  %v4635_v14 = vpop.permute.xlu1 %4634 }
0x23eb   : > { %9070 = vpow2.f32 %v4465_v58  ;;  %v4640_v36 = vsel %vm973_vm2, %v4635_v14, 0 }
0x23ec   : > { %9072 = vpow2.f32 %v4461_v53 }
0x23f3   : > { %v9067_v59 = vpop.eup %9066 }
0x23f4   : > { %v9069_v40 = vpop.eup %9068  ;;  %v4473_v12 = vsel %vm1068_vm3, %v9067_v59, 0.0 }
0x23f5   : > { %v9071_v54 = vpop.eup %9070  ;;  %4474 = vadd.xlane.f32.xlu0 %v4473_v12  ;;  %v4467_v16 = vsel %vm1068_vm3, %v9069_v40, 0.0 }
0x23f6   : > { %v4476_v60 = vsel %vm1068_vm3, %v9071_v54, 0.0  ;;  %v9073_v61 = vpop.eup %9072 }
0x23f7   : > { %4477 = vadd.xlane.f32.xlu1 %v4476_v60  ;;  %v4470_v0 = vsel %vm1068_vm3, %v9073_v61, 0.0 }
0x23f9   : > { %4468 = vadd.xlane.f32.xlu0 %v4467_v16 }
0x23fb   : > { %4471 = vadd.xlane.f32.xlu1 %v4470_v0 }
0x240c   : > { %4578 = vrot.lane.b32.xlu1 %v10447_v23, %s9424_s26 }
0x240f   : > { %4581 = vrot.lane.b32.xlu0 %v10454_v29, %s9424_s26 }
0x2410   : > { %4631 = vrot.lane.b32.xlu1 %v10445_v42, %s9424_s26 }
0x2482   : > { %v4475_v1 = vpop.xlane.xlu0 %4474 }
0x2483   : > { %9074 = vrcp.f32 %v4475_v1 }
0x2484   : > { %v4478_v4 = vpop.xlane.xlu1 %4477 }
0x2485   : > { %9076 = vrcp.f32 %v4478_v4 }
0x2486   : > { %v4469_v6 = vpop.xlane.xlu0 %4468 }
0x2487   : > { %9078 = vrcp.f32 %v4469_v6 }
0x2488   : > { %v4472_v21 = vpop.xlane.xlu1 %4471 }
0x2489   : > { %9080 = vrcp.f32 %v4472_v21 }
0x248a   : > { %v4582_v22 = vpop.permute.xlu0 %4581 }
0x248b   : > { %v4587_v25 = vsel %vm973_vm2, %v4582_v22, 0 }
0x248c   : > { %v4579_v24 = vpop.permute.xlu1 %4578 }
0x248d   : > { %v9075_v18 = vpop.eup %9074 }
0x248e   : > { %v4485_v9 = vmul.f32 %v9075_v18, %v9067_v59 }
0x248f   : > { %v9077_v7 = vpop.eup %9076 }
0x2490   : > { %v4486_v10 = vmul.f32 %v9077_v7, %v9071_v54  ;;  %v4632_v30 = vpop.permute.xlu1 %4631 }
0x2491   : > { %v9079_v47 = vpop.eup %9078 }
0x2492   : > { %v4488_v26 = vpack.c.bf16 %v4486_v10, %v4485_v9  ;;  %v4483_v15 = vmul.f32 %v9079_v47, %v9069_v40 }
0x2493   : > { %v9081_v39 = vpop.eup %9080 }
0x2494   : > { %v4484_v19 = vmul.f32 %v9081_v39, %v9073_v61  ;;  %8378 = vmatmul.mubr.msk.bf16.vlgmr.msra.gmra.mrb[96].mxu0 %vm1068_vm3, %v4488_v26 }
0x2495   : > { %8388 = vmatpush3.bf16.xpose.msra.mxu0 %v4640_v36  ;;  %8389 = vmatprep.mubr.msk.bf16.mxu0 %vm9423_vm1, %v9422_v2 }
0x2496   : > { %v4487_v17 = vpack.c.bf16 %v4484_v19, %v4483_v15  ;;  %8399 = vmatprep.subr.bf16.mxu0 %v9422_v2 }
0x2498   : > { %8372 = vmatmul.mubr.msk.bf16.vlgmr.msra.gmra.mrb[100].mxu1 %vm1068_vm3, %v4487_v17 }
0x2499   : > { %8382 = vmatpush3.bf16.xpose.msra.mxu1 %v4587_v25  ;;  %8383 = vmatprep.mubr.msk.bf16.mxu1 %vm9423_vm1, %v9422_v2 }
0x249a   : > { %8393 = vmatprep.subr.bf16.mxu1 %v9422_v2 }
0x249c   : > { %8390 = vmatmul.mubr.msk.bf16.vlgmr.msra.gmra.mrb[100].mxu0 %vm973_vm2, %v4632_v30 }
0x249d   : > { %8401 = vmatprep.mubr.msk.bf16.mxu0 %vm9423_vm1, %v9422_v2 }
0x24a0   : > { %8384 = vmatmul.mubr.msk.bf16.vlgmr.msra.gmra.mrb[104].mxu1 %vm973_vm2, %v4579_v24 }
0x24a1   : > { %8395 = vmatprep.mubr.msk.bf16.mxu1 %vm9423_vm1, %v9422_v2 }
0x2567   : > { %v10506_v48 = vpop.f32.mrb[96].mxu0 }
0x2568   : > { %v8379_v31 = vpop.f32.mrb[97].mxu0 }
0x2569   : > { %v10508_v37 = vpop.f32.mrb[98].mxu0 }
0x256a   : > { %v8380_v20 = vpop.f32.mrb[99].mxu0 }
0x256b   : > { %v10510_v63 = vpop.f32.mrb[100].mxu1 }
0x256c   : > { %v8373_v57 = vpop.f32.mrb[101].mxu1 }
0x256d   : > { %v10512_v32 = vpop.f32.mrb[102].mxu1 }
0x256e   : > { %v8374_v35 = vpop.f32.mrb[103].mxu1 }
0x256f   : > { %v4676_v33 = vpop.f32.mrb[100].mxu0 }
0x2570   : > { %v8391_v34 = vpop.f32.mrb[101].mxu0  ;;  %v4689_v62 = vsel %vm1068_vm3, %v4676_v33, -inf }
0x2571   : > { %v4679_v43 = vpop.f32.mrb[102].mxu0 }
0x2572   : > { %v8392_v41 = vpop.f32.mrb[103].mxu0  ;;  %v4692_v56 = vsel %vm1068_vm3, %v4679_v43, -inf }
0x2573   : > { %v4623_v27 = vpop.f32.mrb[104].mxu1 }
0x2574   : > { %v8385_v44 = vpop.f32.mrb[105].mxu1  ;;  %v4683_v45 = vsel %vm1068_vm3, %v4623_v27, -inf }
0x2575   : > { %4684 = vmax.xlane.f32.xlu0 %v4683_v45  ;;  %v4626_v3 = vpop.f32.mrb[106].mxu1 }
0x2576   : > { %v8386_v52 = vpop.f32.mrb[107].mxu1  ;;  %v4686_v5 = vsel %vm1068_vm3, %v4626_v3, -inf }
0x2577   : > { %4687 = vmax.xlane.f32.xlu1 %v4686_v5 }
0x2579   : > { %4690 = vmax.xlane.f32.xlu0 %v4689_v62 }
0x257d   : > { %4693 = vmax.xlane.f32.xlu0 %v4692_v56 }
0x2588   : > { %4778 = vrot.lane.b32.xlu1 %v10441_v28, %s9424_s26 }
0x258c   : > { %4827 = vrot.lane.b32.xlu1 %v10454_v29, %s9425_s17 }
0x2602   : > { %v4685_v13 = vpop.xlane.xlu0 %4684 }
0x2603   : > { %v4695_v38 = vsub.f32 %v4623_v27, %v4685_v13 }
0x2604   : > { %v4688_v50 = vpop.xlane.xlu1 %4687 }
0x2605   : > { %v4699_v40 = vmul.f32 1.442695, %v4695_v38  ;;  %v4696_v12 = vsub.f32 %v4626_v3, %v4688_v50 }
0x2606   : > { %v4691_v53 = vpop.xlane.xlu0 %4690 }
0x2607   : > { %v4697_v58 = vsub.f32 %v4676_v33, %v4691_v53  ;;  %v4701_v16 = vmul.f32 1.442695, %v4696_v12 }
0x2608   : > { %v4779_v59 = vpop.permute.xlu1 %4778 }
0x2609   : > { %v4703_v54 = vmul.f32 1.442695, %v4697_v58  ;;  %8400 = vmatpush3.bf16.msra.mxu0 %v4779_v59 }
0x260a   : > { %v4694_v60 = vpop.xlane.xlu0 %4693  ;;  %8411 = vmatprep.subr.bf16.mxu0 %v9422_v2 }
0x260b   : > { %9082 = vpow2.f32 %v4703_v54  ;;  %v4698_v61 = vsub.f32 %v4679_v43, %v4694_v60 }
0x260c   : > { %9084 = vpow2.f32 %v4699_v40  ;;  %v4828_v10 = vpop.permute.xlu1 %4827 }
0x260d   : > { %v4705_v0 = vmul.f32 1.442695, %v4698_v61  ;;  %v4833_v43 = vsel %vm973_vm2, %v4828_v10, 0 }
0x260f   : > { %9086 = vpow2.f32 %v4705_v0 }
0x2610   : > { %9088 = vpow2.f32 %v4701_v16 }
0x2615   : > { %v9083_v14 = vpop.eup %9082 }
0x2616   : > { %v4713_v1 = vsel %vm1068_vm3, %v9083_v14, 0.0  ;;  %v9085_v4 = vpop.eup %9084 }
0x2617   : > { %4714 = vadd.xlane.f32.xlu0 %v4713_v1  ;;  %v4707_v21 = vsel %vm1068_vm3, %v9085_v4, 0.0 }
0x2619   : > { %v9087_v6 = vpop.eup %9086 }
0x261a   : > { %v4716_v18 = vsel %vm1068_vm3, %v9087_v6, 0.0  ;;  %v9089_v7 = vpop.eup %9088 }
0x261b   : > { %4708 = vadd.xlane.f32.xlu0 %v4707_v21  ;;  %4717 = vadd.xlane.f32.xlu1 %v4716_v18  ;;  %v4710_v9 = vsel %vm1068_vm3, %v9089_v7, 0.0 }
0x261f   : > { %4711 = vadd.xlane.f32.xlu1 %v4710_v9 }
0x2630   : > { %4878 = vrot.lane.b32.xlu1 %v10452_v51, %s9425_s17 }
0x2631   : > { %4730 = vrot.lane.b32.xlu0 %v10443_v11, %s9424_s26 }
0x2634   : > { %4876 = vrot.lane.b32.xlu1 %v10445_v42, %s9425_s17 }
0x2635   : > { %4825 = vrot.lane.b32.xlu0 %v10447_v23, %s9425_s17 }
0x26a4   : > { %v4715_v47 = vpop.xlane.xlu0 %4714 }
0x26a5   : > { %9090 = vrcp.f32 %v4715_v47 }
0x26a8   : > { %v4709_v26 = vpop.xlane.xlu0 %4708  ;;  %v4718_v39 = vpop.xlane.xlu1 %4717 }
0x26a9   : > { %9092 = vrcp.f32 %v4718_v39 }
0x26aa   : > { %9094 = vrcp.f32 %v4709_v26 }
0x26ac   : > { %v4731_v36 = vpop.permute.xlu0 %4730  ;;  %v4712_v15 = vpop.xlane.xlu1 %4711 }
0x26ad   : > { %9096 = vrcp.f32 %v4712_v15  ;;  %8394 = vmatpush3.bf16.msra.mxu1 %v4731_v36 }
0x26ae   : > { %8405 = vmatprep.subr.bf16.mxu1 %v9422_v2 }
0x26af   : > { %v9091_v19 = vpop.eup %9090 }
0x26b0   : > { %v4725_v17 = vmul.f32 %v9091_v19, %v9083_v14  ;;  %v4879_v30 = vpop.permute.xlu1 %4878  ;;  %v4826_v27 = vpop.permute.xlu0 %4825 }
0x26b1   : > { %v4884_v33 = vsel %vm973_vm2, %v4879_v30, 0 }
0x26b3   : > { %v9093_v22 = vpop.eup %9092 }
0x26b4   : > { %v9095_v24 = vpop.eup %9094  ;;  %v4726_v25 = vmul.f32 %v9093_v22, %v9087_v6  ;;  %v4877_v41 = vpop.permute.xlu1 %4876 }
0x26b5   : > { %v4723_v57 = vmul.f32 %v9095_v24, %v9085_v4 }
0x26b6   : > { %v4728_v20 = vpack.c.bf16 %v4726_v25, %v4725_v17 }
0x26b7   : > { %v9097_v31 = vpop.eup %9096 }
0x26b8   : > { %v4724_v35 = vmul.f32 %v9097_v31, %v9089_v7  ;;  %8402 = vmatmul.mubr.msk.bf16.vlgmr.msra.gmra.mrb[104].mxu0 %vm1068_vm3, %v4728_v20 }
0x26b9   : > { %8412 = vmatpush3.bf16.xpose.msra.mxu0 %v4884_v33  ;;  %8413 = vmatprep.mubr.msk.bf16.mxu0 %vm9423_vm1, %v9422_v2 }
0x26ba   : > { %v4727_v34 = vpack.c.bf16 %v4724_v35, %v4723_v57  ;;  %8423 = vmatprep.subr.bf16.mxu0 %v9422_v2 }
0x26bc   : > { %8396 = vmatmul.mubr.msk.bf16.vlgmr.msra.gmra.mrb[108].mxu1 %vm1068_vm3, %v4727_v34 }
0x26bd   : > { %8406 = vmatpush3.bf16.xpose.msra.mxu1 %v4833_v43  ;;  %8407 = vmatprep.mubr.msk.bf16.mxu1 %vm9423_vm1, %v9422_v2 }
0x26be   : > { %8417 = vmatprep.subr.bf16.mxu1 %v9422_v2 }
0x26c0   : > { %8414 = vmatmul.mubr.msk.bf16.vlgmr.msra.gmra.mrb[108].mxu0 %vm973_vm2, %v4877_v41 }
0x26c1   : > { %8425 = vmatprep.mubr.msk.bf16.mxu0 %vm9423_vm1, %v9422_v2 }
0x26c4   : > { %8408 = vmatmul.mubr.msk.bf16.vlgmr.msra.gmra.mrb[112].mxu1 %vm973_vm2, %v4826_v27 }
0x26c5   : > { %8419 = vmatprep.mubr.msk.bf16.mxu1 %vm9423_vm1, %v9422_v2 }
0x278b   : > { %v10552_v44 = vpop.f32.mrb[104].mxu0 }
0x278c   : > { %v8403_v45 = vpop.f32.mrb[105].mxu0 }
0x278d   : > { %v10554_v3 = vpop.f32.mrb[106].mxu0 }
0x278e   : > { %v8787_v52 = vpack.i.bf16 %v10554_v3, %v10552_v44  ;;  %v8404_v5 = vpop.f32.mrb[107].mxu0 }
0x278f   : > { %v10558_v62 = vpop.f32.mrb[108].mxu1 }
0x2790   : > { %v8397_v56 = vpop.f32.mrb[109].mxu1 }
0x2791   : > { %v10560_v13 = vpop.f32.mrb[110].mxu1 }
0x2792   : > { %v8782_v50 = vpack.i.bf16 %v10560_v13, %v10558_v62  ;;  %v8398_v38 = vpop.f32.mrb[111].mxu1 }
0x2793   : > { %v4920_v53 = vpop.f32.mrb[108].mxu0 }
0x2794   : > { %v8415_v58 = vpop.f32.mrb[109].mxu0  ;;  %v4933_v14 = vsel %vm1068_vm3, %v4920_v53, -inf }
0x2795   : > { %v4923_v59 = vpop.f32.mrb[110].mxu0 }
0x2796   : > { %v8416_v40 = vpop.f32.mrb[111].mxu0  ;;  %v4936_v1 = vsel %vm1068_vm3, %v4923_v59, -inf }
0x2797   : > { %v4869_v12 = vpop.f32.mrb[112].mxu1 }
0x2798   : > { %v8409_v54 = vpop.f32.mrb[113].mxu1  ;;  %v4927_v60 = vsel %vm1068_vm3, %v4869_v12, -inf }
0x2799   : > { %4928 = vmax.xlane.f32.xlu0 %v4927_v60  ;;  %v4872_v61 = vpop.f32.mrb[114].mxu1 }
0x279a   : > { %v8410_v16 = vpop.f32.mrb[115].mxu1  ;;  %v4930_v0 = vsel %vm1068_vm3, %v4872_v61, -inf }
0x279b   : > { %4931 = vmax.xlane.f32.xlu1 %v4930_v0 }
0x279d   : > { %4934 = vmax.xlane.f32.xlu0 %v4933_v14 }
0x27a1   : > { %4937 = vmax.xlane.f32.xlu0 %v4936_v1 }
0x27ac   : > { %5020 = vrot.lane.b32.xlu1 %v10441_v28, %s9425_s17 }
0x27b0   : > { %5069 = vrot.lane.b32.xlu1 %v10454_v29, %s9426_s21 }
0x2826   : > { %v4929_v4 = vpop.xlane.xlu0 %4928 }
0x2827   : > { %v4939_v21 = vsub.f32 %v4869_v12, %v4929_v4 }
0x2828   : > { %v4932_v6 = vpop.xlane.xlu1 %4931 }
0x2829   : > { %v4943_v10 = vmul.f32 1.442695, %v4939_v21  ;;  %v4940_v47 = vsub.f32 %v4872_v61, %v4932_v6 }
0x282a   : > { %v4935_v18 = vpop.xlane.xlu0 %4934 }
0x282b   : > { %v4941_v7 = vsub.f32 %v4920_v53, %v4935_v18  ;;  %v4945_v15 = vmul.f32 1.442695, %v4940_v47 }
0x282c   : > { %v5021_v9 = vpop.permute.xlu1 %5020 }
0x282d   : > { %v4947_v26 = vmul.f32 1.442695, %v4941_v7  ;;  %8424 = vmatpush3.bf16.msra.mxu0 %v5021_v9 }
0x282e   : > { %v4938_v39 = vpop.xlane.xlu0 %4937  ;;  %8435 = vmatprep.subr.bf16.mxu0 %v9422_v2 }
0x282f   : > { %9098 = vpow2.f32 %v4947_v26  ;;  %v4942_v36 = vsub.f32 %v4923_v59, %v4938_v39 }
0x2830   : > { %9100 = vpow2.f32 %v4943_v10  ;;  %v5070_v57 = vpop.permute.xlu1 %5069 }
0x2831   : > { %v4949_v19 = vmul.f32 1.442695, %v4942_v36  ;;  %v5075_v12 = vsel %vm973_vm2, %v5070_v57, 0 }
0x2833   : > { %9102 = vpow2.f32 %v4949_v19 }
0x2834   : > { %9104 = vpow2.f32 %v4945_v15 }
0x2839   : > { %v9099_v29 = vpop.eup %9098 }
0x283a   : > { %v4957_v22 = vsel %vm1068_vm3, %v9099_v29, 0.0  ;;  %v9101_v24 = vpop.eup %9100 }
0x283b   : > { %4958 = vadd.xlane.f32.xlu0 %v4957_v22  ;;  %v4951_v25 = vsel %vm1068_vm3, %v9101_v24, 0.0 }
0x283d   : > { %v9103_v17 = vpop.eup %9102 }
0x283e   : > { %v4960_v30 = vsel %vm1068_vm3, %v9103_v17, 0.0  ;;  %v9105_v31 = vpop.eup %9104 }
0x283f   : > { %4952 = vadd.xlane.f32.xlu0 %v4951_v25  ;;  %4961 = vadd.xlane.f32.xlu1 %v4960_v30  ;;  %v4954_v20 = vsel %vm1068_vm3, %v9105_v31, 0.0 }
0x2843   : > { %4955 = vadd.xlane.f32.xlu1 %v4954_v20 }
0x2854   : > { %5120 = vrot.lane.b32.xlu1 %v10452_v51, %s9426_s21 }
0x2855   : > { %4973 = vrot.lane.b32.xlu0 %v10443_v11, %s9425_s17 }
0x2858   : > { %5118 = vrot.lane.b32.xlu1 %v10445_v42, %s9426_s21 }
0x2859   : > { %5067 = vrot.lane.b32.xlu0 %v10447_v23, %s9426_s21 }
0x28c8   : > { %v4959_v35 = vpop.xlane.xlu0 %4958 }
0x28c9   : > { %9106 = vrcp.f32 %v4959_v35 }
0x28cc   : > { %v4953_v33 = vpop.xlane.xlu0 %4952  ;;  %v4962_v34 = vpop.xlane.xlu1 %4961 }
0x28cd   : > { %9108 = vrcp.f32 %v4962_v34 }
0x28ce   : > { %9110 = vrcp.f32 %v4953_v33 }
0x28d0   : > { %v4974_v43 = vpop.permute.xlu0 %4973  ;;  %v4956_v41 = vpop.xlane.xlu1 %4955 }
0x28d1   : > { %9112 = vrcp.f32 %v4956_v41  ;;  %8418 = vmatpush3.bf16.msra.mxu1 %v4974_v43 }
0x28d2   : > { %8429 = vmatprep.subr.bf16.mxu1 %v9422_v2 }
0x28d3   : > { %v9107_v51 = vpop.eup %9106 }
0x28d4   : > { %v4969_v42 = vmul.f32 %v9107_v51, %v9099_v29  ;;  %v5121_v56 = vpop.permute.xlu1 %5120  ;;  %v5068_v60 = vpop.permute.xlu0 %5067 }
0x28d5   : > { %v5126_v59 = vsel %vm973_vm2, %v5121_v56, 0 }
0x28d7   : > { %v9109_v27 = vpop.eup %9108 }
0x28d8   : > { %v9111_v45 = vpop.eup %9110  ;;  %v4970_v5 = vmul.f32 %v9109_v27, %v9103_v17  ;;  %v5119_v54 = vpop.permute.xlu1 %5118 }
0x28d9   : > { %v4967_v53 = vmul.f32 %v9111_v45, %v9101_v24 }
0x28da   : > { %v4972_v38 = vpack.c.bf16 %v4970_v5, %v4969_v42 }
0x28db   : > { %v9113_v23 = vpop.eup %9112 }
0x28dc   : > { %v4968_v58 = vmul.f32 %v9113_v23, %v9105_v31  ;;  %8426 = vmatmul.mubr.msk.bf16.vlgmr.msra.gmra.mrb[112].mxu0 %vm1068_vm3, %v4972_v38 }
0x28dd   : > { %8436 = vmatpush3.bf16.xpose.msra.mxu0 %v5126_v59  ;;  %8437 = vmatprep.mubr.msk.bf16.mxu0 %vm9423_vm1, %v9422_v2 }
0x28de   : > { %v4971_v40 = vpack.c.bf16 %v4968_v58, %v4967_v53  ;;  %8447 = vmatprep.subr.bf16.mxu0 %v9422_v2 }
0x28e0   : > { %8420 = vmatmul.mubr.msk.bf16.vlgmr.msra.gmra.mrb[116].mxu1 %vm1068_vm3, %v4971_v40 }
0x28e1   : > { %8430 = vmatpush3.bf16.xpose.msra.mxu1 %v5075_v12  ;;  %8431 = vmatprep.mubr.msk.bf16.mxu1 %vm9423_vm1, %v9422_v2 }
0x28e2   : > { %8441 = vmatprep.subr.bf16.mxu1 %v9422_v2 }
0x28e4   : > { %8438 = vmatmul.mubr.msk.bf16.vlgmr.msra.gmra.mrb[116].mxu0 %vm973_vm2, %v5119_v54 }
0x28e5   : > { %8449 = vmatprep.mubr.msk.bf16.mxu0 %vm9423_vm1, %v9422_v2 }
0x28e8   : > { %8432 = vmatmul.mubr.msk.bf16.vlgmr.msra.gmra.mrb[120].mxu1 %vm973_vm2, %v5068_v60 }
0x28e9   : > { %8443 = vmatprep.mubr.msk.bf16.mxu1 %vm9423_vm1, %v9422_v2 }
0x29af   : > { %v5060_v61 = vpop.f32.mrb[112].mxu0 }
0x29b0   : > { %v8427_v16 = vpop.f32.mrb[113].mxu0 }
0x29b1   : > { %v5063_v0 = vpop.f32.mrb[114].mxu0 }
0x29b2   : > { %v8797_v14 = vpack.i.bf16 %v5063_v0, %v5060_v61  ;;  %v8428_v1 = vpop.f32.mrb[115].mxu0 }
0x29b3   : > { %v5013_v4 = vpop.f32.mrb[116].mxu1  ;;  %v8877_v1 = vld [vmem:[#allocation7 + $0x28] sm:$0xff]  }
0x29b4   : > { %v8421_v6 = vpop.f32.mrb[117].mxu1 }
0x29b5   : > { %v5016_v21 = vpop.f32.mrb[118].mxu1 }
0x29b6   : > { %v8792_v18 = vpack.i.bf16 %v5016_v21, %v5013_v4  ;;  %v8422_v7 = vpop.f32.mrb[119].mxu1 }
0x29b7   : > { %v5162_v9 = vpop.f32.mrb[116].mxu0 }
0x29b8   : > { %v8439_v10 = vpop.f32.mrb[117].mxu0  ;;  %v5175_v24 = vsel %vm1068_vm3, %v5162_v9, -inf }
0x29b9   : > { %v5165_v47 = vpop.f32.mrb[118].mxu0 }
0x29ba   : > { %v8440_v26 = vpop.f32.mrb[119].mxu0  ;;  %v5178_v17 = vsel %vm1068_vm3, %v5165_v47, -inf }
0x29bb   : > { %v5111_v39 = vpop.f32.mrb[120].mxu1 }
0x29bc   : > { %v8433_v36 = vpop.f32.mrb[121].mxu1  ;;  %v5169_v15 = vsel %vm1068_vm3, %v5111_v39, -inf }
0x29bd   : > { %5170 = vmax.xlane.f32.xlu0 %v5169_v15  ;;  %v5114_v19 = vpop.f32.mrb[122].mxu1 }
0x29be   : > { %v8434_v29 = vpop.f32.mrb[123].mxu1  ;;  %v5172_v22 = vsel %vm1068_vm3, %v5114_v19, -inf }
0x29bf   : > { %5173 = vmax.xlane.f32.xlu1 %v5172_v22 }
0x29c1   : > { %5176 = vmax.xlane.f32.xlu0 %v5175_v24 }
0x29c5   : > { %5179 = vmax.xlane.f32.xlu0 %v5178_v17 }
0x2a4a   : > { %v5171_v25 = vpop.xlane.xlu0 %5170 }
0x2a4b   : > { %v5181_v30 = vsub.f32 %v5111_v39, %v5171_v25 }
0x2a4c   : > { %v5174_v31 = vpop.xlane.xlu1 %5173 }
0x2a4d   : > { %v5185_v35 = vmul.f32 1.442695, %v5181_v30  ;;  %v5182_v33 = vsub.f32 %v5114_v19, %v5174_v31 }
0x2a4e   : > { %v5177_v20 = vpop.xlane.xlu0 %5176 }
0x2a4f   : > { %v5183_v57 = vsub.f32 %v5162_v9, %v5177_v20  ;;  %v5187_v51 = vmul.f32 1.442695, %v5182_v33 }
0x2a51   : > { %v5189_v34 = vmul.f32 1.442695, %v5183_v57 }
0x2a52   : > { %v5180_v43 = vpop.xlane.xlu0 %5179 }
0x2a53   : > { %9114 = vpow2.f32 %v5189_v34  ;;  %v5184_v41 = vsub.f32 %v5165_v47, %v5180_v43 }
0x2a54   : > { %9116 = vpow2.f32 %v5185_v35 }
0x2a55   : > { %v5191_v27 = vmul.f32 1.442695, %v5184_v41 }
0x2a57   : > { %9118 = vpow2.f32 %v5191_v27 }
0x2a58   : > { %9120 = vpow2.f32 %v5187_v51 }
0x2a5d   : > { %v9115_v45 = vpop.eup %9114 }
0x2a5e   : > { %v5199_v42 = vsel %vm1068_vm3, %v9115_v45, 0.0  ;;  %v9117_v5 = vpop.eup %9116 }
0x2a5f   : > { %5200 = vadd.xlane.f32.xlu0 %v5199_v42  ;;  %v5193_v23 = vsel %vm1068_vm3, %v9117_v5, 0.0 }
0x2a61   : > { %v9119_v56 = vpop.eup %9118 }
0x2a62   : > { %v5202_v38 = vsel %vm1068_vm3, %v9119_v56, 0.0  ;;  %v9121_v53 = vpop.eup %9120 }
0x2a63   : > { %5194 = vadd.xlane.f32.xlu0 %v5193_v23  ;;  %5203 = vadd.xlane.f32.xlu1 %v5202_v38  ;;  %v5196_v58 = vsel %vm1068_vm3, %v9121_v53, 0.0 }
0x2a67   : > { %5197 = vadd.xlane.f32.xlu1 %v5196_v58 }
0x2a78   : > { %5262 = vrot.lane.b32.xlu1 %v10441_v28, %s9426_s21 }
0x2a79   : > { %5215 = vrot.lane.b32.xlu0 %v10443_v11, %s9426_s21 }
0x2a7c   : > { %8783 = vrot.lane.b32.xlu1 %v8782_v50, %s9427_s1 }
0x2a7d   : > { %8793 = vrot.lane.b32.xlu0 %v8792_v18, %s9428_s28 }
0x2a80   : > { %8788 = vrot.lane.b32.xlu1 %v8787_v52, %s9427_s1 }
0x2a84   : > { %8798 = vrot.lane.b32.xlu1 %v8797_v14, %s9428_s28  ;;  %v8876_v14 = vld [vmem:[#allocation7 + $0x20] sm:$0xff]  }
0x2aec   : > { %v5201_v59 = vpop.xlane.xlu0 %5200 }
0x2aed   : > { %9122 = vrcp.f32 %v5201_v59 }
0x2af0   : > { %v5195_v28 = vpop.xlane.xlu0 %5194  ;;  %v5204_v40 = vpop.xlane.xlu1 %5203 }
0x2af1   : > { %9124 = vrcp.f32 %v5204_v40 }
0x2af2   : > { %9126 = vrcp.f32 %v5195_v28  ;;  %v7701_v28 = vld [vmem:[%s11128_s9 + $0x2] ss:$0 sm:$0xff] }
0x2af4   : > { %v5216_v11 = vpop.permute.xlu0 %5215  ;;  %v5198_v12 = vpop.xlane.xlu1 %5197 }
0x2af5   : > { %9128 = vrcp.f32 %v5198_v12  ;;  %8442 = vmatpush3.bf16.msra.mxu1 %v5216_v11 }
0x2af6   : > { %8453 = vmatprep.subr.bf16.mxu1 %v8876_v14 }
0x2af7   : > { %v9123_v13 = vpop.eup %9122 }
0x2af8   : > { %v5263_v62 = vpop.permute.xlu1 %5262  ;;  %v5211_v60 = vmul.f32 %v9123_v13, %v9115_v45  ;;  %v8794_v31 = vpop.permute.xlu0 %8793 }
0x2af9   : > { %8448 = vmatpush3.bf16.msra.mxu0 %v5263_v62  ;;  %v8796_v45 = vunpack.i.h.bf16 %v8794_v31  ;;  %v8795_v42 = vunpack.i.l.bf16 %v8794_v31  ;;  %v8881_v31 = vld [vmem:[%s11135_s16 + $0x48] sm:$0xff]  }
0x2afb   : > { %v9125_v50 = vpop.eup %9124 }
0x2afc   : > { %v9127_v54 = vpop.eup %9126  ;;  %v5212_v44 = vmul.f32 %v9125_v50, %v9119_v56  ;;  %v8784_v36 = vpop.permute.xlu1 %8783 }
0x2afd   : > { %v5209_v61 = vmul.f32 %v9127_v54, %v9117_v5  ;;  %v8786_v24 = vunpack.i.h.bf16 %v8784_v36  ;;  %v8785_v17 = vunpack.i.l.bf16 %v8784_v36 }
0x2afe   : > { %v5214_v52 = vpack.c.bf16 %v5212_v44, %v5211_v60 }
0x2aff   : > { %v9129_v3 = vpop.eup %9128  ;;  %v5358_v43 = vsel %vm973_vm2, %v10512_v32, %v8786_v24  ;;  %v5357_v41 = vsel %vm973_vm2, %v10510_v63, %v8785_v17  ;;  %v8878_v17 = vld [vmem:[#allocation8 + $0x20] sm:$0xff]  }
0x2b00   : > { %v5210_v16 = vmul.f32 %v9129_v3, %v9121_v53  ;;  %8450 = vmatmul.mubr.msk.bf16.vlgmr.msra.gmra.mrb[120].mxu0 %vm1068_vm3, %v5214_v52  ;;  %v8789_v15 = vpop.permute.xlu1 %8788  ;;  %v5361_v53 = vsel %vm1068_vm3, %v5357_v41, %v8795_v42  ;;  %v5362_v32 = vsel %vm1068_vm3, %v5358_v43, %v8796_v45  ;;  %8461 = vmatprep.subr.bf16.mxu0 %v8878_v17 }
0x2b01   : > { %v8791_v29 = vunpack.i.h.bf16 %v8789_v15  ;;  %v8790_v22 = vunpack.i.l.bf16 %v8789_v15  ;;  %8462 = vmatpush3.bf16.msra.mxu0 %v8878_v17 }
0x2b02   : > { %v5213_v0 = vpack.c.bf16 %v5210_v16, %v5209_v61 }
0x2b03   : > { %v5360_v57 = vsel %vm973_vm2, %v10508_v37, %v8791_v29  ;;  %v5359_v35 = vsel %vm973_vm2, %v10506_v48, %v8790_v22 }
0x2b04   : > { %8444 = vmatmul.mubr.msk.bf16.vlgmr.msra.gmra.mrb[124].mxu1 %vm1068_vm3, %v5213_v0  ;;  %v8799_v19 = vpop.permute.xlu1 %8798 }
0x2b05   : > { %8454 = vmatpush3.bf16.msra.mxu1 %v8876_v14  ;;  %v8801_v25 = vunpack.i.h.bf16 %v8799_v19  ;;  %v8800_v30 = vunpack.i.l.bf16 %v8799_v19 }
0x2b06   : > { %8455 = vmatprep.subr.bf16.mxu1 %v8877_v1 }
0x2b07   : > { %v5363_v51 = vsel %vm1068_vm3, %v5359_v35, %v8800_v30  ;;  %v5364_v27 = vsel %vm1068_vm3, %v5360_v57, %v8801_v25  ;;  %v8879_v25 = vld [vmem:[#allocation8 + $0x28] sm:$0xff]   ;;  %v8880_v30 = vld [vmem:[%s11135_s16 + $0x40] sm:$0xff]  }
0x2b08   : > { %8463 = vmatprep.subr.bf16.mxu0 %v8879_v25 }
0x2b09   : > { %8456 = vmatpush3.bf16.msra.mxu1 %v8877_v1  ;;  %8464 = vmatpush3.bf16.msra.mxu0 %v8879_v25 }
0x2b0a   : > { %8469 = vmatprep.subr.bf16.mxu1 %v8880_v30 }
0x2bd3   : > { %v5302_v4 = vpop.f32.mrb[120].mxu0 }
0x2bd4   : > { %v8451_v6 = vpop.f32.mrb[121].mxu0 }
0x2bd5   : > { %v5305_v21 = vpop.f32.mrb[122].mxu0 }
0x2bd6   : > { %v8807_v18 = vpack.i.bf16 %v5305_v21, %v5302_v4  ;;  %v8452_v7 = vpop.f32.mrb[123].mxu0 }
0x2bd7   : > { %v5255_v9 = vpop.f32.mrb[124].mxu1 }
0x2bd8   : > { %v8445_v10 = vpop.f32.mrb[125].mxu1  ;;  %8808 = vrot.lane.b32.xlu1 %v8807_v18, %s9429_s15 }
0x2bd9   : > { %v5258_v47 = vpop.f32.mrb[126].mxu1 }
0x2bda   : > { %v8802_v26 = vpack.i.bf16 %v5258_v47, %v5255_v9  ;;  %v8446_v39 = vpop.f32.mrb[127].mxu1 }
0x2bdc   : > { %8803 = vrot.lane.b32.xlu0 %v8802_v26, %s9429_s15 }
0x2c4a   : > { %v8809_v20 = vpop.permute.xlu1 %8808 }
0x2c4b   : > { %v8811_v33 = vunpack.i.h.bf16 %v8809_v20  ;;  %v8810_v34 = vunpack.i.l.bf16 %v8809_v20 }
0x2c4d   : > { %v5367_v5 = vsel %vm1991_vm4, %v5363_v51, %v8810_v34  ;;  %v5368_v37 = vsel %vm1991_vm4, %v5364_v27, %v8811_v33 }
0x2c4e   : > { %v8804_v56 = vpop.permute.xlu0 %8803  ;;  %v5370_v48 = vpack.c.bf16 %v5368_v37, %v5367_v5 }
0x2c4f   : > { %v8806_v23 = vunpack.i.h.bf16 %v8804_v56  ;;  %v8805_v38 = vunpack.i.l.bf16 %v8804_v56  ;;  %v7706_v56 = vld [vmem:[%s11131_s12 + $0x2] ss:$0 sm:$0xff] }
0x2c51   : > { %v5366_v63 = vsel %vm1991_vm4, %v5362_v32, %v8806_v23  ;;  %v5365_v58 = vsel %vm1991_vm4, %v5361_v53, %v8805_v38 }
0x2c52   : > { %v5369_v59 = vpack.c.bf16 %v5366_v63, %v5365_v58  ;;  %v7707_v63 = vld [vmem:[%s11132_s13 + $0x2] ss:$0 sm:$0xff] }
0x2c54   : > { %8457 = vmatprep.mubr.msk.bf16.mxu1 %vm680_vm0, %v5369_v59 }
0x2c55   : > { %8458 = vmatmul.mubr.msk.bf16.vlgmr.msra.gmra.mrb[128].mxu1 %vm680_vm0, %v5370_v48 }
0x2c56   : > { %8470 = vmatpush3.bf16.msra.mxu1 %v8880_v30 }
0x2c57   : > { %8471 = vmatprep.subr.bf16.mxu1 %v8881_v31 }
0x2c5a   : > { %8472 = vmatpush3.bf16.msra.mxu1 %v8881_v31 }
0x2d28   : > { %v8459_v40 = vpop.f32.mrb[128].mxu1 }
0x2d29   : > { %v5429_v11 = vpop.f32.mrb[129].mxu1  ;;  %v5438_v12 = vadd.f32 %v8459_v40, %v7701_v28 }
0x2d2a   : > { %v5430_v62 = vadd.f32 %v7701_v28, %v5429_v11  ;;  %v8460_v13 = vpop.f32.mrb[130].mxu1 }
0x2d2b   : > { %v5432_v50 = vpop.f32.mrb[131].mxu1  ;;  %v10653_v44 = vadd.f32 %v5438_v12, %v10389_v55  ;;  %v5441_v3 = vadd.f32 %v8460_v13, %v7701_v28 }
0x2d2c   : > { %v10650_v54 = vadd.f32 %v5430_v62, %v10381_v49  ;;  %v5433_v60 = vadd.f32 %v7701_v28, %v5432_v50 }
0x2d2d   : > { %v10663_v0 = vadd.f32 %v5441_v3, %v10384_v8  ;;  %v5454_v49 = vsel %vm680_vm0, %v10653_v44, 0.0 }
0x2d2e   : > { %v10656_v52 = vadd.f32 %v5433_v60, %v10378_v46  ;;  %v5448_v61 = vsel %vm680_vm0, %v10650_v54, 0.0 }
0x2d2f   : > { %5449 = vadd.xlane.f32.xlu0 %v5448_v61  ;;  %v5457_v55 = vsel %vm680_vm0, %v10663_v0, 0.0 }
0x2d30   : > { %v5451_v16 = vsel %vm680_vm0, %v10656_v52, 0.0 }
0x2d31   : > { %5452 = vadd.xlane.f32.xlu1 %v5451_v16  ;;  %v8882_v16 = vld [vmem:[%s11135_s16 + $0x50] sm:$0xff]  }
0x2d32   : > { %8473 = vmatprep.subr.bf16.mxu1 %v8882_v16 }
0x2d33   : > { %5455 = vadd.xlane.f32.xlu0 %v5454_v49  ;;  %8474 = vmatpush3.bf16.msra.mxu1 %v8882_v16  ;;  %v8883_v49 = vld [vmem:[%s11135_s16 + $0x58] sm:$0xff]  }
0x2d34   : > { %8475 = vmatprep.subr.bf16.mxu1 %v8883_v49 }
0x2d37   : > { %5458 = vadd.xlane.f32.xlu0 %v5457_v55  ;;  %8476 = vmatpush3.bf16.msra.mxu1 %v8883_v49  ;;  %v7708_v55 = vld [vmem:[%s11194_s2 + $0x2] ss:$0 sm:$0xff] }
0x2dbc   : > { %v5450_v46 = vpop.xlane.xlu0 %5449 }
0x2dbd   : > { %v5460_v14 = vmul.f32 0.03125, %v5450_v46 }
0x2dbe   : > { %v5453_v1 = vpop.xlane.xlu1 %5452 }
0x2dbf   : > { %v5464_v4 = vsub.f32 %v10650_v54, %v5460_v14  ;;  %v5461_v6 = vmul.f32 0.03125, %v5453_v1 }
0x2dc0   : > { %v5456_v21 = vpop.xlane.xlu0 %5455 }
0x2dc1   : > { %v5465_v18 = vsub.f32 %v10656_v52, %v5461_v6  ;;  %v5462_v7 = vmul.f32 0.03125, %v5456_v21  ;;  %v5468_v8 = vmul.f32 %v5464_v4, %v5464_v4 }
0x2dc3   : > { %v5466_v9 = vsub.f32 %v10653_v44, %v5462_v7  ;;  %v5472_v10 = vsel %vm680_vm0, %v5468_v8, 0.0  ;;  %v5469_v47 = vmul.f32 %v5465_v18, %v5465_v18 }
0x2dc4   : > { %5473 = vadd.xlane.f32.xlu0 %v5472_v10  ;;  %v5459_v26 = vpop.xlane.xlu0 %5458 }
0x2dc5   : > { %v5463_v39 = vmul.f32 0.03125, %v5459_v26  ;;  %v5475_v36 = vsel %vm680_vm0, %v5469_v47, 0.0  ;;  %v5470_v15 = vmul.f32 %v5466_v9, %v5466_v9 }
0x2dc6   : > { %5476 = vadd.xlane.f32.xlu1 %v5475_v36  ;;  %v7713_v36 = vld [vmem:[%s11195_s24 + $0x2] ss:$0 sm:$0xff] }
0x2dc7   : > { %v5467_v19 = vsub.f32 %v10663_v0, %v5463_v39  ;;  %v5478_v29 = vsel %vm680_vm0, %v5470_v15, 0.0 }
0x2dc8   : > { %5479 = vadd.xlane.f32.xlu0 %v5478_v29 }
0x2dc9   : > { %v5471_v22 = vmul.f32 %v5467_v19, %v5467_v19 }
0x2dcb   : > { %v5481_v24 = vsel %vm680_vm0, %v5471_v22, 0.0 }
0x2dcc   : > { %5482 = vadd.xlane.f32.xlu1 %v5481_v24 }
0x2e51   : > { %v5474_v20 = vpop.xlane.xlu0 %5473 }
0x2e52   : > { %v5484_v57 = vmul.f32 0.03125, %v5474_v20 }
0x2e53   : > { %v5477_v35 = vpop.xlane.xlu1 %5476 }
0x2e54   : > { %v5488_v33 = vadd.f32 1e-05, %v5484_v57  ;;  %v5485_v34 = vmul.f32 0.03125, %v5477_v35 }
0x2e55   : > { %v5480_v43 = vpop.xlane.xlu0 %5479 }
0x2e56   : > { %9130 = vrsqrt.f32 %v5488_v33  ;;  %v5489_v41 = vadd.f32 1e-05, %v5485_v34  ;;  %v5486_v51 = vmul.f32 0.03125, %v5480_v43 }
0x2e58   : > { %9132 = vrsqrt.f32 %v5489_v41  ;;  %v5490_v27 = vadd.f32 1e-05, %v5486_v51 }
0x2e59   : > { %v5483_v45 = vpop.xlane.xlu1 %5482 }
0x2e5a   : > { %9134 = vrsqrt.f32 %v5490_v27  ;;  %v5487_v42 = vmul.f32 0.03125, %v5483_v45 }
0x2e5c   : > { %v5491_v5 = vadd.f32 1e-05, %v5487_v42 }
0x2e5e   : > { %9136 = vrsqrt.f32 %v5491_v5 }
0x2e60   : > { %v9131_v37 = vpop.eup %9130 }
0x2e61   : > { %v5496_v48 = vmul.f32 %v9131_v37, %v5464_v4 }
0x2e62   : > { %v9133_v23 = vpop.eup %9132 }
0x2e63   : > { %v5497_v38 = vmul.f32 %v9133_v23, %v5465_v18  ;;  %v5506_v53 = vmul.f32 %v7706_v56, %v5496_v48 }
0x2e64   : > { %v9135_v32 = vpop.eup %9134 }
0x2e65   : > { %v5498_v58 = vmul.f32 %v9135_v32, %v5466_v9  ;;  %v5507_v59 = vmul.f32 %v7706_v56, %v5497_v38  ;;  %v5516_v28 = vadd.f32 %v7707_v63, %v5506_v53 }
0x2e67   : > { %v5517_v40 = vadd.f32 %v7707_v63, %v5507_v59  ;;  %v5508_v12 = vmul.f32 %v7706_v56, %v5498_v58 }
0x2e68   : > { %v9137_v11 = vpop.eup %9136 }
0x2e69   : > { %v5499_v62 = vmul.f32 %v9137_v11, %v5467_v19  ;;  %v5520_v13 = vpack.c.bf16 %v5517_v40, %v5516_v28  ;;  %v5518_v60 = vadd.f32 %v7707_v63, %v5508_v12  ;;  %v8884_v40 = vld [vmem:[%s11192_s23 + $0x30] sm:$0xff]   ;;  %v8886_v12 = vld [vmem:[%s11192_s23 + $0x38] sm:$0xff]  }
0x2e6a   : > { %v8885_v11 = vld [vmem:[#allocation5 + $0x30] sm:$0xff]   ;;  %8481 = vmatprep.subr.bf16.mxu0 %v8884_v40 }
0x2e6b   : > { %v5509_v50 = vmul.f32 %v7706_v56, %v5499_v62  ;;  %8465 = vmatprep.mubr.msk.bf16.mxu0 %vm680_vm0, %v5520_v13  ;;  %8497 = vmatprep.subr.bf16.mxu1 %v8885_v11  ;;  %v8887_v62 = vld [vmem:[#allocation5 + $0x38] sm:$0xff]   ;;  %v8888_v13 = vld [vmem:[%s11123_s4 + $0x30] sm:$0xff]  }
0x2e6d   : > { %v5519_v3 = vadd.f32 %v7707_v63, %v5509_v50 }
0x2e6f   : > { %v5521_v61 = vpack.c.bf16 %v5519_v3, %v5518_v60 }
0x2e71   : > { %8466 = vmatmul.mubr.msk.bf16.vlgmr.msra.gmra.mrb[124].mxu0 %vm680_vm0, %v5521_v61 }
0x2e72   : > { %8482 = vmatpush3.bf16.msra.mxu0 %v8884_v40 }
0x2e73   : > { %8483 = vmatprep.subr.bf16.mxu0 %v8886_v12 }
0x2e76   : > { %8484 = vmatpush3.bf16.msra.mxu0 %v8886_v12 }
0x2e77   : > { %8489 = vmatprep.subr.bf16.mxu0 %v8888_v13 }
0x2f44   : > { %v8467_v46 = vpop.f32.mrb[124].mxu0 }
0x2f45   : > { %v5589_v14 = vadd.f32 %v8467_v46, %v7708_v55  ;;  %v5580_v1 = vpop.f32.mrb[125].mxu0 }
0x2f46   : > { %v5581_v4 = vadd.f32 %v7708_v55, %v5580_v1  ;;  %v8468_v6 = vpop.f32.mrb[126].mxu0 }
0x2f47   : > { %v5592_v21 = vadd.f32 %v8468_v6, %v7708_v55  ;;  %v5583_v18 = vpop.f32.mrb[127].mxu0  ;;  %v5597_v8 = vmax.f32 %v5589_v14, 0.0 }
0x2f48   : > { %v5584_v7 = vadd.f32 %v7708_v55, %v5583_v18  ;;  %v5595_v10 = vmax.f32 %v5581_v4, 0.0 }
0x2f49   : > { %v5598_v9 = vmax.f32 %v5592_v21, 0.0 }
0x2f4a   : > { %v5596_v47 = vmax.f32 %v5584_v7, 0.0  ;;  %v7746_v7 = vld [vmem:[%s11129_s10 + $0x3] ss:$0 sm:$0xff] }
0x2f4b   : > { %v5600_v26 = vpack.c.bf16 %v5598_v9, %v5597_v8 }
0x2f4c   : > { %v5599_v39 = vpack.c.bf16 %v5596_v47, %v5595_v10 }
0x2f4e   : > { %8477 = vmatprep.mubr.msk.bf16.mxu1 %vm2258_vm5, %v5599_v39  ;;  %v7747_v39 = vld [vmem:[%s11130_s11 + $0x3] ss:$0 sm:$0xff] }
0x2f4f   : > { %8478 = vmatmul.mubr.msk.bf16.vlgmr.msra.gmra.mrb[132].mxu1 %vm2258_vm5, %v5600_v26 }
0x2f50   : > { %8498 = vmatpush3.bf16.msra.mxu1 %v8885_v11 }
0x2f51   : > { %8499 = vmatprep.subr.bf16.mxu1 %v8887_v62 }
0x2f54   : > { %8500 = vmatpush3.bf16.msra.mxu1 %v8887_v62 }
0x2f55   : > { %8511 = vmatprep.subr.bf16.mxu1 %v9422_v2 }
0x3022   : > { %v8479_v15 = vpop.f32.mrb[132].mxu1 }
0x3023   : > { %v5680_v19 = vadd.f32 %v8479_v15, %v7713_v36  ;;  %v5671_v29 = vpop.f32.mrb[133].mxu1 }
0x3024   : > { %v5672_v22 = vadd.f32 %v7713_v36, %v5671_v29  ;;  %v8480_v24 = vpop.f32.mrb[134].mxu1 }
0x3025   : > { %v10706_v17 = vadd.f32 %v5680_v19, %v10653_v44  ;;  %v5674_v25 = vpop.f32.mrb[135].mxu1  ;;  %v5683_v30 = vadd.f32 %v8480_v24, %v7713_v36 }
0x3026   : > { %v5675_v31 = vadd.f32 %v7713_v36, %v5674_v25  ;;  %v10709_v20 = vadd.f32 %v5672_v22, %v10650_v54 }
0x3027   : > { %v5747_v57 = vsel %vm680_vm0, %v10706_v17, 0.0  ;;  %v10717_v33 = vadd.f32 %v5683_v30, %v10663_v0 }
0x3028   : > { %v10714_v35 = vadd.f32 %v5675_v31, %v10656_v52  ;;  %5748 = vadd.xlane.f32.xlu1 %v5747_v57  ;;  %v5753_v34 = vsel %vm680_vm0, %v10709_v20, 0.0 }
0x3029   : > { %v5750_v54 = vsel %vm680_vm0, %v10717_v33, 0.0 }
0x302a   : > { %v5744_v44 = vsel %vm680_vm0, %v10714_v35, 0.0 }
0x302b   : > { %5745 = vadd.xlane.f32.xlu0 %v5744_v44 }
0x302c   : > { %5754 = vadd.xlane.f32.xlu1 %v5753_v34  ;;  %v8889_v34 = vld [vmem:[%s11123_s4 + $0x38] sm:$0xff]  }
0x302f   : > { %5751 = vadd.xlane.f32.xlu0 %v5750_v54  ;;  %v7748_v54 = vld [vmem:[%s11122_s3 + $0x3] ss:$0 sm:$0xff] }
0x30b5   : > { %v5749_v43 = vpop.xlane.xlu1 %5748 }
0x30b6   : > { %v5757_v41 = vmul.f32 0.03125, %v5749_v43 }
0x30b8   : > { %v5761_v52 = vsub.f32 %v10706_v17, %v5757_v41  ;;  %v5746_v51 = vpop.xlane.xlu0 %5745 }
0x30b9   : > { %v5756_v27 = vmul.f32 0.03125, %v5746_v51  ;;  %v5755_v0 = vpop.xlane.xlu1 %5754 }
0x30ba   : > { %v5759_v45 = vmul.f32 0.03125, %v5755_v0  ;;  %v5765_v42 = vmul.f32 %v5761_v52, %v5761_v52 }
0x30bb   : > { %v5760_v5 = vsub.f32 %v10714_v35, %v5756_v27 }
0x30bc   : > { %v5763_v37 = vsub.f32 %v10709_v20, %v5759_v45  ;;  %v5752_v56 = vpop.xlane.xlu0 %5751  ;;  %v5771_v48 = vsel %vm680_vm0, %v5765_v42, 0.0 }
0x30bd   : > { %v5758_v23 = vmul.f32 0.03125, %v5752_v56  ;;  %5772 = vadd.xlane.f32.xlu1 %v5771_v48  ;;  %v5764_v38 = vmul.f32 %v5760_v5, %v5760_v5 }
0x30be   : > { %v5767_v53 = vmul.f32 %v5763_v37, %v5763_v37 }
0x30bf   : > { %v5762_v32 = vsub.f32 %v10717_v33, %v5758_v23  ;;  %v5768_v63 = vsel %vm680_vm0, %v5764_v38, 0.0 }
0x30c0   : > { %5769 = vadd.xlane.f32.xlu0 %v5768_v63  ;;  %v5777_v58 = vsel %vm680_vm0, %v5767_v53, 0.0 }
0x30c1   : > { %5778 = vadd.xlane.f32.xlu1 %v5777_v58  ;;  %v5766_v59 = vmul.f32 %v5762_v32, %v5762_v32 }
0x30c3   : > { %v5774_v28 = vsel %vm680_vm0, %v5766_v59, 0.0 }
0x30c4   : > { %5775 = vadd.xlane.f32.xlu0 %v5774_v28 }
0x314a   : > { %v5773_v50 = vpop.xlane.xlu1 %5772 }
0x314b   : > { %v5781_v60 = vmul.f32 0.03125, %v5773_v50 }
0x314d   : > { %v5785_v3 = vadd.f32 1e-05, %v5781_v60  ;;  %v5770_v61 = vpop.xlane.xlu0 %5769  ;;  %v7753_v60 = vld [vmem:[%s11124_s5 + $0x3] ss:$0 sm:$0xff] }
0x314e   : > { %v5780_v16 = vmul.f32 0.03125, %v5770_v61  ;;  %v5779_v49 = vpop.xlane.xlu1 %5778 }
0x314f   : > { %9138 = vrsqrt.f32 %v5785_v3  ;;  %v5783_v55 = vmul.f32 0.03125, %v5779_v49 }
0x3150   : > { %v5784_v46 = vadd.f32 1e-05, %v5780_v16 }
0x3151   : > { %v5787_v14 = vadd.f32 1e-05, %v5783_v55  ;;  %v5776_v1 = vpop.xlane.xlu0 %5775 }
0x3152   : > { %9140 = vrsqrt.f32 %v5784_v46  ;;  %v5782_v4 = vmul.f32 0.03125, %v5776_v1 }
0x3153   : > { %9142 = vrsqrt.f32 %v5787_v14 }
0x3154   : > { %v5786_v6 = vadd.f32 1e-05, %v5782_v4 }
0x3156   : > { %9144 = vrsqrt.f32 %v5786_v6 }
0x3159   : > { %v9139_v21 = vpop.eup %9138 }
0x315a   : > { %v5793_v18 = vmul.f32 %v9139_v21, %v5761_v52  ;;  %v7758_v52 = vld [vmem:[%s11126_s7 + $0x3] ss:$0 sm:$0xff] }
0x315c   : > { %v9141_v8 = vpop.eup %9140  ;;  %v5803_v47 = vmul.f32 %v7746_v7, %v5793_v18 }
0x315d   : > { %v9143_v9 = vpop.eup %9142  ;;  %v5792_v10 = vmul.f32 %v9141_v8, %v5760_v5 }
0x315e   : > { %v5795_v26 = vmul.f32 %v9143_v9, %v5763_v37  ;;  %v5813_v24 = vadd.f32 %v7747_v39, %v5803_v47  ;;  %v10802_v9 = vld [vmem:[#allocation2] sm:$0xff] }
0x315f   : > { %v5802_v36 = vmul.f32 %v7746_v7, %v5792_v10 }
0x3160   : > { %v9145_v15 = vpop.eup %9144  ;;  %v5805_v19 = vmul.f32 %v7746_v7, %v5795_v26 }
0x3161   : > { %v5794_v29 = vmul.f32 %v9145_v15, %v5762_v32  ;;  %v5812_v22 = vadd.f32 %v7747_v39, %v5802_v36  ;;  %v10805_v15 = vld [vmem:[#allocation2 + $0x10] sm:$0xff] }
0x3162   : > { %v5815_v57 = vadd.f32 %v7747_v39, %v5805_v19 }
0x3163   : > { %v5804_v25 = vmul.f32 %v7746_v7, %v5794_v29  ;;  %v5816_v30 = vpack.c.bf16 %v5813_v24, %v5812_v22  ;;  %v10808_v29 = vld [vmem:[#allocation2 + $0x8] sm:$0xff] }
0x3165   : > { %8485 = vmatprep.mubr.msk.bf16.mxu0 %vm680_vm0, %v5816_v30  ;;  %8501 = vmatprep.mubr.msk.bf16.mxu1 %vm680_vm0, %v5816_v30  ;;  %v5814_v31 = vadd.f32 %v7747_v39, %v5804_v25 }
0x3167   : > { %v5817_v44 = vpack.c.bf16 %v5815_v57, %v5814_v31 }
0x3169   : > { %8486 = vmatmul.mubr.msk.bf16.vlgmr.msra.gmra.mrb[128].mxu0 %vm680_vm0, %v5817_v44  ;;  %8502 = vmatmul.mubr.msk.bf16.vlgmr.msra.gmra.mrb[136].mxu1 %vm680_vm0, %v5817_v44 }
0x316a   : > { %8490 = vmatpush3.bf16.msra.mxu0 %v8888_v13  ;;  %8493 = vmatprep.mubr.msk.bf16.mxu0 %vm680_vm0, %v5816_v30  ;;  %v10812_v30 = vld [vmem:[#allocation2 + $0x18] sm:$0xff] }
0x316b   : > { %8491 = vmatprep.subr.bf16.mxu0 %v8889_v34  ;;  %8513 = vmatprep.mubr.msk.bf16.mxu1 %vm9423_vm1, %v9422_v2 }
0x316e   : > { %8492 = vmatpush3.bf16.msra.mxu0 %v8889_v34 }
0x316f   : > { %8505 = vmatprep.subr.bf16.mxu0 %v9422_v2 }
0x3171   : > { %8494 = vmatmul.mubr.msk.bf16.vlgmr.msra.gmra.mrb[132].mxu0 %vm680_vm0, %v5817_v44 }
0x3172   : > { %8507 = vmatprep.mubr.msk.bf16.mxu0 %vm9423_vm1, %v9422_v2 }
0x323c   : > { %v8487_v43 = vpop.f32.mrb[128].mxu0  ;;  %v8503_v41 = vpop.f32.mrb[136].mxu1 }
0x323d   : > { %v5885_v51 = vadd.f32 %v8487_v43, %v7748_v54  ;;  %v5876_v27 = vpop.f32.mrb[129].mxu0  ;;  %v6010_v0 = vpop.f32.mrb[137].mxu1  ;;  %v6019_v37 = vadd.f32 %v8503_v41, %v7758_v52 }
0x323e   : > { %v5877_v45 = vadd.f32 %v7748_v54, %v5876_v27  ;;  %v8488_v42 = vpop.f32.mrb[130].mxu0  ;;  %v8504_v5 = vpop.f32.mrb[138].mxu1  ;;  %v6011_v53 = vadd.f32 %v7758_v52, %v6010_v0 }
0x323f   : > { %v5888_v56 = vadd.f32 %v8488_v42, %v7748_v54  ;;  %v6022_v48 = vadd.f32 %v8504_v5, %v7758_v52  ;;  %v5879_v23 = vpop.f32.mrb[131].mxu0  ;;  %v6013_v38 = vpop.f32.mrb[139].mxu1  ;;  %v6027_v58 = vmul.f32 0.35355338, %v5885_v51 }
0x3240   : > { %v5880_v32 = vadd.f32 %v7748_v54, %v5879_v23  ;;  %v6014_v63 = vadd.f32 %v7758_v52, %v6013_v38  ;;  %v6025_v40 = vmul.f32 0.35355338, %v5877_v45 }
0x3241   : > { %v6028_v59 = vmul.f32 0.35355338, %v5888_v56  ;;  %v10769_v28 = vpack.c.bf16 %v6022_v48, %v6019_v37 }
0x3242   : > { %v6026_v11 = vmul.f32 0.35355338, %v5880_v32  ;;  %v10771_v12 = vpack.c.bf16 %v6014_v63, %v6011_v53 }
0x3243   : > { %v10773_v62 = vpack.c.bf16 %v6028_v59, %v6027_v58 }
0x3244   : > { %v10775_v13 = vpack.c.bf16 %v6026_v11, %v6025_v40  ;;  %v8495_v50 = vpop.f32.mrb[132].mxu0 }
0x3245   : > { %v5943_v3 = vpop.f32.mrb[133].mxu0  ;;  %v5952_v16 = vadd.f32 %v8495_v50, %v7753_v60 }
0x3246   : > { %v8496_v61 = vpop.f32.mrb[134].mxu0  ;;  %v5944_v46 = vadd.f32 %v7753_v60, %v5943_v3 }
0x3247   : > { %v5955_v49 = vadd.f32 %v8496_v61, %v7753_v60  ;;  %v5946_v55 = vpop.f32.mrb[135].mxu0 }
0x3248   : > { %v5947_v14 = vadd.f32 %v7753_v60, %v5946_v55 }
0x3249   : > { %v10780_v1 = vpack.c.bf16 %v5955_v49, %v5952_v16 }
0x324a   : > { %v10782_v4 = vpack.c.bf16 %v5947_v14, %v5944_v46 }
0x324b   : > { %v6086_v6 = vsel %vm973_vm2, %v10780_v1, 0 }
0x324c   : > { %8512 = vmatpush3.bf16.xpose.msra.mxu1 %v6086_v6  ;;  %v6039_v21 = vsel %vm973_vm2, %v10782_v4, 0 }
0x324d   : > { %8506 = vmatpush3.bf16.xpose.msra.mxu0 %v6039_v21  ;;  %8523 = vmatprep.subr.bf16.mxu1 %v9422_v2 }
0x324e   : > { %8517 = vmatprep.subr.bf16.mxu0 %v9422_v2 }
0x3253   : > { %8514 = vmatmul.mubr.msk.bf16.vlgmr.msra.gmra.mrb[140].mxu1 %vm973_vm2, %v10773_v62 }
0x3254   : > { %8508 = vmatmul.mubr.msk.bf16.vlgmr.msra.gmra.mrb[136].mxu0 %vm973_vm2, %v10775_v13  ;;  %8524 = vmatpush3.bf16.msra.mxu1 %v10769_v28 }
0x3255   : > { %8518 = vmatpush3.bf16.msra.mxu0 %v10771_v12  ;;  %8525 = vmatprep.mubr.msk.bf16.mxu1 %vm9423_vm1, %v9422_v2 }
0x3256   : > { %8535 = vmatprep.subr.bf16.mxu1 %v9422_v2  ;;  %8519 = vmatprep.mubr.msk.bf16.mxu0 %vm9423_vm1, %v9422_v2 }
0x3257   : > { %8529 = vmatprep.subr.bf16.mxu0 %v9422_v2 }
0x3326   : > { %v6122_v18 = vpop.f32.mrb[140].mxu1 }
0x3327   : > { %v6075_v7 = vpop.f32.mrb[136].mxu0  ;;  %v8515_v8 = vpop.f32.mrb[141].mxu1  ;;  %v6123_v19 = vadd.f32 %v10805_v15, %v6122_v18 }
0x3328   : > { %v6076_v10 = vadd.f32 %v10802_v9, %v6075_v7  ;;  %v8509_v47 = vpop.f32.mrb[137].mxu0  ;;  %v6125_v26 = vpop.f32.mrb[142].mxu1 }
0x3329   : > { %v6078_v39 = vpop.f32.mrb[138].mxu0  ;;  %v8516_v36 = vpop.f32.mrb[143].mxu1  ;;  %v6126_v31 = vadd.f32 %v10812_v30, %v6125_v26  ;;  %v6135_v44 = vsel %vm1068_vm3, %v6123_v19, -inf }
0x332a   : > { %v6079_v22 = vadd.f32 %v10808_v29, %v6078_v39  ;;  %v8510_v24 = vpop.f32.mrb[139].mxu0  ;;  %v6129_v25 = vsel %vm1068_vm3, %v6076_v10, -inf }
0x332b   : > { %6130 = vmax.xlane.f32.xlu0 %v6129_v25  ;;  %v6138_v34 = vsel %vm1068_vm3, %v6126_v31, -inf }
0x332c   : > { %v6132_v57 = vsel %vm1068_vm3, %v6079_v22, -inf }
0x332d   : > { %6133 = vmax.xlane.f32.xlu1 %v6132_v57 }
0x332f   : > { %6136 = vmax.xlane.f32.xlu0 %v6135_v44 }
0x3331   : > { %6139 = vmax.xlane.f32.xlu1 %v6138_v34 }
0x3342   : > { %6320 = vrot.lane.b32.xlu1 %v10780_v1, %s9424_s26 }
0x33b8   : > { %v6131_v54 = vpop.xlane.xlu0 %6130 }
0x33b9   : > { %v6141_v43 = vsub.f32 %v6076_v10, %v6131_v54 }
0x33ba   : > { %v6134_v41 = vpop.xlane.xlu1 %6133 }
0x33bb   : > { %v6142_v51 = vsub.f32 %v6079_v22, %v6134_v41  ;;  %v6145_v0 = vmul.f32 1.442695, %v6141_v43 }
0x33bc   : > { %v6137_v52 = vpop.xlane.xlu0 %6136 }
0x33bd   : > { %v6143_v27 = vsub.f32 %v6123_v19, %v6137_v52  ;;  %v6147_v37 = vmul.f32 1.442695, %v6142_v51 }
0x33be   : > { %v6140_v45 = vpop.xlane.xlu1 %6139 }
0x33bf   : > { %v6149_v42 = vmul.f32 1.442695, %v6143_v27  ;;  %v6144_v5 = vsub.f32 %v6126_v31, %v6140_v45 }
0x33c1   : > { %9146 = vpow2.f32 %v6149_v42  ;;  %v6151_v56 = vmul.f32 1.442695, %v6144_v5 }
0x33c2   : > { %9148 = vpow2.f32 %v6145_v0  ;;  %v6321_v40 = vpop.permute.xlu1 %6320 }
0x33c3   : > { %9150 = vpow2.f32 %v6151_v56  ;;  %v6326_v21 = vsel %vm973_vm2, %v6321_v40, 0 }
0x33c4   : > { %9152 = vpow2.f32 %v6147_v37 }
0x33cb   : > { %v9147_v48 = vpop.eup %9146 }
0x33cc   : > { %v9149_v23 = vpop.eup %9148  ;;  %v6159_v38 = vsel %vm1068_vm3, %v9147_v48, 0.0 }
0x33cd   : > { %v9151_v53 = vpop.eup %9150  ;;  %6160 = vadd.xlane.f32.xlu0 %v6159_v38  ;;  %v6153_v58 = vsel %vm1068_vm3, %v9149_v23, 0.0 }
0x33ce   : > { %v6162_v32 = vsel %vm1068_vm3, %v9151_v53, 0.0  ;;  %v9153_v63 = vpop.eup %9152 }
0x33cf   : > { %6163 = vadd.xlane.f32.xlu1 %v6162_v32  ;;  %v6156_v59 = vsel %vm1068_vm3, %v9153_v63, 0.0 }
0x33d1   : > { %6154 = vadd.xlane.f32.xlu0 %v6153_v58 }
0x33d3   : > { %6157 = vadd.xlane.f32.xlu1 %v6156_v59 }
0x33e4   : > { %6264 = vrot.lane.b32.xlu1 %v10775_v13, %s9424_s26 }
0x33e7   : > { %6267 = vrot.lane.b32.xlu0 %v10782_v4, %s9424_s26 }
0x33e8   : > { %6317 = vrot.lane.b32.xlu1 %v10773_v62, %s9424_s26 }
0x345a   : > { %v6161_v11 = vpop.xlane.xlu0 %6160 }
0x345b   : > { %9154 = vrcp.f32 %v6161_v11 }
0x345c   : > { %v6164_v50 = vpop.xlane.xlu1 %6163 }
0x345d   : > { %9156 = vrcp.f32 %v6164_v50 }
0x345e   : > { %v6155_v60 = vpop.xlane.xlu0 %6154 }
0x345f   : > { %9158 = vrcp.f32 %v6155_v60 }
0x3460   : > { %v6158_v3 = vpop.xlane.xlu1 %6157 }
0x3461   : > { %9160 = vrcp.f32 %v6158_v3 }
0x3462   : > { %v6268_v8 = vpop.permute.xlu0 %6267 }
0x3463   : > { %v6273_v26 = vsel %vm973_vm2, %v6268_v8, 0 }
0x3464   : > { %v6265_v10 = vpop.permute.xlu1 %6264 }
0x3465   : > { %v9155_v61 = vpop.eup %9154 }
0x3466   : > { %v6171_v49 = vmul.f32 %v9155_v61, %v9147_v48 }
0x3467   : > { %v9157_v16 = vpop.eup %9156 }
0x3468   : > { %v6172_v55 = vmul.f32 %v9157_v16, %v9151_v53  ;;  %v6318_v39 = vpop.permute.xlu1 %6317 }
0x3469   : > { %v9159_v46 = vpop.eup %9158 }
0x346a   : > { %v6174_v14 = vpack.c.bf16 %v6172_v55, %v6171_v49  ;;  %v6169_v18 = vmul.f32 %v9159_v46, %v9149_v23 }
0x346b   : > { %v9161_v6 = vpop.eup %9160 }
0x346c   : > { %v6170_v7 = vmul.f32 %v9161_v6, %v9153_v63  ;;  %8526 = vmatmul.mubr.msk.bf16.vlgmr.msra.gmra.mrb[144].mxu1 %vm1068_vm3, %v6174_v14 }
0x346d   : > { %8536 = vmatpush3.bf16.xpose.msra.mxu1 %v6326_v21  ;;  %8537 = vmatprep.mubr.msk.bf16.mxu1 %vm9423_vm1, %v9422_v2 }
0x346e   : > { %v6173_v47 = vpack.c.bf16 %v6170_v7, %v6169_v18  ;;  %8547 = vmatprep.subr.bf16.mxu1 %v9422_v2 }
0x3470   : > { %8520 = vmatmul.mubr.msk.bf16.vlgmr.msra.gmra.mrb[140].mxu0 %vm1068_vm3, %v6173_v47 }
0x3471   : > { %8530 = vmatpush3.bf16.xpose.msra.mxu0 %v6273_v26  ;;  %8531 = vmatprep.mubr.msk.bf16.mxu0 %vm9423_vm1, %v9422_v2 }
0x3472   : > { %8541 = vmatprep.subr.bf16.mxu0 %v9422_v2 }
0x3474   : > { %8538 = vmatmul.mubr.msk.bf16.vlgmr.msra.gmra.mrb[148].mxu1 %vm973_vm2, %v6318_v39 }
0x3475   : > { %8549 = vmatprep.mubr.msk.bf16.mxu1 %vm9423_vm1, %v9422_v2 }
0x3478   : > { %8532 = vmatmul.mubr.msk.bf16.vlgmr.msra.gmra.mrb[144].mxu0 %vm973_vm2, %v6265_v10 }
0x3479   : > { %8543 = vmatprep.mubr.msk.bf16.mxu0 %vm9423_vm1, %v9422_v2 }
0x353f   : > { %v10846_v36 = vpop.f32.mrb[144].mxu1 }
0x3540   : > { %v8527_v19 = vpop.f32.mrb[145].mxu1 }
0x3541   : > { %v10848_v22 = vpop.f32.mrb[146].mxu1 }
0x3542   : > { %v8528_v24 = vpop.f32.mrb[147].mxu1 }
0x3543   : > { %v10850_v25 = vpop.f32.mrb[140].mxu0 }
0x3544   : > { %v8521_v31 = vpop.f32.mrb[141].mxu0 }
0x3545   : > { %v10852_v57 = vpop.f32.mrb[142].mxu0 }
0x3546   : > { %v8522_v44 = vpop.f32.mrb[143].mxu0 }
0x3547   : > { %v6362_v34 = vpop.f32.mrb[148].mxu1 }
0x3548   : > { %v8539_v54 = vpop.f32.mrb[149].mxu1  ;;  %v6363_v45 = vadd.f32 %v10805_v15, %v6362_v34 }
0x3549   : > { %v6365_v43 = vpop.f32.mrb[150].mxu1 }
0x354a   : > { %v8540_v41 = vpop.f32.mrb[151].mxu1  ;;  %v6366_v48 = vadd.f32 %v10812_v30, %v6365_v43  ;;  %v6375_v23 = vsel %vm1068_vm3, %v6363_v45, -inf }
0x354b   : > { %v6309_v52 = vpop.f32.mrb[144].mxu0 }
0x354c   : > { %v6310_v51 = vadd.f32 %v10802_v9, %v6309_v52  ;;  %v8533_v27 = vpop.f32.mrb[145].mxu0  ;;  %v6378_v38 = vsel %vm1068_vm3, %v6366_v48, -inf }
0x354d   : > { %v6312_v0 = vpop.f32.mrb[146].mxu0 }
0x354e   : > { %v6313_v42 = vadd.f32 %v10808_v29, %v6312_v0  ;;  %v8534_v5 = vpop.f32.mrb[147].mxu0  ;;  %v6369_v37 = vsel %vm1068_vm3, %v6310_v51, -inf }
0x354f   : > { %6370 = vmax.xlane.f32.xlu0 %v6369_v37 }
0x3550   : > { %v6372_v56 = vsel %vm1068_vm3, %v6313_v42, -inf }
0x3551   : > { %6373 = vmax.xlane.f32.xlu1 %v6372_v56 }
0x3553   : > { %6376 = vmax.xlane.f32.xlu0 %v6375_v23 }
0x3557   : > { %6379 = vmax.xlane.f32.xlu0 %v6378_v38 }
0x3562   : > { %6464 = vrot.lane.b32.xlu1 %v10769_v28, %s9424_s26 }
0x3566   : > { %6513 = vrot.lane.b32.xlu1 %v10782_v4, %s9425_s17 }
0x35dc   : > { %v6371_v53 = vpop.xlane.xlu0 %6370 }
0x35dd   : > { %v6381_v63 = vsub.f32 %v6310_v51, %v6371_v53 }
0x35de   : > { %v6374_v32 = vpop.xlane.xlu1 %6373 }
0x35df   : > { %v6385_v11 = vmul.f32 1.442695, %v6381_v63  ;;  %v6382_v50 = vsub.f32 %v6313_v42, %v6374_v32 }
0x35e0   : > { %v6377_v58 = vpop.xlane.xlu0 %6376 }
0x35e1   : > { %v6383_v59 = vsub.f32 %v6363_v45, %v6377_v58  ;;  %v6387_v16 = vmul.f32 1.442695, %v6382_v50 }
0x35e2   : > { %v6465_v40 = vpop.permute.xlu1 %6464 }
0x35e3   : > { %v6389_v60 = vmul.f32 1.442695, %v6383_v59  ;;  %8548 = vmatpush3.bf16.msra.mxu1 %v6465_v40 }
0x35e4   : > { %v6380_v3 = vpop.xlane.xlu0 %6379  ;;  %8559 = vmatprep.subr.bf16.mxu1 %v9422_v2 }
0x35e5   : > { %9162 = vpow2.f32 %v6389_v60  ;;  %v6384_v61 = vsub.f32 %v6366_v48, %v6380_v3 }
0x35e6   : > { %9164 = vpow2.f32 %v6385_v11  ;;  %v6514_v10 = vpop.permute.xlu1 %6513 }
0x35e7   : > { %v6391_v49 = vmul.f32 1.442695, %v6384_v61  ;;  %v6519_v5 = vsel %vm973_vm2, %v6514_v10, 0 }
0x35e9   : > { %9166 = vpow2.f32 %v6391_v49 }
0x35ea   : > { %9168 = vpow2.f32 %v6387_v16 }
0x35ef   : > { %v9163_v55 = vpop.eup %9162 }
0x35f0   : > { %v6399_v46 = vsel %vm1068_vm3, %v9163_v55, 0.0  ;;  %v9165_v14 = vpop.eup %9164 }
0x35f1   : > { %6400 = vadd.xlane.f32.xlu0 %v6399_v46  ;;  %v6393_v21 = vsel %vm1068_vm3, %v9165_v14, 0.0 }
0x35f3   : > { %v9167_v6 = vpop.eup %9166 }
0x35f4   : > { %v6402_v18 = vsel %vm1068_vm3, %v9167_v6, 0.0  ;;  %v9169_v7 = vpop.eup %9168 }
0x35f5   : > { %6394 = vadd.xlane.f32.xlu0 %v6393_v21  ;;  %6403 = vadd.xlane.f32.xlu1 %v6402_v18  ;;  %v6396_v8 = vsel %vm1068_vm3, %v9169_v7, 0.0 }
0x35f9   : > { %6397 = vadd.xlane.f32.xlu1 %v6396_v8 }
0x360a   : > { %6564 = vrot.lane.b32.xlu1 %v10780_v1, %s9425_s17 }
0x360b   : > { %6416 = vrot.lane.b32.xlu0 %v10771_v12, %s9424_s26 }
0x360e   : > { %6562 = vrot.lane.b32.xlu1 %v10773_v62, %s9425_s17 }
0x360f   : > { %6511 = vrot.lane.b32.xlu0 %v10775_v13, %s9425_s17 }
0x367e   : > { %v6401_v47 = vpop.xlane.xlu0 %6400 }
0x367f   : > { %9170 = vrcp.f32 %v6401_v47 }
0x3682   : > { %v6395_v26 = vpop.xlane.xlu0 %6394  ;;  %v6404_v39 = vpop.xlane.xlu1 %6403 }
0x3683   : > { %9172 = vrcp.f32 %v6404_v39 }
0x3684   : > { %9174 = vrcp.f32 %v6395_v26 }
0x3686   : > { %v6417_v19 = vpop.permute.xlu0 %6416  ;;  %v6398_v24 = vpop.xlane.xlu1 %6397 }
0x3687   : > { %9176 = vrcp.f32 %v6398_v24  ;;  %8542 = vmatpush3.bf16.msra.mxu0 %v6417_v19 }
0x3688   : > { %8553 = vmatprep.subr.bf16.mxu0 %v9422_v2 }
0x3689   : > { %v9171_v31 = vpop.eup %9170 }
0x368a   : > { %v6411_v54 = vmul.f32 %v9171_v31, %v9163_v55  ;;  %v6565_v41 = vpop.permute.xlu1 %6564  ;;  %v6512_v56 = vpop.permute.xlu0 %6511 }
0x368b   : > { %v6570_v45 = vsel %vm973_vm2, %v6565_v41, 0 }
0x368d   : > { %v9173_v44 = vpop.eup %9172 }
0x368e   : > { %v9175_v34 = vpop.eup %9174  ;;  %v6412_v43 = vmul.f32 %v9173_v44, %v9167_v6  ;;  %v6563_v37 = vpop.permute.xlu1 %6562 }
0x368f   : > { %v6409_v27 = vmul.f32 %v9175_v34, %v9165_v14 }
0x3690   : > { %v6414_v51 = vpack.c.bf16 %v6412_v43, %v6411_v54 }
0x3691   : > { %v9177_v52 = vpop.eup %9176 }
0x3692   : > { %v6410_v0 = vmul.f32 %v9177_v52, %v9169_v7  ;;  %8550 = vmatmul.mubr.msk.bf16.vlgmr.msra.gmra.mrb[152].mxu1 %vm1068_vm3, %v6414_v51 }
0x3693   : > { %8560 = vmatpush3.bf16.xpose.msra.mxu1 %v6570_v45  ;;  %8561 = vmatprep.mubr.msk.bf16.mxu1 %vm9423_vm1, %v9422_v2 }
0x3694   : > { %v6413_v42 = vpack.c.bf16 %v6410_v0, %v6409_v27  ;;  %8571 = vmatprep.subr.bf16.mxu1 %v9422_v2 }
0x3696   : > { %8544 = vmatmul.mubr.msk.bf16.vlgmr.msra.gmra.mrb[148].mxu0 %vm1068_vm3, %v6413_v42 }
0x3697   : > { %8554 = vmatpush3.bf16.xpose.msra.mxu0 %v6519_v5  ;;  %8555 = vmatprep.mubr.msk.bf16.mxu0 %vm9423_vm1, %v9422_v2 }
0x3698   : > { %8565 = vmatprep.subr.bf16.mxu0 %v9422_v2 }
0x369a   : > { %8562 = vmatmul.mubr.msk.bf16.vlgmr.msra.gmra.mrb[156].mxu1 %vm973_vm2, %v6563_v37 }
0x369b   : > { %8573 = vmatprep.mubr.msk.bf16.mxu1 %vm9423_vm1, %v9422_v2 }
0x369e   : > { %8556 = vmatmul.mubr.msk.bf16.vlgmr.msra.gmra.mrb[152].mxu0 %vm973_vm2, %v6512_v56 }
0x369f   : > { %8567 = vmatprep.mubr.msk.bf16.mxu0 %vm9423_vm1, %v9422_v2 }
0x3765   : > { %v10896_v48 = vpop.f32.mrb[152].mxu1 }
0x3766   : > { %v8551_v23 = vpop.f32.mrb[153].mxu1 }
0x3767   : > { %v10898_v38 = vpop.f32.mrb[154].mxu1 }
0x3768   : > { %v8817_v53 = vpack.i.bf16 %v10898_v38, %v10896_v48  ;;  %v8552_v32 = vpop.f32.mrb[155].mxu1 }
0x3769   : > { %v10902_v63 = vpop.f32.mrb[148].mxu0 }
0x376a   : > { %v8545_v58 = vpop.f32.mrb[149].mxu0 }
0x376b   : > { %v10904_v59 = vpop.f32.mrb[150].mxu0 }
0x376c   : > { %v8812_v40 = vpack.i.bf16 %v10904_v59, %v10902_v63  ;;  %v8546_v11 = vpop.f32.mrb[151].mxu0 }
0x376d   : > { %v6606_v50 = vpop.f32.mrb[156].mxu1 }
0x376e   : > { %v8563_v60 = vpop.f32.mrb[157].mxu1  ;;  %v6607_v14 = vadd.f32 %v10805_v15, %v6606_v50 }
0x376f   : > { %v6609_v3 = vpop.f32.mrb[158].mxu1 }
0x3770   : > { %v8564_v61 = vpop.f32.mrb[159].mxu1  ;;  %v6610_v8 = vadd.f32 %v10812_v30, %v6609_v3  ;;  %v6619_v10 = vsel %vm1068_vm3, %v6607_v14, -inf }
0x3771   : > { %v6555_v16 = vpop.f32.mrb[152].mxu0 }
0x3772   : > { %v6556_v49 = vadd.f32 %v10802_v9, %v6555_v16  ;;  %v8557_v55 = vpop.f32.mrb[153].mxu0  ;;  %v6622_v47 = vsel %vm1068_vm3, %v6610_v8, -inf }
0x3773   : > { %v6558_v46 = vpop.f32.mrb[154].mxu0 }
0x3774   : > { %v6559_v6 = vadd.f32 %v10808_v29, %v6558_v46  ;;  %v8558_v21 = vpop.f32.mrb[155].mxu0  ;;  %v6613_v18 = vsel %vm1068_vm3, %v6556_v49, -inf }
0x3775   : > { %6614 = vmax.xlane.f32.xlu0 %v6613_v18 }
0x3776   : > { %v6616_v7 = vsel %vm1068_vm3, %v6559_v6, -inf }
0x3777   : > { %6617 = vmax.xlane.f32.xlu1 %v6616_v7 }
0x3779   : > { %6620 = vmax.xlane.f32.xlu0 %v6619_v10 }
0x377d   : > { %6623 = vmax.xlane.f32.xlu0 %v6622_v47 }
0x3788   : > { %6706 = vrot.lane.b32.xlu1 %v10769_v28, %s9425_s17 }
0x378c   : > { %6755 = vrot.lane.b32.xlu1 %v10782_v4, %s9426_s21 }
0x3802   : > { %v6615_v26 = vpop.xlane.xlu0 %6614 }
0x3803   : > { %v6625_v19 = vsub.f32 %v6556_v49, %v6615_v26 }
0x3804   : > { %v6618_v39 = vpop.xlane.xlu1 %6617 }
0x3805   : > { %v6629_v34 = vmul.f32 1.442695, %v6625_v19  ;;  %v6626_v54 = vsub.f32 %v6559_v6, %v6618_v39 }
0x3806   : > { %v6621_v24 = vpop.xlane.xlu0 %6620 }
0x3807   : > { %v6627_v31 = vsub.f32 %v6607_v14, %v6621_v24  ;;  %v6631_v51 = vmul.f32 1.442695, %v6626_v54 }
0x3808   : > { %v6707_v44 = vpop.permute.xlu1 %6706 }
0x3809   : > { %v6633_v43 = vmul.f32 1.442695, %v6627_v31  ;;  %8572 = vmatpush3.bf16.msra.mxu1 %v6707_v44 }
0x380a   : > { %v6624_v41 = vpop.xlane.xlu0 %6623  ;;  %8583 = vmatprep.subr.bf16.mxu1 %v9422_v2 }
0x380b   : > { %9178 = vpow2.f32 %v6633_v43  ;;  %v6628_v52 = vsub.f32 %v6610_v8, %v6624_v41 }
0x380c   : > { %9180 = vpow2.f32 %v6629_v34  ;;  %v6756_v32 = vpop.permute.xlu1 %6755 }
0x380d   : > { %v6635_v27 = vmul.f32 1.442695, %v6628_v52  ;;  %v6761_v7 = vsel %vm973_vm2, %v6756_v32, 0 }
0x380f   : > { %9182 = vpow2.f32 %v6635_v27 }
0x3810   : > { %9184 = vpow2.f32 %v6631_v51 }
0x3815   : > { %v9179_v4 = vpop.eup %9178 }
0x3816   : > { %v6643_v0 = vsel %vm1068_vm3, %v9179_v4, 0.0  ;;  %v9181_v45 = vpop.eup %9180 }
0x3817   : > { %6644 = vadd.xlane.f32.xlu0 %v6643_v0  ;;  %v6637_v5 = vsel %vm1068_vm3, %v9181_v45, 0.0 }
0x3819   : > { %v9183_v42 = vpop.eup %9182 }
0x381a   : > { %v6646_v37 = vsel %vm1068_vm3, %v9183_v42, 0.0  ;;  %v9185_v56 = vpop.eup %9184 }
0x381b   : > { %6638 = vadd.xlane.f32.xlu0 %v6637_v5  ;;  %6647 = vadd.xlane.f32.xlu1 %v6646_v37  ;;  %v6640_v23 = vsel %vm1068_vm3, %v9185_v56, 0.0 }
0x381f   : > { %6641 = vadd.xlane.f32.xlu1 %v6640_v23 }
0x3830   : > { %6806 = vrot.lane.b32.xlu1 %v10780_v1, %s9426_s21 }
0x3831   : > { %6659 = vrot.lane.b32.xlu0 %v10771_v12, %s9425_s17  ;;  %s11198_s17 = sld [smem:[#allocation29_spill]] }
0x3834   : > { %6804 = vrot.lane.b32.xlu1 %v10773_v62, %s9426_s21 }
0x3835   : > { %6753 = vrot.lane.b32.xlu0 %v10775_v13, %s9426_s21 }
0x3837   : > { %s11073_s0 = scalar_lea.hbm %s11198_s17, %s7804_s19 }
0x38a4   : > { %v6645_v58 = vpop.xlane.xlu0 %6644 }
0x38a5   : > { %9186 = vrcp.f32 %v6645_v58 }
0x38a8   : > { %v6639_v11 = vpop.xlane.xlu0 %6638  ;;  %v6648_v50 = vpop.xlane.xlu1 %6647 }
0x38a9   : > { %9188 = vrcp.f32 %v6648_v50 }
0x38aa   : > { %9190 = vrcp.f32 %v6639_v11 }
0x38ac   : > { %v6660_v60 = vpop.permute.xlu0 %6659  ;;  %v6642_v3 = vpop.xlane.xlu1 %6641 }
0x38ad   : > { %9192 = vrcp.f32 %v6642_v3  ;;  %8566 = vmatpush3.bf16.msra.mxu0 %v6660_v60 }
0x38ae   : > { %8577 = vmatprep.subr.bf16.mxu0 %v9422_v2 }
0x38af   : > { %v9187_v1 = vpop.eup %9186 }
0x38b0   : > { %v6655_v62 = vmul.f32 %v9187_v1, %v9179_v4  ;;  %v6807_v55 = vpop.permute.xlu1 %6806  ;;  %v6754_v10 = vpop.permute.xlu0 %6753 }
0x38b1   : > { %v6812_v21 = vsel %vm973_vm2, %v6807_v55, 0 }
0x38b3   : > { %v9189_v61 = vpop.eup %9188 }
0x38b4   : > { %v9191_v16 = vpop.eup %9190  ;;  %v6656_v49 = vmul.f32 %v9189_v61, %v9183_v42  ;;  %v6805_v8 = vpop.permute.xlu1 %6804 }
0x38b5   : > { %v6653_v14 = vmul.f32 %v9191_v16, %v9181_v45 }
0x38b6   : > { %v6658_v46 = vpack.c.bf16 %v6656_v49, %v6655_v62 }
0x38b7   : > { %v9193_v13 = vpop.eup %9192 }
0x38b8   : > { %v6654_v6 = vmul.f32 %v9193_v13, %v9185_v56  ;;  %8574 = vmatmul.mubr.msk.bf16.vlgmr.msra.gmra.mrb[160].mxu1 %vm1068_vm3, %v6658_v46 }
0x38b9   : > { %8584 = vmatpush3.bf16.xpose.msra.mxu1 %v6812_v21  ;;  %8585 = vmatprep.mubr.msk.bf16.mxu1 %vm9423_vm1, %v9422_v2 }
0x38ba   : > { %v6657_v18 = vpack.c.bf16 %v6654_v6, %v6653_v14  ;;  %8595 = vmatprep.subr.bf16.mxu1 %v9422_v2 }
0x38bc   : > { %8568 = vmatmul.mubr.msk.bf16.vlgmr.msra.gmra.mrb[156].mxu0 %vm1068_vm3, %v6657_v18 }
0x38bd   : > { %8578 = vmatpush3.bf16.xpose.msra.mxu0 %v6761_v7  ;;  %8579 = vmatprep.mubr.msk.bf16.mxu0 %vm9423_vm1, %v9422_v2 }
0x38be   : > { %8589 = vmatprep.subr.bf16.mxu0 %v9422_v2 }
0x38c0   : > { %8586 = vmatmul.mubr.msk.bf16.vlgmr.msra.gmra.mrb[164].mxu1 %vm973_vm2, %v6805_v8 }
0x38c1   : > { %8597 = vmatprep.mubr.msk.bf16.mxu1 %vm9423_vm1, %v9422_v2 }
0x38c4   : > { %8580 = vmatmul.mubr.msk.bf16.vlgmr.msra.gmra.mrb[160].mxu0 %vm973_vm2, %v6754_v10 }
0x38c5   : > { %8591 = vmatprep.mubr.msk.bf16.mxu0 %vm9423_vm1, %v9422_v2 }
0x398b   : > { %v10950_v47 = vpop.f32.mrb[160].mxu1 }
0x398c   : > { %v8575_v26 = vpop.f32.mrb[161].mxu1 }
0x398d   : > { %v6749_v39 = vpop.f32.mrb[162].mxu1 }
0x398e   : > { %v8827_v19 = vpack.i.bf16 %v6749_v39, %v10950_v47  ;;  %v8576_v24 = vpop.f32.mrb[163].mxu1 }
0x398f   : > { %v6699_v31 = vpop.f32.mrb[156].mxu0 }
0x3990   : > { %v8569_v44 = vpop.f32.mrb[157].mxu0 }
0x3991   : > { %v6702_v34 = vpop.f32.mrb[158].mxu0  ;;  %v8890_v44 = vld [vmem:[#allocation7 + $0x30] sm:$0xff]  }
0x3992   : > { %v8822_v54 = vpack.i.bf16 %v6702_v34, %v6699_v31  ;;  %v8570_v43 = vpop.f32.mrb[159].mxu0  ;;  %v8891_v34 = vld [vmem:[#allocation7 + $0x38] sm:$0xff]  }
0x3993   : > { %v6848_v41 = vpop.f32.mrb[164].mxu1 }
0x3994   : > { %v8587_v52 = vpop.f32.mrb[165].mxu1  ;;  %v6849_v42 = vadd.f32 %v10805_v15, %v6848_v41 }
0x3995   : > { %v6851_v51 = vpop.f32.mrb[166].mxu1 }
0x3996   : > { %v8588_v27 = vpop.f32.mrb[167].mxu1  ;;  %v6852_v32 = vadd.f32 %v10812_v30, %v6851_v51  ;;  %v6861_v58 = vsel %vm1068_vm3, %v6849_v42, -inf }
0x3997   : > { %v6797_v4 = vpop.f32.mrb[160].mxu0 }
0x3998   : > { %v6798_v0 = vadd.f32 %v10802_v9, %v6797_v4  ;;  %v8581_v2 = vpop.f32.mrb[161].mxu0  ;;  %v6864_v9 = vsel %vm1068_vm3, %v6852_v32, -inf }
0x3999   : > { %v6800_v45 = vpop.f32.mrb[162].mxu0 }
0x399a   : > { %v6801_v5 = vadd.f32 %v10808_v29, %v6800_v45  ;;  %v8582_v37 = vpop.f32.mrb[163].mxu0  ;;  %v6855_v56 = vsel %vm1068_vm3, %v6798_v0, -inf }
0x399b   : > { %6856 = vmax.xlane.f32.xlu0 %v6855_v56 }
0x399c   : > { %v6858_v23 = vsel %vm1068_vm3, %v6801_v5, -inf }
0x399d   : > { %6859 = vmax.xlane.f32.xlu1 %v6858_v23 }
0x399f   : > { %6862 = vmax.xlane.f32.xlu0 %v6861_v58 }
0x39a3   : > { %6865 = vmax.xlane.f32.xlu0 %v6864_v9 }
0x3a28   : > { %v6857_v11 = vpop.xlane.xlu0 %6856 }
0x3a29   : > { %v6867_v50 = vsub.f32 %v6798_v0, %v6857_v11 }
0x3a2a   : > { %v6860_v15 = vpop.xlane.xlu1 %6859 }
0x3a2b   : > { %v6871_v3 = vmul.f32 1.442695, %v6867_v50  ;;  %v6868_v1 = vsub.f32 %v6801_v5, %v6860_v15 }
0x3a2c   : > { %v6863_v60 = vpop.xlane.xlu0 %6862 }
0x3a2d   : > { %v6869_v29 = vsub.f32 %v6849_v42, %v6863_v60  ;;  %v6873_v49 = vmul.f32 1.442695, %v6868_v1 }
0x3a2f   : > { %v6875_v61 = vmul.f32 1.442695, %v6869_v29 }
0x3a30   : > { %v6866_v16 = vpop.xlane.xlu0 %6865 }
0x3a31   : > { %9194 = vpow2.f32 %v6875_v61  ;;  %v6870_v62 = vsub.f32 %v6852_v32, %v6866_v16 }
0x3a32   : > { %9196 = vpow2.f32 %v6871_v3 }
0x3a33   : > { %v6877_v30 = vmul.f32 1.442695, %v6870_v62 }
0x3a35   : > { %9198 = vpow2.f32 %v6877_v30 }
0x3a36   : > { %9200 = vpow2.f32 %v6873_v49 }
0x3a3b   : > { %v9195_v55 = vpop.eup %9194 }
0x3a3c   : > { %v6885_v13 = vsel %vm1068_vm3, %v9195_v55, 0.0  ;;  %v9197_v46 = vpop.eup %9196 }
0x3a3d   : > { %6886 = vadd.xlane.f32.xlu0 %v6885_v13  ;;  %v6879_v6 = vsel %vm1068_vm3, %v9197_v46, 0.0 }
0x3a3f   : > { %v9199_v14 = vpop.eup %9198 }
0x3a40   : > { %v6888_v21 = vsel %vm1068_vm3, %v9199_v14, 0.0  ;;  %v9201_v18 = vpop.eup %9200 }
0x3a41   : > { %6880 = vadd.xlane.f32.xlu0 %v6879_v6  ;;  %6889 = vadd.xlane.f32.xlu1 %v6888_v21  ;;  %v6882_v7 = vsel %vm1068_vm3, %v9201_v18, 0.0 }
0x3a45   : > { %6883 = vadd.xlane.f32.xlu1 %v6882_v7 }
0x3a56   : > { %6948 = vrot.lane.b32.xlu1 %v10769_v28, %s9426_s21 }
0x3a57   : > { %6901 = vrot.lane.b32.xlu0 %v10771_v12, %s9426_s21 }
0x3a5a   : > { %8813 = vrot.lane.b32.xlu1 %v8812_v40, %s9427_s1 }
0x3a5b   : > { %8823 = vrot.lane.b32.xlu0 %v8822_v54, %s9428_s28 }
0x3a5e   : > { %8818 = vrot.lane.b32.xlu1 %v8817_v53, %s9427_s1 }
0x3a62   : > { %8828 = vrot.lane.b32.xlu1 %v8827_v19, %s9428_s28  ;;  %s11196_s28 = sld [smem:[#allocation16_spill]] }
0x3aca   : > { %v6887_v8 = vpop.xlane.xlu0 %6886 }
0x3acb   : > { %9202 = vrcp.f32 %v6887_v8  ;;  %v7779_v8 = vld [vmem:[%s11128_s9 + $0x3] ss:$0 sm:$0xff] }
0x3ace   : > { %v6881_v28 = vpop.xlane.xlu0 %6880  ;;  %v6890_v10 = vpop.xlane.xlu1 %6889 }
0x3acf   : > { %9204 = vrcp.f32 %v6890_v10 }
0x3ad0   : > { %9206 = vrcp.f32 %v6881_v28 }
0x3ad2   : > { %v6902_v12 = vpop.permute.xlu0 %6901  ;;  %v6884_v47 = vpop.xlane.xlu1 %6883 }
0x3ad3   : > { %9208 = vrcp.f32 %v6884_v47  ;;  %8590 = vmatpush3.bf16.msra.mxu0 %v6902_v12 }
0x3ad4   : > { %8601 = vmatprep.subr.bf16.mxu0 %v8890_v44 }
0x3ad5   : > { %v9203_v59 = vpop.eup %9202 }
0x3ad6   : > { %v6949_v63 = vpop.permute.xlu1 %6948  ;;  %v6897_v39 = vmul.f32 %v9203_v59, %v9195_v55  ;;  %v8824_v50 = vpop.permute.xlu0 %8823 }
0x3ad7   : > { %8596 = vmatpush3.bf16.msra.mxu1 %v6949_v63  ;;  %v8826_v30 = vunpack.i.h.bf16 %v8824_v50  ;;  %v8825_v55 = vunpack.i.l.bf16 %v8824_v50 }
0x3ad9   : > { %v9205_v40 = vpop.eup %9204 }
0x3ada   : > { %v9207_v26 = vpop.eup %9206  ;;  %v6898_v48 = vmul.f32 %v9205_v40, %v9199_v14  ;;  %v8814_v42 = vpop.permute.xlu1 %8813 }
0x3adb   : > { %v6895_v19 = vmul.f32 %v9207_v26, %v9197_v46  ;;  %v8816_v32 = vunpack.i.h.bf16 %v8814_v42  ;;  %v8815_v58 = vunpack.i.l.bf16 %v8814_v42 }
0x3adc   : > { %v6900_v53 = vpack.c.bf16 %v6898_v48, %v6897_v39 }
0x3add   : > { %v9209_v38 = vpop.eup %9208  ;;  %v7044_v61 = vsel %vm973_vm2, %v10852_v57, %v8816_v32  ;;  %v7043_v16 = vsel %vm973_vm2, %v10850_v25, %v8815_v58  ;;  %v8892_v32 = vld [vmem:[#allocation8 + $0x30] sm:$0xff]   ;;  %v8893_v58 = vld [vmem:[#allocation8 + $0x38] sm:$0xff]  }
0x3ade   : > { %v6896_v24 = vmul.f32 %v9209_v38, %v9201_v18  ;;  %8598 = vmatmul.mubr.msk.bf16.vlgmr.msra.gmra.mrb[168].mxu1 %vm1068_vm3, %v6900_v53  ;;  %v8819_v5 = vpop.permute.xlu1 %8818  ;;  %v7047_v21 = vsel %vm1068_vm3, %v7043_v16, %v8825_v55  ;;  %v7048_v57 = vsel %vm1068_vm3, %v7044_v61, %v8826_v30  ;;  %8609 = vmatprep.subr.bf16.mxu1 %v8892_v32 }
0x3adf   : > { %v8821_v56 = vunpack.i.h.bf16 %v8819_v5  ;;  %v8820_v23 = vunpack.i.l.bf16 %v8819_v5  ;;  %8610 = vmatpush3.bf16.msra.mxu1 %v8892_v32 }
0x3ae0   : > { %v6899_v31 = vpack.c.bf16 %v6896_v24, %v6895_v19  ;;  %8611 = vmatprep.subr.bf16.mxu1 %v8893_v58 }
0x3ae1   : > { %v7046_v60 = vsel %vm973_vm2, %v10848_v22, %v8821_v56  ;;  %v7045_v29 = vsel %vm973_vm2, %v10846_v36, %v8820_v23 }
0x3ae2   : > { %8592 = vmatmul.mubr.msk.bf16.vlgmr.msra.gmra.mrb[164].mxu0 %vm1068_vm3, %v6899_v31  ;;  %v8829_v37 = vpop.permute.xlu1 %8828 }
0x3ae3   : > { %8602 = vmatpush3.bf16.msra.mxu0 %v8890_v44  ;;  %v8831_v9 = vunpack.i.h.bf16 %v8829_v37  ;;  %v8830_v11 = vunpack.i.l.bf16 %v8829_v37  ;;  %8612 = vmatpush3.bf16.msra.mxu1 %v8893_v58 }
0x3ae4   : > { %8603 = vmatprep.subr.bf16.mxu0 %v8891_v34 }
0x3ae5   : > { %v7049_v62 = vsel %vm1068_vm3, %v7045_v29, %v8830_v11  ;;  %v7050_v49 = vsel %vm1068_vm3, %v7046_v60, %v8831_v9  ;;  %v8894_v9 = vld [vmem:[%s11135_s16 + $0x60] sm:$0xff]   ;;  %v8895_v11 = vld [vmem:[%s11135_s16 + $0x68] sm:$0xff]  }
0x3ae7   : > { %8604 = vmatpush3.bf16.msra.mxu0 %v8891_v34 }
0x3ae8   : > { %8617 = vmatprep.subr.bf16.mxu0 %v8894_v9 }
0x3bb1   : > { %v6988_v54 = vpop.f32.mrb[168].mxu1 }
0x3bb2   : > { %v8599_v43 = vpop.f32.mrb[169].mxu1 }
0x3bb3   : > { %v6991_v41 = vpop.f32.mrb[170].mxu1 }
0x3bb4   : > { %v8837_v52 = vpack.i.bf16 %v6991_v41, %v6988_v54  ;;  %v8600_v51 = vpop.f32.mrb[171].mxu1 }
0x3bb5   : > { %v6941_v27 = vpop.f32.mrb[164].mxu0 }
0x3bb6   : > { %v8593_v4 = vpop.f32.mrb[165].mxu0  ;;  %8838 = vrot.lane.b32.xlu1 %v8837_v52, %s9429_s15 }
0x3bb7   : > { %v6944_v0 = vpop.f32.mrb[166].mxu0 }
0x3bb8   : > { %v8832_v2 = vpack.i.bf16 %v6944_v0, %v6941_v27  ;;  %v8594_v45 = vpop.f32.mrb[167].mxu0 }
0x3bba   : > { %8833 = vrot.lane.b32.xlu0 %v8832_v2, %s9429_s15  ;;  %s625_s15 = sand.u32 1, %s11196_s28  }
0x3bbb   : > { %s7509_s25 = sshll.u32 %s625_s15, 5  ;;  %s11077_s21 = scalar_lea.sflag [#allocation4], %s625_s15 }
0x3bbc   : > { %s627_s27 = scalar_lea.vmem [#allocation10], %s7509_s25  ;;  %s9430_s25 = smov [#allocation10]  }
0x3bbd   : > { %s7394_s30 = sshll.u32 %s627_s27, 4  ;;  %s9342_s20 = sshll.u32 %s9430_s25, 4  ;;  %s11065_s30 = int_to_ptr.vmem [resolvable:$true] %s7394_s30  ;;  %s9343_s20 = int_to_ptr.vmem [resolvable:$false] %s9342_s20 }
0x3bbe   : > { %s9338_s28 = scalar_lea.vmem %s11065_s30, 512  ;;  %s9344_s6 = scalar_lea.vmem %s9343_s20, 1024 }
0x3bbf   : > { %p9339_p2 = scmp.ne.s32.totalorder %s11065_s30, %s9338_s28  ;;  %p9345_p8 = scmp.lt.s32.totalorder %s11065_s30, %s9343_s20 }
0x3bc0   : > { %p9346_p11 = scmp.lt.s32.totalorder %s9344_s6, %s9338_s28 }
0x3bc1   : > { %p9340_p4 = pnand %p9339_p2, %p11199_p3 }
0x3bc2   : > { %p9347_p5 = por %p9346_p11, %p9345_p8 }
0x3bc3   : > { %p9341_p7 = pneg %p9340_p4 }
0x3bc5   : > { %p9348_p0 = pnand %p9347_p5, %p9341_p7 }
0x3c28   : > { %v8839_v15 = vpop.permute.xlu1 %8838 }
0x3c29   : > { %v8841_v3 = vunpack.i.h.bf16 %v8839_v15  ;;  %v8840_v1 = vunpack.i.l.bf16 %v8839_v15 }
0x3c2b   : > { %v7053_v13 = vsel %vm1991_vm4, %v7049_v62, %v8840_v1  ;;  %v7054_v22 = vsel %vm1991_vm4, %v7050_v49, %v8841_v3 }
0x3c2c   : > { %v8834_v46 = vpop.permute.xlu0 %8833  ;;  %v7056_v36 = vpack.c.bf16 %v7054_v22, %v7053_v13  ;;  %v7784_v22 = vld [vmem:[%s11131_s12 + $0x3] ss:$0 sm:$0xff] }
0x3c2d   : > { %v8836_v14 = vunpack.i.h.bf16 %v8834_v46  ;;  %v8835_v6 = vunpack.i.l.bf16 %v8834_v46 }
0x3c2f   : > { %v7052_v25 = vsel %vm1991_vm4, %v7048_v57, %v8836_v14  ;;  %v7051_v18 = vsel %vm1991_vm4, %v7047_v21, %v8835_v6  ;;  %v7785_v57 = vld [vmem:[%s11132_s13 + $0x3] ss:$0 sm:$0xff] }
0x3c30   : > { %v7055_v7 = vpack.c.bf16 %v7052_v25, %v7051_v18 }
0x3c32   : > { %8605 = vmatprep.mubr.msk.bf16.mxu0 %vm680_vm0, %v7055_v7 }
0x3c33   : > { %8606 = vmatmul.mubr.msk.bf16.vlgmr.msra.gmra.mrb[168].mxu0 %vm680_vm0, %v7056_v36 }
0x3c34   : > { %8618 = vmatpush3.bf16.msra.mxu0 %v8894_v9 }
0x3c35   : > { %8619 = vmatprep.subr.bf16.mxu0 %v8895_v11 }
0x3c38   : > { %8620 = vmatpush3.bf16.msra.mxu0 %v8895_v11 }
0x3d06   : > { %v8607_v28 = vpop.f32.mrb[168].mxu0 }
0x3d07   : > { %v7115_v10 = vpop.f32.mrb[169].mxu0  ;;  %v7124_v12 = vadd.f32 %v8607_v28, %v7779_v8 }
0x3d08   : > { %v7116_v47 = vadd.f32 %v7779_v8, %v7115_v10  ;;  %v8608_v63 = vpop.f32.mrb[170].mxu0 }
0x3d09   : > { %v7118_v59 = vpop.f32.mrb[171].mxu0  ;;  %v11008_v39 = vadd.f32 %v7124_v12, %v10717_v33  ;;  %v7127_v48 = vadd.f32 %v8608_v63, %v7779_v8 }
0x3d0a   : > { %v11005_v40 = vadd.f32 %v7116_v47, %v10714_v35  ;;  %v7119_v26 = vadd.f32 %v7779_v8, %v7118_v59 }
0x3d0b   : > { %v11018_v24 = vadd.f32 %v7127_v48, %v10709_v20  ;;  %v7140_v35 = vsel %vm680_vm0, %v11008_v39, 0.0 }
0x3d0c   : > { %v11011_v38 = vadd.f32 %v7119_v26, %v10706_v17  ;;  %v7134_v53 = vsel %vm680_vm0, %v11005_v40, 0.0 }
0x3d0d   : > { %7135 = vadd.xlane.f32.xlu0 %v7134_v53  ;;  %v7143_v33 = vsel %vm680_vm0, %v11018_v24, 0.0  ;;  %v8896_v53 = vld [vmem:[%s11135_s16 + $0x70] sm:$0xff]  }
0x3d0e   : > { %v7137_v19 = vsel %vm680_vm0, %v11011_v38, 0.0  ;;  %8621 = vmatprep.subr.bf16.mxu0 %v8896_v53 }
0x3d0f   : > { %7138 = vadd.xlane.f32.xlu1 %v7137_v19  ;;  %8622 = vmatpush3.bf16.msra.mxu0 %v8896_v53  ;;  %v8897_v19 = vld [vmem:[%s11135_s16 + $0x78] sm:$0xff]  }
0x3d10   : > { %8623 = vmatprep.subr.bf16.mxu0 %v8897_v19 }
0x3d11   : > { %7141 = vadd.xlane.f32.xlu0 %v7140_v35  ;;  %v7786_v35 = vld [vmem:[%s11194_s2 + $0x3] ss:$0 sm:$0xff] }
0x3d13   : > { %8624 = vmatpush3.bf16.msra.mxu0 %v8897_v19 }
0x3d15   : > { %7144 = vadd.xlane.f32.xlu0 %v7143_v33 }
0x3d9a   : > { %v7136_v17 = vpop.xlane.xlu0 %7135 }
0x3d9b   : > { %v7146_v31 = vmul.f32 0.03125, %v7136_v17 }
0x3d9c   : > { %v7139_v44 = vpop.xlane.xlu1 %7138 }
0x3d9d   : > { %v7150_v34 = vsub.f32 %v11005_v40, %v7146_v31  ;;  %v7147_v54 = vmul.f32 0.03125, %v7139_v44 }
0x3d9e   : > { %v7142_v43 = vpop.xlane.xlu0 %7141 }
0x3d9f   : > { %v7151_v41 = vsub.f32 %v11011_v38, %v7147_v54  ;;  %v7148_v52 = vmul.f32 0.03125, %v7142_v43  ;;  %v7154_v20 = vmul.f32 %v7150_v34, %v7150_v34 }
0x3da1   : > { %v7152_v51 = vsub.f32 %v11008_v39, %v7148_v52  ;;  %v7158_v27 = vsel %vm680_vm0, %v7154_v20, 0.0  ;;  %v7155_v4 = vmul.f32 %v7151_v41, %v7151_v41 }
0x3da2   : > { %7159 = vadd.xlane.f32.xlu0 %v7158_v27  ;;  %v7145_v0 = vpop.xlane.xlu0 %7144 }
0x3da3   : > { %v7149_v2 = vmul.f32 0.03125, %v7145_v0  ;;  %v7161_v45 = vsel %vm680_vm0, %v7155_v4, 0.0  ;;  %v7156_v42 = vmul.f32 %v7152_v51, %v7152_v51 }
0x3da4   : > { %7162 = vadd.xlane.f32.xlu1 %v7161_v45 }
0x3da5   : > { %v7153_v5 = vsub.f32 %v11018_v24, %v7149_v2  ;;  %v7164_v37 = vsel %vm680_vm0, %v7156_v42, 0.0  ;;  %v7791_v2 = vld [vmem:[%s11195_s24 + $0x3] ss:$0 sm:$0xff] }
0x3da6   : > { %7165 = vadd.xlane.f32.xlu0 %v7164_v37 }
0x3da7   : > { %v7157_v56 = vmul.f32 %v7153_v5, %v7153_v5 }
0x3da9   : > { %v7167_v23 = vsel %vm680_vm0, %v7157_v56, 0.0 }
0x3daa   : > { %7168 = vadd.xlane.f32.xlu1 %v7167_v23 }
0x3e2f   : > { %v7160_v50 = vpop.xlane.xlu0 %7159 }
0x3e30   : > { %v7170_v15 = vmul.f32 0.03125, %v7160_v50 }
0x3e31   : > { %v7163_v60 = vpop.xlane.xlu1 %7162 }
0x3e32   : > { %v7174_v29 = vadd.f32 1e-05, %v7170_v15  ;;  %v7171_v3 = vmul.f32 0.03125, %v7163_v60 }
0x3e33   : > { %v7166_v1 = vpop.xlane.xlu0 %7165 }
0x3e34   : > { %9210 = vrsqrt.f32 %v7174_v29  ;;  %v7175_v61 = vadd.f32 1e-05, %v7171_v3  ;;  %v7172_v16 = vmul.f32 0.03125, %v7166_v1 }
0x3e36   : > { %9212 = vrsqrt.f32 %v7175_v61  ;;  %v7176_v62 = vadd.f32 1e-05, %v7172_v16 }
0x3e37   : > { %v7169_v49 = vpop.xlane.xlu1 %7168 }
0x3e38   : > { %9214 = vrsqrt.f32 %v7176_v62  ;;  %v7173_v30 = vmul.f32 0.03125, %v7169_v49 }
0x3e3a   : > { %v7177_v55 = vadd.f32 1e-05, %v7173_v30 }
0x3e3c   : > { %9216 = vrsqrt.f32 %v7177_v55 }
0x3e3e   : > { %v9211_v13 = vpop.eup %9210 }
0x3e3f   : > { %v7182_v46 = vmul.f32 %v9211_v13, %v7150_v34 }
0x3e40   : > { %v9213_v36 = vpop.eup %9212 }
0x3e41   : > { %v7183_v14 = vmul.f32 %v9213_v36, %v7151_v41  ;;  %v7192_v6 = vmul.f32 %v7784_v22, %v7182_v46 }
0x3e42   : > { %v9215_v21 = vpop.eup %9214 }
0x3e43   : > { %v7184_v25 = vmul.f32 %v9215_v21, %v7152_v51  ;;  %v7193_v18 = vmul.f32 %v7784_v22, %v7183_v14  ;;  %v7202_v7 = vadd.f32 %v7785_v57, %v7192_v6 }
0x3e45   : > { %v7203_v8 = vadd.f32 %v7785_v57, %v7193_v18  ;;  %v7194_v10 = vmul.f32 %v7784_v22, %v7184_v25 }
0x3e46   : > { %v9217_v28 = vpop.eup %9216 }
0x3e47   : > { %v7185_v12 = vmul.f32 %v9217_v28, %v7153_v5  ;;  %v7206_v47 = vpack.c.bf16 %v7203_v8, %v7202_v7  ;;  %v7204_v59 = vadd.f32 %v7785_v57, %v7194_v10 }
0x3e49   : > { %v7195_v63 = vmul.f32 %v7784_v22, %v7185_v12  ;;  %8613 = vmatprep.mubr.msk.bf16.mxu1 %vm680_vm0, %v7206_v47 }
0x3e4b   : > { %v7205_v26 = vadd.f32 %v7785_v57, %v7195_v63 }
0x3e4d   : > { %v7207_v48 = vpack.c.bf16 %v7205_v26, %v7204_v59 }
0x3e4f   : > { %8614 = vmatmul.mubr.msk.bf16.vlgmr.msra.gmra.mrb[172].mxu1 %vm680_vm0, %v7207_v48 }
0x3f22   : > { %v8615_v33 = vpop.f32.mrb[172].mxu1 }
0x3f23   : > { %v7275_v17 = vadd.f32 %v8615_v33, %v7786_v35  ;;  %v7266_v31 = vpop.f32.mrb[173].mxu1 }
0x3f24   : > { %v7267_v44 = vadd.f32 %v7786_v35, %v7266_v31  ;;  %v8616_v34 = vpop.f32.mrb[174].mxu1 }
0x3f25   : > { %v7278_v54 = vadd.f32 %v8616_v34, %v7786_v35  ;;  %v7269_v43 = vpop.f32.mrb[175].mxu1  ;;  %v7283_v52 = vmax.f32 %v7275_v17, 0.0 }
0x3f26   : > { %v7270_v41 = vadd.f32 %v7786_v35, %v7269_v43  ;;  %v7281_v51 = vmax.f32 %v7267_v44, 0.0 }
0x3f27   : > { %v7284_v20 = vmax.f32 %v7278_v54, 0.0 }
0x3f28   : > { %v7282_v27 = vmax.f32 %v7270_v41, 0.0 }
0x3f29   : > { %v7286_v4 = vpack.c.bf16 %v7284_v20, %v7283_v52 }
0x3f2a   : > { %v7285_v0 = vpack.c.bf16 %v7282_v27, %v7281_v51 }
0x3f2c   : > { %8625 = vmatprep.mubr.msk.bf16.mxu0 %vm2258_vm5, %v7285_v0 }
0x3f2d   : > { %8626 = vmatmul.mubr.msk.bf16.vlgmr.msra.gmra.mrb[172].mxu0 %vm2258_vm5, %v7286_v4 }
0x4000   : > { %v8627_v45 = vpop.f32.mrb[172].mxu0 }
0x4001   : > { %v7366_v42 = vadd.f32 %v8627_v45, %v7791_v2  ;;  %v7357_v5 = vpop.f32.mrb[173].mxu0 }
0x4002   : > { %v7358_v37 = vadd.f32 %v7791_v2, %v7357_v5  ;;  %v8628_v56 = vpop.f32.mrb[174].mxu0 }
0x4003   : > { %v7374_v23 = vadd.f32 %v7366_v42, %v11008_v39  ;;  %v7369_v32 = vadd.f32 %v8628_v56, %v7791_v2  ;;  %v7360_v58 = vpop.f32.mrb[175].mxu0 }
0x4004   : > { %v7372_v9 = vadd.f32 %v7358_v37, %v11005_v40  ;;  %v7361_v11 = vadd.f32 %v7791_v2, %v7360_v58 }
0x4005   : > { %7379 = vst.msk [vmem:[%s627_s27 + $0x18] sm:$0xff] %vm680_vm0, %v7374_v23  ;;  %v7375_v50 = vadd.f32 %v7369_v32, %v11018_v24 }
0x4006   : > { %7377 = vst.msk [vmem:[%s627_s27 + $0x8] sm:$0xff] %vm680_vm0, %v7372_v9  ;;  %v7373_v39 = vadd.f32 %v7361_v11, %v11011_v38 }
0x4007   : > { %7376 = vst.msk [vmem:[%s627_s27] sm:$0xff] %vm680_vm0, %v7375_v50 }
0x4008   : > { %7378 = vst.msk [vmem:[%s627_s27 + $0x10] sm:$0xff] %vm680_vm0, %v7373_v39 }
0x4009   : > { %9351 = shalt.err (!%p9348_p0)
}
0x400a   : > { %s9352_s15 = scalar_lea.hbm %s11073_s0, 512  ;;  %s9356_s22 = scalar_lea.hbm %s11198_s17, 1024 }
0x400b   : > { %p9353_p6 = scmp.ne.s32.totalorder %s11073_s0, %s9352_s15  ;;  %p9357_p13 = scmp.lt.u32.totalorder %s11073_s0, %s11198_s17 }
0x400c   : > { %p9358_p12 = scmp.lt.u32.totalorder %s9356_s22, %s9352_s15  ;;  %p9360_p2 = scmp.lt.u32.totalorder %s9352_s15, %s11073_s0 }
0x400d   : > { %p9354_p9 = pnand %p9353_p6, %p11199_p3 }
0x400e   : > { %p9359_p1 = por %p9358_p12, %p9357_p13 }
0x400f   : > { %p9355_p10 = pneg %p9354_p9 }
0x4010   : > { %p9361_p4 = por %p9360_p2, %p9359_p1 }
0x4012   : > { %p9362_p7 = pnand %p9361_p4, %p9355_p10 }
0x4014   : > { %9365 = shalt.err (!%p9362_p7)
}
0x4015   : > { %s9431_s28 = smov 128  }
0x4016   : > { %8645 = dma.vmem_to_hbm [thread:$0]  (%p11199_p3), %s11065_s30, 512, %s11073_s0, %s11077_s21, %s9431_s28, %s9431_s28, %s9427_s1  }
0x4017 PF: > { %s11200_s20 = sld [smem:[#allocation18_spill]]  ;;  %s11201_s6 = sld [smem:[#allocation15_spill]] }
0x4018   : > { %s11202_s27 = sld [smem:[#allocation22_spill]] }
0x401d   : > { %p8672_p8 = scmp.ge.s32.totalorder %s11200_s20, 2  ;;  %s7409_s19 = sand.u32 1, %s11201_s6  }
0x401e   : > { %p11203_p11 = scmp.ne.s32.totalorder %s11202_s27, 0  ;;  %s7410_s15 = scalar_lea.sflag [#allocation4], %s7409_s19 }
0x4020   : > { %p8661_p5 = pnand %p8672_p8, %p11203_p11 }
0x4022   : > { %9395 = dma.done.wait (!%p8661_p5), %s7410_s15, 512  }
0x4023   : > { %9397 = vsyncadd (!%p8661_p5), %s7410_s15, 4294966784  ;;  %s11204_s30 = sld [smem:[#allocation19_spill]]  ;;  %s11205_s27 = sld [smem:[#allocation16_spill]] }
0x4024   : > { %s11206_s28 = sld [smem:[#allocation17_spill]]  ;;  %s11207_s29 = sld [smem:[#allocation20_spill]] }
0x4029   : > { %p31_p0 = scmp.ge.s32.totalorder %s11204_s30, 4  }
0x402b   :  { %33 = sbr.rel (!%p31_p0) target bundleno = 14 (0xe), region = 192 }
0x4032   :  { %7415 = vsyncpa [#allocation3], 1 }
0x4033   :  { %7417 = vsyncpa [#allocation3 + $0x1], 1 }
0x4034   :  { %7418 = vsyncpa [#allocation6], 1 }
0x4035   :  { %7419 = vsyncpa [#allocation9], 1 }
0x4036   :  { %7420 = vsyncpa [#allocation4], 1 }
0x4037   :  { %7422 = vsyncpa [#allocation4 + $0x1], 1 }

</bundles_post_ra>
